<compile_context>
chip_gen: v5e
topology: v5e:2x2
jax: 0.10.0
libtpu: 0.0.40
codegen_flags: <defaults>
</compile_context>

<pallas_src>
import jax
import jax.numpy as jnp
import numpy as np
from jax.experimental import pallas as pl
from jax.experimental.pallas import tpu as pltpu

# Model dims (from the PyTorch module).
IN_DIM = 2560
H_DIM = 400
Z_DIM = 20

# Kernel tiling / padding.
Z_PAD = 128            # latent padded to one full lane register
HEAD_DIM = 2 * Z_PAD   # fused [mu | logvar] head, each in its own 128-lane block
N_CHUNK = 1280         # decoder output columns per grid step (10 * 128)
N_STEPS = IN_DIM // N_CHUNK


def vae_kernel(x_ref, w1_ref, b1_ref, wh_ref, bh_ref, w3_ref, b3_ref,
               w4_ref, b4_ref, eps_ref,
               recon_ref, mu_ref, logvar_ref,
               h3_ref):
    j = pl.program_id(0)

    # --- encoder + reparameterize + fc3: once, at the first grid step ---
    @pl.when(j == 0)
    def _encode():
        x = x_ref[...].astype(jnp.bfloat16)
        h1 = jnp.dot(x, w1_ref[...], preferred_element_type=jnp.float32) + b1_ref[...]
        h1 = jnp.maximum(h1, 0.0)                                       # ReLU

        # Fused mu/logvar head: cols [0:128) -> mu (padded), [128:256) -> logvar.
        head = jnp.dot(h1.astype(jnp.bfloat16), wh_ref[...],
                       preferred_element_type=jnp.float32) + bh_ref[...]
        mu_pad = head[:, :Z_PAD]        # pad lanes are exactly 0 (zero weights/bias)
        logvar_pad = head[:, Z_PAD:]    # pad lanes 0 -> std = 1, eps pad = 0 -> z pad = 0

        # z = mu + eps * exp(0.5 * logvar), carried 128-wide.
        z_pad = mu_pad + eps_ref[...] * jnp.exp(0.5 * logvar_pad)

        h3 = jnp.dot(z_pad.astype(jnp.bfloat16), w3_ref[...],
                     preferred_element_type=jnp.float32) + b3_ref[...]
        h3_ref[...] = jnp.maximum(h3, 0.0).astype(jnp.bfloat16)         # ReLU

        # Lane-dense (batch, 128) stores; wrapper slices down to 20 columns.
        mu_ref[...] = mu_pad
        logvar_ref[...] = logvar_pad

    # --- decoder chunk: every grid step consumes one 1280-column slab of w4 ---
    logits = jnp.dot(h3_ref[...], w4_ref[...],
                     preferred_element_type=jnp.float32) + b4_ref[...]
    recon_ref[...] = jax.nn.sigmoid(logits)


@jax.jit
def vae_forward(x, packed_params, eps):
    (w1, b1, wh, bh, w3p, b3, w4, b4) = packed_params
    batch = x.shape[0]

    # Pad eps (batch, 20) -> (batch, 128) with zeros so z's pad lanes stay 0.
    eps_pad = jnp.zeros((batch, Z_PAD), jnp.float32).at[:, :Z_DIM].set(eps)

    in_specs = [
        pl.BlockSpec((batch, IN_DIM), lambda j: (0, 0)),    # x        (resident)
        pl.BlockSpec((IN_DIM, H_DIM), lambda j: (0, 0)),    # w1 bf16  (fetched once)
        pl.BlockSpec((1, H_DIM), lambda j: (0, 0)),         # b1
        pl.BlockSpec((H_DIM, HEAD_DIM), lambda j: (0, 0)),  # fused head weight
        pl.BlockSpec((1, HEAD_DIM), lambda j: (0, 0)),      # fused head bias
        pl.BlockSpec((Z_PAD, H_DIM), lambda j: (0, 0)),     # w3 (zero-padded rows)
        pl.BlockSpec((1, H_DIM), lambda j: (0, 0)),         # b3
        pl.BlockSpec((H_DIM, N_CHUNK), lambda j: (0, j)),   # w4 column chunk (streamed)
        pl.BlockSpec((1, N_CHUNK), lambda j: (0, j)),       # b4 column chunk (streamed)
        pl.BlockSpec((batch, Z_PAD), lambda j: (0, 0)),     # eps (padded)
    ]
    out_specs = (
        pl.BlockSpec((batch, N_CHUNK), lambda j: (0, j)),   # reconstruction chunk
        pl.BlockSpec((batch, Z_PAD), lambda j: (0, 0)),     # mu  (padded, lane-dense)
        pl.BlockSpec((batch, Z_PAD), lambda j: (0, 0)),     # logvar (padded)
    )
    out_shape = (
        jax.ShapeDtypeStruct((batch, IN_DIM), jnp.float32),
        jax.ShapeDtypeStruct((batch, Z_PAD), jnp.float32),
        jax.ShapeDtypeStruct((batch, Z_PAD), jnp.float32),
    )

    recon, mu_pad, logvar_pad = pl.pallas_call(
        vae_kernel,
        out_shape=out_shape,
        grid=(N_STEPS,),
        in_specs=in_specs,
        out_specs=out_specs,
        scratch_shapes=[pltpu.VMEM((batch, H_DIM), jnp.bfloat16)],  # h3, reused across steps
        compiler_params=pltpu.CompilerParams(
            dimension_semantics=("arbitrary",),
            vmem_limit_bytes=32 * 1024 * 1024,
        ),
    )(x, w1, b1, wh, bh, w3p, b3, w4, b4, eps_pad)

    return recon, mu_pad[:, :Z_DIM], logvar_pad[:, :Z_DIM]


def init_params(key):
    """Deterministic synthetic parameters; weights stored (in, out), biases (1, out), f32."""
    def linear(k, fan_in, fan_out):
        kw, kb = jax.random.split(k)
        scale = 1.0 / np.sqrt(fan_in)
        w = jax.random.uniform(kw, (fan_in, fan_out), jnp.float32, -scale, scale)
        b = jax.random.uniform(kb, (1, fan_out), jnp.float32, -scale, scale)
        return w, b

    k1, k2, k3, k4, k5 = jax.random.split(key, 5)
    w1, b1 = linear(k1, IN_DIM, H_DIM)
    w21, b21 = linear(k2, H_DIM, Z_DIM)
    w22, b22 = linear(k3, H_DIM, Z_DIM)
    w3, b3 = linear(k4, Z_DIM, H_DIM)
    w4, b4 = linear(k5, H_DIM, IN_DIM)
    return (w1, b1, w21, b21, w22, b22, w3, b3, w4, b4)


def pack_params(params):
    """One-time packing: bf16 weights, fused/padded mu|logvar head, padded w3."""
    (w1, b1, w21, b21, w22, b22, w3, b3, w4, b4) = params

    w1p = w1.astype(jnp.bfloat16)

    wh = jnp.zeros((H_DIM, HEAD_DIM), jnp.bfloat16)
    wh = wh.at[:, :Z_DIM].set(w21.astype(jnp.bfloat16))
    wh = wh.at[:, Z_PAD:Z_PAD + Z_DIM].set(w22.astype(jnp.bfloat16))
    bh = jnp.zeros((1, HEAD_DIM), jnp.float32)
    bh = bh.at[:, :Z_DIM].set(b21)
    bh = bh.at[:, Z_PAD:Z_PAD + Z_DIM].set(b22)

    w3p = jnp.zeros((Z_PAD, H_DIM), jnp.bfloat16)
    w3p = w3p.at[:Z_DIM, :].set(w3.astype(jnp.bfloat16))

    w4p = w4.astype(jnp.bfloat16)
    return (w1p, b1, wh, bh, w3p, b3, w4p, b4)


def vae_reference(x, params, eps):
    """Pure-JAX f32 reference for correctness check."""
    (w1, b1, w21, b21, w22, b22, w3, b3, w4, b4) = params
    h1 = jax.nn.relu(x @ w1 + b1)
    mu = h1 @ w21 + b21
    logvar = h1 @ w22 + b22
    z = mu + eps * jnp.exp(0.5 * logvar)
    h3 = jax.nn.relu(z @ w3 + b3)
    recon = jax.nn.sigmoid(h3 @ w4 + b4)
    return recon, mu, logvar


if __name__ == "__main__":
    key = jax.random.PRNGKey(0)
    k_params, k_x, k_eps = jax.random.split(key, 3)

    batch = 8
    params = init_params(k_params)
    packed = pack_params(params)   # done once, outside the per-call path
    x = jax.random.uniform(k_x, (batch, IN_DIM), jnp.float32)     # flattened 2560-dim input
    # eps = randn_like(std): sampled outside the kernel so the forward stays deterministic.
    eps = jax.random.normal(k_eps, (batch, Z_DIM), jnp.float32)

    recon, mu, logvar = vae_forward(x, packed, eps)
    jax.block_until_ready((recon, mu, logvar))

    r_ref, mu_ref_v, lv_ref = vae_reference(x, params, eps)
    # bf16 weights/activations -> looser tolerance vs the f32 reference.
    np.testing.assert_allclose(np.asarray(mu), np.asarray(mu_ref_v), rtol=2e-2, atol=2e-2)
    np.testing.assert_allclose(np.asarray(logvar), np.asarray(lv_ref), rtol=2e-2, atol=2e-2)
    np.testing.assert_allclose(np.asarray(recon), np.asarray(r_ref), rtol=2e-2, atol=2e-2)

    assert recon.shape == (batch, IN_DIM) and mu.shape == (batch, Z_DIM) and logvar.shape == (batch, Z_DIM)
    print("KERNEL_OK")
</pallas_src>

<mosaic_0001>
module attributes {stable_mosaic.version = 11 : i64} {
  func.func @vae_kernel(%arg0: i32, %arg1: memref<8x2560xf32, #tpu.memory_space<vmem>>, %arg2: memref<2560x400xbf16, #tpu.memory_space<vmem>>, %arg3: memref<1x400xf32, #tpu.memory_space<vmem>>, %arg4: memref<400x256xbf16, #tpu.memory_space<vmem>>, %arg5: memref<1x256xf32, #tpu.memory_space<vmem>>, %arg6: memref<128x400xbf16, #tpu.memory_space<vmem>>, %arg7: memref<1x400xf32, #tpu.memory_space<vmem>>, %arg8: memref<400x1280xbf16, #tpu.memory_space<vmem>>, %arg9: memref<1x1280xf32, #tpu.memory_space<vmem>>, %arg10: memref<8x128xf32, #tpu.memory_space<vmem>>, %arg11: memref<8x1280xf32, #tpu.memory_space<vmem>>, %arg12: memref<8x128xf32, #tpu.memory_space<vmem>>, %arg13: memref<8x128xf32, #tpu.memory_space<vmem>>, %arg14: memref<8x400xbf16, #tpu.memory_space<vmem>>) attributes {dimension_semantics = [#tpu.dimension_semantics<arbitrary>], iteration_bounds = array<i64: 2>, scalar_prefetch = 0 : i64, scratch_operands = 1 : i64, tpu.core_type = #tpu.core_type<tc>, window_params = [{pipeline_mode = #tpu.pipeline_mode<synchronous>, transform_indices = @transform_0, window_bounds = array<i64: 8, 2560>}, {pipeline_mode = #tpu.pipeline_mode<synchronous>, transform_indices = @transform_1, window_bounds = array<i64: 2560, 400>}, {pipeline_mode = #tpu.pipeline_mode<synchronous>, transform_indices = @transform_2, window_bounds = array<i64: 1, 400>}, {pipeline_mode = #tpu.pipeline_mode<synchronous>, transform_indices = @transform_3, window_bounds = array<i64: 400, 256>}, {pipeline_mode = #tpu.pipeline_mode<synchronous>, transform_indices = @transform_4, window_bounds = array<i64: 1, 256>}, {pipeline_mode = #tpu.pipeline_mode<synchronous>, transform_indices = @transform_5, window_bounds = array<i64: 128, 400>}, {pipeline_mode = #tpu.pipeline_mode<synchronous>, transform_indices = @transform_6, window_bounds = array<i64: 1, 400>}, {transform_indices = @transform_7, window_bounds = array<i64: 400, 1280>}, {transform_indices = @transform_8, window_bounds = array<i64: 1, 1280>}, {pipeline_mode = #tpu.pipeline_mode<synchronous>, transform_indices = @transform_9, window_bounds = array<i64: 8, 128>}, {transform_indices = @transform_10, window_bounds = array<i64: 8, 1280>}, {pipeline_mode = #tpu.pipeline_mode<synchronous>, transform_indices = @transform_11, window_bounds = array<i64: 8, 128>}, {pipeline_mode = #tpu.pipeline_mode<synchronous>, transform_indices = @transform_12, window_bounds = array<i64: 8, 128>}]} {
    %c0_i32 = arith.constant 0 : i32
    %0 = arith.cmpi eq, %arg0, %c0_i32 : i32
    %1 = arith.extui %0 : i1 to i32
    %c0_i32_0 = arith.constant 0 : i32
    %2 = arith.cmpi ne, %1, %c0_i32_0 : i32
    scf.if %2 {
      %c0_9 = arith.constant 0 : index
      %c0_10 = arith.constant 0 : index
      %15 = vector.load %arg1[%c0_9, %c0_10] : memref<8x2560xf32, #tpu.memory_space<vmem>>, vector<8x2560xf32>
      %16 = arith.truncf %15 : vector<8x2560xf32> to vector<8x2560xbf16>
      %c0_11 = arith.constant 0 : index
      %c0_12 = arith.constant 0 : index
      %17 = vector.load %arg2[%c0_11, %c0_12] : memref<2560x400xbf16, #tpu.memory_space<vmem>>, vector<2560x400xbf16>
      %cst_13 = arith.constant dense<0.000000e+00> : vector<8x400xf32>
      %18 = tpu.matmul %16, %17, %cst_13 {dimension_numbers = #tpu.dot_dimension_numbers<[1], [0], [0], [1], [0, 0, 1, 1], [], []>} : vector<8x2560xbf16>, vector<2560x400xbf16>, vector<8x400xf32> -> vector<8x400xf32>
      %c0_14 = arith.constant 0 : index
      %c0_15 = arith.constant 0 : index
      %19 = vector.load %arg3[%c0_14, %c0_15] : memref<1x400xf32, #tpu.memory_space<vmem>>, vector<1x400xf32>
      %20 = vector.broadcast %19 : vector<1x400xf32> to vector<8x400xf32>
      %21 = arith.addf %18, %20 : vector<8x400xf32>
      %cst_16 = arith.constant 0.000000e+00 : f32
      %22 = vector.broadcast %cst_16 : f32 to vector<8x400xf32>
      %23 = arith.maximumf %21, %22 : vector<8x400xf32>
      %24 = arith.truncf %23 : vector<8x400xf32> to vector<8x400xbf16>
      %c0_17 = arith.constant 0 : index
      %c0_18 = arith.constant 0 : index
      %25 = vector.load %arg4[%c0_17, %c0_18] : memref<400x256xbf16, #tpu.memory_space<vmem>>, vector<400x256xbf16>
      %cst_19 = arith.constant dense<0.000000e+00> : vector<8x256xf32>
      %26 = tpu.matmul %24, %25, %cst_19 {dimension_numbers = #tpu.dot_dimension_numbers<[1], [0], [0], [1], [0, 0, 1, 1], [], []>} : vector<8x400xbf16>, vector<400x256xbf16>, vector<8x256xf32> -> vector<8x256xf32>
      %c0_20 = arith.constant 0 : index
      %c0_21 = arith.constant 0 : index
      %27 = vector.load %arg5[%c0_20, %c0_21] : memref<1x256xf32, #tpu.memory_space<vmem>>, vector<1x256xf32>
      %28 = vector.broadcast %27 : vector<1x256xf32> to vector<8x256xf32>
      %29 = arith.addf %26, %28 : vector<8x256xf32>
      %30 = vector.extract_strided_slice %29 {offsets = [0, 0], sizes = [8, 128], strides = [1, 1]} : vector<8x256xf32> to vector<8x128xf32>
      %31 = vector.extract_strided_slice %29 {offsets = [0, 128], sizes = [8, 128], strides = [1, 1]} : vector<8x256xf32> to vector<8x128xf32>
      %c0_22 = arith.constant 0 : index
      %c0_23 = arith.constant 0 : index
      %32 = vector.load %arg10[%c0_22, %c0_23] : memref<8x128xf32, #tpu.memory_space<vmem>>, vector<8x128xf32>
      %cst_24 = arith.constant 5.000000e-01 : f32
      %33 = vector.broadcast %cst_24 : f32 to vector<8x128xf32>
      %34 = arith.mulf %33, %31 : vector<8x128xf32>
      %35 = math.exp %34 : vector<8x128xf32>
      %36 = arith.mulf %32, %35 : vector<8x128xf32>
      %37 = arith.addf %30, %36 : vector<8x128xf32>
      %38 = arith.truncf %37 : vector<8x128xf32> to vector<8x128xbf16>
      %c0_25 = arith.constant 0 : index
      %c0_26 = arith.constant 0 : index
      %39 = vector.load %arg6[%c0_25, %c0_26] : memref<128x400xbf16, #tpu.memory_space<vmem>>, vector<128x400xbf16>
      %cst_27 = arith.constant dense<0.000000e+00> : vector<8x400xf32>
      %40 = tpu.matmul %38, %39, %cst_27 {dimension_numbers = #tpu.dot_dimension_numbers<[1], [0], [0], [1], [0, 0, 1, 1], [], []>} : vector<8x128xbf16>, vector<128x400xbf16>, vector<8x400xf32> -> vector<8x400xf32>
      %c0_28 = arith.constant 0 : index
      %c0_29 = arith.constant 0 : index
      %41 = vector.load %arg7[%c0_28, %c0_29] : memref<1x400xf32, #tpu.memory_space<vmem>>, vector<1x400xf32>
      %42 = vector.broadcast %41 : vector<1x400xf32> to vector<8x400xf32>
      %43 = arith.addf %40, %42 : vector<8x400xf32>
      %cst_30 = arith.constant 0.000000e+00 : f32
      %44 = vector.broadcast %cst_30 : f32 to vector<8x400xf32>
      %45 = arith.maximumf %43, %44 : vector<8x400xf32>
      %46 = arith.truncf %45 : vector<8x400xf32> to vector<8x400xbf16>
      %c0_31 = arith.constant 0 : index
      %c0_32 = arith.constant 0 : index
      %47 = vector.load %arg14[%c0_31, %c0_32] : memref<8x400xbf16, #tpu.memory_space<vmem>>, vector<8x400xbf16>
      tpu.vector_store %arg14[%c0_31, %c0_32], %46 {strides = array<i32>} : memref<8x400xbf16, #tpu.memory_space<vmem>>, vector<8x400xbf16>,
      %c0_33 = arith.constant 0 : index
      %c0_34 = arith.constant 0 : index
      %48 = vector.load %arg12[%c0_33, %c0_34] : memref<8x128xf32, #tpu.memory_space<vmem>>, vector<8x128xf32>
      tpu.vector_store %arg12[%c0_33, %c0_34], %30 {strides = array<i32>} : memref<8x128xf32, #tpu.memory_space<vmem>>, vector<8x128xf32>,
      %c0_35 = arith.constant 0 : index
      %c0_36 = arith.constant 0 : index
      %49 = vector.load %arg13[%c0_35, %c0_36] : memref<8x128xf32, #tpu.memory_space<vmem>>, vector<8x128xf32>
      tpu.vector_store %arg13[%c0_35, %c0_36], %31 {strides = array<i32>} : memref<8x128xf32, #tpu.memory_space<vmem>>, vector<8x128xf32>,
    } else {
    }
    %c0 = arith.constant 0 : index
    %c0_1 = arith.constant 0 : index
    %3 = vector.load %arg14[%c0, %c0_1] : memref<8x400xbf16, #tpu.memory_space<vmem>>, vector<8x400xbf16>
    %c0_2 = arith.constant 0 : index
    %c0_3 = arith.constant 0 : index
    %4 = vector.load %arg8[%c0_2, %c0_3] : memref<400x1280xbf16, #tpu.memory_space<vmem>>, vector<400x1280xbf16>
    %cst = arith.constant dense<0.000000e+00> : vector<8x1280xf32>
    %5 = tpu.matmul %3, %4, %cst {dimension_numbers = #tpu.dot_dimension_numbers<[1], [0], [0], [1], [0, 0, 1, 1], [], []>} : vector<8x400xbf16>, vector<400x1280xbf16>, vector<8x1280xf32> -> vector<8x1280xf32>
    %c0_4 = arith.constant 0 : index
    %c0_5 = arith.constant 0 : index
    %6 = vector.load %arg9[%c0_4, %c0_5] : memref<1x1280xf32, #tpu.memory_space<vmem>>, vector<1x1280xf32>
    %7 = vector.broadcast %6 : vector<1x1280xf32> to vector<8x1280xf32>
    %8 = arith.addf %5, %7 : vector<8x1280xf32>
    %9 = arith.negf %8 : vector<8x1280xf32>
    %10 = math.exp %9 : vector<8x1280xf32>
    %cst_6 = arith.constant 1.000000e+00 : f32
    %11 = vector.broadcast %cst_6 : f32 to vector<8x1280xf32>
    %12 = arith.addf %11, %10 : vector<8x1280xf32>
    %13 = arith.divf %11, %12 : vector<8x1280xf32>
    %c0_7 = arith.constant 0 : index
    %c0_8 = arith.constant 0 : index
    %14 = vector.load %arg11[%c0_7, %c0_8] : memref<8x1280xf32, #tpu.memory_space<vmem>>, vector<8x1280xf32>
    tpu.vector_store %arg11[%c0_7, %c0_8], %13 {strides = array<i32>} : memref<8x1280xf32, #tpu.memory_space<vmem>>, vector<8x1280xf32>,
    return
  }
  func.func @transform_0(%arg0: i32) -> (i32, i32) {
    %c0_i32 = arith.constant 0 : i32
    %c0_i32_0 = arith.constant 0 : i32
    %c0_i32_1 = arith.constant 0 : i32
    return %c0_i32, %c0_i32_0 : i32, i32
  }
  func.func @transform_1(%arg0: i32) -> (i32, i32) {
    %c0_i32 = arith.constant 0 : i32
    %c0_i32_0 = arith.constant 0 : i32
    %c0_i32_1 = arith.constant 0 : i32
    return %c0_i32, %c0_i32_0 : i32, i32
  }
  func.func @transform_2(%arg0: i32) -> (i32, i32) {
    %c0_i32 = arith.constant 0 : i32
    %c0_i32_0 = arith.constant 0 : i32
    %c0_i32_1 = arith.constant 0 : i32
    return %c0_i32, %c0_i32_0 : i32, i32
  }
  func.func @transform_3(%arg0: i32) -> (i32, i32) {
    %c0_i32 = arith.constant 0 : i32
    %c0_i32_0 = arith.constant 0 : i32
    %c0_i32_1 = arith.constant 0 : i32
    return %c0_i32, %c0_i32_0 : i32, i32
  }
  func.func @transform_4(%arg0: i32) -> (i32, i32) {
    %c0_i32 = arith.constant 0 : i32
    %c0_i32_0 = arith.constant 0 : i32
    %c0_i32_1 = arith.constant 0 : i32
    return %c0_i32, %c0_i32_0 : i32, i32
  }
  func.func @transform_5(%arg0: i32) -> (i32, i32) {
    %c0_i32 = arith.constant 0 : i32
    %c0_i32_0 = arith.constant 0 : i32
    %c0_i32_1 = arith.constant 0 : i32
    return %c0_i32, %c0_i32_0 : i32, i32
  }
  func.func @transform_6(%arg0: i32) -> (i32, i32) {
    %c0_i32 = arith.constant 0 : i32
    %c0_i32_0 = arith.constant 0 : i32
    %c0_i32_1 = arith.constant 0 : i32
    return %c0_i32, %c0_i32_0 : i32, i32
  }
  func.func @transform_7(%arg0: i32) -> (i32, i32) {
    %c0_i32 = arith.constant 0 : i32
    %c0_i32_0 = arith.constant 0 : i32
    return %c0_i32, %arg0 : i32, i32
  }
  func.func @transform_8(%arg0: i32) -> (i32, i32) {
    %c0_i32 = arith.constant 0 : i32
    %c0_i32_0 = arith.constant 0 : i32
    return %c0_i32, %arg0 : i32, i32
  }
  func.func @transform_9(%arg0: i32) -> (i32, i32) {
    %c0_i32 = arith.constant 0 : i32
    %c0_i32_0 = arith.constant 0 : i32
    %c0_i32_1 = arith.constant 0 : i32
    return %c0_i32, %c0_i32_0 : i32, i32
  }
  func.func @transform_10(%arg0: i32) -> (i32, i32) {
    %c0_i32 = arith.constant 0 : i32
    %c0_i32_0 = arith.constant 0 : i32
    return %c0_i32, %arg0 : i32, i32
  }
  func.func @transform_11(%arg0: i32) -> (i32, i32) {
    %c0_i32 = arith.constant 0 : i32
    %c0_i32_0 = arith.constant 0 : i32
    %c0_i32_1 = arith.constant 0 : i32
    return %c0_i32, %c0_i32_0 : i32, i32
  }
  func.func @transform_12(%arg0: i32) -> (i32, i32) {
    %c0_i32 = arith.constant 0 : i32
    %c0_i32_0 = arith.constant 0 : i32
    %c0_i32_1 = arith.constant 0 : i32
    return %c0_i32, %c0_i32_0 : i32, i32
  }
}

</mosaic_0001>

<bundles_post_ra>
// kernel: vae_forward.1
= control target key start
LH: loop header
LB: loop body
LE: loop exit
PB: predicated region body
PF: predicated region fallthrough
CT: control target
= control target key end

     0   :  { %s20047_s0 = inlined_call_operand.vmem [shape: f32[8,2560], index: 0, kind: input, shape index: {}]   ;;  %s20048_s1 = inlined_call_operand.vmem [shape: bf16[2560,400], index: 1, kind: input, shape index: {}]   ;;  %s20049_s2 = inlined_call_operand.vmem [shape: f32[1,400], index: 2, kind: input, shape index: {}]   ;;  %s20050_s3 = inlined_call_operand.vmem [shape: bf16[400,256], index: 3, kind: input, shape index: {}]   ;;  %s20051_s4 = inlined_call_operand.vmem [shape: f32[1,256], index: 4, kind: input, shape index: {}]   ;;  %s20052_s5 = inlined_call_operand.vmem [shape: bf16[128,400], index: 5, kind: input, shape index: {}]   ;;  %s20053_s6 = inlined_call_operand.vmem [shape: f32[1,400], index: 6, kind: input, shape index: {}]   ;;  %s20054_s7 = inlined_call_operand.vmem [shape: bf16[400,2560], index: 7, kind: input, shape index: {}]   ;;  %s20055_s8 = inlined_call_operand.vmem [shape: f32[1,2560], index: 8, kind: input, shape index: {}]   ;;  %s20056_s9 = inlined_call_operand.vmem [shape: f32[8,128], index: 9, kind: input, shape index: {}]   ;;  %s20057_s10 = inlined_call_operand.hbm [shape: f32[8,2560], index: 10, kind: output, shape index: {0}]   ;;  %s20058_s11 = inlined_call_operand.hbm [shape: f32[8,128], index: 11, kind: output, shape index: {1}]   ;;  %s20059_s12 = inlined_call_operand.hbm [shape: f32[8,128], index: 12, kind: output, shape index: {2}]  }
   0x1   :  { %20065 = sst [smem:[#allocation16_spill]] %s20054_s7 }
   0x2   :  { %20066 = sst [smem:[#allocation17_spill]] %s20055_s8 }
   0x3   :  { %18 = vsyncpa [#allocation5], 0 }
   0x4   :  { %20 = vsyncpa [#allocation5 + $0x1], 0 }
   0x5   :  { %21 = vsyncpa [#allocation7], 0  ;;  %s14169_s21 = smov 0   ;;  %s14171_s22 = smov 0  }
   0x6   :  { %s14173_s23 = smov 0   ;;  %s14175_s24 = smov 0  }
   0x7 LB: > { %20067 = sst [smem:[#allocation11_spill]] %s14092_s22  ;;  %s14190_s25 = sadd.s32 4294967295, %s14100_s24   ;;  %s14100_s24 = sphi %s14175_s24, %s20079_s24   ;;  %s14096_s23 = sphi %s14173_s23, %s20082_s23   ;;  %s14092_s22 = sphi %s14171_s22, %s20081_s22   ;;  %s14088_s21 = sphi %s14169_s21, %s20080_s21  }
   0x8   : > { %20068 = sst [smem:[#allocation12_spill]] %s14096_s23  ;;  %s8979_s26 = sadd.s32 4294967294, %s14100_s24  }
   0x9   : > { %20069 = sst [smem:[#allocation13_spill]] %s14100_s24  ;;  %s14194_s27 = sadd.s32 1, %s14100_s24  }
   0xa   : > { %20070 = sst [smem:[#allocation14_spill]] %s14194_s27  ;;  %s181_s28 = sadd.s32 1, %s14096_s23 }
   0xb   : > { %s178_s29 = ssub.s32 %s14100_s24, %s14194_s27  ;;  %p188_p0 = scmp.ne.s32.totalorder %s14096_s23, %s14092_s22 }
   0xc   : > { %p179_p1 = scmp.eq.s32.totalorder %s178_s29, 0  ;;  %p189_p2 = scmp.eq.s32.totalorder %s14100_s24, 0 }
   0xd   : > { %p265_p3 = scmp.eq.s32.totalorder %s14190_s25, 1  ;;  %p270_p4 = scmp.ne.s32.totalorder %s14092_s22, %s14088_s21 }
   0xe   : > { %s14206_s30 = scalar_select %p179_p1, %s14096_s23, %s181_s28  }
   0xf   : > { %p190_p5 = por %p189_p2, %p188_p0  ;;  %p14210_p6 = por %p265_p3, %p188_p0 }
  0x10   : > { %20071 = sst [smem:[#allocation15_spill]] %s14206_s30  ;;  %p271_p7 = scmp.eq.s32.totalorder %s8979_s26, 1 }
  0x11   : > { %p8981_p9 = scmp.ge.s32.totalorder %s14100_s24, 2 }
  0x12   : > { %p14214_p8 = por %p271_p7, %p270_p4 }
  0x13   : > { %353 = sbr.rel (%p8981_p9) target bundleno = 283 (0x11b), region = 48 }
  0x18   : > { %356 = sbr.rel (!%p190_p5) target bundleno = 283 (0x11b), region = 52  ;;  %s358_s15 = sand.u32 (%p190_p5), 1, %s14096_s23  }
  0x19   : > { %s12902_s16 = smul.u32 (%p190_p5), 40, %s14100_s24  ;;  %s20074_s7 = sld [smem:[#allocation16_spill]] (%p190_p5) }
  0x1a   : > { %s13876_s17 = smul.u32 (%p190_p5), 2000, %s358_s15 }
  0x1c   : > { %s14231_s26 = scalar_lea.vmem (%p190_p5), [#allocation3], %s13876_s17 }
  0x1f   : > { %s14226_s20 = scalar_lea.vmem %s20074_s7, %s12902_s16 }
  0x20   : > { %v376_v0 = vld [vmem:[%s14226_s20] sm:$0xff]  ;;  %v378_v1 = vld [vmem:[%s14226_s20 + $0x8] sm:$0xff]  ;;  %v380_v2 = vld [vmem:[%s14226_s20 + $0x10] sm:$0xff] }
  0x21   : > { %377 = vst [vmem:[%s14231_s26] sm:$0xff] %v376_v0  ;;  %v382_v3 = vld [vmem:[%s14226_s20 + $0x18] sm:$0xff]  ;;  %v384_v4 = vld [vmem:[%s14226_s20 + $0x20] sm:$0xff]  ;;  %v386_v5 = vld [vmem:[%s14226_s20 + $0x50] sm:$0xff] }
  0x22   : > { %379 = vst [vmem:[%s14231_s26 + $0x8] sm:$0xff] %v378_v1  ;;  %v388_v6 = vld [vmem:[%s14226_s20 + $0x58] sm:$0xff]  ;;  %v390_v7 = vld [vmem:[%s14226_s20 + $0x60] sm:$0xff]  ;;  %v392_v8 = vld [vmem:[%s14226_s20 + $0x68] sm:$0xff] }
  0x23   : > { %381 = vst [vmem:[%s14231_s26 + $0x10] sm:$0xff] %v380_v2  ;;  %v394_v9 = vld [vmem:[%s14226_s20 + $0x70] sm:$0xff]  ;;  %v396_v10 = vld [vmem:[%s14226_s20 + $0xa0] sm:$0xff]  ;;  %v398_v11 = vld [vmem:[%s14226_s20 + $0xa8] sm:$0xff] }
  0x24   : > { %383 = vst [vmem:[%s14231_s26 + $0x18] sm:$0xff] %v382_v3  ;;  %v400_v12 = vld [vmem:[%s14226_s20 + $0xb0] sm:$0xff]  ;;  %v402_v13 = vld [vmem:[%s14226_s20 + $0xb8] sm:$0xff]  ;;  %v404_v14 = vld [vmem:[%s14226_s20 + $0xc0] sm:$0xff] }
  0x25   : > { %385 = vst [vmem:[%s14231_s26 + $0x20] sm:$0xff] %v384_v4  ;;  %v406_v15 = vld [vmem:[%s14226_s20 + $0xf0] sm:$0xff]  ;;  %v408_v16 = vld [vmem:[%s14226_s20 + $0xf8] sm:$0xff]  ;;  %v410_v17 = vld [vmem:[%s14226_s20 + $0x100] sm:$0xff] }
  0x26   : > { %387 = vst [vmem:[%s14231_s26 + $0x28] sm:$0xff] %v386_v5  ;;  %v412_v18 = vld [vmem:[%s14226_s20 + $0x108] sm:$0xff]  ;;  %v414_v19 = vld [vmem:[%s14226_s20 + $0x110] sm:$0xff]  ;;  %v416_v20 = vld [vmem:[%s14226_s20 + $0x140] sm:$0xff] }
  0x27   : > { %389 = vst [vmem:[%s14231_s26 + $0x30] sm:$0xff] %v388_v6  ;;  %v418_v21 = vld [vmem:[%s14226_s20 + $0x148] sm:$0xff]  ;;  %v420_v22 = vld [vmem:[%s14226_s20 + $0x150] sm:$0xff]  ;;  %v422_v23 = vld [vmem:[%s14226_s20 + $0x158] sm:$0xff] }
  0x28   : > { %391 = vst [vmem:[%s14231_s26 + $0x38] sm:$0xff] %v390_v7  ;;  %v424_v24 = vld [vmem:[%s14226_s20 + $0x160] sm:$0xff]  ;;  %v426_v25 = vld [vmem:[%s14226_s20 + $0x190] sm:$0xff]  ;;  %v428_v26 = vld [vmem:[%s14226_s20 + $0x198] sm:$0xff] }
  0x29   : > { %393 = vst [vmem:[%s14231_s26 + $0x40] sm:$0xff] %v392_v8  ;;  %v430_v27 = vld [vmem:[%s14226_s20 + $0x1a0] sm:$0xff]  ;;  %v432_v28 = vld [vmem:[%s14226_s20 + $0x1a8] sm:$0xff]  ;;  %v434_v29 = vld [vmem:[%s14226_s20 + $0x1b0] sm:$0xff] }
  0x2a   : > { %395 = vst [vmem:[%s14231_s26 + $0x48] sm:$0xff] %v394_v9  ;;  %v436_v30 = vld [vmem:[%s14226_s20 + $0x1e0] sm:$0xff]  ;;  %v438_v31 = vld [vmem:[%s14226_s20 + $0x1e8] sm:$0xff]  ;;  %v440_v32 = vld [vmem:[%s14226_s20 + $0x1f0] sm:$0xff] }
  0x2b   : > { %397 = vst [vmem:[%s14231_s26 + $0x50] sm:$0xff] %v396_v10  ;;  %v442_v33 = vld [vmem:[%s14226_s20 + $0x1f8] sm:$0xff]  ;;  %v444_v34 = vld [vmem:[%s14226_s20 + $0x200] sm:$0xff]  ;;  %v446_v35 = vld [vmem:[%s14226_s20 + $0x230] sm:$0xff] }
  0x2c   : > { %399 = vst [vmem:[%s14231_s26 + $0x58] sm:$0xff] %v398_v11  ;;  %v448_v36 = vld [vmem:[%s14226_s20 + $0x238] sm:$0xff]  ;;  %v450_v37 = vld [vmem:[%s14226_s20 + $0x240] sm:$0xff]  ;;  %v452_v38 = vld [vmem:[%s14226_s20 + $0x248] sm:$0xff] }
  0x2d   : > { %401 = vst [vmem:[%s14231_s26 + $0x60] sm:$0xff] %v400_v12  ;;  %v454_v39 = vld [vmem:[%s14226_s20 + $0x250] sm:$0xff]  ;;  %v456_v40 = vld [vmem:[%s14226_s20 + $0x280] sm:$0xff]  ;;  %v458_v41 = vld [vmem:[%s14226_s20 + $0x288] sm:$0xff] }
  0x2e   : > { %403 = vst [vmem:[%s14231_s26 + $0x68] sm:$0xff] %v402_v13  ;;  %v460_v42 = vld [vmem:[%s14226_s20 + $0x290] sm:$0xff]  ;;  %v462_v43 = vld [vmem:[%s14226_s20 + $0x298] sm:$0xff]  ;;  %v464_v44 = vld [vmem:[%s14226_s20 + $0x2a0] sm:$0xff] }
  0x2f   : > { %405 = vst [vmem:[%s14231_s26 + $0x70] sm:$0xff] %v404_v14  ;;  %v466_v45 = vld [vmem:[%s14226_s20 + $0x2d0] sm:$0xff]  ;;  %v468_v46 = vld [vmem:[%s14226_s20 + $0x2d8] sm:$0xff]  ;;  %v470_v47 = vld [vmem:[%s14226_s20 + $0x2e0] sm:$0xff] }
  0x30   : > { %407 = vst [vmem:[%s14231_s26 + $0x78] sm:$0xff] %v406_v15  ;;  %v472_v48 = vld [vmem:[%s14226_s20 + $0x2e8] sm:$0xff]  ;;  %v474_v49 = vld [vmem:[%s14226_s20 + $0x2f0] sm:$0xff]  ;;  %v476_v50 = vld [vmem:[%s14226_s20 + $0x320] sm:$0xff] }
  0x31   : > { %409 = vst [vmem:[%s14231_s26 + $0x80] sm:$0xff] %v408_v16  ;;  %v478_v51 = vld [vmem:[%s14226_s20 + $0x328] sm:$0xff]  ;;  %v480_v52 = vld [vmem:[%s14226_s20 + $0x330] sm:$0xff]  ;;  %v482_v53 = vld [vmem:[%s14226_s20 + $0x338] sm:$0xff] }
  0x32   : > { %411 = vst [vmem:[%s14231_s26 + $0x88] sm:$0xff] %v410_v17  ;;  %v484_v54 = vld [vmem:[%s14226_s20 + $0x340] sm:$0xff]  ;;  %v486_v55 = vld [vmem:[%s14226_s20 + $0x370] sm:$0xff]  ;;  %v488_v56 = vld [vmem:[%s14226_s20 + $0x378] sm:$0xff] }
  0x33   : > { %413 = vst [vmem:[%s14231_s26 + $0x90] sm:$0xff] %v412_v18  ;;  %v490_v57 = vld [vmem:[%s14226_s20 + $0x380] sm:$0xff]  ;;  %v492_v58 = vld [vmem:[%s14226_s20 + $0x388] sm:$0xff]  ;;  %v494_v59 = vld [vmem:[%s14226_s20 + $0x390] sm:$0xff] }
  0x34   : > { %415 = vst [vmem:[%s14231_s26 + $0x98] sm:$0xff] %v414_v19  ;;  %v496_v60 = vld [vmem:[%s14226_s20 + $0x3c0] sm:$0xff]  ;;  %v498_v61 = vld [vmem:[%s14226_s20 + $0x3c8] sm:$0xff]  ;;  %v500_v62 = vld [vmem:[%s14226_s20 + $0x3d0] sm:$0xff] }
  0x35   : > { %417 = vst [vmem:[%s14231_s26 + $0xa0] sm:$0xff] %v416_v20  ;;  %v502_v63 = vld [vmem:[%s14226_s20 + $0x3d8] sm:$0xff]  ;;  %v504_v0 = vld [vmem:[%s14226_s20 + $0x3e0] sm:$0xff]  ;;  %v506_v1 = vld [vmem:[%s14226_s20 + $0x410] sm:$0xff] }
  0x36   : > { %419 = vst [vmem:[%s14231_s26 + $0xa8] sm:$0xff] %v418_v21  ;;  %v508_v2 = vld [vmem:[%s14226_s20 + $0x418] sm:$0xff]  ;;  %v510_v3 = vld [vmem:[%s14226_s20 + $0x420] sm:$0xff]  ;;  %v512_v4 = vld [vmem:[%s14226_s20 + $0x428] sm:$0xff] }
  0x37   : > { %421 = vst [vmem:[%s14231_s26 + $0xb0] sm:$0xff] %v420_v22  ;;  %v514_v5 = vld [vmem:[%s14226_s20 + $0x430] sm:$0xff]  ;;  %v516_v6 = vld [vmem:[%s14226_s20 + $0x460] sm:$0xff]  ;;  %v518_v7 = vld [vmem:[%s14226_s20 + $0x468] sm:$0xff] }
  0x38   : > { %423 = vst [vmem:[%s14231_s26 + $0xb8] sm:$0xff] %v422_v23  ;;  %v520_v8 = vld [vmem:[%s14226_s20 + $0x470] sm:$0xff]  ;;  %v522_v9 = vld [vmem:[%s14226_s20 + $0x478] sm:$0xff]  ;;  %v524_v10 = vld [vmem:[%s14226_s20 + $0x480] sm:$0xff] }
  0x39   : > { %425 = vst [vmem:[%s14231_s26 + $0xc0] sm:$0xff] %v424_v24  ;;  %v526_v11 = vld [vmem:[%s14226_s20 + $0x4b0] sm:$0xff]  ;;  %v528_v12 = vld [vmem:[%s14226_s20 + $0x4b8] sm:$0xff]  ;;  %v530_v13 = vld [vmem:[%s14226_s20 + $0x4c0] sm:$0xff] }
  0x3a   : > { %427 = vst [vmem:[%s14231_s26 + $0xc8] sm:$0xff] %v426_v25  ;;  %v532_v14 = vld [vmem:[%s14226_s20 + $0x4c8] sm:$0xff]  ;;  %v534_v15 = vld [vmem:[%s14226_s20 + $0x4d0] sm:$0xff]  ;;  %v536_v16 = vld [vmem:[%s14226_s20 + $0x500] sm:$0xff] }
  0x3b   : > { %429 = vst [vmem:[%s14231_s26 + $0xd0] sm:$0xff] %v428_v26  ;;  %v538_v17 = vld [vmem:[%s14226_s20 + $0x508] sm:$0xff]  ;;  %v540_v18 = vld [vmem:[%s14226_s20 + $0x510] sm:$0xff]  ;;  %v542_v19 = vld [vmem:[%s14226_s20 + $0x518] sm:$0xff] }
  0x3c   : > { %431 = vst [vmem:[%s14231_s26 + $0xd8] sm:$0xff] %v430_v27  ;;  %v544_v20 = vld [vmem:[%s14226_s20 + $0x520] sm:$0xff]  ;;  %v546_v21 = vld [vmem:[%s14226_s20 + $0x550] sm:$0xff]  ;;  %v548_v22 = vld [vmem:[%s14226_s20 + $0x558] sm:$0xff] }
  0x3d   : > { %433 = vst [vmem:[%s14231_s26 + $0xe0] sm:$0xff] %v432_v28  ;;  %v550_v23 = vld [vmem:[%s14226_s20 + $0x560] sm:$0xff]  ;;  %v552_v24 = vld [vmem:[%s14226_s20 + $0x568] sm:$0xff]  ;;  %v554_v25 = vld [vmem:[%s14226_s20 + $0x570] sm:$0xff] }
  0x3e   : > { %435 = vst [vmem:[%s14231_s26 + $0xe8] sm:$0xff] %v434_v29  ;;  %v556_v26 = vld [vmem:[%s14226_s20 + $0x5a0] sm:$0xff]  ;;  %v558_v27 = vld [vmem:[%s14226_s20 + $0x5a8] sm:$0xff]  ;;  %v560_v28 = vld [vmem:[%s14226_s20 + $0x5b0] sm:$0xff] }
  0x3f   : > { %437 = vst [vmem:[%s14231_s26 + $0xf0] sm:$0xff] %v436_v30  ;;  %v562_v29 = vld [vmem:[%s14226_s20 + $0x5b8] sm:$0xff]  ;;  %v564_v30 = vld [vmem:[%s14226_s20 + $0x5c0] sm:$0xff] }
  0x40   : > { %439 = vst [vmem:[%s14231_s26 + $0xf8] sm:$0xff] %v438_v31  ;;  %v566_v31 = vld [vmem:[%s14226_s20 + $0x5f0] sm:$0xff] }
  0x41   : > { %441 = vst [vmem:[%s14231_s26 + $0x100] sm:$0xff] %v440_v32  ;;  %v568_v32 = vld [vmem:[%s14226_s20 + $0x5f8] sm:$0xff] }
  0x42   : > { %443 = vst [vmem:[%s14231_s26 + $0x108] sm:$0xff] %v442_v33  ;;  %v570_v33 = vld [vmem:[%s14226_s20 + $0x600] sm:$0xff] }
  0x43   : > { %445 = vst [vmem:[%s14231_s26 + $0x110] sm:$0xff] %v444_v34  ;;  %v572_v34 = vld [vmem:[%s14226_s20 + $0x608] sm:$0xff] }
  0x44   : > { %447 = vst [vmem:[%s14231_s26 + $0x118] sm:$0xff] %v446_v35  ;;  %v574_v35 = vld [vmem:[%s14226_s20 + $0x610] sm:$0xff] }
  0x45   : > { %449 = vst [vmem:[%s14231_s26 + $0x120] sm:$0xff] %v448_v36  ;;  %v576_v36 = vld [vmem:[%s14226_s20 + $0x640] sm:$0xff] }
  0x46   : > { %451 = vst [vmem:[%s14231_s26 + $0x128] sm:$0xff] %v450_v37  ;;  %v578_v37 = vld [vmem:[%s14226_s20 + $0x648] sm:$0xff] }
  0x47   : > { %453 = vst [vmem:[%s14231_s26 + $0x130] sm:$0xff] %v452_v38  ;;  %v580_v38 = vld [vmem:[%s14226_s20 + $0x650] sm:$0xff] }
  0x48   : > { %455 = vst [vmem:[%s14231_s26 + $0x138] sm:$0xff] %v454_v39  ;;  %v582_v39 = vld [vmem:[%s14226_s20 + $0x658] sm:$0xff] }
  0x49   : > { %457 = vst [vmem:[%s14231_s26 + $0x140] sm:$0xff] %v456_v40  ;;  %v584_v40 = vld [vmem:[%s14226_s20 + $0x660] sm:$0xff] }
  0x4a   : > { %459 = vst [vmem:[%s14231_s26 + $0x148] sm:$0xff] %v458_v41  ;;  %v586_v41 = vld [vmem:[%s14226_s20 + $0x690] sm:$0xff] }
  0x4b   : > { %461 = vst [vmem:[%s14231_s26 + $0x150] sm:$0xff] %v460_v42  ;;  %v588_v42 = vld [vmem:[%s14226_s20 + $0x698] sm:$0xff] }
  0x4c   : > { %463 = vst [vmem:[%s14231_s26 + $0x158] sm:$0xff] %v462_v43  ;;  %v590_v43 = vld [vmem:[%s14226_s20 + $0x6a0] sm:$0xff] }
  0x4d   : > { %465 = vst [vmem:[%s14231_s26 + $0x160] sm:$0xff] %v464_v44  ;;  %v592_v44 = vld [vmem:[%s14226_s20 + $0x6a8] sm:$0xff] }
  0x4e   : > { %467 = vst [vmem:[%s14231_s26 + $0x168] sm:$0xff] %v466_v45  ;;  %v594_v45 = vld [vmem:[%s14226_s20 + $0x6b0] sm:$0xff] }
  0x4f   : > { %469 = vst [vmem:[%s14231_s26 + $0x170] sm:$0xff] %v468_v46  ;;  %v596_v46 = vld [vmem:[%s14226_s20 + $0x6e0] sm:$0xff] }
  0x50   : > { %471 = vst [vmem:[%s14231_s26 + $0x178] sm:$0xff] %v470_v47  ;;  %v598_v47 = vld [vmem:[%s14226_s20 + $0x6e8] sm:$0xff] }
  0x51   : > { %473 = vst [vmem:[%s14231_s26 + $0x180] sm:$0xff] %v472_v48  ;;  %v600_v48 = vld [vmem:[%s14226_s20 + $0x6f0] sm:$0xff] }
  0x52   : > { %475 = vst [vmem:[%s14231_s26 + $0x188] sm:$0xff] %v474_v49  ;;  %v602_v49 = vld [vmem:[%s14226_s20 + $0x6f8] sm:$0xff] }
  0x53   : > { %477 = vst [vmem:[%s14231_s26 + $0x190] sm:$0xff] %v476_v50  ;;  %v604_v50 = vld [vmem:[%s14226_s20 + $0x700] sm:$0xff] }
  0x54   : > { %479 = vst [vmem:[%s14231_s26 + $0x198] sm:$0xff] %v478_v51  ;;  %v606_v51 = vld [vmem:[%s14226_s20 + $0x730] sm:$0xff] }
  0x55   : > { %481 = vst [vmem:[%s14231_s26 + $0x1a0] sm:$0xff] %v480_v52  ;;  %v608_v52 = vld [vmem:[%s14226_s20 + $0x738] sm:$0xff] }
  0x56   : > { %483 = vst [vmem:[%s14231_s26 + $0x1a8] sm:$0xff] %v482_v53  ;;  %v610_v53 = vld [vmem:[%s14226_s20 + $0x740] sm:$0xff] }
  0x57   : > { %485 = vst [vmem:[%s14231_s26 + $0x1b0] sm:$0xff] %v484_v54  ;;  %v612_v54 = vld [vmem:[%s14226_s20 + $0x748] sm:$0xff] }
  0x58   : > { %487 = vst [vmem:[%s14231_s26 + $0x1b8] sm:$0xff] %v486_v55  ;;  %v614_v55 = vld [vmem:[%s14226_s20 + $0x750] sm:$0xff] }
  0x59   : > { %489 = vst [vmem:[%s14231_s26 + $0x1c0] sm:$0xff] %v488_v56  ;;  %v616_v56 = vld [vmem:[%s14226_s20 + $0x780] sm:$0xff] }
  0x5a   : > { %491 = vst [vmem:[%s14231_s26 + $0x1c8] sm:$0xff] %v490_v57  ;;  %v618_v57 = vld [vmem:[%s14226_s20 + $0x788] sm:$0xff] }
  0x5b   : > { %493 = vst [vmem:[%s14231_s26 + $0x1d0] sm:$0xff] %v492_v58  ;;  %v620_v58 = vld [vmem:[%s14226_s20 + $0x790] sm:$0xff] }
  0x5c   : > { %495 = vst [vmem:[%s14231_s26 + $0x1d8] sm:$0xff] %v494_v59  ;;  %v622_v59 = vld [vmem:[%s14226_s20 + $0x798] sm:$0xff] }
  0x5d   : > { %497 = vst [vmem:[%s14231_s26 + $0x1e0] sm:$0xff] %v496_v60  ;;  %v624_v60 = vld [vmem:[%s14226_s20 + $0x7a0] sm:$0xff] }
  0x5e   : > { %499 = vst [vmem:[%s14231_s26 + $0x1e8] sm:$0xff] %v498_v61  ;;  %v626_v61 = vld [vmem:[%s14226_s20 + $0x7d0] sm:$0xff] }
  0x5f   : > { %501 = vst [vmem:[%s14231_s26 + $0x1f0] sm:$0xff] %v500_v62  ;;  %v628_v62 = vld [vmem:[%s14226_s20 + $0x7d8] sm:$0xff] }
  0x60   : > { %503 = vst [vmem:[%s14231_s26 + $0x1f8] sm:$0xff] %v502_v63  ;;  %v630_v63 = vld [vmem:[%s14226_s20 + $0x7e0] sm:$0xff] }
  0x61   : > { %505 = vst [vmem:[%s14231_s26 + $0x200] sm:$0xff] %v504_v0  ;;  %v632_v0 = vld [vmem:[%s14226_s20 + $0x7e8] sm:$0xff] }
  0x62   : > { %507 = vst [vmem:[%s14231_s26 + $0x208] sm:$0xff] %v506_v1  ;;  %v634_v1 = vld [vmem:[%s14226_s20 + $0x7f0] sm:$0xff] }
  0x63   : > { %509 = vst [vmem:[%s14231_s26 + $0x210] sm:$0xff] %v508_v2  ;;  %v636_v2 = vld [vmem:[%s14226_s20 + $0x820] sm:$0xff] }
  0x64   : > { %511 = vst [vmem:[%s14231_s26 + $0x218] sm:$0xff] %v510_v3  ;;  %v638_v3 = vld [vmem:[%s14226_s20 + $0x828] sm:$0xff] }
  0x65   : > { %513 = vst [vmem:[%s14231_s26 + $0x220] sm:$0xff] %v512_v4  ;;  %v640_v4 = vld [vmem:[%s14226_s20 + $0x830] sm:$0xff] }
  0x66   : > { %515 = vst [vmem:[%s14231_s26 + $0x228] sm:$0xff] %v514_v5  ;;  %v642_v5 = vld [vmem:[%s14226_s20 + $0x838] sm:$0xff] }
  0x67   : > { %517 = vst [vmem:[%s14231_s26 + $0x230] sm:$0xff] %v516_v6  ;;  %v644_v6 = vld [vmem:[%s14226_s20 + $0x840] sm:$0xff] }
  0x68   : > { %519 = vst [vmem:[%s14231_s26 + $0x238] sm:$0xff] %v518_v7  ;;  %v646_v7 = vld [vmem:[%s14226_s20 + $0x870] sm:$0xff] }
  0x69   : > { %521 = vst [vmem:[%s14231_s26 + $0x240] sm:$0xff] %v520_v8  ;;  %v648_v8 = vld [vmem:[%s14226_s20 + $0x878] sm:$0xff] }
  0x6a   : > { %523 = vst [vmem:[%s14231_s26 + $0x248] sm:$0xff] %v522_v9  ;;  %v650_v9 = vld [vmem:[%s14226_s20 + $0x880] sm:$0xff] }
  0x6b   : > { %525 = vst [vmem:[%s14231_s26 + $0x250] sm:$0xff] %v524_v10  ;;  %v652_v10 = vld [vmem:[%s14226_s20 + $0x888] sm:$0xff] }
  0x6c   : > { %527 = vst [vmem:[%s14231_s26 + $0x258] sm:$0xff] %v526_v11  ;;  %v654_v11 = vld [vmem:[%s14226_s20 + $0x890] sm:$0xff] }
  0x6d   : > { %529 = vst [vmem:[%s14231_s26 + $0x260] sm:$0xff] %v528_v12  ;;  %v656_v12 = vld [vmem:[%s14226_s20 + $0x8c0] sm:$0xff] }
  0x6e   : > { %531 = vst [vmem:[%s14231_s26 + $0x268] sm:$0xff] %v530_v13  ;;  %v658_v13 = vld [vmem:[%s14226_s20 + $0x8c8] sm:$0xff] }
  0x6f   : > { %533 = vst [vmem:[%s14231_s26 + $0x270] sm:$0xff] %v532_v14  ;;  %v660_v14 = vld [vmem:[%s14226_s20 + $0x8d0] sm:$0xff] }
  0x70   : > { %535 = vst [vmem:[%s14231_s26 + $0x278] sm:$0xff] %v534_v15  ;;  %v662_v15 = vld [vmem:[%s14226_s20 + $0x8d8] sm:$0xff] }
  0x71   : > { %537 = vst [vmem:[%s14231_s26 + $0x280] sm:$0xff] %v536_v16  ;;  %v664_v16 = vld [vmem:[%s14226_s20 + $0x8e0] sm:$0xff] }
  0x72   : > { %539 = vst [vmem:[%s14231_s26 + $0x288] sm:$0xff] %v538_v17  ;;  %v666_v17 = vld [vmem:[%s14226_s20 + $0x910] sm:$0xff] }
  0x73   : > { %541 = vst [vmem:[%s14231_s26 + $0x290] sm:$0xff] %v540_v18  ;;  %v668_v18 = vld [vmem:[%s14226_s20 + $0x918] sm:$0xff] }
  0x74   : > { %543 = vst [vmem:[%s14231_s26 + $0x298] sm:$0xff] %v542_v19  ;;  %v670_v19 = vld [vmem:[%s14226_s20 + $0x920] sm:$0xff] }
  0x75   : > { %545 = vst [vmem:[%s14231_s26 + $0x2a0] sm:$0xff] %v544_v20  ;;  %v672_v20 = vld [vmem:[%s14226_s20 + $0x928] sm:$0xff] }
  0x76   : > { %547 = vst [vmem:[%s14231_s26 + $0x2a8] sm:$0xff] %v546_v21  ;;  %v674_v21 = vld [vmem:[%s14226_s20 + $0x930] sm:$0xff] }
  0x77   : > { %549 = vst [vmem:[%s14231_s26 + $0x2b0] sm:$0xff] %v548_v22  ;;  %v676_v22 = vld [vmem:[%s14226_s20 + $0x960] sm:$0xff] }
  0x78   : > { %551 = vst [vmem:[%s14231_s26 + $0x2b8] sm:$0xff] %v550_v23  ;;  %v678_v23 = vld [vmem:[%s14226_s20 + $0x968] sm:$0xff] }
  0x79   : > { %553 = vst [vmem:[%s14231_s26 + $0x2c0] sm:$0xff] %v552_v24  ;;  %v680_v24 = vld [vmem:[%s14226_s20 + $0x970] sm:$0xff] }
  0x7a   : > { %555 = vst [vmem:[%s14231_s26 + $0x2c8] sm:$0xff] %v554_v25  ;;  %v682_v25 = vld [vmem:[%s14226_s20 + $0x978] sm:$0xff] }
  0x7b   : > { %557 = vst [vmem:[%s14231_s26 + $0x2d0] sm:$0xff] %v556_v26  ;;  %v684_v26 = vld [vmem:[%s14226_s20 + $0x980] sm:$0xff] }
  0x7c   : > { %559 = vst [vmem:[%s14231_s26 + $0x2d8] sm:$0xff] %v558_v27  ;;  %v686_v27 = vld [vmem:[%s14226_s20 + $0x9b0] sm:$0xff] }
  0x7d   : > { %561 = vst [vmem:[%s14231_s26 + $0x2e0] sm:$0xff] %v560_v28  ;;  %v688_v28 = vld [vmem:[%s14226_s20 + $0x9b8] sm:$0xff] }
  0x7e   : > { %563 = vst [vmem:[%s14231_s26 + $0x2e8] sm:$0xff] %v562_v29  ;;  %v690_v29 = vld [vmem:[%s14226_s20 + $0x9c0] sm:$0xff] }
  0x7f   : > { %565 = vst [vmem:[%s14231_s26 + $0x2f0] sm:$0xff] %v564_v30  ;;  %v692_v30 = vld [vmem:[%s14226_s20 + $0x9c8] sm:$0xff] }
  0x80   : > { %567 = vst [vmem:[%s14231_s26 + $0x2f8] sm:$0xff] %v566_v31  ;;  %v694_v31 = vld [vmem:[%s14226_s20 + $0x9d0] sm:$0xff] }
  0x81   : > { %569 = vst [vmem:[%s14231_s26 + $0x300] sm:$0xff] %v568_v32  ;;  %v696_v32 = vld [vmem:[%s14226_s20 + $0xa00] sm:$0xff] }
  0x82   : > { %571 = vst [vmem:[%s14231_s26 + $0x308] sm:$0xff] %v570_v33  ;;  %v698_v33 = vld [vmem:[%s14226_s20 + $0xa08] sm:$0xff] }
  0x83   : > { %573 = vst [vmem:[%s14231_s26 + $0x310] sm:$0xff] %v572_v34  ;;  %v700_v34 = vld [vmem:[%s14226_s20 + $0xa10] sm:$0xff] }
  0x84   : > { %575 = vst [vmem:[%s14231_s26 + $0x318] sm:$0xff] %v574_v35  ;;  %v702_v35 = vld [vmem:[%s14226_s20 + $0xa18] sm:$0xff] }
  0x85   : > { %577 = vst [vmem:[%s14231_s26 + $0x320] sm:$0xff] %v576_v36  ;;  %v704_v36 = vld [vmem:[%s14226_s20 + $0xa20] sm:$0xff] }
  0x86   : > { %579 = vst [vmem:[%s14231_s26 + $0x328] sm:$0xff] %v578_v37  ;;  %v706_v37 = vld [vmem:[%s14226_s20 + $0xa50] sm:$0xff] }
  0x87   : > { %581 = vst [vmem:[%s14231_s26 + $0x330] sm:$0xff] %v580_v38  ;;  %v708_v38 = vld [vmem:[%s14226_s20 + $0xa58] sm:$0xff] }
  0x88   : > { %583 = vst [vmem:[%s14231_s26 + $0x338] sm:$0xff] %v582_v39  ;;  %v710_v39 = vld [vmem:[%s14226_s20 + $0xa60] sm:$0xff] }
  0x89   : > { %585 = vst [vmem:[%s14231_s26 + $0x340] sm:$0xff] %v584_v40  ;;  %v712_v40 = vld [vmem:[%s14226_s20 + $0xa68] sm:$0xff] }
  0x8a   : > { %587 = vst [vmem:[%s14231_s26 + $0x348] sm:$0xff] %v586_v41  ;;  %v714_v41 = vld [vmem:[%s14226_s20 + $0xa70] sm:$0xff] }
  0x8b   : > { %589 = vst [vmem:[%s14231_s26 + $0x350] sm:$0xff] %v588_v42  ;;  %v716_v42 = vld [vmem:[%s14226_s20 + $0xaa0] sm:$0xff] }
  0x8c   : > { %591 = vst [vmem:[%s14231_s26 + $0x358] sm:$0xff] %v590_v43  ;;  %v718_v43 = vld [vmem:[%s14226_s20 + $0xaa8] sm:$0xff] }
  0x8d   : > { %593 = vst [vmem:[%s14231_s26 + $0x360] sm:$0xff] %v592_v44  ;;  %v720_v44 = vld [vmem:[%s14226_s20 + $0xab0] sm:$0xff] }
  0x8e   : > { %595 = vst [vmem:[%s14231_s26 + $0x368] sm:$0xff] %v594_v45  ;;  %v722_v45 = vld [vmem:[%s14226_s20 + $0xab8] sm:$0xff] }
  0x8f   : > { %597 = vst [vmem:[%s14231_s26 + $0x370] sm:$0xff] %v596_v46  ;;  %v724_v46 = vld [vmem:[%s14226_s20 + $0xac0] sm:$0xff] }
  0x90   : > { %599 = vst [vmem:[%s14231_s26 + $0x378] sm:$0xff] %v598_v47  ;;  %v726_v47 = vld [vmem:[%s14226_s20 + $0xaf0] sm:$0xff] }
  0x91   : > { %601 = vst [vmem:[%s14231_s26 + $0x380] sm:$0xff] %v600_v48  ;;  %v728_v48 = vld [vmem:[%s14226_s20 + $0xaf8] sm:$0xff] }
  0x92   : > { %603 = vst [vmem:[%s14231_s26 + $0x388] sm:$0xff] %v602_v49  ;;  %v730_v49 = vld [vmem:[%s14226_s20 + $0xb00] sm:$0xff] }
  0x93   : > { %605 = vst [vmem:[%s14231_s26 + $0x390] sm:$0xff] %v604_v50  ;;  %v732_v50 = vld [vmem:[%s14226_s20 + $0xb08] sm:$0xff] }
  0x94   : > { %607 = vst [vmem:[%s14231_s26 + $0x398] sm:$0xff] %v606_v51  ;;  %v734_v51 = vld [vmem:[%s14226_s20 + $0xb10] sm:$0xff] }
  0x95   : > { %609 = vst [vmem:[%s14231_s26 + $0x3a0] sm:$0xff] %v608_v52  ;;  %v736_v52 = vld [vmem:[%s14226_s20 + $0xb40] sm:$0xff] }
  0x96   : > { %611 = vst [vmem:[%s14231_s26 + $0x3a8] sm:$0xff] %v610_v53  ;;  %v738_v53 = vld [vmem:[%s14226_s20 + $0xb48] sm:$0xff] }
  0x97   : > { %613 = vst [vmem:[%s14231_s26 + $0x3b0] sm:$0xff] %v612_v54  ;;  %v740_v54 = vld [vmem:[%s14226_s20 + $0xb50] sm:$0xff] }
  0x98   : > { %615 = vst [vmem:[%s14231_s26 + $0x3b8] sm:$0xff] %v614_v55  ;;  %v742_v55 = vld [vmem:[%s14226_s20 + $0xb58] sm:$0xff] }
  0x99   : > { %617 = vst [vmem:[%s14231_s26 + $0x3c0] sm:$0xff] %v616_v56  ;;  %v744_v56 = vld [vmem:[%s14226_s20 + $0xb60] sm:$0xff] }
  0x9a   : > { %619 = vst [vmem:[%s14231_s26 + $0x3c8] sm:$0xff] %v618_v57  ;;  %v746_v57 = vld [vmem:[%s14226_s20 + $0xb90] sm:$0xff] }
  0x9b   : > { %621 = vst [vmem:[%s14231_s26 + $0x3d0] sm:$0xff] %v620_v58  ;;  %v748_v58 = vld [vmem:[%s14226_s20 + $0xb98] sm:$0xff] }
  0x9c   : > { %623 = vst [vmem:[%s14231_s26 + $0x3d8] sm:$0xff] %v622_v59  ;;  %v750_v59 = vld [vmem:[%s14226_s20 + $0xba0] sm:$0xff] }
  0x9d   : > { %625 = vst [vmem:[%s14231_s26 + $0x3e0] sm:$0xff] %v624_v60  ;;  %v752_v60 = vld [vmem:[%s14226_s20 + $0xba8] sm:$0xff] }
  0x9e   : > { %627 = vst [vmem:[%s14231_s26 + $0x3e8] sm:$0xff] %v626_v61  ;;  %v754_v61 = vld [vmem:[%s14226_s20 + $0xbb0] sm:$0xff] }
  0x9f   : > { %629 = vst [vmem:[%s14231_s26 + $0x3f0] sm:$0xff] %v628_v62  ;;  %v756_v62 = vld [vmem:[%s14226_s20 + $0xbe0] sm:$0xff] }
  0xa0   : > { %631 = vst [vmem:[%s14231_s26 + $0x3f8] sm:$0xff] %v630_v63  ;;  %v758_v63 = vld [vmem:[%s14226_s20 + $0xbe8] sm:$0xff] }
  0xa1   : > { %633 = vst [vmem:[%s14231_s26 + $0x400] sm:$0xff] %v632_v0  ;;  %v760_v0 = vld [vmem:[%s14226_s20 + $0xbf0] sm:$0xff] }
  0xa2   : > { %635 = vst [vmem:[%s14231_s26 + $0x408] sm:$0xff] %v634_v1  ;;  %v762_v1 = vld [vmem:[%s14226_s20 + $0xbf8] sm:$0xff] }
  0xa3   : > { %637 = vst [vmem:[%s14231_s26 + $0x410] sm:$0xff] %v636_v2  ;;  %v764_v2 = vld [vmem:[%s14226_s20 + $0xc00] sm:$0xff] }
  0xa4   : > { %639 = vst [vmem:[%s14231_s26 + $0x418] sm:$0xff] %v638_v3  ;;  %v766_v3 = vld [vmem:[%s14226_s20 + $0xc30] sm:$0xff] }
  0xa5   : > { %641 = vst [vmem:[%s14231_s26 + $0x420] sm:$0xff] %v640_v4  ;;  %v768_v4 = vld [vmem:[%s14226_s20 + $0xc38] sm:$0xff] }
  0xa6   : > { %643 = vst [vmem:[%s14231_s26 + $0x428] sm:$0xff] %v642_v5  ;;  %v770_v5 = vld [vmem:[%s14226_s20 + $0xc40] sm:$0xff] }
  0xa7   : > { %645 = vst [vmem:[%s14231_s26 + $0x430] sm:$0xff] %v644_v6  ;;  %v772_v6 = vld [vmem:[%s14226_s20 + $0xc48] sm:$0xff] }
  0xa8   : > { %647 = vst [vmem:[%s14231_s26 + $0x438] sm:$0xff] %v646_v7  ;;  %v774_v7 = vld [vmem:[%s14226_s20 + $0xc50] sm:$0xff] }
  0xa9   : > { %649 = vst [vmem:[%s14231_s26 + $0x440] sm:$0xff] %v648_v8  ;;  %v776_v8 = vld [vmem:[%s14226_s20 + $0xc80] sm:$0xff] }
  0xaa   : > { %651 = vst [vmem:[%s14231_s26 + $0x448] sm:$0xff] %v650_v9  ;;  %v778_v9 = vld [vmem:[%s14226_s20 + $0xc88] sm:$0xff] }
  0xab   : > { %653 = vst [vmem:[%s14231_s26 + $0x450] sm:$0xff] %v652_v10  ;;  %v780_v10 = vld [vmem:[%s14226_s20 + $0xc90] sm:$0xff] }
  0xac   : > { %655 = vst [vmem:[%s14231_s26 + $0x458] sm:$0xff] %v654_v11  ;;  %v782_v11 = vld [vmem:[%s14226_s20 + $0xc98] sm:$0xff] }
  0xad   : > { %657 = vst [vmem:[%s14231_s26 + $0x460] sm:$0xff] %v656_v12  ;;  %v784_v12 = vld [vmem:[%s14226_s20 + $0xca0] sm:$0xff] }
  0xae   : > { %659 = vst [vmem:[%s14231_s26 + $0x468] sm:$0xff] %v658_v13  ;;  %v786_v13 = vld [vmem:[%s14226_s20 + $0xcd0] sm:$0xff] }
  0xaf   : > { %661 = vst [vmem:[%s14231_s26 + $0x470] sm:$0xff] %v660_v14  ;;  %v788_v14 = vld [vmem:[%s14226_s20 + $0xcd8] sm:$0xff] }
  0xb0   : > { %663 = vst [vmem:[%s14231_s26 + $0x478] sm:$0xff] %v662_v15  ;;  %v790_v15 = vld [vmem:[%s14226_s20 + $0xce0] sm:$0xff] }
  0xb1   : > { %665 = vst [vmem:[%s14231_s26 + $0x480] sm:$0xff] %v664_v16  ;;  %v792_v16 = vld [vmem:[%s14226_s20 + $0xce8] sm:$0xff] }
  0xb2   : > { %667 = vst [vmem:[%s14231_s26 + $0x488] sm:$0xff] %v666_v17  ;;  %v794_v17 = vld [vmem:[%s14226_s20 + $0xcf0] sm:$0xff] }
  0xb3   : > { %669 = vst [vmem:[%s14231_s26 + $0x490] sm:$0xff] %v668_v18  ;;  %v796_v18 = vld [vmem:[%s14226_s20 + $0xd20] sm:$0xff] }
  0xb4   : > { %671 = vst [vmem:[%s14231_s26 + $0x498] sm:$0xff] %v670_v19  ;;  %v798_v19 = vld [vmem:[%s14226_s20 + $0xd28] sm:$0xff] }
  0xb5   : > { %673 = vst [vmem:[%s14231_s26 + $0x4a0] sm:$0xff] %v672_v20  ;;  %v800_v20 = vld [vmem:[%s14226_s20 + $0xd30] sm:$0xff] }
  0xb6   : > { %675 = vst [vmem:[%s14231_s26 + $0x4a8] sm:$0xff] %v674_v21  ;;  %v802_v21 = vld [vmem:[%s14226_s20 + $0xd38] sm:$0xff] }
  0xb7   : > { %677 = vst [vmem:[%s14231_s26 + $0x4b0] sm:$0xff] %v676_v22  ;;  %v804_v22 = vld [vmem:[%s14226_s20 + $0xd40] sm:$0xff] }
  0xb8   : > { %679 = vst [vmem:[%s14231_s26 + $0x4b8] sm:$0xff] %v678_v23  ;;  %v806_v23 = vld [vmem:[%s14226_s20 + $0xd70] sm:$0xff] }
  0xb9   : > { %681 = vst [vmem:[%s14231_s26 + $0x4c0] sm:$0xff] %v680_v24  ;;  %v808_v24 = vld [vmem:[%s14226_s20 + $0xd78] sm:$0xff] }
  0xba   : > { %683 = vst [vmem:[%s14231_s26 + $0x4c8] sm:$0xff] %v682_v25  ;;  %v810_v25 = vld [vmem:[%s14226_s20 + $0xd80] sm:$0xff] }
  0xbb   : > { %685 = vst [vmem:[%s14231_s26 + $0x4d0] sm:$0xff] %v684_v26  ;;  %v812_v26 = vld [vmem:[%s14226_s20 + $0xd88] sm:$0xff] }
  0xbc   : > { %687 = vst [vmem:[%s14231_s26 + $0x4d8] sm:$0xff] %v686_v27  ;;  %v814_v27 = vld [vmem:[%s14226_s20 + $0xd90] sm:$0xff] }
  0xbd   : > { %689 = vst [vmem:[%s14231_s26 + $0x4e0] sm:$0xff] %v688_v28  ;;  %v816_v28 = vld [vmem:[%s14226_s20 + $0xdc0] sm:$0xff] }
  0xbe   : > { %691 = vst [vmem:[%s14231_s26 + $0x4e8] sm:$0xff] %v690_v29  ;;  %v818_v29 = vld [vmem:[%s14226_s20 + $0xdc8] sm:$0xff] }
  0xbf   : > { %693 = vst [vmem:[%s14231_s26 + $0x4f0] sm:$0xff] %v692_v30  ;;  %v820_v30 = vld [vmem:[%s14226_s20 + $0xdd0] sm:$0xff] }
  0xc0   : > { %695 = vst [vmem:[%s14231_s26 + $0x4f8] sm:$0xff] %v694_v31  ;;  %v822_v31 = vld [vmem:[%s14226_s20 + $0xdd8] sm:$0xff] }
  0xc1   : > { %697 = vst [vmem:[%s14231_s26 + $0x500] sm:$0xff] %v696_v32  ;;  %v824_v32 = vld [vmem:[%s14226_s20 + $0xde0] sm:$0xff] }
  0xc2   : > { %699 = vst [vmem:[%s14231_s26 + $0x508] sm:$0xff] %v698_v33  ;;  %v826_v33 = vld [vmem:[%s14226_s20 + $0xe10] sm:$0xff] }
  0xc3   : > { %701 = vst [vmem:[%s14231_s26 + $0x510] sm:$0xff] %v700_v34  ;;  %v828_v34 = vld [vmem:[%s14226_s20 + $0xe18] sm:$0xff] }
  0xc4   : > { %703 = vst [vmem:[%s14231_s26 + $0x518] sm:$0xff] %v702_v35  ;;  %v830_v35 = vld [vmem:[%s14226_s20 + $0xe20] sm:$0xff] }
  0xc5   : > { %705 = vst [vmem:[%s14231_s26 + $0x520] sm:$0xff] %v704_v36  ;;  %v832_v36 = vld [vmem:[%s14226_s20 + $0xe28] sm:$0xff] }
  0xc6   : > { %707 = vst [vmem:[%s14231_s26 + $0x528] sm:$0xff] %v706_v37  ;;  %v834_v37 = vld [vmem:[%s14226_s20 + $0xe30] sm:$0xff] }
  0xc7   : > { %709 = vst [vmem:[%s14231_s26 + $0x530] sm:$0xff] %v708_v38  ;;  %v836_v38 = vld [vmem:[%s14226_s20 + $0xe60] sm:$0xff] }
  0xc8   : > { %711 = vst [vmem:[%s14231_s26 + $0x538] sm:$0xff] %v710_v39  ;;  %v838_v39 = vld [vmem:[%s14226_s20 + $0xe68] sm:$0xff] }
  0xc9   : > { %713 = vst [vmem:[%s14231_s26 + $0x540] sm:$0xff] %v712_v40  ;;  %v840_v40 = vld [vmem:[%s14226_s20 + $0xe70] sm:$0xff] }
  0xca   : > { %715 = vst [vmem:[%s14231_s26 + $0x548] sm:$0xff] %v714_v41  ;;  %v842_v41 = vld [vmem:[%s14226_s20 + $0xe78] sm:$0xff] }
  0xcb   : > { %717 = vst [vmem:[%s14231_s26 + $0x550] sm:$0xff] %v716_v42  ;;  %v844_v42 = vld [vmem:[%s14226_s20 + $0xe80] sm:$0xff] }
  0xcc   : > { %719 = vst [vmem:[%s14231_s26 + $0x558] sm:$0xff] %v718_v43  ;;  %v846_v43 = vld [vmem:[%s14226_s20 + $0xeb0] sm:$0xff] }
  0xcd   : > { %721 = vst [vmem:[%s14231_s26 + $0x560] sm:$0xff] %v720_v44  ;;  %v848_v44 = vld [vmem:[%s14226_s20 + $0xeb8] sm:$0xff] }
  0xce   : > { %723 = vst [vmem:[%s14231_s26 + $0x568] sm:$0xff] %v722_v45  ;;  %v850_v45 = vld [vmem:[%s14226_s20 + $0xec0] sm:$0xff] }
  0xcf   : > { %725 = vst [vmem:[%s14231_s26 + $0x570] sm:$0xff] %v724_v46  ;;  %v852_v46 = vld [vmem:[%s14226_s20 + $0xec8] sm:$0xff] }
  0xd0   : > { %727 = vst [vmem:[%s14231_s26 + $0x578] sm:$0xff] %v726_v47  ;;  %v854_v47 = vld [vmem:[%s14226_s20 + $0xed0] sm:$0xff] }
  0xd1   : > { %729 = vst [vmem:[%s14231_s26 + $0x580] sm:$0xff] %v728_v48  ;;  %v856_v48 = vld [vmem:[%s14226_s20 + $0xf00] sm:$0xff] }
  0xd2   : > { %731 = vst [vmem:[%s14231_s26 + $0x588] sm:$0xff] %v730_v49  ;;  %v858_v49 = vld [vmem:[%s14226_s20 + $0xf08] sm:$0xff] }
  0xd3   : > { %733 = vst [vmem:[%s14231_s26 + $0x590] sm:$0xff] %v732_v50  ;;  %v860_v50 = vld [vmem:[%s14226_s20 + $0xf10] sm:$0xff] }
  0xd4   : > { %735 = vst [vmem:[%s14231_s26 + $0x598] sm:$0xff] %v734_v51  ;;  %v862_v51 = vld [vmem:[%s14226_s20 + $0xf18] sm:$0xff] }
  0xd5   : > { %737 = vst [vmem:[%s14231_s26 + $0x5a0] sm:$0xff] %v736_v52  ;;  %v864_v52 = vld [vmem:[%s14226_s20 + $0xf20] sm:$0xff] }
  0xd6   : > { %739 = vst [vmem:[%s14231_s26 + $0x5a8] sm:$0xff] %v738_v53  ;;  %v866_v53 = vld [vmem:[%s14226_s20 + $0xf50] sm:$0xff] }
  0xd7   : > { %741 = vst [vmem:[%s14231_s26 + $0x5b0] sm:$0xff] %v740_v54  ;;  %v868_v54 = vld [vmem:[%s14226_s20 + $0xf58] sm:$0xff] }
  0xd8   : > { %743 = vst [vmem:[%s14231_s26 + $0x5b8] sm:$0xff] %v742_v55  ;;  %v870_v55 = vld [vmem:[%s14226_s20 + $0xf60] sm:$0xff] }
  0xd9   : > { %745 = vst [vmem:[%s14231_s26 + $0x5c0] sm:$0xff] %v744_v56  ;;  %v872_v56 = vld [vmem:[%s14226_s20 + $0xf68] sm:$0xff] }
  0xda   : > { %747 = vst [vmem:[%s14231_s26 + $0x5c8] sm:$0xff] %v746_v57  ;;  %v874_v57 = vld [vmem:[%s14226_s20 + $0xf70] sm:$0xff] }
  0xdb   : > { %749 = vst [vmem:[%s14231_s26 + $0x5d0] sm:$0xff] %v748_v58 }
  0xdc   : > { %751 = vst [vmem:[%s14231_s26 + $0x5d8] sm:$0xff] %v750_v59 }
  0xdd   : > { %753 = vst [vmem:[%s14231_s26 + $0x5e0] sm:$0xff] %v752_v60 }
  0xde   : > { %755 = vst [vmem:[%s14231_s26 + $0x5e8] sm:$0xff] %v754_v61 }
  0xdf   : > { %757 = vst [vmem:[%s14231_s26 + $0x5f0] sm:$0xff] %v756_v62 }
  0xe0   : > { %759 = vst [vmem:[%s14231_s26 + $0x5f8] sm:$0xff] %v758_v63 }
  0xe1   : > { %761 = vst [vmem:[%s14231_s26 + $0x600] sm:$0xff] %v760_v0 }
  0xe2   : > { %763 = vst [vmem:[%s14231_s26 + $0x608] sm:$0xff] %v762_v1 }
  0xe3   : > { %765 = vst [vmem:[%s14231_s26 + $0x610] sm:$0xff] %v764_v2 }
  0xe4   : > { %767 = vst [vmem:[%s14231_s26 + $0x618] sm:$0xff] %v766_v3 }
  0xe5   : > { %769 = vst [vmem:[%s14231_s26 + $0x620] sm:$0xff] %v768_v4 }
  0xe6   : > { %771 = vst [vmem:[%s14231_s26 + $0x628] sm:$0xff] %v770_v5 }
  0xe7   : > { %773 = vst [vmem:[%s14231_s26 + $0x630] sm:$0xff] %v772_v6 }
  0xe8   : > { %775 = vst [vmem:[%s14231_s26 + $0x638] sm:$0xff] %v774_v7 }
  0xe9   : > { %777 = vst [vmem:[%s14231_s26 + $0x640] sm:$0xff] %v776_v8 }
  0xea   : > { %779 = vst [vmem:[%s14231_s26 + $0x648] sm:$0xff] %v778_v9 }
  0xeb   : > { %781 = vst [vmem:[%s14231_s26 + $0x650] sm:$0xff] %v780_v10 }
  0xec   : > { %783 = vst [vmem:[%s14231_s26 + $0x658] sm:$0xff] %v782_v11 }
  0xed   : > { %785 = vst [vmem:[%s14231_s26 + $0x660] sm:$0xff] %v784_v12 }
  0xee   : > { %787 = vst [vmem:[%s14231_s26 + $0x668] sm:$0xff] %v786_v13 }
  0xef   : > { %789 = vst [vmem:[%s14231_s26 + $0x670] sm:$0xff] %v788_v14 }
  0xf0   : > { %791 = vst [vmem:[%s14231_s26 + $0x678] sm:$0xff] %v790_v15 }
  0xf1   : > { %793 = vst [vmem:[%s14231_s26 + $0x680] sm:$0xff] %v792_v16 }
  0xf2   : > { %795 = vst [vmem:[%s14231_s26 + $0x688] sm:$0xff] %v794_v17 }
  0xf3   : > { %797 = vst [vmem:[%s14231_s26 + $0x690] sm:$0xff] %v796_v18 }
  0xf4   : > { %799 = vst [vmem:[%s14231_s26 + $0x698] sm:$0xff] %v798_v19 }
  0xf5   : > { %801 = vst [vmem:[%s14231_s26 + $0x6a0] sm:$0xff] %v800_v20 }
  0xf6   : > { %803 = vst [vmem:[%s14231_s26 + $0x6a8] sm:$0xff] %v802_v21 }
  0xf7   : > { %805 = vst [vmem:[%s14231_s26 + $0x6b0] sm:$0xff] %v804_v22 }
  0xf8   : > { %807 = vst [vmem:[%s14231_s26 + $0x6b8] sm:$0xff] %v806_v23 }
  0xf9   : > { %809 = vst [vmem:[%s14231_s26 + $0x6c0] sm:$0xff] %v808_v24 }
  0xfa   : > { %811 = vst [vmem:[%s14231_s26 + $0x6c8] sm:$0xff] %v810_v25 }
  0xfb   : > { %813 = vst [vmem:[%s14231_s26 + $0x6d0] sm:$0xff] %v812_v26 }
  0xfc   : > { %815 = vst [vmem:[%s14231_s26 + $0x6d8] sm:$0xff] %v814_v27 }
  0xfd   : > { %817 = vst [vmem:[%s14231_s26 + $0x6e0] sm:$0xff] %v816_v28 }
  0xfe   : > { %819 = vst [vmem:[%s14231_s26 + $0x6e8] sm:$0xff] %v818_v29 }
  0xff   : > { %821 = vst [vmem:[%s14231_s26 + $0x6f0] sm:$0xff] %v820_v30 }
 0x100   : > { %823 = vst [vmem:[%s14231_s26 + $0x6f8] sm:$0xff] %v822_v31 }
 0x101   : > { %825 = vst [vmem:[%s14231_s26 + $0x700] sm:$0xff] %v824_v32 }
 0x102   : > { %827 = vst [vmem:[%s14231_s26 + $0x708] sm:$0xff] %v826_v33 }
 0x103   : > { %829 = vst [vmem:[%s14231_s26 + $0x710] sm:$0xff] %v828_v34 }
 0x104   : > { %831 = vst [vmem:[%s14231_s26 + $0x718] sm:$0xff] %v830_v35 }
 0x105   : > { %833 = vst [vmem:[%s14231_s26 + $0x720] sm:$0xff] %v832_v36 }
 0x106   : > { %835 = vst [vmem:[%s14231_s26 + $0x728] sm:$0xff] %v834_v37 }
 0x107   : > { %837 = vst [vmem:[%s14231_s26 + $0x730] sm:$0xff] %v836_v38 }
 0x108   : > { %839 = vst [vmem:[%s14231_s26 + $0x738] sm:$0xff] %v838_v39 }
 0x109   : > { %841 = vst [vmem:[%s14231_s26 + $0x740] sm:$0xff] %v840_v40 }
 0x10a   : > { %843 = vst [vmem:[%s14231_s26 + $0x748] sm:$0xff] %v842_v41 }
 0x10b   : > { %845 = vst [vmem:[%s14231_s26 + $0x750] sm:$0xff] %v844_v42 }
 0x10c   : > { %847 = vst [vmem:[%s14231_s26 + $0x758] sm:$0xff] %v846_v43 }
 0x10d   : > { %849 = vst [vmem:[%s14231_s26 + $0x760] sm:$0xff] %v848_v44 }
 0x10e   : > { %851 = vst [vmem:[%s14231_s26 + $0x768] sm:$0xff] %v850_v45 }
 0x10f   : > { %853 = vst [vmem:[%s14231_s26 + $0x770] sm:$0xff] %v852_v46 }
 0x110   : > { %855 = vst [vmem:[%s14231_s26 + $0x778] sm:$0xff] %v854_v47 }
 0x111   : > { %857 = vst [vmem:[%s14231_s26 + $0x780] sm:$0xff] %v856_v48 }
 0x112   : > { %859 = vst [vmem:[%s14231_s26 + $0x788] sm:$0xff] %v858_v49 }
 0x113   : > { %861 = vst [vmem:[%s14231_s26 + $0x790] sm:$0xff] %v860_v50 }
 0x114   : > { %863 = vst [vmem:[%s14231_s26 + $0x798] sm:$0xff] %v862_v51 }
 0x115   : > { %865 = vst [vmem:[%s14231_s26 + $0x7a0] sm:$0xff] %v864_v52 }
 0x116   : > { %867 = vst [vmem:[%s14231_s26 + $0x7a8] sm:$0xff] %v866_v53 }
 0x117   : > { %869 = vst [vmem:[%s14231_s26 + $0x7b0] sm:$0xff] %v868_v54 }
 0x118   : > { %871 = vst [vmem:[%s14231_s26 + $0x7b8] sm:$0xff] %v870_v55 }
 0x119   : > { %873 = vst [vmem:[%s14231_s26 + $0x7c0] sm:$0xff] %v872_v56 }
 0x11a   : > { %875 = vst [vmem:[%s14231_s26 + $0x7c8] sm:$0xff] %v874_v57 }
 0x11b PF: > { %p8983_p10 = scmp.ge.s32.totalorder %s14100_s24, 1  ;;  %p888_p11 = scmp.lt.s32.totalorder %s14100_s24, 3 }
 0x11d   : > { %p889_p12 = pnand %p8983_p10, %p888_p11 }
 0x11e   : > { %s14733_s28 = sand.u32 (!%p889_p12), 1, %s14092_s22   ;;  %s941_s29 = smul.u32 (!%p889_p12), 10, %s14190_s25 }
 0x11f   : > { %892 = sbr.rel (%p889_p12) target bundleno = 1836 (0x72c), region = 79  ;;  %s20075_s8 = sld [smem:[#allocation17_spill]] (!%p889_p12) }
 0x120   : > { %s13877_s15 = smul.u32 (!%p889_p12), 2000, %s14733_s28  ;;  %p942_p13 = scmp.lt.s32.totalorder (!%p889_p12), %s941_s29, 19 }
 0x121   : > { %s13878_s16 = smul.u32 (!%p889_p12), 80, %s14733_s28  ;;  %p8984_p0 = scmp.ne.s32.totalorder (!%p889_p12), %s14190_s25, 0 }
 0x122   : > { %s14743_s20 = scalar_lea.vmem (!%p889_p12), [#allocation3], %s13877_s15 }
 0x123   : > { %s14745_s26 = scalar_lea.vmem (!%p889_p12), [#allocation4], %s13878_s16 }
 0x124   : > { %s20084_s29 = smov (!%p942_p13, %s941_s29), 19  ;;  %951 = sbr.rel (%p8984_p0) target bundleno = 1398 (0x576), region = 87 }
 0x125   : > { %s14741_s19 = scalar_lea.vmem %s20075_s8, %s20084_s29 }
 0x129   : > { %v9099_v58 = vld [vmem:[%s20048_s1 + $0xe0] sm:$0xf]  ;;  %v12933_v59 = vld [vmem:[%s20048_s1 + $0xec] sm:$0xf0]  ;;  %vm6196_vm0 = vcmask 130048   ;;  %vm6572_vm1 = vcmask 1043456  }
 0x12a   : > { %v9227_v60 = vld [vmem:[%s20048_s1 + $0x1e0] sm:$0xf]  ;;  %v9100_v61 = vor.u32 %v12933_v59, %v9099_v58  ;;  %v12965_v62 = vld [vmem:[%s20048_s1 + $0x1ec] sm:$0xf0]  ;;  %vm6573_vm2 = vcmask 130052  }
 0x12b   : > { %v9355_v63 = vld [vmem:[%s20048_s1 + $0x2e0] sm:$0xf]  ;;  %v12997_v0 = vld [vmem:[%s20048_s1 + $0x2ec] sm:$0xf0]  ;;  %v9228_v1 = vor.u32 %v12965_v62, %v9227_v60  ;;  %vm6574_vm3 = vmor %vm6573_vm2, %vm6572_vm1 }
 0x12c   : > { %v9356_v2 = vor.u32 %v12997_v0, %v9355_v63  ;;  %v9483_v3 = vld [vmem:[%s20048_s1 + $0x3e0] sm:$0xf]  ;;  %v13029_v4 = vld [vmem:[%s20048_s1 + $0x3ec] sm:$0xf0]  ;;  %4842 = vmatpush.bf16.msra.mxu0 %v9100_v61 }
 0x12d   : > { %v9083_v5 = vld [vmem:[%s20048_s1 + $0xc0] sm:$0xf]  ;;  %v9484_v6 = vor.u32 %v13029_v4, %v9483_v3  ;;  %v12929_v7 = vld [vmem:[%s20048_s1 + $0xcc] sm:$0xf0]  ;;  %4855 = vmatpush.bf16.msra.mxu1 %v9228_v1 }
 0x12e   : > { %v9211_v8 = vld [vmem:[%s20048_s1 + $0x1c0] sm:$0xf]  ;;  %v12961_v9 = vld [vmem:[%s20048_s1 + $0x1cc] sm:$0xf0]  ;;  %4868 = vmatpush.bf16.msra.mxu2 %v9356_v2  ;;  %v9084_v10 = vor.u32 %v12929_v7, %v9083_v5 }
 0x12f   : > { %v9212_v11 = vor.u32 %v12961_v9, %v9211_v8  ;;  %v9339_v12 = vld [vmem:[%s20048_s1 + $0x2c0] sm:$0xf]  ;;  %v12993_v13 = vld [vmem:[%s20048_s1 + $0x2cc] sm:$0xf0]  ;;  %4881 = vmatpush.bf16.msra.mxu3 %v9484_v6 }
 0x130   : > { %v9467_v14 = vld [vmem:[%s20048_s1 + $0x3c0] sm:$0xf]  ;;  %v9340_v15 = vor.u32 %v12993_v13, %v9339_v12  ;;  %v13025_v16 = vld [vmem:[%s20048_s1 + $0x3cc] sm:$0xf0]  ;;  %4843 = vmatpush.bf16.msra.mxu0 %v9084_v10 }
 0x131   : > { %v9067_v17 = vld [vmem:[%s20048_s1 + $0xa0] sm:$0xf]  ;;  %v12925_v18 = vld [vmem:[%s20048_s1 + $0xac] sm:$0xf0]  ;;  %v9468_v19 = vor.u32 %v13025_v16, %v9467_v14  ;;  %4856 = vmatpush.bf16.msra.mxu1 %v9212_v11 }
 0x132   : > { %v9195_v20 = vld [vmem:[%s20048_s1 + $0x1a0] sm:$0xf]  ;;  %v12957_v21 = vld [vmem:[%s20048_s1 + $0x1ac] sm:$0xf0]  ;;  %v9068_v23 = vor.u32 %v12925_v18, %v9067_v17  ;;  %4869 = vmatpush.bf16.msra.mxu2 %v9340_v15 }
 0x133   : > { %v9323_v22 = vld [vmem:[%s20048_s1 + $0x2a0] sm:$0xf]  ;;  %v12989_v24 = vld [vmem:[%s20048_s1 + $0x2ac] sm:$0xf0]  ;;  %v9196_v27 = vor.u32 %v12957_v21, %v9195_v20  ;;  %4882 = vmatpush.bf16.msra.mxu3 %v9468_v19 }
 0x134   : > { %v9451_v25 = vld [vmem:[%s20048_s1 + $0x3a0] sm:$0xf]  ;;  %v13021_v26 = vld [vmem:[%s20048_s1 + $0x3ac] sm:$0xf0]  ;;  %v9324_v28 = vor.u32 %v12989_v24, %v9323_v22  ;;  %4844 = vmatpush.bf16.msra.mxu0 %v9068_v23 }
 0x135   : > { %v9051_v29 = vld [vmem:[%s20048_s1 + $0x80] sm:$0xf]  ;;  %v12921_v30 = vld [vmem:[%s20048_s1 + $0x8c] sm:$0xf0]  ;;  %v9452_v32 = vor.u32 %v13021_v26, %v9451_v25  ;;  %4857 = vmatpush.bf16.msra.mxu1 %v9196_v27 }
 0x136   : > { %v9179_v31 = vld [vmem:[%s20048_s1 + $0x180] sm:$0xf]  ;;  %v12953_v33 = vld [vmem:[%s20048_s1 + $0x18c] sm:$0xf0]  ;;  %v9052_v38 = vor.u32 %v12921_v30, %v9051_v29  ;;  %4870 = vmatpush.bf16.msra.mxu2 %v9324_v28 }
 0x137   : > { %v9307_v34 = vld [vmem:[%s20048_s1 + $0x280] sm:$0xf]  ;;  %v12985_v35 = vld [vmem:[%s20048_s1 + $0x28c] sm:$0xf0]  ;;  %v9180_v39 = vor.u32 %v12953_v33, %v9179_v31  ;;  %4883 = vmatpush.bf16.msra.mxu3 %v9452_v32 }
 0x138   : > { %v9435_v36 = vld [vmem:[%s20048_s1 + $0x380] sm:$0xf]  ;;  %v13017_v37 = vld [vmem:[%s20048_s1 + $0x38c] sm:$0xf0]  ;;  %v9308_v40 = vor.u32 %v12985_v35, %v9307_v34  ;;  %4845 = vmatpush.bf16.msra.mxu0 %v9052_v38 }
 0x139   : > { %v9035_v41 = vld [vmem:[%s20048_s1 + $0x60] sm:$0xf]  ;;  %v12917_v42 = vld [vmem:[%s20048_s1 + $0x6c] sm:$0xf0]  ;;  %v9436_v44 = vor.u32 %v13017_v37, %v9435_v36  ;;  %4858 = vmatpush.bf16.msra.mxu1 %v9180_v39 }
 0x13a   : > { %v9163_v43 = vld [vmem:[%s20048_s1 + $0x160] sm:$0xf]  ;;  %v12949_v45 = vld [vmem:[%s20048_s1 + $0x16c] sm:$0xf0]  ;;  %v9036_v50 = vor.u32 %v12917_v42, %v9035_v41  ;;  %4871 = vmatpush.bf16.msra.mxu2 %v9308_v40 }
 0x13b   : > { %v9291_v46 = vld [vmem:[%s20048_s1 + $0x260] sm:$0xf]  ;;  %v12981_v47 = vld [vmem:[%s20048_s1 + $0x26c] sm:$0xf0]  ;;  %v9164_v51 = vor.u32 %v12949_v45, %v9163_v43  ;;  %4884 = vmatpush.bf16.msra.mxu3 %v9436_v44 }
 0x13c   : > { %v9419_v48 = vld [vmem:[%s20048_s1 + $0x360] sm:$0xf]  ;;  %v13013_v49 = vld [vmem:[%s20048_s1 + $0x36c] sm:$0xf0]  ;;  %v9292_v52 = vor.u32 %v12981_v47, %v9291_v46  ;;  %4846 = vmatpush.bf16.msra.mxu0 %v9036_v50 }
 0x13d   : > { %v9019_v53 = vld [vmem:[%s20048_s1 + $0x40] sm:$0xf]  ;;  %v12913_v54 = vld [vmem:[%s20048_s1 + $0x4c] sm:$0xf0]  ;;  %v9420_v56 = vor.u32 %v13013_v49, %v9419_v48  ;;  %4859 = vmatpush.bf16.msra.mxu1 %v9164_v51 }
 0x13e   : > { %v9147_v55 = vld [vmem:[%s20048_s1 + $0x140] sm:$0xf]  ;;  %v12945_v57 = vld [vmem:[%s20048_s1 + $0x14c] sm:$0xf0]  ;;  %v9020_v62 = vor.u32 %v12913_v54, %v9019_v53  ;;  %4872 = vmatpush.bf16.msra.mxu2 %v9292_v52 }
 0x13f   : > { %v9275_v58 = vld [vmem:[%s20048_s1 + $0x240] sm:$0xf]  ;;  %v12977_v59 = vld [vmem:[%s20048_s1 + $0x24c] sm:$0xf0]  ;;  %v9148_v63 = vor.u32 %v12945_v57, %v9147_v55  ;;  %4885 = vmatpush.bf16.msra.mxu3 %v9420_v56 }
 0x140   : > { %v9403_v60 = vld [vmem:[%s20048_s1 + $0x340] sm:$0xf]  ;;  %v13009_v61 = vld [vmem:[%s20048_s1 + $0x34c] sm:$0xf0]  ;;  %v9276_v0 = vor.u32 %v12977_v59, %v9275_v58  ;;  %4847 = vmatpush.bf16.msra.mxu0 %v9020_v62 }
 0x141   : > { %v9003_v1 = vld [vmem:[%s20048_s1 + $0x20] sm:$0xf]  ;;  %v12909_v2 = vld [vmem:[%s20048_s1 + $0x2c] sm:$0xf0]  ;;  %v9404_v4 = vor.u32 %v13009_v61, %v9403_v60  ;;  %4860 = vmatpush.bf16.msra.mxu1 %v9148_v63 }
 0x142   : > { %v9131_v3 = vld [vmem:[%s20048_s1 + $0x120] sm:$0xf]  ;;  %v12941_v5 = vld [vmem:[%s20048_s1 + $0x12c] sm:$0xf0]  ;;  %v9004_v10 = vor.u32 %v12909_v2, %v9003_v1  ;;  %4873 = vmatpush.bf16.msra.mxu2 %v9276_v0 }
 0x143   : > { %v9259_v6 = vld [vmem:[%s20048_s1 + $0x220] sm:$0xf]  ;;  %v12973_v7 = vld [vmem:[%s20048_s1 + $0x22c] sm:$0xf0]  ;;  %v9132_v13 = vor.u32 %v12941_v5, %v9131_v3  ;;  %4886 = vmatpush.bf16.msra.mxu3 %v9404_v4  ;;  %v955_v4 = vld [vmem:[%s20047_s0 + $0x18] sm:$0xff] }
 0x144   : > { %v9387_v8 = vld [vmem:[%s20048_s1 + $0x320] sm:$0xf]  ;;  %v13005_v9 = vld [vmem:[%s20048_s1 + $0x32c] sm:$0xf0]  ;;  %v9260_v14 = vor.u32 %v12973_v7, %v9259_v6  ;;  %4848 = vmatpush.bf16.msra.mxu0 %v9004_v10 }
 0x145   : > { %v8987_v11 = vld [vmem:[%s20048_s1] sm:$0xf]  ;;  %v12905_v12 = vld [vmem:[%s20048_s1 + $0xc] sm:$0xf0]  ;;  %v9388_v18 = vor.u32 %v13005_v9, %v9387_v8  ;;  %4861 = vmatpush.bf16.msra.mxu1 %v9132_v13  ;;  %v15043_v9 = vpack.c.bf16 %v955_v4, %v955_v4  ;;  %v953_v13 = vld [vmem:[%s20047_s0 + $0x8] sm:$0xff] }
 0x146   : > { %v9115_v15 = vld [vmem:[%s20048_s1 + $0x100] sm:$0xf]  ;;  %v12937_v16 = vld [vmem:[%s20048_s1 + $0x10c] sm:$0xf0]  ;;  %v8988_v25 = vor.u32 %v12905_v12, %v8987_v11  ;;  %4874 = vmatpush.bf16.msra.mxu2 %v9260_v14 }
 0x147   : > { %v9243_v17 = vld [vmem:[%s20048_s1 + $0x200] sm:$0xf]  ;;  %v12969_v19 = vld [vmem:[%s20048_s1 + $0x20c] sm:$0xf0]  ;;  %v9116_v29 = vor.u32 %v12937_v16, %v9115_v15  ;;  %4887 = vmatpush.bf16.msra.mxu3 %v9388_v18 }
 0x148   : > { %v9371_v20 = vld [vmem:[%s20048_s1 + $0x300] sm:$0xf]  ;;  %v13001_v21 = vld [vmem:[%s20048_s1 + $0x30c] sm:$0xf0]  ;;  %v9244_v30 = vor.u32 %v12969_v19, %v9243_v17  ;;  %4849 = vmatpush.bf16.msra.mxu0 %v8988_v25  ;;  %v15066_v19 = vpack.c.bf16 %v953_v13, %v953_v13 }
 0x149   : > { %v9611_v22 = vld [vmem:[%s20048_s1 + $0x4e0] sm:$0xf]  ;;  %v13061_v23 = vld [vmem:[%s20048_s1 + $0x4ec] sm:$0xf0]  ;;  %v9372_v33 = vor.u32 %v13001_v21, %v9371_v20  ;;  %4862 = vmatpush.bf16.msra.mxu1 %v9116_v29 }
 0x14a   : > { %v9739_v24 = vld [vmem:[%s20048_s1 + $0x5e0] sm:$0xf]  ;;  %v13093_v26 = vld [vmem:[%s20048_s1 + $0x5ec] sm:$0xf0]  ;;  %v9612_v34 = vor.u32 %v13061_v23, %v9611_v22  ;;  %4875 = vmatpush.bf16.msra.mxu2 %v9244_v30 }
 0x14b   : > { %v9867_v27 = vld [vmem:[%s20048_s1 + $0x6e0] sm:$0xf]  ;;  %v13125_v28 = vld [vmem:[%s20048_s1 + $0x6ec] sm:$0xf0]  ;;  %v9740_v35 = vor.u32 %v13093_v26, %v9739_v24  ;;  %4888 = vmatpush.bf16.msra.mxu3 %v9372_v33 }
 0x14c   : > { %v9995_v31 = vld [vmem:[%s20048_s1 + $0x7e0] sm:$0xf]  ;;  %v13157_v32 = vld [vmem:[%s20048_s1 + $0x7ec] sm:$0xf0]  ;;  %v9868_v36 = vor.u32 %v13125_v28, %v9867_v27  ;;  %4894 = vmatpush.bf16.msrb.mxu0 %v9612_v34  ;;  %4863 = vmatmul.bf16.vlgmr.msra.gmra.mxu1 %v15066_v19 }
 0x14d   : > { %v9595_v37 = vld [vmem:[%s20048_s1 + $0x4c0] sm:$0xf]  ;;  %v13057_v38 = vld [vmem:[%s20048_s1 + $0x4cc] sm:$0xf0]  ;;  %v9996_v40 = vor.u32 %v13157_v32, %v9995_v31  ;;  %4907 = vmatpush.bf16.msrb.mxu1 %v9740_v35 }
 0x14e   : > { %v9723_v39 = vld [vmem:[%s20048_s1 + $0x5c0] sm:$0xf]  ;;  %v13089_v41 = vld [vmem:[%s20048_s1 + $0x5cc] sm:$0xf0]  ;;  %v9596_v46 = vor.u32 %v13057_v38, %v9595_v37  ;;  %4920 = vmatpush.bf16.msrb.mxu2 %v9868_v36  ;;  %4889 = vmatmul.bf16.vlgmr.msra.gmra.mxu3 %v15043_v9 }
 0x14f   : > { %v9851_v42 = vld [vmem:[%s20048_s1 + $0x6c0] sm:$0xf]  ;;  %v13121_v43 = vld [vmem:[%s20048_s1 + $0x6cc] sm:$0xf0]  ;;  %v9724_v48 = vor.u32 %v13089_v41, %v9723_v39  ;;  %4933 = vmatpush.bf16.msrb.mxu3 %v9996_v40 }
 0x150   : > { %v9979_v44 = vld [vmem:[%s20048_s1 + $0x7c0] sm:$0xf]  ;;  %v13153_v45 = vld [vmem:[%s20048_s1 + $0x7cc] sm:$0xf0]  ;;  %v9852_v49 = vor.u32 %v13121_v43, %v9851_v42  ;;  %4895 = vmatpush.bf16.msrb.mxu0 %v9596_v46 }
 0x151   : > { %v9579_v47 = vld [vmem:[%s20048_s1 + $0x4a0] sm:$0xf]  ;;  %v13053_v50 = vld [vmem:[%s20048_s1 + $0x4ac] sm:$0xf0]  ;;  %v9980_v53 = vor.u32 %v13153_v45, %v9979_v44  ;;  %4908 = vmatpush.bf16.msrb.mxu1 %v9724_v48 }
 0x152   : > { %v9707_v51 = vld [vmem:[%s20048_s1 + $0x5a0] sm:$0xf]  ;;  %v13085_v52 = vld [vmem:[%s20048_s1 + $0x5ac] sm:$0xf0]  ;;  %v9580_v58 = vor.u32 %v13053_v50, %v9579_v47  ;;  %4921 = vmatpush.bf16.msrb.mxu2 %v9852_v49 }
 0x153   : > { %v9835_v54 = vld [vmem:[%s20048_s1 + $0x6a0] sm:$0xf]  ;;  %v13117_v55 = vld [vmem:[%s20048_s1 + $0x6ac] sm:$0xf0]  ;;  %v9708_v59 = vor.u32 %v13085_v52, %v9707_v51  ;;  %4934 = vmatpush.bf16.msrb.mxu3 %v9980_v53 }
 0x154   : > { %v9963_v56 = vld [vmem:[%s20048_s1 + $0x7a0] sm:$0xf]  ;;  %v13149_v57 = vld [vmem:[%s20048_s1 + $0x7ac] sm:$0xf0]  ;;  %v9836_v63 = vor.u32 %v13117_v55, %v9835_v54  ;;  %4896 = vmatpush.bf16.msrb.mxu0 %v9580_v58 }
 0x155   : > { %v9563_v60 = vld [vmem:[%s20048_s1 + $0x480] sm:$0xf]  ;;  %v954_v61 = vld [vmem:[%s20047_s0 + $0x10] sm:$0xff]  ;;  %v9964_v5 = vor.u32 %v13149_v57, %v9963_v56  ;;  %4909 = vmatpush.bf16.msrb.mxu1 %v9708_v59 }
 0x156   : > { %v952_v62 = vld [vmem:[%s20047_s0] sm:$0xff]  ;;  %v13049_v0 = vld [vmem:[%s20048_s1 + $0x48c] sm:$0xf0]  ;;  %v15027_v2 = vpack.c.bf16 %v954_v61, %v954_v61  ;;  %4922 = vmatpush.bf16.msrb.mxu2 %v9836_v63 }
 0x157   : > { %v9691_v1 = vld [vmem:[%s20048_s1 + $0x580] sm:$0xf]  ;;  %v15029_v3 = vpack.c.bf16 %v952_v62, %v952_v62  ;;  %v13081_v6 = vld [vmem:[%s20048_s1 + $0x58c] sm:$0xf0]  ;;  %v9564_v12 = vor.u32 %v13049_v0, %v9563_v60  ;;  %4935 = vmatpush.bf16.msrb.mxu3 %v9964_v5 }
 0x158   : > { %v9819_v7 = vld [vmem:[%s20048_s1 + $0x680] sm:$0xf]  ;;  %v13113_v8 = vld [vmem:[%s20048_s1 + $0x68c] sm:$0xf0]  ;;  %4876 = vmatmul.bf16.vlgmr.msra.gmra.mxu2 %v15027_v2  ;;  %v9692_v14 = vor.u32 %v13081_v6, %v9691_v1 }
 0x159   : > { %v9947_v10 = vld [vmem:[%s20048_s1 + $0x780] sm:$0xf]  ;;  %v13145_v11 = vld [vmem:[%s20048_s1 + $0x78c] sm:$0xf0]  ;;  %4850 = vmatmul.bf16.vlgmr.msra.gmra.mxu0 %v15029_v3  ;;  %v9820_v15 = vor.u32 %v13113_v8, %v9819_v7 }
 0x15a   : > { %v9547_v16 = vld [vmem:[%s20048_s1 + $0x460] sm:$0xf]  ;;  %v13045_v17 = vld [vmem:[%s20048_s1 + $0x46c] sm:$0xf0]  ;;  %v9948_v20 = vor.u32 %v13145_v11, %v9947_v10  ;;  %4897 = vmatpush.bf16.msrb.mxu0 %v9564_v12  ;;  %4910 = vmatpush.bf16.msrb.mxu1 %v9692_v14 }
 0x15b   : > { %v9675_v18 = vld [vmem:[%s20048_s1 + $0x560] sm:$0xf]  ;;  %v13077_v21 = vld [vmem:[%s20048_s1 + $0x56c] sm:$0xf0]  ;;  %v9548_v26 = vor.u32 %v13045_v17, %v9547_v16  ;;  %4923 = vmatpush.bf16.msrb.mxu2 %v9820_v15  ;;  %v959_v17 = vld [vmem:[%s20047_s0 + $0x38] sm:$0xff] }
 0x15c   : > { %v9803_v22 = vld [vmem:[%s20048_s1 + $0x660] sm:$0xf]  ;;  %v13109_v23 = vld [vmem:[%s20048_s1 + $0x66c] sm:$0xf0]  ;;  %v9676_v27 = vor.u32 %v13077_v21, %v9675_v18  ;;  %4936 = vmatpush.bf16.msrb.mxu3 %v9948_v20 }
 0x15d   : > { %v9931_v24 = vld [vmem:[%s20048_s1 + $0x760] sm:$0xf]  ;;  %v13141_v25 = vld [vmem:[%s20048_s1 + $0x76c] sm:$0xf0]  ;;  %v9804_v28 = vor.u32 %v13109_v23, %v9803_v22  ;;  %v957_v23 = vld [vmem:[%s20047_s0 + $0x28] sm:$0xff] }
 0x15e   : > { %v9531_v29 = vld [vmem:[%s20048_s1 + $0x440] sm:$0xf]  ;;  %v13041_v30 = vld [vmem:[%s20048_s1 + $0x44c] sm:$0xf0]  ;;  %v9932_v32 = vor.u32 %v13141_v25, %v9931_v24  ;;  %4898 = vmatpush.bf16.msrb.mxu0 %v9548_v26  ;;  %4911 = vmatpush.bf16.msrb.mxu1 %v9676_v27 }
 0x15f   : > { %v9659_v31 = vld [vmem:[%s20048_s1 + $0x540] sm:$0xf]  ;;  %v13073_v33 = vld [vmem:[%s20048_s1 + $0x54c] sm:$0xf0]  ;;  %v9532_v38 = vor.u32 %v13041_v30, %v9531_v29  ;;  %4924 = vmatpush.bf16.msrb.mxu2 %v9804_v28 }
 0x160   : > { %v9787_v34 = vld [vmem:[%s20048_s1 + $0x640] sm:$0xf]  ;;  %v13105_v35 = vld [vmem:[%s20048_s1 + $0x64c] sm:$0xf0]  ;;  %v9660_v39 = vor.u32 %v13073_v33, %v9659_v31  ;;  %4937 = vmatpush.bf16.msrb.mxu3 %v9932_v32  ;;  %v15220_v32 = vpack.c.bf16 %v959_v17, %v959_v17 }
 0x161   : > { %v9915_v36 = vld [vmem:[%s20048_s1 + $0x740] sm:$0xf]  ;;  %v13137_v37 = vld [vmem:[%s20048_s1 + $0x74c] sm:$0xf0]  ;;  %v9788_v40 = vor.u32 %v13105_v35, %v9787_v34  ;;  %v15222_v34 = vpack.c.bf16 %v957_v23, %v957_v23 }
 0x162   : > { %v9515_v41 = vld [vmem:[%s20048_s1 + $0x420] sm:$0xf]  ;;  %v13037_v42 = vld [vmem:[%s20048_s1 + $0x42c] sm:$0xf0]  ;;  %v9916_v44 = vor.u32 %v13137_v37, %v9915_v36  ;;  %4899 = vmatpush.bf16.msrb.mxu0 %v9532_v38  ;;  %4912 = vmatpush.bf16.msrb.mxu1 %v9660_v39 }
 0x163   : > { %v9643_v43 = vld [vmem:[%s20048_s1 + $0x520] sm:$0xf]  ;;  %v13069_v45 = vld [vmem:[%s20048_s1 + $0x52c] sm:$0xf0]  ;;  %v9516_v50 = vor.u32 %v13037_v42, %v9515_v41  ;;  %4925 = vmatpush.bf16.msrb.mxu2 %v9788_v40 }
 0x164   : > { %v9771_v46 = vld [vmem:[%s20048_s1 + $0x620] sm:$0xf]  ;;  %v13101_v47 = vld [vmem:[%s20048_s1 + $0x62c] sm:$0xf0]  ;;  %v9644_v53 = vor.u32 %v13069_v45, %v9643_v43  ;;  %4938 = vmatpush.bf16.msrb.mxu3 %v9916_v44 }
 0x165   : > { %v9899_v48 = vld [vmem:[%s20048_s1 + $0x720] sm:$0xf]  ;;  %v13133_v49 = vld [vmem:[%s20048_s1 + $0x72c] sm:$0xf0]  ;;  %v9772_v54 = vor.u32 %v13101_v47, %v9771_v46 }
 0x166   : > { %v9499_v51 = vld [vmem:[%s20048_s1 + $0x400] sm:$0xf]  ;;  %v13033_v52 = vld [vmem:[%s20048_s1 + $0x40c] sm:$0xf0]  ;;  %v9900_v58 = vor.u32 %v13133_v49, %v9899_v48  ;;  %4900 = vmatpush.bf16.msrb.mxu0 %v9516_v50  ;;  %4913 = vmatpush.bf16.msrb.mxu1 %v9644_v53 }
 0x167   : > { %v9627_v55 = vld [vmem:[%s20048_s1 + $0x500] sm:$0xf]  ;;  %v13065_v56 = vld [vmem:[%s20048_s1 + $0x50c] sm:$0xf0]  ;;  %v9500_v1 = vor.u32 %v13033_v52, %v9499_v51  ;;  %4926 = vmatpush.bf16.msrb.mxu2 %v9772_v54 }
 0x168   : > { %v9755_v57 = vld [vmem:[%s20048_s1 + $0x600] sm:$0xf]  ;;  %v13097_v59 = vld [vmem:[%s20048_s1 + $0x60c] sm:$0xf0]  ;;  %v9628_v7 = vor.u32 %v13065_v56, %v9627_v55  ;;  %4939 = vmatpush.bf16.msrb.mxu3 %v9900_v58 }
 0x169   : > { %v9883_v60 = vld [vmem:[%s20048_s1 + $0x700] sm:$0xf]  ;;  %v13129_v61 = vld [vmem:[%s20048_s1 + $0x70c] sm:$0xf0]  ;;  %v9756_v8 = vor.u32 %v13097_v59, %v9755_v57 }
 0x16a   : > { %v10123_v62 = vld [vmem:[%s20048_s1 + $0x8e0] sm:$0xf]  ;;  %v13189_v63 = vld [vmem:[%s20048_s1 + $0x8ec] sm:$0xf0]  ;;  %v9884_v13 = vor.u32 %v13129_v61, %v9883_v60  ;;  %4901 = vmatpush.bf16.msrb.mxu0 %v9500_v1  ;;  %4914 = vmatpush.bf16.msrb.mxu1 %v9628_v7 }
 0x16b   : > { %v10251_v0 = vld [vmem:[%s20048_s1 + $0x9e0] sm:$0xf]  ;;  %v13221_v4 = vld [vmem:[%s20048_s1 + $0x9ec] sm:$0xf0]  ;;  %v10124_v14 = vor.u32 %v13189_v63, %v10123_v62  ;;  %4927 = vmatpush.bf16.msrb.mxu2 %v9756_v8 }
 0x16c   : > { %v10379_v5 = vld [vmem:[%s20048_s1 + $0xae0] sm:$0xf]  ;;  %v13253_v6 = vld [vmem:[%s20048_s1 + $0xaec] sm:$0xf0]  ;;  %v10252_v18 = vor.u32 %v13221_v4, %v10251_v0  ;;  %4940 = vmatpush.bf16.msrb.mxu3 %v9884_v13 }
 0x16d   : > { %v10507_v10 = vld [vmem:[%s20048_s1 + $0xbe0] sm:$0xf]  ;;  %v13285_v11 = vld [vmem:[%s20048_s1 + $0xbec] sm:$0xf0]  ;;  %v10380_v20 = vor.u32 %v13253_v6, %v10379_v5  ;;  %4915 = vmatmul.bf16.vlgmr.msrb.gmra.mxu1 %v15222_v34 }
 0x16e   : > { %v958_v12 = vld [vmem:[%s20047_s0 + $0x30] sm:$0xff]  ;;  %v10107_v15 = vld [vmem:[%s20048_s1 + $0x8c0] sm:$0xf]  ;;  %v10508_v24 = vor.u32 %v13285_v11, %v10507_v10  ;;  %4946 = vmatpush.bf16.msra.mxu0 %v10124_v14  ;;  %4959 = vmatpush.bf16.msra.mxu1 %v10252_v18 }
 0x16f   : > { %v956_v16 = vld [vmem:[%s20047_s0 + $0x20] sm:$0xff]  ;;  %v13185_v21 = vld [vmem:[%s20048_s1 + $0x8cc] sm:$0xf0]  ;;  %v15210_v28 = vpack.c.bf16 %v958_v12, %v958_v12  ;;  %4972 = vmatpush.bf16.msra.mxu2 %v10380_v20  ;;  %4941 = vmatmul.bf16.vlgmr.msrb.gmra.mxu3 %v15220_v32 }
 0x170   : > { %v10235_v22 = vld [vmem:[%s20048_s1 + $0x9c0] sm:$0xf]  ;;  %v13217_v25 = vld [vmem:[%s20048_s1 + $0x9cc] sm:$0xf0]  ;;  %v15218_v31 = vpack.c.bf16 %v956_v16, %v956_v16  ;;  %v10108_v33 = vor.u32 %v13185_v21, %v10107_v15  ;;  %4985 = vmatpush.bf16.msra.mxu3 %v10508_v24 }
 0x171   : > { %v10363_v26 = vld [vmem:[%s20048_s1 + $0xac0] sm:$0xf]  ;;  %v13249_v27 = vld [vmem:[%s20048_s1 + $0xacc] sm:$0xf0]  ;;  %v10236_v35 = vor.u32 %v13217_v25, %v10235_v22  ;;  %4928 = vmatmul.bf16.vlgmr.msrb.gmra.mxu2 %v15210_v28 }
 0x172   : > { %v10491_v29 = vld [vmem:[%s20048_s1 + $0xbc0] sm:$0xf]  ;;  %v13281_v30 = vld [vmem:[%s20048_s1 + $0xbcc] sm:$0xf0]  ;;  %v10364_v36 = vor.u32 %v13249_v27, %v10363_v26  ;;  %4902 = vmatmul.bf16.vlgmr.msrb.gmra.mxu0 %v15218_v31 }
 0x173   : > { %v10091_v37 = vld [vmem:[%s20048_s1 + $0x8a0] sm:$0xf]  ;;  %v13181_v38 = vld [vmem:[%s20048_s1 + $0x8ac] sm:$0xf0]  ;;  %v10492_v40 = vor.u32 %v13281_v30, %v10491_v29  ;;  %4947 = vmatpush.bf16.msra.mxu0 %v10108_v33  ;;  %4960 = vmatpush.bf16.msra.mxu1 %v10236_v35 }
 0x174   : > { %v10219_v39 = vld [vmem:[%s20048_s1 + $0x9a0] sm:$0xf]  ;;  %v13213_v41 = vld [vmem:[%s20048_s1 + $0x9ac] sm:$0xf0]  ;;  %v10092_v46 = vor.u32 %v13181_v38, %v10091_v37  ;;  %4973 = vmatpush.bf16.msra.mxu2 %v10364_v36 }
 0x175   : > { %v10347_v42 = vld [vmem:[%s20048_s1 + $0xaa0] sm:$0xf]  ;;  %v13245_v43 = vld [vmem:[%s20048_s1 + $0xaac] sm:$0xf0]  ;;  %v10220_v47 = vor.u32 %v13213_v41, %v10219_v39  ;;  %4986 = vmatpush.bf16.msra.mxu3 %v10492_v40 }
 0x176   : > { %v10475_v44 = vld [vmem:[%s20048_s1 + $0xba0] sm:$0xf]  ;;  %v13277_v45 = vld [vmem:[%s20048_s1 + $0xbac] sm:$0xf0]  ;;  %v10348_v48 = vor.u32 %v13245_v43, %v10347_v42 }
 0x177   : > { %v10075_v49 = vld [vmem:[%s20048_s1 + $0x880] sm:$0xf]  ;;  %v13177_v50 = vld [vmem:[%s20048_s1 + $0x88c] sm:$0xf0]  ;;  %v10476_v52 = vor.u32 %v13277_v45, %v10475_v44  ;;  %4948 = vmatpush.bf16.msra.mxu0 %v10092_v46  ;;  %4961 = vmatpush.bf16.msra.mxu1 %v10220_v47 }
 0x178   : > { %v10203_v51 = vld [vmem:[%s20048_s1 + $0x980] sm:$0xf]  ;;  %v13209_v53 = vld [vmem:[%s20048_s1 + $0x98c] sm:$0xf0]  ;;  %v10076_v58 = vor.u32 %v13177_v50, %v10075_v49  ;;  %4974 = vmatpush.bf16.msra.mxu2 %v10348_v48 }
 0x179   : > { %v10331_v54 = vld [vmem:[%s20048_s1 + $0xa80] sm:$0xf]  ;;  %v13241_v55 = vld [vmem:[%s20048_s1 + $0xa8c] sm:$0xf0]  ;;  %v10204_v59 = vor.u32 %v13209_v53, %v10203_v51  ;;  %4987 = vmatpush.bf16.msra.mxu3 %v10476_v52 }
 0x17a   : > { %v10459_v56 = vld [vmem:[%s20048_s1 + $0xb80] sm:$0xf]  ;;  %v13273_v57 = vld [vmem:[%s20048_s1 + $0xb8c] sm:$0xf0]  ;;  %v10332_v60 = vor.u32 %v13241_v55, %v10331_v54 }
 0x17b   : > { %v10059_v61 = vld [vmem:[%s20048_s1 + $0x860] sm:$0xf]  ;;  %v13173_v62 = vld [vmem:[%s20048_s1 + $0x86c] sm:$0xf0]  ;;  %v10460_v0 = vor.u32 %v13273_v57, %v10459_v56  ;;  %4949 = vmatpush.bf16.msra.mxu0 %v10076_v58  ;;  %4962 = vmatpush.bf16.msra.mxu1 %v10204_v59 }
 0x17c   : > { %v10187_v63 = vld [vmem:[%s20048_s1 + $0x960] sm:$0xf]  ;;  %v13205_v1 = vld [vmem:[%s20048_s1 + $0x96c] sm:$0xf0]  ;;  %v10060_v8 = vor.u32 %v13173_v62, %v10059_v61  ;;  %4975 = vmatpush.bf16.msra.mxu2 %v10332_v60 }
 0x17d   : > { %v10315_v4 = vld [vmem:[%s20048_s1 + $0xa60] sm:$0xf]  ;;  %v13237_v5 = vld [vmem:[%s20048_s1 + $0xa6c] sm:$0xf0]  ;;  %v10188_v10 = vor.u32 %v13205_v1, %v10187_v63  ;;  %4988 = vmatpush.bf16.msra.mxu3 %v10460_v0  ;;  %v961_v1 = vld [vmem:[%s20047_s0 + $0x48] sm:$0xff] }
 0x17e   : > { %v10443_v6 = vld [vmem:[%s20048_s1 + $0xb60] sm:$0xf]  ;;  %v13269_v7 = vld [vmem:[%s20048_s1 + $0xb6c] sm:$0xf0]  ;;  %v10316_v11 = vor.u32 %v13237_v5, %v10315_v4  ;;  %v963_v4 = vld [vmem:[%s20047_s0 + $0x58] sm:$0xff] }
 0x17f   : > { %v10043_v12 = vld [vmem:[%s20048_s1 + $0x840] sm:$0xf]  ;;  %v13169_v13 = vld [vmem:[%s20048_s1 + $0x84c] sm:$0xf0]  ;;  %v10444_v15 = vor.u32 %v13269_v7, %v10443_v6  ;;  %4950 = vmatpush.bf16.msra.mxu0 %v10060_v8  ;;  %4963 = vmatpush.bf16.msra.mxu1 %v10188_v10 }
 0x180   : > { %v10171_v14 = vld [vmem:[%s20048_s1 + $0x940] sm:$0xf]  ;;  %v13201_v16 = vld [vmem:[%s20048_s1 + $0x94c] sm:$0xf0]  ;;  %v10044_v22 = vor.u32 %v13169_v13, %v10043_v12  ;;  %4976 = vmatpush.bf16.msra.mxu2 %v10316_v11 }
 0x181   : > { %v10299_v17 = vld [vmem:[%s20048_s1 + $0xa40] sm:$0xf]  ;;  %v13233_v18 = vld [vmem:[%s20048_s1 + $0xa4c] sm:$0xf0]  ;;  %v10172_v23 = vor.u32 %v13201_v16, %v10171_v14  ;;  %4989 = vmatpush.bf16.msra.mxu3 %v10444_v15 }
 0x182   : > { %v10427_v20 = vld [vmem:[%s20048_s1 + $0xb40] sm:$0xf]  ;;  %v13265_v21 = vld [vmem:[%s20048_s1 + $0xb4c] sm:$0xf0]  ;;  %v10300_v24 = vor.u32 %v13233_v18, %v10299_v17  ;;  %v15430_v17 = vpack.c.bf16 %v961_v1, %v961_v1 }
 0x183   : > { %v10027_v25 = vld [vmem:[%s20048_s1 + $0x820] sm:$0xf]  ;;  %v13165_v26 = vld [vmem:[%s20048_s1 + $0x82c] sm:$0xf0]  ;;  %v10428_v29 = vor.u32 %v13265_v21, %v10427_v20  ;;  %4951 = vmatpush.bf16.msra.mxu0 %v10044_v22  ;;  %4964 = vmatpush.bf16.msra.mxu1 %v10172_v23  ;;  %v15438_v21 = vpack.c.bf16 %v963_v4, %v963_v4 }
 0x184   : > { %v10155_v27 = vld [vmem:[%s20048_s1 + $0x920] sm:$0xf]  ;;  %v13197_v30 = vld [vmem:[%s20048_s1 + $0x92c] sm:$0xf0]  ;;  %v10028_v38 = vor.u32 %v13165_v26, %v10027_v25  ;;  %4977 = vmatpush.bf16.msra.mxu2 %v10300_v24 }
 0x185   : > { %v10283_v33 = vld [vmem:[%s20048_s1 + $0xa20] sm:$0xf]  ;;  %v13229_v35 = vld [vmem:[%s20048_s1 + $0xa2c] sm:$0xf0]  ;;  %v10156_v41 = vor.u32 %v13197_v30, %v10155_v27  ;;  %4990 = vmatpush.bf16.msra.mxu3 %v10428_v29 }
 0x186   : > { %v10411_v36 = vld [vmem:[%s20048_s1 + $0xb20] sm:$0xf]  ;;  %v13261_v37 = vld [vmem:[%s20048_s1 + $0xb2c] sm:$0xf0]  ;;  %v10284_v42 = vor.u32 %v13229_v35, %v10283_v33 }
 0x187   : > { %v10011_v39 = vld [vmem:[%s20048_s1 + $0x800] sm:$0xf]  ;;  %v13161_v40 = vld [vmem:[%s20048_s1 + $0x80c] sm:$0xf0]  ;;  %v10412_v46 = vor.u32 %v13261_v37, %v10411_v36  ;;  %4952 = vmatpush.bf16.msra.mxu0 %v10028_v38  ;;  %4965 = vmatpush.bf16.msra.mxu1 %v10156_v41 }
 0x188   : > { %v10139_v43 = vld [vmem:[%s20048_s1 + $0x900] sm:$0xf]  ;;  %v13193_v44 = vld [vmem:[%s20048_s1 + $0x90c] sm:$0xf0]  ;;  %v10012_v53 = vor.u32 %v13161_v40, %v10011_v39  ;;  %4978 = vmatpush.bf16.msra.mxu2 %v10284_v42 }
 0x189   : > { %v10267_v45 = vld [vmem:[%s20048_s1 + $0xa00] sm:$0xf]  ;;  %v13225_v47 = vld [vmem:[%s20048_s1 + $0xa0c] sm:$0xf0]  ;;  %v10140_v57 = vor.u32 %v13193_v44, %v10139_v43  ;;  %4991 = vmatpush.bf16.msra.mxu3 %v10412_v46 }
 0x18a   : > { %v10395_v48 = vld [vmem:[%s20048_s1 + $0xb00] sm:$0xf]  ;;  %v13257_v49 = vld [vmem:[%s20048_s1 + $0xb0c] sm:$0xf0]  ;;  %v10268_v58 = vor.u32 %v13225_v47, %v10267_v45 }
 0x18b   : > { %v10635_v50 = vld [vmem:[%s20048_s1 + $0xce0] sm:$0xf]  ;;  %v13317_v51 = vld [vmem:[%s20048_s1 + $0xcec] sm:$0xf0]  ;;  %v10396_v62 = vor.u32 %v13257_v49, %v10395_v48  ;;  %4953 = vmatpush.bf16.msra.mxu0 %v10012_v53  ;;  %4966 = vmatpush.bf16.msra.mxu1 %v10140_v57 }
 0x18c   : > { %v10763_v52 = vld [vmem:[%s20048_s1 + $0xde0] sm:$0xf]  ;;  %v13349_v54 = vld [vmem:[%s20048_s1 + $0xdec] sm:$0xf0]  ;;  %v10636_v63 = vor.u32 %v13317_v51, %v10635_v50  ;;  %4979 = vmatpush.bf16.msra.mxu2 %v10268_v58 }
 0x18d   : > { %v10891_v55 = vld [vmem:[%s20048_s1 + $0xee0] sm:$0xf]  ;;  %v13381_v56 = vld [vmem:[%s20048_s1 + $0xeec] sm:$0xf0]  ;;  %v10764_v5 = vor.u32 %v13349_v54, %v10763_v52  ;;  %4992 = vmatpush.bf16.msra.mxu3 %v10396_v62 }
 0x18e   : > { %v11019_v59 = vld [vmem:[%s20048_s1 + $0xfe0] sm:$0xf]  ;;  %v13413_v60 = vld [vmem:[%s20048_s1 + $0xfec] sm:$0xf0]  ;;  %v10892_v6 = vor.u32 %v13381_v56, %v10891_v55  ;;  %4967 = vmatmul.bf16.vlgmr.msra.gmra.mxu1 %v15430_v17 }
 0x18f   : > { %v960_v61 = vld [vmem:[%s20047_s0 + $0x40] sm:$0xff]  ;;  %v962_v0 = vld [vmem:[%s20047_s0 + $0x50] sm:$0xff]  ;;  %v11020_v11 = vor.u32 %v13413_v60, %v11019_v59  ;;  %4998 = vmatpush.bf16.msrb.mxu0 %v10636_v63  ;;  %5011 = vmatpush.bf16.msrb.mxu1 %v10764_v5 }
 0x190   : > { %v10619_v7 = vld [vmem:[%s20048_s1 + $0xcc0] sm:$0xf]  ;;  %v13313_v8 = vld [vmem:[%s20048_s1 + $0xccc] sm:$0xf0]  ;;  %v15417_v12 = vpack.c.bf16 %v960_v61, %v960_v61  ;;  %v15428_v16 = vpack.c.bf16 %v962_v0, %v962_v0  ;;  %5024 = vmatpush.bf16.msrb.mxu2 %v10892_v6  ;;  %4993 = vmatmul.bf16.vlgmr.msra.gmra.mxu3 %v15438_v21 }
 0x191   : > { %v10747_v10 = vld [vmem:[%s20048_s1 + $0xdc0] sm:$0xf]  ;;  %v13345_v13 = vld [vmem:[%s20048_s1 + $0xdcc] sm:$0xf0]  ;;  %v10620_v22 = vor.u32 %v13313_v8, %v10619_v7  ;;  %5037 = vmatpush.bf16.msrb.mxu3 %v11020_v11 }
 0x192   : > { %v10875_v14 = vld [vmem:[%s20048_s1 + $0xec0] sm:$0xf]  ;;  %v13377_v15 = vld [vmem:[%s20048_s1 + $0xecc] sm:$0xf0]  ;;  %v10748_v23 = vor.u32 %v13345_v13, %v10747_v10  ;;  %4954 = vmatmul.bf16.vlgmr.msra.gmra.mxu0 %v15417_v12  ;;  %4980 = vmatmul.bf16.vlgmr.msra.gmra.mxu2 %v15428_v16 }
 0x193   : > { %v11003_v18 = vld [vmem:[%s20048_s1 + $0xfc0] sm:$0xf]  ;;  %v13409_v20 = vld [vmem:[%s20048_s1 + $0xfcc] sm:$0xf0]  ;;  %v10876_v24 = vor.u32 %v13377_v15, %v10875_v14  ;;  %4999 = vmatpush.bf16.msrb.mxu0 %v10620_v22 }
 0x194   : > { %v10603_v25 = vld [vmem:[%s20048_s1 + $0xca0] sm:$0xf]  ;;  %v13309_v26 = vld [vmem:[%s20048_s1 + $0xcac] sm:$0xf0]  ;;  %v11004_v29 = vor.u32 %v13409_v20, %v11003_v18  ;;  %5012 = vmatpush.bf16.msrb.mxu1 %v10748_v23 }
 0x195   : > { %v10731_v27 = vld [vmem:[%s20048_s1 + $0xda0] sm:$0xf]  ;;  %v13341_v30 = vld [vmem:[%s20048_s1 + $0xdac] sm:$0xf0]  ;;  %v10604_v38 = vor.u32 %v13309_v26, %v10603_v25  ;;  %5025 = vmatpush.bf16.msrb.mxu2 %v10876_v24 }
 0x196   : > { %v10859_v33 = vld [vmem:[%s20048_s1 + $0xea0] sm:$0xf]  ;;  %v13373_v35 = vld [vmem:[%s20048_s1 + $0xeac] sm:$0xf0]  ;;  %v10732_v39 = vor.u32 %v13341_v30, %v10731_v27  ;;  %5038 = vmatpush.bf16.msrb.mxu3 %v11004_v29 }
 0x197   : > { %v10987_v36 = vld [vmem:[%s20048_s1 + $0xfa0] sm:$0xf]  ;;  %v13405_v37 = vld [vmem:[%s20048_s1 + $0xfac] sm:$0xf0]  ;;  %v10860_v40 = vor.u32 %v13373_v35, %v10859_v33  ;;  %5000 = vmatpush.bf16.msrb.mxu0 %v10604_v38 }
 0x198   : > { %v10587_v41 = vld [vmem:[%s20048_s1 + $0xc80] sm:$0xf]  ;;  %v13305_v42 = vld [vmem:[%s20048_s1 + $0xc8c] sm:$0xf0]  ;;  %v10988_v44 = vor.u32 %v13405_v37, %v10987_v36  ;;  %5013 = vmatpush.bf16.msrb.mxu1 %v10732_v39 }
 0x199   : > { %v10715_v43 = vld [vmem:[%s20048_s1 + $0xd80] sm:$0xf]  ;;  %v13337_v45 = vld [vmem:[%s20048_s1 + $0xd8c] sm:$0xf0]  ;;  %v10588_v50 = vor.u32 %v13305_v42, %v10587_v41  ;;  %5026 = vmatpush.bf16.msrb.mxu2 %v10860_v40 }
 0x19a   : > { %v10843_v46 = vld [vmem:[%s20048_s1 + $0xe80] sm:$0xf]  ;;  %v13369_v47 = vld [vmem:[%s20048_s1 + $0xe8c] sm:$0xf0]  ;;  %v10716_v51 = vor.u32 %v13337_v45, %v10715_v43  ;;  %5039 = vmatpush.bf16.msrb.mxu3 %v10988_v44 }
 0x19b   : > { %v10971_v48 = vld [vmem:[%s20048_s1 + $0xf80] sm:$0xf]  ;;  %v13401_v49 = vld [vmem:[%s20048_s1 + $0xf8c] sm:$0xf0]  ;;  %v10844_v52 = vor.u32 %v13369_v47, %v10843_v46  ;;  %5001 = vmatpush.bf16.msrb.mxu0 %v10588_v50 }
 0x19c   : > { %v10571_v53 = vld [vmem:[%s20048_s1 + $0xc60] sm:$0xf]  ;;  %v13301_v54 = vld [vmem:[%s20048_s1 + $0xc6c] sm:$0xf0]  ;;  %v10972_v56 = vor.u32 %v13401_v49, %v10971_v48  ;;  %5014 = vmatpush.bf16.msrb.mxu1 %v10716_v51 }
 0x19d   : > { %v10699_v55 = vld [vmem:[%s20048_s1 + $0xd60] sm:$0xf]  ;;  %v13333_v57 = vld [vmem:[%s20048_s1 + $0xd6c] sm:$0xf0]  ;;  %v10572_v62 = vor.u32 %v13301_v54, %v10571_v53  ;;  %5027 = vmatpush.bf16.msrb.mxu2 %v10844_v52 }
 0x19e   : > { %v10827_v58 = vld [vmem:[%s20048_s1 + $0xe60] sm:$0xf]  ;;  %v13365_v59 = vld [vmem:[%s20048_s1 + $0xe6c] sm:$0xf0]  ;;  %v10700_v63 = vor.u32 %v13333_v57, %v10699_v55  ;;  %5040 = vmatpush.bf16.msrb.mxu3 %v10972_v56 }
 0x19f   : > { %v10955_v60 = vld [vmem:[%s20048_s1 + $0xf60] sm:$0xf]  ;;  %v13397_v61 = vld [vmem:[%s20048_s1 + $0xf6c] sm:$0xf0]  ;;  %v10828_v0 = vor.u32 %v13365_v59, %v10827_v58  ;;  %5002 = vmatpush.bf16.msrb.mxu0 %v10572_v62  ;;  %v967_v62 = vld [vmem:[%s20047_s0 + $0x78] sm:$0xff] }
 0x1a0   : > { %v10555_v1 = vld [vmem:[%s20048_s1 + $0xc40] sm:$0xf]  ;;  %v13297_v4 = vld [vmem:[%s20048_s1 + $0xc4c] sm:$0xf0]  ;;  %v10956_v6 = vor.u32 %v13397_v61, %v10955_v60  ;;  %5015 = vmatpush.bf16.msrb.mxu1 %v10700_v63  ;;  %v965_v61 = vld [vmem:[%s20047_s0 + $0x68] sm:$0xff] }
 0x1a1   : > { %v10683_v5 = vld [vmem:[%s20048_s1 + $0xd40] sm:$0xf]  ;;  %v13329_v7 = vld [vmem:[%s20048_s1 + $0xd4c] sm:$0xf0]  ;;  %v10556_v14 = vor.u32 %v13297_v4, %v10555_v1  ;;  %5028 = vmatpush.bf16.msrb.mxu2 %v10828_v0 }
 0x1a2   : > { %v10811_v8 = vld [vmem:[%s20048_s1 + $0xe40] sm:$0xf]  ;;  %v13361_v10 = vld [vmem:[%s20048_s1 + $0xe4c] sm:$0xf0]  ;;  %v10684_v15 = vor.u32 %v13329_v7, %v10683_v5  ;;  %5041 = vmatpush.bf16.msrb.mxu3 %v10956_v6 }
 0x1a3   : > { %v10939_v11 = vld [vmem:[%s20048_s1 + $0xf40] sm:$0xf]  ;;  %v13393_v13 = vld [vmem:[%s20048_s1 + $0xf4c] sm:$0xf0]  ;;  %v10812_v18 = vor.u32 %v13361_v10, %v10811_v8  ;;  %5003 = vmatpush.bf16.msrb.mxu0 %v10556_v14  ;;  %v15646_v14 = vpack.c.bf16 %v965_v61, %v965_v61 }
 0x1a4   : > { %v10539_v20 = vld [vmem:[%s20048_s1 + $0xc20] sm:$0xf]  ;;  %v13293_v22 = vld [vmem:[%s20048_s1 + $0xc2c] sm:$0xf0]  ;;  %v10940_v24 = vor.u32 %v13393_v13, %v10939_v11  ;;  %5016 = vmatpush.bf16.msrb.mxu1 %v10684_v15 }
 0x1a5   : > { %v10667_v23 = vld [vmem:[%s20048_s1 + $0xd20] sm:$0xf]  ;;  %v13325_v25 = vld [vmem:[%s20048_s1 + $0xd2c] sm:$0xf0]  ;;  %v10540_v33 = vor.u32 %v13293_v22, %v10539_v20  ;;  %5029 = vmatpush.bf16.msrb.mxu2 %v10812_v18  ;;  %v15654_v20 = vpack.c.bf16 %v967_v62, %v967_v62 }
 0x1a6   : > { %v10795_v26 = vld [vmem:[%s20048_s1 + $0xe20] sm:$0xf]  ;;  %v13357_v27 = vld [vmem:[%s20048_s1 + $0xe2c] sm:$0xf0]  ;;  %v10668_v37 = vor.u32 %v13325_v25, %v10667_v23  ;;  %5042 = vmatpush.bf16.msrb.mxu3 %v10940_v24 }
 0x1a7   : > { %v10923_v29 = vld [vmem:[%s20048_s1 + $0xf20] sm:$0xf]  ;;  %v13389_v30 = vld [vmem:[%s20048_s1 + $0xf2c] sm:$0xf0]  ;;  %v10796_v38 = vor.u32 %v13357_v27, %v10795_v26  ;;  %5004 = vmatpush.bf16.msrb.mxu0 %v10540_v33 }
 0x1a8   : > { %v10523_v35 = vld [vmem:[%s20048_s1 + $0xc00] sm:$0xf]  ;;  %v13289_v36 = vld [vmem:[%s20048_s1 + $0xc0c] sm:$0xf0]  ;;  %v10924_v42 = vor.u32 %v13389_v30, %v10923_v29  ;;  %5017 = vmatpush.bf16.msrb.mxu1 %v10668_v37 }
 0x1a9   : > { %v10651_v39 = vld [vmem:[%s20048_s1 + $0xd00] sm:$0xf]  ;;  %v13321_v40 = vld [vmem:[%s20048_s1 + $0xd0c] sm:$0xf0]  ;;  %v10524_v49 = vor.u32 %v13289_v36, %v10523_v35  ;;  %5030 = vmatpush.bf16.msrb.mxu2 %v10796_v38 }
 0x1aa   : > { %v10779_v41 = vld [vmem:[%s20048_s1 + $0xe00] sm:$0xf]  ;;  %v13353_v43 = vld [vmem:[%s20048_s1 + $0xe0c] sm:$0xf0]  ;;  %v10652_v53 = vor.u32 %v13321_v40, %v10651_v39  ;;  %5043 = vmatpush.bf16.msrb.mxu3 %v10924_v42 }
 0x1ab   : > { %v10907_v44 = vld [vmem:[%s20048_s1 + $0xf00] sm:$0xf]  ;;  %v13385_v45 = vld [vmem:[%s20048_s1 + $0xf0c] sm:$0xf0]  ;;  %v10780_v54 = vor.u32 %v13353_v43, %v10779_v41  ;;  %5005 = vmatpush.bf16.msrb.mxu0 %v10524_v49 }
 0x1ac   : > { %v11147_v46 = vld [vmem:[%s20048_s1 + $0x10e0] sm:$0xf]  ;;  %v13445_v47 = vld [vmem:[%s20048_s1 + $0x10ec] sm:$0xf0]  ;;  %v10908_v58 = vor.u32 %v13385_v45, %v10907_v44  ;;  %5018 = vmatpush.bf16.msrb.mxu1 %v10652_v53 }
 0x1ad   : > { %v11275_v48 = vld [vmem:[%s20048_s1 + $0x11e0] sm:$0xf]  ;;  %v13477_v50 = vld [vmem:[%s20048_s1 + $0x11ec] sm:$0xf0]  ;;  %v11148_v59 = vor.u32 %v13445_v47, %v11147_v46  ;;  %5031 = vmatpush.bf16.msrb.mxu2 %v10780_v54 }
 0x1ae   : > { %v11403_v51 = vld [vmem:[%s20048_s1 + $0x12e0] sm:$0xf]  ;;  %v13509_v52 = vld [vmem:[%s20048_s1 + $0x12ec] sm:$0xf0]  ;;  %v11276_v63 = vor.u32 %v13477_v50, %v11275_v48  ;;  %5044 = vmatpush.bf16.msrb.mxu3 %v10908_v58 }
 0x1af   : > { %v11531_v55 = vld [vmem:[%s20048_s1 + $0x13e0] sm:$0xf]  ;;  %v13541_v56 = vld [vmem:[%s20048_s1 + $0x13ec] sm:$0xf0]  ;;  %v11404_v0 = vor.u32 %v13509_v52, %v11403_v51  ;;  %5050 = vmatpush.bf16.msra.mxu0 %v11148_v59  ;;  %5019 = vmatmul.bf16.vlgmr.msrb.gmra.mxu1 %v15646_v14 }
 0x1b0   : > { %v964_v57 = vld [vmem:[%s20047_s0 + $0x60] sm:$0xff]  ;;  %v966_v60 = vld [vmem:[%s20047_s0 + $0x70] sm:$0xff]  ;;  %v11532_v6 = vor.u32 %v13541_v56, %v11531_v55  ;;  %5063 = vmatpush.bf16.msra.mxu1 %v11276_v63 }
 0x1b1   : > { %v11131_v1 = vld [vmem:[%s20048_s1 + $0x10c0] sm:$0xf]  ;;  %v13441_v4 = vld [vmem:[%s20048_s1 + $0x10cc] sm:$0xf0]  ;;  %v15633_v7 = vpack.c.bf16 %v964_v57, %v964_v57  ;;  %v15644_v13 = vpack.c.bf16 %v966_v60, %v966_v60  ;;  %5076 = vmatpush.bf16.msra.mxu2 %v11404_v0  ;;  %5045 = vmatmul.bf16.vlgmr.msrb.gmra.mxu3 %v15654_v20 }
 0x1b2   : > { %v11259_v5 = vld [vmem:[%s20048_s1 + $0x11c0] sm:$0xf]  ;;  %v13473_v8 = vld [vmem:[%s20048_s1 + $0x11cc] sm:$0xf0]  ;;  %v11132_v22 = vor.u32 %v13441_v4, %v11131_v1  ;;  %5089 = vmatpush.bf16.msra.mxu3 %v11532_v6 }
 0x1b3   : > { %v11387_v10 = vld [vmem:[%s20048_s1 + $0x12c0] sm:$0xf]  ;;  %v13505_v11 = vld [vmem:[%s20048_s1 + $0x12cc] sm:$0xf0]  ;;  %v11260_v23 = vor.u32 %v13473_v8, %v11259_v5  ;;  %5006 = vmatmul.bf16.vlgmr.msrb.gmra.mxu0 %v15633_v7  ;;  %5032 = vmatmul.bf16.vlgmr.msrb.gmra.mxu2 %v15644_v13 }
 0x1b4   : > { %v11515_v15 = vld [vmem:[%s20048_s1 + $0x13c0] sm:$0xf]  ;;  %v13537_v18 = vld [vmem:[%s20048_s1 + $0x13cc] sm:$0xf0]  ;;  %v11388_v24 = vor.u32 %v13505_v11, %v11387_v10  ;;  %5051 = vmatpush.bf16.msra.mxu0 %v11132_v22 }
 0x1b5   : > { %v11115_v25 = vld [vmem:[%s20048_s1 + $0x10a0] sm:$0xf]  ;;  %v13437_v26 = vld [vmem:[%s20048_s1 + $0x10ac] sm:$0xf0]  ;;  %v11516_v29 = vor.u32 %v13537_v18, %v11515_v15  ;;  %5064 = vmatpush.bf16.msra.mxu1 %v11260_v23 }
 0x1b6   : > { %v11243_v27 = vld [vmem:[%s20048_s1 + $0x11a0] sm:$0xf]  ;;  %v13469_v30 = vld [vmem:[%s20048_s1 + $0x11ac] sm:$0xf0]  ;;  %v11116_v38 = vor.u32 %v13437_v26, %v11115_v25  ;;  %5077 = vmatpush.bf16.msra.mxu2 %v11388_v24 }
 0x1b7   : > { %v11371_v33 = vld [vmem:[%s20048_s1 + $0x12a0] sm:$0xf]  ;;  %v13501_v35 = vld [vmem:[%s20048_s1 + $0x12ac] sm:$0xf0]  ;;  %v11244_v39 = vor.u32 %v13469_v30, %v11243_v27  ;;  %5090 = vmatpush.bf16.msra.mxu3 %v11516_v29 }
 0x1b8   : > { %v11499_v36 = vld [vmem:[%s20048_s1 + $0x13a0] sm:$0xf]  ;;  %v13533_v37 = vld [vmem:[%s20048_s1 + $0x13ac] sm:$0xf0]  ;;  %v11372_v40 = vor.u32 %v13501_v35, %v11371_v33  ;;  %5052 = vmatpush.bf16.msra.mxu0 %v11116_v38 }
 0x1b9   : > { %v11099_v41 = vld [vmem:[%s20048_s1 + $0x1080] sm:$0xf]  ;;  %v13433_v42 = vld [vmem:[%s20048_s1 + $0x108c] sm:$0xf0]  ;;  %v11500_v44 = vor.u32 %v13533_v37, %v11499_v36  ;;  %5065 = vmatpush.bf16.msra.mxu1 %v11244_v39 }
 0x1ba   : > { %v11227_v43 = vld [vmem:[%s20048_s1 + $0x1180] sm:$0xf]  ;;  %v13465_v45 = vld [vmem:[%s20048_s1 + $0x118c] sm:$0xf0]  ;;  %v11100_v50 = vor.u32 %v13433_v42, %v11099_v41  ;;  %5078 = vmatpush.bf16.msra.mxu2 %v11372_v40 }
 0x1bb   : > { %v11355_v46 = vld [vmem:[%s20048_s1 + $0x1280] sm:$0xf]  ;;  %v13497_v47 = vld [vmem:[%s20048_s1 + $0x128c] sm:$0xf0]  ;;  %v11228_v51 = vor.u32 %v13465_v45, %v11227_v43  ;;  %5091 = vmatpush.bf16.msra.mxu3 %v11500_v44 }
 0x1bc   : > { %v11483_v48 = vld [vmem:[%s20048_s1 + $0x1380] sm:$0xf]  ;;  %v13529_v49 = vld [vmem:[%s20048_s1 + $0x138c] sm:$0xf0]  ;;  %v11356_v52 = vor.u32 %v13497_v47, %v11355_v46  ;;  %5053 = vmatpush.bf16.msra.mxu0 %v11100_v50  ;;  %v12931_v50 = vld [vmem:[%s20048_s1 + $0xe4] sm:$0xf] }
 0x1bd   : > { %v11083_v53 = vld [vmem:[%s20048_s1 + $0x1060] sm:$0xf]  ;;  %v13429_v54 = vld [vmem:[%s20048_s1 + $0x106c] sm:$0xf0]  ;;  %v11484_v56 = vor.u32 %v13529_v49, %v11483_v48  ;;  %5066 = vmatpush.bf16.msra.mxu1 %v11228_v51  ;;  %v9101_v51 = vld [vmem:[%s20048_s1 + $0xf0] sm:$0xf0] }
 0x1be   : > { %v11211_v55 = vld [vmem:[%s20048_s1 + $0x1160] sm:$0xf]  ;;  %v13461_v57 = vld [vmem:[%s20048_s1 + $0x116c] sm:$0xf0]  ;;  %v11084_v62 = vor.u32 %v13429_v54, %v11083_v53  ;;  %5079 = vmatpush.bf16.msra.mxu2 %v11356_v52  ;;  %v12963_v52 = vld [vmem:[%s20048_s1 + $0x1e4] sm:$0xf] }
 0x1bf   : > { %v11339_v58 = vld [vmem:[%s20048_s1 + $0x1260] sm:$0xf]  ;;  %v13493_v59 = vld [vmem:[%s20048_s1 + $0x126c] sm:$0xf0]  ;;  %v11212_v63 = vor.u32 %v13461_v57, %v11211_v55  ;;  %5092 = vmatpush.bf16.msra.mxu3 %v11484_v56  ;;  %v9229_v54 = vld [vmem:[%s20048_s1 + $0x1f0] sm:$0xf0] }
 0x1c0   : > { %v11467_v60 = vld [vmem:[%s20048_s1 + $0x1360] sm:$0xf]  ;;  %v13525_v61 = vld [vmem:[%s20048_s1 + $0x136c] sm:$0xf0]  ;;  %v11340_v0 = vor.u32 %v13493_v59, %v11339_v58  ;;  %5054 = vmatpush.bf16.msra.mxu0 %v11084_v62  ;;  %v12995_v55 = vld [vmem:[%s20048_s1 + $0x2e4] sm:$0xf] }
 0x1c1   : > { %v11067_v1 = vld [vmem:[%s20048_s1 + $0x1040] sm:$0xf]  ;;  %v13425_v4 = vld [vmem:[%s20048_s1 + $0x104c] sm:$0xf0]  ;;  %v11468_v6 = vor.u32 %v13525_v61, %v11467_v60  ;;  %5067 = vmatpush.bf16.msra.mxu1 %v11212_v63  ;;  %v9357_v56 = vld [vmem:[%s20048_s1 + $0x2f0] sm:$0xf0]  ;;  %v9104_v63 = vor.u32 %v12931_v50, %v9101_v51 }
 0x1c2   : > { %v11195_v5 = vld [vmem:[%s20048_s1 + $0x1140] sm:$0xf]  ;;  %v13457_v8 = vld [vmem:[%s20048_s1 + $0x114c] sm:$0xf0]  ;;  %v11068_v22 = vor.u32 %v13425_v4, %v11067_v1  ;;  %5080 = vmatpush.bf16.msra.mxu2 %v11340_v0  ;;  %v13027_v59 = vld [vmem:[%s20048_s1 + $0x3e4] sm:$0xf] }
 0x1c3   : > { %v11323_v10 = vld [vmem:[%s20048_s1 + $0x1240] sm:$0xf]  ;;  %v13489_v11 = vld [vmem:[%s20048_s1 + $0x124c] sm:$0xf0]  ;;  %v11196_v23 = vor.u32 %v13457_v8, %v11195_v5  ;;  %5093 = vmatpush.bf16.msra.mxu3 %v11468_v6  ;;  %v9485_v60 = vld [vmem:[%s20048_s1 + $0x3f0] sm:$0xf0]  ;;  %v9232_v5 = vor.u32 %v12963_v52, %v9229_v54  ;;  %v9360_v6 = vor.u32 %v12995_v55, %v9357_v56 }
 0x1c4   : > { %v11451_v15 = vld [vmem:[%s20048_s1 + $0x1340] sm:$0xf]  ;;  %v13521_v18 = vld [vmem:[%s20048_s1 + $0x134c] sm:$0xf0]  ;;  %v11324_v24 = vor.u32 %v13489_v11, %v11323_v10  ;;  %5055 = vmatpush.bf16.msra.mxu0 %v11068_v22  ;;  %v969_v1 = vld [vmem:[%s20047_s0 + $0x88] sm:$0xff] }
 0x1c5   : > { %v11051_v25 = vld [vmem:[%s20048_s1 + $0x1020] sm:$0xf]  ;;  %v13421_v26 = vld [vmem:[%s20048_s1 + $0x102c] sm:$0xf0]  ;;  %v11452_v29 = vor.u32 %v13521_v18, %v11451_v15  ;;  %5068 = vmatpush.bf16.msra.mxu1 %v11196_v23  ;;  %v971_v4 = vld [vmem:[%s20047_s0 + $0x98] sm:$0xff]  ;;  %v9488_v15 = vor.u32 %v13027_v59, %v9485_v60 }
 0x1c6   : > { %v11179_v27 = vld [vmem:[%s20048_s1 + $0x1120] sm:$0xf]  ;;  %v13453_v30 = vld [vmem:[%s20048_s1 + $0x112c] sm:$0xf0]  ;;  %v11052_v38 = vor.u32 %v13421_v26, %v11051_v25  ;;  %5081 = vmatpush.bf16.msra.mxu2 %v11324_v24  ;;  %v12927_v8 = vld [vmem:[%s20048_s1 + $0xc4] sm:$0xf]  ;;  %v15862_v26 = vpack.c.bf16 %v969_v1, %v969_v1 }
 0x1c7   : > { %v11307_v33 = vld [vmem:[%s20048_s1 + $0x1220] sm:$0xf]  ;;  %v13485_v35 = vld [vmem:[%s20048_s1 + $0x122c] sm:$0xf0]  ;;  %v11180_v41 = vor.u32 %v13453_v30, %v11179_v27  ;;  %5094 = vmatpush.bf16.msra.mxu3 %v11452_v29  ;;  %v9085_v10 = vld [vmem:[%s20048_s1 + $0xd0] sm:$0xf0]  ;;  %v15870_v30 = vpack.c.bf16 %v971_v4, %v971_v4 }
 0x1c8   : > { %v11435_v36 = vld [vmem:[%s20048_s1 + $0x1320] sm:$0xf]  ;;  %v13517_v37 = vld [vmem:[%s20048_s1 + $0x132c] sm:$0xf0]  ;;  %v11308_v42 = vor.u32 %v13485_v35, %v11307_v33  ;;  %5056 = vmatpush.bf16.msra.mxu0 %v11052_v38  ;;  %v12959_v11 = vld [vmem:[%s20048_s1 + $0x1c4] sm:$0xf]  ;;  %v9088_v33 = vor.u32 %v12927_v8, %v9085_v10 }
 0x1c9   : > { %v11035_v39 = vld [vmem:[%s20048_s1 + $0x1000] sm:$0xf]  ;;  %v13417_v40 = vld [vmem:[%s20048_s1 + $0x100c] sm:$0xf0]  ;;  %v11436_v46 = vor.u32 %v13517_v37, %v11435_v36  ;;  %5069 = vmatpush.bf16.msra.mxu1 %v11180_v41  ;;  %v9213_v22 = vld [vmem:[%s20048_s1 + $0x1d0] sm:$0xf0] }
 0x1ca   : > { %v11163_v43 = vld [vmem:[%s20048_s1 + $0x1100] sm:$0xf]  ;;  %v13449_v44 = vld [vmem:[%s20048_s1 + $0x110c] sm:$0xf0]  ;;  %v11036_v53 = vor.u32 %v13417_v40, %v11035_v39  ;;  %5082 = vmatpush.bf16.msra.mxu2 %v11308_v42  ;;  %v12991_v23 = vld [vmem:[%s20048_s1 + $0x2c4] sm:$0xf]  ;;  %v9216_v35 = vor.u32 %v12959_v11, %v9213_v22 }
 0x1cb   : > { %v11291_v45 = vld [vmem:[%s20048_s1 + $0x1200] sm:$0xf]  ;;  %v13481_v47 = vld [vmem:[%s20048_s1 + $0x120c] sm:$0xf0]  ;;  %v11164_v57 = vor.u32 %v13449_v44, %v11163_v43  ;;  %5095 = vmatpush.bf16.msra.mxu3 %v11436_v46  ;;  %v9341_v24 = vld [vmem:[%s20048_s1 + $0x2d0] sm:$0xf0] }
 0x1cc   : > { %v11419_v48 = vld [vmem:[%s20048_s1 + $0x1300] sm:$0xf]  ;;  %v13513_v49 = vld [vmem:[%s20048_s1 + $0x130c] sm:$0xf0]  ;;  %v11292_v58 = vor.u32 %v13481_v47, %v11291_v45  ;;  %5057 = vmatpush.bf16.msra.mxu0 %v11036_v53  ;;  %v13023_v27 = vld [vmem:[%s20048_s1 + $0x3c4] sm:$0xf]  ;;  %v9344_v36 = vor.u32 %v12991_v23, %v9341_v24 }
 0x1cd   : > { %v968_v61 = vld [vmem:[%s20047_s0 + $0x80] sm:$0xff]  ;;  %v11420_v62 = vor.u32 %v13513_v49, %v11419_v48  ;;  %v970_v0 = vld [vmem:[%s20047_s0 + $0x90] sm:$0xff]  ;;  %5070 = vmatpush.bf16.msra.mxu1 %v11164_v57 }
 0x1ce   : > { %v15849_v18 = vpack.c.bf16 %v968_v61, %v968_v61  ;;  %5083 = vmatpush.bf16.msra.mxu2 %v11292_v58  ;;  %v15860_v25 = vpack.c.bf16 %v970_v0, %v970_v0  ;;  %v9469_v29 = vld [vmem:[%s20048_s1 + $0x3d0] sm:$0xf0]  ;;  %v12923_v37 = vld [vmem:[%s20048_s1 + $0xa4] sm:$0xf]  ;;  %v1632_v56 = vld [vmem:[%s20049_s2] sm:$0xf] }
 0x1cf   : > { %5096 = vmatpush.bf16.msra.mxu3 %v11420_v62  ;;  %v9069_v38 = vld [vmem:[%s20048_s1 + $0xb0] sm:$0xf0]  ;;  %v12955_v39 = vld [vmem:[%s20048_s1 + $0x1a4] sm:$0xf]  ;;  %v9472_v40 = vor.u32 %v13023_v27, %v9469_v29  ;;  %v1634_v1 = vperm.slane %v1632_v56, 0 }
 0x1d0   : > { %5102 = vmatpush.bf16.msrb.mxu0 %v9104_v63  ;;  %v9197_v41 = vld [vmem:[%s20048_s1 + $0x1b0] sm:$0xf0]  ;;  %v12987_v42 = vld [vmem:[%s20048_s1 + $0x2a4] sm:$0xf]  ;;  %5071 = vmatmul.bf16.vlgmr.msra.gmra.mxu1 %v15862_v26  ;;  %v9072_v46 = vor.u32 %v12923_v37, %v9069_v38 }
 0x1d1   : > { %5115 = vmatpush.bf16.msrb.mxu1 %v9232_v5  ;;  %5058 = vmatmul.bf16.vlgmr.msra.gmra.mxu0 %v15849_v18  ;;  %v9325_v43 = vld [vmem:[%s20048_s1 + $0x2b0] sm:$0xf0]  ;;  %v13019_v44 = vld [vmem:[%s20048_s1 + $0x3a4] sm:$0xf]  ;;  %v9200_v48 = vor.u32 %v12955_v39, %v9197_v41 }
 0x1d2   : > { %5128 = vmatpush.bf16.msrb.mxu2 %v9360_v6  ;;  %v9453_v45 = vld [vmem:[%s20048_s1 + $0x3b0] sm:$0xf0]  ;;  %5097 = vmatmul.bf16.vlgmr.msra.gmra.mxu3 %v15870_v30  ;;  %v12919_v47 = vld [vmem:[%s20048_s1 + $0x84] sm:$0xf]  ;;  %v9328_v49 = vor.u32 %v12987_v42, %v9325_v43  ;;  %v4864_v43 = vpop.f32.mrf.mxu1 }
 0x1d3   : > { %5141 = vmatpush.bf16.msrb.mxu3 %v9488_v15  ;;  %5084 = vmatmul.bf16.vlgmr.msra.gmra.mxu2 %v15860_v25  ;;  %v9053_v50 = vld [vmem:[%s20048_s1 + $0x90] sm:$0xf0]  ;;  %v12951_v51 = vld [vmem:[%s20048_s1 + $0x184] sm:$0xf]  ;;  %v9456_v53 = vor.u32 %v13019_v44, %v9453_v45 }
 0x1d4   : > { %5103 = vmatpush.bf16.msrb.mxu0 %v9088_v33  ;;  %v9181_v52 = vld [vmem:[%s20048_s1 + $0x190] sm:$0xf0]  ;;  %v12983_v54 = vld [vmem:[%s20048_s1 + $0x284] sm:$0xf]  ;;  %v9056_v59 = vor.u32 %v12919_v47, %v9053_v50 }
 0x1d5   : > { %5116 = vmatpush.bf16.msrb.mxu1 %v9216_v35  ;;  %v9309_v55 = vld [vmem:[%s20048_s1 + $0x290] sm:$0xf0]  ;;  %v13015_v57 = vld [vmem:[%s20048_s1 + $0x384] sm:$0xf]  ;;  %v9184_v61 = vor.u32 %v12951_v51, %v9181_v52 }
 0x1d6   : > { %5129 = vmatpush.bf16.msrb.mxu2 %v9344_v36  ;;  %v9437_v58 = vld [vmem:[%s20048_s1 + $0x390] sm:$0xf0]  ;;  %v12915_v60 = vld [vmem:[%s20048_s1 + $0x64] sm:$0xf]  ;;  %v9312_v62 = vor.u32 %v12983_v54, %v9309_v55  ;;  %v4851_v22 = vpop.f32.mrf.mxu0 }
 0x1d7   : > { %5142 = vmatpush.bf16.msrb.mxu3 %v9472_v40  ;;  %v9037_v63 = vld [vmem:[%s20048_s1 + $0x70] sm:$0xf0]  ;;  %v12947_v0 = vld [vmem:[%s20048_s1 + $0x164] sm:$0xf]  ;;  %v9440_v4 = vor.u32 %v13015_v57, %v9437_v58  ;;  %v4852_v35 = vadd.f32 %v4851_v22, %v1634_v1  ;;  %v4890_v58 = vpop.f32.mrf.mxu3 }
 0x1d8   : > { %5104 = vmatpush.bf16.msrb.mxu0 %v9072_v46  ;;  %v9165_v5 = vld [vmem:[%s20048_s1 + $0x170] sm:$0xf0]  ;;  %v12979_v6 = vld [vmem:[%s20048_s1 + $0x264] sm:$0xf]  ;;  %v9040_v15 = vor.u32 %v12915_v60, %v9037_v63 }
 0x1d9   : > { %5117 = vmatpush.bf16.msrb.mxu1 %v9200_v48  ;;  %v9293_v8 = vld [vmem:[%s20048_s1 + $0x270] sm:$0xf0]  ;;  %v13011_v10 = vld [vmem:[%s20048_s1 + $0x364] sm:$0xf]  ;;  %v9168_v23 = vor.u32 %v12947_v0, %v9165_v5 }
 0x1da   : > { %5130 = vmatpush.bf16.msrb.mxu2 %v9328_v49  ;;  %v9421_v11 = vld [vmem:[%s20048_s1 + $0x370] sm:$0xf0]  ;;  %v9296_v24 = vor.u32 %v12979_v6, %v9293_v8  ;;  %v12911_v27 = vld [vmem:[%s20048_s1 + $0x44] sm:$0xf]  ;;  %v4865_v49 = vadd.f32 %v4864_v43, %v4852_v35 }
 0x1db   : > { %5143 = vmatpush.bf16.msrb.mxu3 %v9456_v53  ;;  %v9021_v29 = vld [vmem:[%s20048_s1 + $0x50] sm:$0xf0]  ;;  %v12943_v33 = vld [vmem:[%s20048_s1 + $0x144] sm:$0xf]  ;;  %v9424_v36 = vor.u32 %v13011_v10, %v9421_v11  ;;  %v4877_v54 = vpop.f32.mrf.mxu2 }
 0x1dc   : > { %5105 = vmatpush.bf16.msrb.mxu0 %v9056_v59  ;;  %v9149_v37 = vld [vmem:[%s20048_s1 + $0x150] sm:$0xf0]  ;;  %v12975_v38 = vld [vmem:[%s20048_s1 + $0x244] sm:$0xf]  ;;  %v9024_v42 = vor.u32 %v12911_v27, %v9021_v29  ;;  %v4878_v57 = vadd.f32 %v4877_v54, %v4865_v49 }
 0x1dd   : > { %5118 = vmatpush.bf16.msrb.mxu1 %v9184_v61  ;;  %v9277_v39 = vld [vmem:[%s20048_s1 + $0x250] sm:$0xf0]  ;;  %v13007_v40 = vld [vmem:[%s20048_s1 + $0x344] sm:$0xf]  ;;  %v9152_v44 = vor.u32 %v12943_v33, %v9149_v37 }
 0x1de   : > { %5131 = vmatpush.bf16.msrb.mxu2 %v9312_v62  ;;  %v9405_v41 = vld [vmem:[%s20048_s1 + $0x350] sm:$0xf0]  ;;  %v9280_v45 = vor.u32 %v12975_v38, %v9277_v39  ;;  %v12907_v46 = vld [vmem:[%s20048_s1 + $0x24] sm:$0xf]  ;;  %v4853_v62 = vpop.f32.mrf.mxu0  ;;  %v16014_v6 = vadd.f32 %v4890_v58, %v4878_v57 }
 0x1df   : > { %5144 = vmatpush.bf16.msrb.mxu3 %v9440_v4  ;;  %v9005_v47 = vld [vmem:[%s20048_s1 + $0x30] sm:$0xf0]  ;;  %v12939_v48 = vld [vmem:[%s20048_s1 + $0x124] sm:$0xf]  ;;  %v9408_v50 = vor.u32 %v13007_v40, %v9405_v41  ;;  %v4892_v49 = vpop.f32.mrf.mxu3 }
 0x1e0   : > { %5106 = vmatpush.bf16.msrb.mxu0 %v9040_v15  ;;  %v9133_v51 = vld [vmem:[%s20048_s1 + $0x130] sm:$0xf0]  ;;  %v12971_v52 = vld [vmem:[%s20048_s1 + $0x224] sm:$0xf]  ;;  %v9008_v59 = vor.u32 %v12907_v46, %v9005_v47 }
 0x1e1   : > { %5119 = vmatpush.bf16.msrb.mxu1 %v9168_v23  ;;  %v9261_v53 = vld [vmem:[%s20048_s1 + $0x230] sm:$0xf0]  ;;  %v13003_v55 = vld [vmem:[%s20048_s1 + $0x324] sm:$0xf]  ;;  %v9136_v63 = vor.u32 %v12939_v48, %v9133_v51 }
 0x1e2   : > { %5132 = vmatpush.bf16.msrb.mxu2 %v9296_v24  ;;  %v9389_v56 = vld [vmem:[%s20048_s1 + $0x330] sm:$0xf0]  ;;  %v12903_v60 = vld [vmem:[%s20048_s1 + $0x4] sm:$0xf]  ;;  %v9264_v0 = vor.u32 %v12971_v52, %v9261_v53 }
 0x1e3   : > { %5145 = vmatpush.bf16.msrb.mxu3 %v9424_v36  ;;  %v8989_v61 = vld [vmem:[%s20048_s1 + $0x10] sm:$0xf0]  ;;  %v12935_v1 = vld [vmem:[%s20048_s1 + $0x104] sm:$0xf]  ;;  %v9392_v8 = vor.u32 %v13003_v55, %v9389_v56  ;;  %v4866_v36 = vpop.f32.mrf.mxu1  ;;  %v4879_v43 = vpop.f32.mrf.mxu2 }
 0x1e4   : > { %5107 = vmatpush.bf16.msrb.mxu0 %v9024_v42  ;;  %v9117_v4 = vld [vmem:[%s20048_s1 + $0x110] sm:$0xf0]  ;;  %v12967_v5 = vld [vmem:[%s20048_s1 + $0x204] sm:$0xf]  ;;  %v8992_v27 = vor.u32 %v12903_v60, %v8989_v61 }
 0x1e5   : > { %5120 = vmatpush.bf16.msrb.mxu1 %v9152_v44  ;;  %v9245_v10 = vld [vmem:[%s20048_s1 + $0x210] sm:$0xf0]  ;;  %v12999_v11 = vld [vmem:[%s20048_s1 + $0x304] sm:$0xf]  ;;  %v9120_v37 = vor.u32 %v12935_v1, %v9117_v4 }
 0x1e6   : > { %5133 = vmatpush.bf16.msrb.mxu2 %v9280_v45  ;;  %v9373_v15 = vld [vmem:[%s20048_s1 + $0x310] sm:$0xf0]  ;;  %v13059_v22 = vld [vmem:[%s20048_s1 + $0x4e4] sm:$0xf]  ;;  %v9248_v38 = vor.u32 %v12967_v5, %v9245_v10 }
 0x1e7   : > { %5146 = vmatpush.bf16.msrb.mxu3 %v9408_v50  ;;  %v9613_v23 = vld [vmem:[%s20048_s1 + $0x4f0] sm:$0xf0]  ;;  %v13091_v24 = vld [vmem:[%s20048_s1 + $0x5e4] sm:$0xf]  ;;  %v9376_v41 = vor.u32 %v12999_v11, %v9373_v15 }
 0x1e8   : > { %5108 = vmatpush.bf16.msrb.mxu0 %v9008_v59  ;;  %v9741_v29 = vld [vmem:[%s20048_s1 + $0x5f0] sm:$0xf0]  ;;  %v13123_v33 = vld [vmem:[%s20048_s1 + $0x6e4] sm:$0xf]  ;;  %v9616_v42 = vor.u32 %v13059_v22, %v9613_v23 }
 0x1e9   : > { %v9869_v35 = vld [vmem:[%s20048_s1 + $0x6f0] sm:$0xf0]  ;;  %5121 = vmatpush.bf16.msrb.mxu1 %v9136_v63  ;;  %v13155_v39 = vld [vmem:[%s20048_s1 + $0x7e4] sm:$0xf]  ;;  %v9744_v44 = vor.u32 %v13091_v24, %v9741_v29 }
 0x1ea   : > { %5134 = vmatpush.bf16.msrb.mxu2 %v9264_v0  ;;  %v9997_v40 = vld [vmem:[%s20048_s1 + $0x7f0] sm:$0xf0]  ;;  %v9872_v45 = vor.u32 %v13123_v33, %v9869_v35  ;;  %v13055_v46 = vld [vmem:[%s20048_s1 + $0x4c4] sm:$0xf] }
 0x1eb   : > { %5147 = vmatpush.bf16.msrb.mxu3 %v9392_v8  ;;  %v9597_v47 = vld [vmem:[%s20048_s1 + $0x4d0] sm:$0xf0]  ;;  %v13087_v48 = vld [vmem:[%s20048_s1 + $0x5c4] sm:$0xf]  ;;  %v10000_v50 = vor.u32 %v13155_v39, %v9997_v40 }
 0x1ec   : > { %5109 = vmatpush.bf16.msrb.mxu0 %v8992_v27  ;;  %v9725_v51 = vld [vmem:[%s20048_s1 + $0x5d0] sm:$0xf0]  ;;  %v13119_v52 = vld [vmem:[%s20048_s1 + $0x6c4] sm:$0xf]  ;;  %v9600_v56 = vor.u32 %v13055_v46, %v9597_v47 }
 0x1ed   : > { %v9853_v53 = vld [vmem:[%s20048_s1 + $0x6d0] sm:$0xf0]  ;;  %5122 = vmatpush.bf16.msrb.mxu1 %v9120_v37  ;;  %v13151_v54 = vld [vmem:[%s20048_s1 + $0x7c4] sm:$0xf]  ;;  %v9728_v57 = vor.u32 %v13087_v48, %v9725_v51 }
 0x1ee   : > { %5135 = vmatpush.bf16.msrb.mxu2 %v9248_v38  ;;  %v9981_v55 = vld [vmem:[%s20048_s1 + $0x7d0] sm:$0xf0]  ;;  %v9856_v58 = vor.u32 %v13119_v52, %v9853_v53  ;;  %v13051_v59 = vld [vmem:[%s20048_s1 + $0x4a4] sm:$0xf] }
 0x1ef   : > { %5148 = vmatpush.bf16.msrb.mxu3 %v9376_v41  ;;  %v9581_v60 = vld [vmem:[%s20048_s1 + $0x4b0] sm:$0xf0]  ;;  %v13083_v61 = vld [vmem:[%s20048_s1 + $0x5a4] sm:$0xf]  ;;  %v9984_v62 = vor.u32 %v13151_v54, %v9981_v55  ;;  %5110 = vmatmul.bf16.vlgmr.msrb.gmra.mxu0 %v15029_v3  ;;  %v4903_v38 = vpop.f32.mrf.mxu0 }
 0x1f0   : > { %5154 = vmatpush.bf16.msra.mxu0 %v9616_v42  ;;  %v9709_v63 = vld [vmem:[%s20048_s1 + $0x5b0] sm:$0xf0]  ;;  %v13115_v0 = vld [vmem:[%s20048_s1 + $0x6a4] sm:$0xf]  ;;  %v9584_v8 = vor.u32 %v13051_v59, %v9581_v60  ;;  %5123 = vmatmul.bf16.vlgmr.msrb.gmra.mxu1 %v15066_v19 }
 0x1f1   : > { %5167 = vmatpush.bf16.msra.mxu1 %v9744_v44  ;;  %v9837_v1 = vld [vmem:[%s20048_s1 + $0x6b0] sm:$0xf0]  ;;  %5136 = vmatmul.bf16.vlgmr.msrb.gmra.mxu2 %v15027_v2  ;;  %v13147_v4 = vld [vmem:[%s20048_s1 + $0x7a4] sm:$0xf]  ;;  %v9712_v10 = vor.u32 %v13083_v61, %v9709_v63  ;;  %v4904_v44 = vadd.f32 %v4903_v38, %v16014_v6 }
 0x1f2   : > { %5180 = vmatpush.bf16.msra.mxu2 %v9872_v45  ;;  %v9965_v5 = vld [vmem:[%s20048_s1 + $0x7b0] sm:$0xf0]  ;;  %5149 = vmatmul.bf16.vlgmr.msrb.gmra.mxu3 %v15043_v9  ;;  %v9840_v11 = vor.u32 %v13115_v0, %v9837_v1  ;;  %v13047_v15 = vld [vmem:[%s20048_s1 + $0x484] sm:$0xf]  ;;  %v4916_v45 = vpop.f32.mrf.mxu1  ;;  %v4942_v0 = vpop.f32.mrf.mxu3 }
 0x1f3   : > { %5193 = vmatpush.bf16.msra.mxu3 %v10000_v50  ;;  %v9565_v22 = vld [vmem:[%s20048_s1 + $0x490] sm:$0xf0]  ;;  %v13079_v23 = vld [vmem:[%s20048_s1 + $0x584] sm:$0xf]  ;;  %v9968_v24 = vor.u32 %v13147_v4, %v9965_v5  ;;  %v4917_v51 = vadd.f32 %v4916_v45, %v4904_v44 }
 0x1f4   : > { %5155 = vmatpush.bf16.msra.mxu0 %v9600_v56  ;;  %v9693_v27 = vld [vmem:[%s20048_s1 + $0x590] sm:$0xf0]  ;;  %v13111_v29 = vld [vmem:[%s20048_s1 + $0x684] sm:$0xf]  ;;  %v9568_v37 = vor.u32 %v13047_v15, %v9565_v22 }
 0x1f5   : > { %5168 = vmatpush.bf16.msra.mxu1 %v9728_v57  ;;  %v9821_v33 = vld [vmem:[%s20048_s1 + $0x690] sm:$0xf0]  ;;  %v13143_v35 = vld [vmem:[%s20048_s1 + $0x784] sm:$0xf]  ;;  %v9696_v39 = vor.u32 %v13079_v23, %v9693_v27 }
 0x1f6   : > { %5181 = vmatpush.bf16.msra.mxu2 %v9856_v58  ;;  %v9949_v36 = vld [vmem:[%s20048_s1 + $0x790] sm:$0xf0]  ;;  %v9824_v40 = vor.u32 %v13111_v29, %v9821_v33  ;;  %v13043_v41 = vld [vmem:[%s20048_s1 + $0x464] sm:$0xf]  ;;  %v4929_v58 = vpop.f32.mrf.mxu2 }
 0x1f7   : > { %5194 = vmatpush.bf16.msra.mxu3 %v9984_v62  ;;  %v9549_v42 = vld [vmem:[%s20048_s1 + $0x470] sm:$0xf0]  ;;  %v13075_v43 = vld [vmem:[%s20048_s1 + $0x564] sm:$0xf]  ;;  %v9952_v46 = vor.u32 %v13143_v35, %v9949_v36  ;;  %v4930_v63 = vadd.f32 %v4929_v58, %v4917_v51 }
 0x1f8   : > { %5156 = vmatpush.bf16.msra.mxu0 %v9584_v8  ;;  %v9677_v47 = vld [vmem:[%s20048_s1 + $0x570] sm:$0xf0]  ;;  %v13107_v48 = vld [vmem:[%s20048_s1 + $0x664] sm:$0xf]  ;;  %v9552_v52 = vor.u32 %v13043_v41, %v9549_v42 }
 0x1f9   : > { %5169 = vmatpush.bf16.msra.mxu1 %v9712_v10  ;;  %v9805_v49 = vld [vmem:[%s20048_s1 + $0x670] sm:$0xf0]  ;;  %v13139_v50 = vld [vmem:[%s20048_s1 + $0x764] sm:$0xf]  ;;  %v9680_v53 = vor.u32 %v13075_v43, %v9677_v47  ;;  %v16174_v8 = vadd.f32 %v4942_v0, %v4930_v63  ;;  %v4905_v10 = vpop.f32.mrf.mxu0 }
 0x1fa   : > { %5182 = vmatpush.bf16.msra.mxu2 %v9840_v11  ;;  %v9933_v6 = vld [vmem:[%s20048_s1 + $0x770] sm:$0xf0]  ;;  %v9808_v54 = vor.u32 %v13107_v48, %v9805_v49  ;;  %v13039_v55 = vld [vmem:[%s20048_s1 + $0x444] sm:$0xf]  ;;  %v4918_v27 = vpop.f32.mrf.mxu1  ;;  %v4944_v51 = vpop.f32.mrf.mxu3 }
 0x1fb   : > { %5195 = vmatpush.bf16.msra.mxu3 %v9968_v24  ;;  %v9533_v56 = vld [vmem:[%s20048_s1 + $0x450] sm:$0xf0]  ;;  %v13071_v57 = vld [vmem:[%s20048_s1 + $0x544] sm:$0xf]  ;;  %v9936_v59 = vor.u32 %v13139_v50, %v9933_v6 }
 0x1fc   : > { %5157 = vmatpush.bf16.msra.mxu0 %v9568_v37  ;;  %v9661_v60 = vld [vmem:[%s20048_s1 + $0x550] sm:$0xf0]  ;;  %v13103_v61 = vld [vmem:[%s20048_s1 + $0x644] sm:$0xf]  ;;  %v9536_v5 = vor.u32 %v13039_v55, %v9533_v56 }
 0x1fd   : > { %5170 = vmatpush.bf16.msra.mxu1 %v9696_v39  ;;  %v9789_v62 = vld [vmem:[%s20048_s1 + $0x650] sm:$0xf0]  ;;  %v13135_v1 = vld [vmem:[%s20048_s1 + $0x744] sm:$0xf]  ;;  %v9664_v11 = vor.u32 %v13071_v57, %v9661_v60 }
 0x1fe   : > { %5183 = vmatpush.bf16.msra.mxu2 %v9824_v40  ;;  %v9917_v4 = vld [vmem:[%s20048_s1 + $0x750] sm:$0xf0]  ;;  %v9792_v15 = vor.u32 %v13103_v61, %v9789_v62  ;;  %v13035_v22 = vld [vmem:[%s20048_s1 + $0x424] sm:$0xf]  ;;  %v4931_v47 = vpop.f32.mrf.mxu2 }
 0x1ff   : > { %5196 = vmatpush.bf16.msra.mxu3 %v9952_v46  ;;  %v9517_v23 = vld [vmem:[%s20048_s1 + $0x430] sm:$0xf0]  ;;  %v13067_v24 = vld [vmem:[%s20048_s1 + $0x524] sm:$0xf]  ;;  %v9920_v29 = vor.u32 %v13135_v1, %v9917_v4 }
 0x200   : > { %5158 = vmatpush.bf16.msra.mxu0 %v9552_v52  ;;  %v9645_v33 = vld [vmem:[%s20048_s1 + $0x530] sm:$0xf0]  ;;  %v13099_v35 = vld [vmem:[%s20048_s1 + $0x624] sm:$0xf]  ;;  %v9520_v39 = vor.u32 %v13035_v22, %v9517_v23 }
 0x201   : > { %5171 = vmatpush.bf16.msra.mxu1 %v9680_v53  ;;  %v9773_v36 = vld [vmem:[%s20048_s1 + $0x630] sm:$0xf0]  ;;  %v13131_v37 = vld [vmem:[%s20048_s1 + $0x724] sm:$0xf]  ;;  %v9648_v42 = vor.u32 %v13067_v24, %v9645_v33 }
 0x202   : > { %5184 = vmatpush.bf16.msra.mxu2 %v9808_v54  ;;  %v9901_v38 = vld [vmem:[%s20048_s1 + $0x730] sm:$0xf0]  ;;  %v13031_v40 = vld [vmem:[%s20048_s1 + $0x404] sm:$0xf]  ;;  %v9776_v43 = vor.u32 %v13099_v35, %v9773_v36 }
 0x203   : > { %5197 = vmatpush.bf16.msra.mxu3 %v9936_v59  ;;  %v9501_v41 = vld [vmem:[%s20048_s1 + $0x410] sm:$0xf0]  ;;  %v13063_v44 = vld [vmem:[%s20048_s1 + $0x504] sm:$0xf]  ;;  %v9904_v48 = vor.u32 %v13131_v37, %v9901_v38 }
 0x204   : > { %5159 = vmatpush.bf16.msra.mxu0 %v9536_v5  ;;  %v9629_v45 = vld [vmem:[%s20048_s1 + $0x510] sm:$0xf0]  ;;  %v13095_v46 = vld [vmem:[%s20048_s1 + $0x604] sm:$0xf]  ;;  %v9504_v55 = vor.u32 %v13031_v40, %v9501_v41 }
 0x205   : > { %5172 = vmatpush.bf16.msra.mxu1 %v9664_v11  ;;  %v9757_v49 = vld [vmem:[%s20048_s1 + $0x610] sm:$0xf0]  ;;  %v13127_v50 = vld [vmem:[%s20048_s1 + $0x704] sm:$0xf]  ;;  %v9632_v59 = vor.u32 %v13063_v44, %v9629_v45 }
 0x206   : > { %5185 = vmatpush.bf16.msra.mxu2 %v9792_v15  ;;  %v9885_v6 = vld [vmem:[%s20048_s1 + $0x710] sm:$0xf0]  ;;  %v13187_v52 = vld [vmem:[%s20048_s1 + $0x8e4] sm:$0xf]  ;;  %v9760_v60 = vor.u32 %v13095_v46, %v9757_v49 }
 0x207   : > { %5198 = vmatpush.bf16.msra.mxu3 %v9920_v29  ;;  %v10125_v53 = vld [vmem:[%s20048_s1 + $0x8f0] sm:$0xf0]  ;;  %v13219_v54 = vld [vmem:[%s20048_s1 + $0x9e4] sm:$0xf]  ;;  %v9888_v63 = vor.u32 %v13127_v50, %v9885_v6 }
 0x208   : > { %5160 = vmatpush.bf16.msra.mxu0 %v9520_v39  ;;  %v10253_v56 = vld [vmem:[%s20048_s1 + $0x9f0] sm:$0xf0]  ;;  %v13251_v57 = vld [vmem:[%s20048_s1 + $0xae4] sm:$0xf]  ;;  %v10128_v0 = vor.u32 %v13187_v52, %v10125_v53 }
 0x209   : > { %v10381_v58 = vld [vmem:[%s20048_s1 + $0xaf0] sm:$0xf0]  ;;  %5173 = vmatpush.bf16.msra.mxu1 %v9648_v42  ;;  %v13283_v61 = vld [vmem:[%s20048_s1 + $0xbe4] sm:$0xf]  ;;  %v10256_v1 = vor.u32 %v13219_v54, %v10253_v56 }
 0x20a   : > { %5186 = vmatpush.bf16.msra.mxu2 %v9776_v43  ;;  %v10509_v62 = vld [vmem:[%s20048_s1 + $0xbf0] sm:$0xf0]  ;;  %v10384_v4 = vor.u32 %v13251_v57, %v10381_v58  ;;  %v13183_v5 = vld [vmem:[%s20048_s1 + $0x8c4] sm:$0xf] }
 0x20b   : > { %5199 = vmatpush.bf16.msra.mxu3 %v9904_v48  ;;  %v10109_v10 = vld [vmem:[%s20048_s1 + $0x8d0] sm:$0xf0]  ;;  %v13215_v11 = vld [vmem:[%s20048_s1 + $0x9c4] sm:$0xf]  ;;  %v10512_v15 = vor.u32 %v13283_v61, %v10509_v62 }
 0x20c   : > { %5161 = vmatpush.bf16.msra.mxu0 %v9504_v55  ;;  %v10237_v22 = vld [vmem:[%s20048_s1 + $0x9d0] sm:$0xf0]  ;;  %v13247_v23 = vld [vmem:[%s20048_s1 + $0xac4] sm:$0xf]  ;;  %v10112_v33 = vor.u32 %v13183_v5, %v10109_v10 }
 0x20d   : > { %v10365_v24 = vld [vmem:[%s20048_s1 + $0xad0] sm:$0xf0]  ;;  %5174 = vmatpush.bf16.msra.mxu1 %v9632_v59  ;;  %v13279_v27 = vld [vmem:[%s20048_s1 + $0xbc4] sm:$0xf]  ;;  %v10240_v35 = vor.u32 %v13215_v11, %v10237_v22 }
 0x20e   : > { %5187 = vmatpush.bf16.msra.mxu2 %v9760_v60  ;;  %v10493_v29 = vld [vmem:[%s20048_s1 + $0xbd0] sm:$0xf0]  ;;  %v10368_v36 = vor.u32 %v13247_v23, %v10365_v24  ;;  %v13179_v37 = vld [vmem:[%s20048_s1 + $0x8a4] sm:$0xf]  ;;  %v4968_v60 = vpop.f32.mrf.mxu1 }
 0x20f   : > { %5200 = vmatpush.bf16.msra.mxu3 %v9888_v63  ;;  %v10093_v38 = vld [vmem:[%s20048_s1 + $0x8b0] sm:$0xf0]  ;;  %v13211_v39 = vld [vmem:[%s20048_s1 + $0x9a4] sm:$0xf]  ;;  %v10496_v40 = vor.u32 %v13279_v27, %v10493_v29  ;;  %5162 = vmatmul.bf16.vlgmr.msra.gmra.mxu0 %v15218_v31  ;;  %v4955_v55 = vpop.f32.mrf.mxu0 }
 0x210   : > { %5206 = vmatpush.bf16.msrb.mxu0 %v10128_v0  ;;  %v10221_v41 = vld [vmem:[%s20048_s1 + $0x9b0] sm:$0xf0]  ;;  %v13243_v42 = vld [vmem:[%s20048_s1 + $0xaa4] sm:$0xf]  ;;  %v10096_v46 = vor.u32 %v13179_v37, %v10093_v38  ;;  %5175 = vmatmul.bf16.vlgmr.msra.gmra.mxu1 %v15222_v34  ;;  %v4956_v58 = vadd.f32 %v4955_v55, %v16174_v8 }
 0x211   : > { %5219 = vmatpush.bf16.msrb.mxu1 %v10256_v1  ;;  %5188 = vmatmul.bf16.vlgmr.msra.gmra.mxu2 %v15210_v28  ;;  %v10349_v43 = vld [vmem:[%s20048_s1 + $0xab0] sm:$0xf0]  ;;  %v13275_v44 = vld [vmem:[%s20048_s1 + $0xba4] sm:$0xf]  ;;  %v10224_v47 = vor.u32 %v13211_v39, %v10221_v41 }
 0x212   : > { %5232 = vmatpush.bf16.msrb.mxu2 %v10384_v4  ;;  %v10477_v45 = vld [vmem:[%s20048_s1 + $0xbb0] sm:$0xf0]  ;;  %5201 = vmatmul.bf16.vlgmr.msra.gmra.mxu3 %v15220_v32  ;;  %v10352_v48 = vor.u32 %v13243_v42, %v10349_v43  ;;  %v13175_v49 = vld [vmem:[%s20048_s1 + $0x884] sm:$0xf]  ;;  %v4969_v4 = vadd.f32 %v4968_v60, %v4956_v58 }
 0x213   : > { %5245 = vmatpush.bf16.msrb.mxu3 %v10512_v15  ;;  %v10077_v50 = vld [vmem:[%s20048_s1 + $0x890] sm:$0xf0]  ;;  %v13207_v6 = vld [vmem:[%s20048_s1 + $0x984] sm:$0xf]  ;;  %v10480_v51 = vor.u32 %v13275_v44, %v10477_v45  ;;  %v4994_v42 = vpop.f32.mrf.mxu3 }
 0x214   : > { %5207 = vmatpush.bf16.msrb.mxu0 %v10112_v33  ;;  %v10205_v52 = vld [vmem:[%s20048_s1 + $0x990] sm:$0xf0]  ;;  %v13239_v53 = vld [vmem:[%s20048_s1 + $0xa84] sm:$0xf]  ;;  %v10080_v59 = vor.u32 %v13175_v49, %v10077_v50 }
 0x215   : > { %5220 = vmatpush.bf16.msrb.mxu1 %v10240_v35  ;;  %v10333_v54 = vld [vmem:[%s20048_s1 + $0xa90] sm:$0xf0]  ;;  %v13271_v56 = vld [vmem:[%s20048_s1 + $0xb84] sm:$0xf]  ;;  %v10208_v61 = vor.u32 %v13207_v6, %v10205_v52  ;;  %v4981_v37 = vpop.f32.mrf.mxu2 }
 0x216   : > { %5233 = vmatpush.bf16.msrb.mxu2 %v10368_v36  ;;  %v10461_v57 = vld [vmem:[%s20048_s1 + $0xb90] sm:$0xf0]  ;;  %v10336_v62 = vor.u32 %v13239_v53, %v10333_v54  ;;  %v13171_v63 = vld [vmem:[%s20048_s1 + $0x864] sm:$0xf]  ;;  %v4982_v41 = vadd.f32 %v4981_v37, %v4969_v4 }
 0x217   : > { %5246 = vmatpush.bf16.msrb.mxu3 %v10496_v40  ;;  %v10061_v0 = vld [vmem:[%s20048_s1 + $0x870] sm:$0xf0]  ;;  %v13203_v1 = vld [vmem:[%s20048_s1 + $0x964] sm:$0xf]  ;;  %v10464_v8 = vor.u32 %v13271_v56, %v10461_v57  ;;  %v4957_v45 = vpop.f32.mrf.mxu0 }
 0x218   : > { %5208 = vmatpush.bf16.msrb.mxu0 %v10096_v46  ;;  %v10189_v5 = vld [vmem:[%s20048_s1 + $0x970] sm:$0xf0]  ;;  %v13235_v10 = vld [vmem:[%s20048_s1 + $0xa64] sm:$0xf]  ;;  %v10064_v23 = vor.u32 %v13171_v63, %v10061_v0 }
 0x219   : > { %5221 = vmatpush.bf16.msrb.mxu1 %v10224_v47  ;;  %v10317_v11 = vld [vmem:[%s20048_s1 + $0xa70] sm:$0xf0]  ;;  %v13267_v15 = vld [vmem:[%s20048_s1 + $0xb64] sm:$0xf]  ;;  %v10192_v24 = vor.u32 %v13203_v1, %v10189_v5  ;;  %v4970_v47 = vpop.f32.mrf.mxu1 }
 0x21a   : > { %5234 = vmatpush.bf16.msrb.mxu2 %v10352_v48  ;;  %v10445_v22 = vld [vmem:[%s20048_s1 + $0xb70] sm:$0xf0]  ;;  %v10320_v27 = vor.u32 %v13235_v10, %v10317_v11  ;;  %v13167_v29 = vld [vmem:[%s20048_s1 + $0x844] sm:$0xf]  ;;  %v16373_v48 = vadd.f32 %v4994_v42, %v4982_v41 }
 0x21b   : > { %5247 = vmatpush.bf16.msrb.mxu3 %v10480_v51  ;;  %v10045_v33 = vld [vmem:[%s20048_s1 + $0x850] sm:$0xf0]  ;;  %v13199_v35 = vld [vmem:[%s20048_s1 + $0x944] sm:$0xf]  ;;  %v10448_v36 = vor.u32 %v13267_v15, %v10445_v22 }
 0x21c   : > { %5209 = vmatpush.bf16.msrb.mxu0 %v10080_v59  ;;  %v10173_v38 = vld [vmem:[%s20048_s1 + $0x950] sm:$0xf0]  ;;  %v13231_v39 = vld [vmem:[%s20048_s1 + $0xa44] sm:$0xf]  ;;  %v10048_v46 = vor.u32 %v13167_v29, %v10045_v33 }
 0x21d   : > { %5222 = vmatpush.bf16.msrb.mxu1 %v10208_v61  ;;  %v10301_v40 = vld [vmem:[%s20048_s1 + $0xa50] sm:$0xf0]  ;;  %v13263_v43 = vld [vmem:[%s20048_s1 + $0xb44] sm:$0xf]  ;;  %v10176_v49 = vor.u32 %v13199_v35, %v10173_v38  ;;  %v4983_v15 = vpop.f32.mrf.mxu2 }
 0x21e   : > { %5235 = vmatpush.bf16.msrb.mxu2 %v10336_v62  ;;  %v10429_v44 = vld [vmem:[%s20048_s1 + $0xb50] sm:$0xf0]  ;;  %v10304_v50 = vor.u32 %v13231_v39, %v10301_v40  ;;  %v13163_v6 = vld [vmem:[%s20048_s1 + $0x824] sm:$0xf] }
 0x21f   : > { %5248 = vmatpush.bf16.msrb.mxu3 %v10464_v8  ;;  %v10029_v51 = vld [vmem:[%s20048_s1 + $0x830] sm:$0xf0]  ;;  %v13195_v52 = vld [vmem:[%s20048_s1 + $0x924] sm:$0xf]  ;;  %v10432_v53 = vor.u32 %v13263_v43, %v10429_v44 }
 0x220   : > { %5210 = vmatpush.bf16.msrb.mxu0 %v10064_v23  ;;  %v10157_v54 = vld [vmem:[%s20048_s1 + $0x930] sm:$0xf0]  ;;  %v13227_v55 = vld [vmem:[%s20048_s1 + $0xa24] sm:$0xf]  ;;  %v10032_v59 = vor.u32 %v13163_v6, %v10029_v51 }
 0x221   : > { %5223 = vmatpush.bf16.msrb.mxu1 %v10192_v24  ;;  %v10285_v56 = vld [vmem:[%s20048_s1 + $0xa30] sm:$0xf0]  ;;  %v13259_v57 = vld [vmem:[%s20048_s1 + $0xb24] sm:$0xf]  ;;  %v10160_v62 = vor.u32 %v13195_v52, %v10157_v54 }
 0x222   : > { %5236 = vmatpush.bf16.msrb.mxu2 %v10320_v27  ;;  %v10413_v58 = vld [vmem:[%s20048_s1 + $0xb30] sm:$0xf0]  ;;  %v13159_v60 = vld [vmem:[%s20048_s1 + $0x804] sm:$0xf]  ;;  %v10288_v63 = vor.u32 %v13227_v55, %v10285_v56  ;;  %v4996_v27 = vpop.f32.mrf.mxu3 }
 0x223   : > { %5249 = vmatpush.bf16.msrb.mxu3 %v10448_v36  ;;  %v10013_v61 = vld [vmem:[%s20048_s1 + $0x810] sm:$0xf0]  ;;  %v13191_v0 = vld [vmem:[%s20048_s1 + $0x904] sm:$0xf]  ;;  %v10416_v4 = vor.u32 %v13259_v57, %v10413_v58 }
 0x224   : > { %5211 = vmatpush.bf16.msrb.mxu0 %v10048_v46  ;;  %v10141_v1 = vld [vmem:[%s20048_s1 + $0x910] sm:$0xf0]  ;;  %v13223_v8 = vld [vmem:[%s20048_s1 + $0xa04] sm:$0xf]  ;;  %v10016_v29 = vor.u32 %v13159_v60, %v10013_v61 }
 0x225   : > { %5224 = vmatpush.bf16.msrb.mxu1 %v10176_v49  ;;  %v10269_v5 = vld [vmem:[%s20048_s1 + $0xa10] sm:$0xf0]  ;;  %v13255_v10 = vld [vmem:[%s20048_s1 + $0xb04] sm:$0xf]  ;;  %v10144_v37 = vor.u32 %v13191_v0, %v10141_v1 }
 0x226   : > { %5237 = vmatpush.bf16.msrb.mxu2 %v10304_v50  ;;  %v10397_v11 = vld [vmem:[%s20048_s1 + $0xb10] sm:$0xf0]  ;;  %v13315_v22 = vld [vmem:[%s20048_s1 + $0xce4] sm:$0xf]  ;;  %v10272_v38 = vor.u32 %v13223_v8, %v10269_v5 }
 0x227   : > { %5250 = vmatpush.bf16.msrb.mxu3 %v10432_v53  ;;  %v10637_v23 = vld [vmem:[%s20048_s1 + $0xcf0] sm:$0xf0]  ;;  %v13347_v24 = vld [vmem:[%s20048_s1 + $0xde4] sm:$0xf]  ;;  %v10400_v41 = vor.u32 %v13255_v10, %v10397_v11 }
 0x228   : > { %5212 = vmatpush.bf16.msrb.mxu0 %v10032_v59  ;;  %v10765_v33 = vld [vmem:[%s20048_s1 + $0xdf0] sm:$0xf0]  ;;  %v13379_v35 = vld [vmem:[%s20048_s1 + $0xee4] sm:$0xf]  ;;  %v10640_v42 = vor.u32 %v13315_v22, %v10637_v23 }
 0x229   : > { %v10893_v36 = vld [vmem:[%s20048_s1 + $0xef0] sm:$0xf0]  ;;  %5225 = vmatpush.bf16.msrb.mxu1 %v10160_v62  ;;  %v13411_v39 = vld [vmem:[%s20048_s1 + $0xfe4] sm:$0xf]  ;;  %v10768_v43 = vor.u32 %v13347_v24, %v10765_v33 }
 0x22a   : > { %5238 = vmatpush.bf16.msrb.mxu2 %v10288_v63  ;;  %v11021_v40 = vld [vmem:[%s20048_s1 + $0xff0] sm:$0xf0]  ;;  %v10896_v44 = vor.u32 %v13379_v35, %v10893_v36  ;;  %v13311_v45 = vld [vmem:[%s20048_s1 + $0xcc4] sm:$0xf] }
 0x22b   : > { %5251 = vmatpush.bf16.msrb.mxu3 %v10416_v4  ;;  %v10621_v46 = vld [vmem:[%s20048_s1 + $0xcd0] sm:$0xf0]  ;;  %v13343_v47 = vld [vmem:[%s20048_s1 + $0xdc4] sm:$0xf]  ;;  %v11024_v49 = vor.u32 %v13411_v39, %v11021_v40 }
 0x22c   : > { %5213 = vmatpush.bf16.msrb.mxu0 %v10016_v29  ;;  %v10749_v50 = vld [vmem:[%s20048_s1 + $0xdd0] sm:$0xf0]  ;;  %v13375_v6 = vld [vmem:[%s20048_s1 + $0xec4] sm:$0xf]  ;;  %v10624_v54 = vor.u32 %v13311_v45, %v10621_v46 }
 0x22d   : > { %v10877_v51 = vld [vmem:[%s20048_s1 + $0xed0] sm:$0xf0]  ;;  %5226 = vmatpush.bf16.msrb.mxu1 %v10144_v37  ;;  %v13407_v52 = vld [vmem:[%s20048_s1 + $0xfc4] sm:$0xf]  ;;  %v10752_v55 = vor.u32 %v13343_v47, %v10749_v50 }
 0x22e   : > { %5239 = vmatpush.bf16.msrb.mxu2 %v10272_v38  ;;  %v11005_v53 = vld [vmem:[%s20048_s1 + $0xfd0] sm:$0xf0]  ;;  %v10880_v56 = vor.u32 %v13375_v6, %v10877_v51  ;;  %v13307_v57 = vld [vmem:[%s20048_s1 + $0xca4] sm:$0xf]  ;;  %v5020_v38 = vpop.f32.mrf.mxu1 }
 0x22f   : > { %5252 = vmatpush.bf16.msrb.mxu3 %v10400_v41  ;;  %v10605_v58 = vld [vmem:[%s20048_s1 + $0xcb0] sm:$0xf0]  ;;  %v13339_v59 = vld [vmem:[%s20048_s1 + $0xda4] sm:$0xf]  ;;  %5214 = vmatmul.bf16.vlgmr.msrb.gmra.mxu0 %v15417_v12  ;;  %v11008_v60 = vor.u32 %v13407_v52, %v11005_v53 }
 0x230   : > { %5258 = vmatpush.bf16.msra.mxu0 %v10640_v42  ;;  %v10733_v61 = vld [vmem:[%s20048_s1 + $0xdb0] sm:$0xf0]  ;;  %v13371_v62 = vld [vmem:[%s20048_s1 + $0xea4] sm:$0xf]  ;;  %5227 = vmatmul.bf16.vlgmr.msrb.gmra.mxu1 %v15430_v17  ;;  %v10608_v8 = vor.u32 %v13307_v57, %v10605_v58  ;;  %v5007_v29 = vpop.f32.mrf.mxu0 }
 0x231   : > { %5271 = vmatpush.bf16.msra.mxu1 %v10768_v43  ;;  %v10861_v63 = vld [vmem:[%s20048_s1 + $0xeb0] sm:$0xf0]  ;;  %5240 = vmatmul.bf16.vlgmr.msrb.gmra.mxu2 %v15428_v16  ;;  %v13403_v0 = vld [vmem:[%s20048_s1 + $0xfa4] sm:$0xf]  ;;  %v10736_v4 = vor.u32 %v13339_v59, %v10733_v61  ;;  %v5008_v36 = vadd.f32 %v5007_v29, %v16373_v48 }
 0x232   : > { %5284 = vmatpush.bf16.msra.mxu2 %v10896_v44  ;;  %v10989_v1 = vld [vmem:[%s20048_s1 + $0xfb0] sm:$0xf0]  ;;  %5253 = vmatmul.bf16.vlgmr.msrb.gmra.mxu3 %v15438_v21  ;;  %v10864_v5 = vor.u32 %v13371_v62, %v10861_v63  ;;  %v13303_v10 = vld [vmem:[%s20048_s1 + $0xc84] sm:$0xf] }
 0x233   : > { %5297 = vmatpush.bf16.msra.mxu3 %v11024_v49  ;;  %v10589_v11 = vld [vmem:[%s20048_s1 + $0xc90] sm:$0xf0]  ;;  %v13335_v15 = vld [vmem:[%s20048_s1 + $0xd84] sm:$0xf]  ;;  %v10992_v22 = vor.u32 %v13403_v0, %v10989_v1  ;;  %v5021_v44 = vadd.f32 %v5020_v38, %v5008_v36 }
 0x234   : > { %5259 = vmatpush.bf16.msra.mxu0 %v10624_v54  ;;  %v10717_v23 = vld [vmem:[%s20048_s1 + $0xd90] sm:$0xf0]  ;;  %v13367_v24 = vld [vmem:[%s20048_s1 + $0xe84] sm:$0xf]  ;;  %v10592_v37 = vor.u32 %v13303_v10, %v10589_v11  ;;  %v5046_v62 = vpop.f32.mrf.mxu3 }
 0x235   : > { %5272 = vmatpush.bf16.msra.mxu1 %v10752_v55  ;;  %v10845_v27 = vld [vmem:[%s20048_s1 + $0xe90] sm:$0xf0]  ;;  %v13399_v33 = vld [vmem:[%s20048_s1 + $0xf84] sm:$0xf]  ;;  %v10720_v39 = vor.u32 %v13335_v15, %v10717_v23 }
 0x236   : > { %5285 = vmatpush.bf16.msra.mxu2 %v10880_v56  ;;  %v10973_v35 = vld [vmem:[%s20048_s1 + $0xf90] sm:$0xf0]  ;;  %v10848_v40 = vor.u32 %v13367_v24, %v10845_v27  ;;  %v13299_v41 = vld [vmem:[%s20048_s1 + $0xc64] sm:$0xf]  ;;  %v5033_v57 = vpop.f32.mrf.mxu2 }
 0x237   : > { %5298 = vmatpush.bf16.msra.mxu3 %v11008_v60  ;;  %v10573_v42 = vld [vmem:[%s20048_s1 + $0xc70] sm:$0xf0]  ;;  %v13331_v43 = vld [vmem:[%s20048_s1 + $0xd64] sm:$0xf]  ;;  %v10976_v48 = vor.u32 %v13399_v33, %v10973_v35  ;;  %v5034_v61 = vadd.f32 %v5033_v57, %v5021_v44 }
 0x238   : > { %5260 = vmatpush.bf16.msra.mxu0 %v10608_v8  ;;  %v10701_v45 = vld [vmem:[%s20048_s1 + $0xd70] sm:$0xf0]  ;;  %v13363_v46 = vld [vmem:[%s20048_s1 + $0xe64] sm:$0xf]  ;;  %v10576_v6 = vor.u32 %v13299_v41, %v10573_v42  ;;  %v5009_v1 = vpop.f32.mrf.mxu0 }
 0x239   : > { %5273 = vmatpush.bf16.msra.mxu1 %v10736_v4  ;;  %v10829_v47 = vld [vmem:[%s20048_s1 + $0xe70] sm:$0xf0]  ;;  %v13395_v49 = vld [vmem:[%s20048_s1 + $0xf64] sm:$0xf]  ;;  %v10704_v51 = vor.u32 %v13331_v43, %v10701_v45  ;;  %v5022_v4 = vpop.f32.mrf.mxu1 }
 0x23a   : > { %5286 = vmatpush.bf16.msra.mxu2 %v10864_v5  ;;  %v10957_v50 = vld [vmem:[%s20048_s1 + $0xf70] sm:$0xf0]  ;;  %v10832_v52 = vor.u32 %v13363_v46, %v10829_v47  ;;  %v13295_v53 = vld [vmem:[%s20048_s1 + $0xc44] sm:$0xf]  ;;  %v16572_v5 = vadd.f32 %v5046_v62, %v5034_v61 }
 0x23b   : > { %5299 = vmatpush.bf16.msra.mxu3 %v10992_v22  ;;  %v10557_v54 = vld [vmem:[%s20048_s1 + $0xc50] sm:$0xf0]  ;;  %v13327_v55 = vld [vmem:[%s20048_s1 + $0xd44] sm:$0xf]  ;;  %v10960_v56 = vor.u32 %v13395_v49, %v10957_v50 }
 0x23c   : > { %5261 = vmatpush.bf16.msra.mxu0 %v10592_v37  ;;  %v10685_v58 = vld [vmem:[%s20048_s1 + $0xd50] sm:$0xf0]  ;;  %v13359_v59 = vld [vmem:[%s20048_s1 + $0xe44] sm:$0xf]  ;;  %v10560_v8 = vor.u32 %v13295_v53, %v10557_v54 }
 0x23d   : > { %5274 = vmatpush.bf16.msra.mxu1 %v10720_v39  ;;  %v10813_v60 = vld [vmem:[%s20048_s1 + $0xe50] sm:$0xf0]  ;;  %v13391_v63 = vld [vmem:[%s20048_s1 + $0xf44] sm:$0xf]  ;;  %v10688_v10 = vor.u32 %v13327_v55, %v10685_v58 }
 0x23e   : > { %5287 = vmatpush.bf16.msra.mxu2 %v10848_v40  ;;  %v10941_v0 = vld [vmem:[%s20048_s1 + $0xf50] sm:$0xf0]  ;;  %v10816_v11 = vor.u32 %v13359_v59, %v10813_v60  ;;  %v13291_v15 = vld [vmem:[%s20048_s1 + $0xc24] sm:$0xf]  ;;  %v5035_v49 = vpop.f32.mrf.mxu2 }
 0x23f   : > { %5300 = vmatpush.bf16.msra.mxu3 %v10976_v48  ;;  %v10541_v22 = vld [vmem:[%s20048_s1 + $0xc30] sm:$0xf0]  ;;  %v13323_v23 = vld [vmem:[%s20048_s1 + $0xd24] sm:$0xf]  ;;  %v10944_v24 = vor.u32 %v13391_v63, %v10941_v0 }
 0x240   : > { %5262 = vmatpush.bf16.msra.mxu0 %v10576_v6  ;;  %v10669_v27 = vld [vmem:[%s20048_s1 + $0xd30] sm:$0xf0]  ;;  %v13355_v29 = vld [vmem:[%s20048_s1 + $0xe24] sm:$0xf]  ;;  %v10544_v37 = vor.u32 %v13291_v15, %v10541_v22 }
 0x241   : > { %5275 = vmatpush.bf16.msra.mxu1 %v10704_v51  ;;  %v10797_v33 = vld [vmem:[%s20048_s1 + $0xe30] sm:$0xf0]  ;;  %v13387_v35 = vld [vmem:[%s20048_s1 + $0xf24] sm:$0xf]  ;;  %v10672_v40 = vor.u32 %v13323_v23, %v10669_v27 }
 0x242   : > { %5288 = vmatpush.bf16.msra.mxu2 %v10832_v52  ;;  %v10925_v36 = vld [vmem:[%s20048_s1 + $0xf30] sm:$0xf0]  ;;  %v13287_v38 = vld [vmem:[%s20048_s1 + $0xc04] sm:$0xf]  ;;  %v10800_v41 = vor.u32 %v13355_v29, %v10797_v33  ;;  %v5048_v52 = vpop.f32.mrf.mxu3 }
 0x243   : > { %5301 = vmatpush.bf16.msra.mxu3 %v10960_v56  ;;  %v10525_v39 = vld [vmem:[%s20048_s1 + $0xc10] sm:$0xf0]  ;;  %v13319_v42 = vld [vmem:[%s20048_s1 + $0xd04] sm:$0xf]  ;;  %v10928_v44 = vor.u32 %v13387_v35, %v10925_v36 }
 0x244   : > { %5263 = vmatpush.bf16.msra.mxu0 %v10560_v8  ;;  %v10653_v43 = vld [vmem:[%s20048_s1 + $0xd10] sm:$0xf0]  ;;  %v13351_v48 = vld [vmem:[%s20048_s1 + $0xe04] sm:$0xf]  ;;  %v10528_v53 = vor.u32 %v13287_v38, %v10525_v39 }
 0x245   : > { %5276 = vmatpush.bf16.msra.mxu1 %v10688_v10  ;;  %v10781_v45 = vld [vmem:[%s20048_s1 + $0xe10] sm:$0xf0]  ;;  %v13383_v46 = vld [vmem:[%s20048_s1 + $0xf04] sm:$0xf]  ;;  %v10656_v57 = vor.u32 %v13319_v42, %v10653_v43 }
 0x246   : > { %5289 = vmatpush.bf16.msra.mxu2 %v10816_v11  ;;  %v10909_v47 = vld [vmem:[%s20048_s1 + $0xf10] sm:$0xf0]  ;;  %v13443_v50 = vld [vmem:[%s20048_s1 + $0x10e4] sm:$0xf]  ;;  %v10784_v58 = vor.u32 %v13351_v48, %v10781_v45 }
 0x247   : > { %5302 = vmatpush.bf16.msra.mxu3 %v10944_v24  ;;  %v11149_v6 = vld [vmem:[%s20048_s1 + $0x10f0] sm:$0xf0]  ;;  %v13475_v51 = vld [vmem:[%s20048_s1 + $0x11e4] sm:$0xf]  ;;  %v10912_v61 = vor.u32 %v13383_v46, %v10909_v47 }
 0x248   : > { %5264 = vmatpush.bf16.msra.mxu0 %v10544_v37  ;;  %v11277_v54 = vld [vmem:[%s20048_s1 + $0x11f0] sm:$0xf0]  ;;  %v13507_v55 = vld [vmem:[%s20048_s1 + $0x12e4] sm:$0xf]  ;;  %v11152_v62 = vor.u32 %v13443_v50, %v11149_v6 }
 0x249   : > { %v11405_v56 = vld [vmem:[%s20048_s1 + $0x12f0] sm:$0xf0]  ;;  %5277 = vmatpush.bf16.msra.mxu1 %v10672_v40  ;;  %v13539_v59 = vld [vmem:[%s20048_s1 + $0x13e4] sm:$0xf]  ;;  %v11280_v63 = vor.u32 %v13475_v51, %v11277_v54 }
 0x24a   : > { %5290 = vmatpush.bf16.msra.mxu2 %v10800_v41  ;;  %v11533_v60 = vld [vmem:[%s20048_s1 + $0x13f0] sm:$0xf0]  ;;  %v11408_v0 = vor.u32 %v13507_v55, %v11405_v56  ;;  %v13439_v1 = vld [vmem:[%s20048_s1 + $0x10c4] sm:$0xf] }
 0x24b   : > { %5303 = vmatpush.bf16.msra.mxu3 %v10928_v44  ;;  %v11133_v8 = vld [vmem:[%s20048_s1 + $0x10d0] sm:$0xf0]  ;;  %v13471_v4 = vld [vmem:[%s20048_s1 + $0x11c4] sm:$0xf]  ;;  %v11536_v10 = vor.u32 %v13539_v59, %v11533_v60 }
 0x24c   : > { %5265 = vmatpush.bf16.msra.mxu0 %v10528_v53  ;;  %v11261_v11 = vld [vmem:[%s20048_s1 + $0x11d0] sm:$0xf0]  ;;  %v13503_v15 = vld [vmem:[%s20048_s1 + $0x12c4] sm:$0xf]  ;;  %v11136_v27 = vor.u32 %v13439_v1, %v11133_v8 }
 0x24d   : > { %v11389_v22 = vld [vmem:[%s20048_s1 + $0x12d0] sm:$0xf0]  ;;  %5278 = vmatpush.bf16.msra.mxu1 %v10656_v57  ;;  %v13535_v23 = vld [vmem:[%s20048_s1 + $0x13c4] sm:$0xf]  ;;  %v11264_v29 = vor.u32 %v13471_v4, %v11261_v11 }
 0x24e   : > { %5291 = vmatpush.bf16.msra.mxu2 %v10784_v58  ;;  %v11517_v24 = vld [vmem:[%s20048_s1 + $0x13d0] sm:$0xf0]  ;;  %v11392_v33 = vor.u32 %v13503_v15, %v11389_v22  ;;  %v13435_v35 = vld [vmem:[%s20048_s1 + $0x10a4] sm:$0xf]  ;;  %v5059_v53 = vpop.f32.mrf.mxu0  ;;  %v5072_v58 = vpop.f32.mrf.mxu1 }
 0x24f   : > { %5304 = vmatpush.bf16.msra.mxu3 %v10912_v61  ;;  %v11117_v36 = vld [vmem:[%s20048_s1 + $0x10b0] sm:$0xf0]  ;;  %v13467_v37 = vld [vmem:[%s20048_s1 + $0x11a4] sm:$0xf]  ;;  %5266 = vmatmul.bf16.vlgmr.msra.gmra.mxu0 %v15633_v7  ;;  %v11520_v38 = vor.u32 %v13535_v23, %v11517_v24  ;;  %v5060_v56 = vadd.f32 %v5059_v53, %v16572_v5 }
 0x250   : > { %5310 = vmatpush.bf16.msrb.mxu0 %v11152_v62  ;;  %v11245_v39 = vld [vmem:[%s20048_s1 + $0x11b0] sm:$0xf0]  ;;  %v13499_v40 = vld [vmem:[%s20048_s1 + $0x12a4] sm:$0xf]  ;;  %5279 = vmatmul.bf16.vlgmr.msra.gmra.mxu1 %v15646_v14  ;;  %v11120_v48 = vor.u32 %v13435_v35, %v11117_v36 }
 0x251   : > { %5323 = vmatpush.bf16.msrb.mxu1 %v11280_v63  ;;  %v11373_v41 = vld [vmem:[%s20048_s1 + $0x12b0] sm:$0xf0]  ;;  %5292 = vmatmul.bf16.vlgmr.msra.gmra.mxu2 %v15644_v13  ;;  %v13531_v42 = vld [vmem:[%s20048_s1 + $0x13a4] sm:$0xf]  ;;  %v11248_v44 = vor.u32 %v13467_v37, %v11245_v39 }
 0x252   : > { %5336 = vmatpush.bf16.msrb.mxu2 %v11408_v0  ;;  %v11501_v43 = vld [vmem:[%s20048_s1 + $0x13b0] sm:$0xf0]  ;;  %5305 = vmatmul.bf16.vlgmr.msra.gmra.mxu3 %v15654_v20  ;;  %v11376_v45 = vor.u32 %v13499_v40, %v11373_v41  ;;  %v13431_v46 = vld [vmem:[%s20048_s1 + $0x1084] sm:$0xf]  ;;  %v5073_v0 = vadd.f32 %v5072_v58, %v5060_v56 }
 0x253   : > { %5349 = vmatpush.bf16.msrb.mxu3 %v11536_v10  ;;  %v11101_v47 = vld [vmem:[%s20048_s1 + $0x1090] sm:$0xf0]  ;;  %v13463_v49 = vld [vmem:[%s20048_s1 + $0x1184] sm:$0xf]  ;;  %v11504_v50 = vor.u32 %v13531_v42, %v11501_v43 }
 0x254   : > { %5311 = vmatpush.bf16.msrb.mxu0 %v11136_v27  ;;  %v11229_v6 = vld [vmem:[%s20048_s1 + $0x1190] sm:$0xf0]  ;;  %v13495_v51 = vld [vmem:[%s20048_s1 + $0x1284] sm:$0xf]  ;;  %v11104_v57 = vor.u32 %v13431_v46, %v11101_v47 }
 0x255   : > { %5324 = vmatpush.bf16.msrb.mxu1 %v11264_v29  ;;  %v11357_v52 = vld [vmem:[%s20048_s1 + $0x1290] sm:$0xf0]  ;;  %v13527_v54 = vld [vmem:[%s20048_s1 + $0x1384] sm:$0xf]  ;;  %v11232_v59 = vor.u32 %v13463_v49, %v11229_v6  ;;  %v5098_v40 = vpop.f32.mrf.mxu3 }
 0x256   : > { %5337 = vmatpush.bf16.msrb.mxu2 %v11392_v33  ;;  %v11485_v55 = vld [vmem:[%s20048_s1 + $0x1390] sm:$0xf0]  ;;  %v11360_v60 = vor.u32 %v13495_v51, %v11357_v52  ;;  %v13427_v61 = vld [vmem:[%s20048_s1 + $0x1064] sm:$0xf]  ;;  %v5085_v35 = vpop.f32.mrf.mxu2  ;;  %v5061_v43 = vpop.f32.mrf.mxu0 }
 0x257   : > { %5350 = vmatpush.bf16.msrb.mxu3 %v11520_v38  ;;  %v11085_v62 = vld [vmem:[%s20048_s1 + $0x1070] sm:$0xf0]  ;;  %v13459_v63 = vld [vmem:[%s20048_s1 + $0x1164] sm:$0xf]  ;;  %v11488_v5 = vor.u32 %v13527_v54, %v11485_v55  ;;  %v5086_v39 = vadd.f32 %v5085_v35, %v5073_v0  ;;  %v9091_v43 = vld [vmem:[%s20048_s1 + $0xc8] sm:$0xf] }
 0x258   : > { %5312 = vmatpush.bf16.msrb.mxu0 %v11120_v48  ;;  %v11213_v1 = vld [vmem:[%s20048_s1 + $0x1170] sm:$0xf0]  ;;  %v13491_v8 = vld [vmem:[%s20048_s1 + $0x1264] sm:$0xf]  ;;  %v11088_v15 = vor.u32 %v13427_v61, %v11085_v62 }
 0x259   : > { %5325 = vmatpush.bf16.msrb.mxu1 %v11248_v44  ;;  %v11341_v4 = vld [vmem:[%s20048_s1 + $0x1270] sm:$0xf0]  ;;  %v13523_v10 = vld [vmem:[%s20048_s1 + $0x1364] sm:$0xf]  ;;  %v11216_v22 = vor.u32 %v13459_v63, %v11213_v1  ;;  %v5074_v44 = vpop.f32.mrf.mxu1 }
 0x25a   : > { %5338 = vmatpush.bf16.msrb.mxu2 %v11376_v45  ;;  %v11469_v11 = vld [vmem:[%s20048_s1 + $0x1370] sm:$0xf0]  ;;  %v11344_v23 = vor.u32 %v13491_v8, %v11341_v4  ;;  %v13423_v24 = vld [vmem:[%s20048_s1 + $0x1044] sm:$0xf]  ;;  %v16771_v45 = vadd.f32 %v5098_v40, %v5086_v39  ;;  %v9219_v44 = vld [vmem:[%s20048_s1 + $0x1c8] sm:$0xf] }
 0x25b   : > { %5351 = vmatpush.bf16.msrb.mxu3 %v11504_v50  ;;  %v11069_v27 = vld [vmem:[%s20048_s1 + $0x1050] sm:$0xf0]  ;;  %v13455_v29 = vld [vmem:[%s20048_s1 + $0x1144] sm:$0xf]  ;;  %v11472_v33 = vor.u32 %v13523_v10, %v11469_v11  ;;  %v9107_v11 = vld [vmem:[%s20048_s1 + $0xe8] sm:$0xf] }
 0x25c   : > { %5313 = vmatpush.bf16.msrb.mxu0 %v11104_v57  ;;  %v11197_v36 = vld [vmem:[%s20048_s1 + $0x1150] sm:$0xf0]  ;;  %v13487_v37 = vld [vmem:[%s20048_s1 + $0x1244] sm:$0xf]  ;;  %v11072_v48 = vor.u32 %v13423_v24, %v11069_v27  ;;  %v12966_v27 = vld [vmem:[%s20048_s1 + $0x1f4] sm:$0xf0] }
 0x25d   : > { %5326 = vmatpush.bf16.msrb.mxu1 %v11232_v59  ;;  %v11325_v38 = vld [vmem:[%s20048_s1 + $0x1250] sm:$0xf0]  ;;  %v13519_v41 = vld [vmem:[%s20048_s1 + $0x1344] sm:$0xf]  ;;  %v11200_v46 = vor.u32 %v13455_v29, %v11197_v36  ;;  %v9363_v29 = vld [vmem:[%s20048_s1 + $0x2e8] sm:$0xf] }
 0x25e   : > { %5339 = vmatpush.bf16.msrb.mxu2 %v11360_v60  ;;  %v11453_v42 = vld [vmem:[%s20048_s1 + $0x1350] sm:$0xf0]  ;;  %v11328_v47 = vor.u32 %v13487_v37, %v11325_v38  ;;  %v13419_v49 = vld [vmem:[%s20048_s1 + $0x1024] sm:$0xf]  ;;  %v5087_v10 = vpop.f32.mrf.mxu2  ;;  %v9491_v37 = vld [vmem:[%s20048_s1 + $0x3e8] sm:$0xf] }
 0x25f   : > { %5352 = vmatpush.bf16.msrb.mxu3 %v11488_v5  ;;  %v11053_v50 = vld [vmem:[%s20048_s1 + $0x1030] sm:$0xf0]  ;;  %v13451_v6 = vld [vmem:[%s20048_s1 + $0x1124] sm:$0xf]  ;;  %v11456_v51 = vor.u32 %v13519_v41, %v11453_v42  ;;  %v13030_v38 = vld [vmem:[%s20048_s1 + $0x3f4] sm:$0xf0] }
 0x260   : > { %5314 = vmatpush.bf16.msrb.mxu0 %v11088_v15  ;;  %v11181_v52 = vld [vmem:[%s20048_s1 + $0x1130] sm:$0xf0]  ;;  %v13483_v53 = vld [vmem:[%s20048_s1 + $0x1224] sm:$0xf]  ;;  %v11056_v57 = vor.u32 %v13419_v49, %v11053_v50  ;;  %v12934_v15 = vld [vmem:[%s20048_s1 + $0xf4] sm:$0xf0] }
 0x261   : > { %5327 = vmatpush.bf16.msrb.mxu1 %v11216_v22  ;;  %v11309_v54 = vld [vmem:[%s20048_s1 + $0x1230] sm:$0xf0]  ;;  %v13515_v55 = vld [vmem:[%s20048_s1 + $0x1324] sm:$0xf]  ;;  %v11184_v60 = vor.u32 %v13451_v6, %v11181_v52  ;;  %v9235_v22 = vld [vmem:[%s20048_s1 + $0x1e8] sm:$0xf]  ;;  %v9108_v40 = vor.u32 %v12934_v15, %v9107_v11 }
 0x262   : > { %5340 = vmatpush.bf16.msrb.mxu2 %v11344_v23  ;;  %v11437_v56 = vld [vmem:[%s20048_s1 + $0x1330] sm:$0xf0]  ;;  %v13415_v58 = vld [vmem:[%s20048_s1 + $0x1004] sm:$0xf]  ;;  %v11312_v61 = vor.u32 %v13483_v53, %v11309_v54  ;;  %v5100_v23 = vpop.f32.mrf.mxu3  ;;  %v9236_v41 = vor.u32 %v12966_v27, %v9235_v22  ;;  %v9347_v49 = vld [vmem:[%s20048_s1 + $0x2c8] sm:$0xf] }
 0x263   : > { %5353 = vmatpush.bf16.msrb.mxu3 %v11472_v33  ;;  %v11037_v59 = vld [vmem:[%s20048_s1 + $0x1010] sm:$0xf0]  ;;  %v13447_v62 = vld [vmem:[%s20048_s1 + $0x1104] sm:$0xf]  ;;  %v11440_v0 = vor.u32 %v13515_v55, %v11437_v56  ;;  %v12998_v33 = vld [vmem:[%s20048_s1 + $0x2f4] sm:$0xf0] }
 0x264   : > { %5315 = vmatpush.bf16.msrb.mxu0 %v11072_v48  ;;  %v11165_v63 = vld [vmem:[%s20048_s1 + $0x1110] sm:$0xf0]  ;;  %v13479_v5 = vld [vmem:[%s20048_s1 + $0x1204] sm:$0xf]  ;;  %v11040_v24 = vor.u32 %v13415_v58, %v11037_v59  ;;  %v9364_v42 = vor.u32 %v12998_v33, %v9363_v29  ;;  %v12930_v48 = vld [vmem:[%s20048_s1 + $0xd4] sm:$0xf0] }
 0x265   : > { %5328 = vmatpush.bf16.msrb.mxu1 %v11200_v46  ;;  %v11293_v1 = vld [vmem:[%s20048_s1 + $0x1210] sm:$0xf0]  ;;  %v13511_v8 = vld [vmem:[%s20048_s1 + $0x1304] sm:$0xf]  ;;  %v11168_v35 = vor.u32 %v13447_v62, %v11165_v63  ;;  %v9492_v46 = vor.u32 %v13030_v38, %v9491_v37  ;;  %v12994_v50 = vld [vmem:[%s20048_s1 + $0x2d4] sm:$0xf0]  ;;  %v9092_v52 = vor.u32 %v12930_v48, %v9091_v43 }
 0x266   : > { %5341 = vmatpush.bf16.msrb.mxu2 %v11328_v47  ;;  %v11421_v4 = vld [vmem:[%s20048_s1 + $0x1310] sm:$0xf0]  ;;  %v11296_v36 = vor.u32 %v13479_v5, %v11293_v1  ;;  %v12962_v47 = vld [vmem:[%s20048_s1 + $0x1d4] sm:$0xf0]  ;;  %v9475_v6 = vld [vmem:[%s20048_s1 + $0x3c8] sm:$0xf]  ;;  %v9348_v54 = vor.u32 %v12994_v50, %v9347_v49 }
 0x267   : > { %5354 = vmatpush.bf16.msrb.mxu3 %v11456_v51  ;;  %v11424_v39 = vor.u32 %v13511_v8, %v11421_v4  ;;  %v13026_v51 = vld [vmem:[%s20048_s1 + $0x3d4] sm:$0xf0]  ;;  %v9220_v53 = vor.u32 %v12962_v47, %v9219_v44  ;;  %v9075_v55 = vld [vmem:[%s20048_s1 + $0xa8] sm:$0xf]  ;;  %v13934_v11 = vld [vmem:[%s20049_s2] sm:$0xf] }
 0x268   : > { %5316 = vmatpush.bf16.msrb.mxu0 %v11056_v57  ;;  %v12926_v56 = vld [vmem:[%s20048_s1 + $0xb4] sm:$0xf0]  ;;  %v9203_v57 = vld [vmem:[%s20048_s1 + $0x1a8] sm:$0xf]  ;;  %v9476_v58 = vor.u32 %v13026_v51, %v9475_v6  ;;  %v1635_v15 = vperm.slane %v13934_v11, 1 }
 0x269   : > { %5329 = vmatpush.bf16.msrb.mxu1 %v11184_v60  ;;  %v12958_v59 = vld [vmem:[%s20048_s1 + $0x1b4] sm:$0xf0]  ;;  %v9331_v60 = vld [vmem:[%s20048_s1 + $0x2a8] sm:$0xf]  ;;  %v9076_v5 = vor.u32 %v12926_v56, %v9075_v55 }
 0x26a   : > { %5342 = vmatpush.bf16.msrb.mxu2 %v11312_v61  ;;  %v12990_v61 = vld [vmem:[%s20048_s1 + $0x2b4] sm:$0xf0]  ;;  %v9459_v62 = vld [vmem:[%s20048_s1 + $0x3a8] sm:$0xf]  ;;  %v9204_v1 = vor.u32 %v12958_v59, %v9203_v57 }
 0x26b   : > { %5355 = vmatpush.bf16.msrb.mxu3 %v11440_v0  ;;  %v13022_v63 = vld [vmem:[%s20048_s1 + $0x3b4] sm:$0xf0]  ;;  %v9059_v0 = vld [vmem:[%s20048_s1 + $0x88] sm:$0xf]  ;;  %v9332_v8 = vor.u32 %v12990_v61, %v9331_v60 }
 0x26c   : > { %5317 = vmatpush.bf16.msrb.mxu0 %v11040_v24  ;;  %v12922_v4 = vld [vmem:[%s20048_s1 + $0x94] sm:$0xf0]  ;;  %v9187_v10 = vld [vmem:[%s20048_s1 + $0x188] sm:$0xf]  ;;  %v9460_v22 = vor.u32 %v13022_v63, %v9459_v62 }
 0x26d   : > { %5330 = vmatpush.bf16.msrb.mxu1 %v11168_v35  ;;  %v12954_v23 = vld [vmem:[%s20048_s1 + $0x194] sm:$0xf0]  ;;  %v9315_v24 = vld [vmem:[%s20048_s1 + $0x288] sm:$0xf]  ;;  %v9060_v35 = vor.u32 %v12922_v4, %v9059_v0  ;;  %v5124_v43 = vpop.f32.mrf.mxu1 }
 0x26e   : > { %5343 = vmatpush.bf16.msrb.mxu2 %v11296_v36  ;;  %v12986_v27 = vld [vmem:[%s20048_s1 + $0x294] sm:$0xf0]  ;;  %v9443_v29 = vld [vmem:[%s20048_s1 + $0x388] sm:$0xf]  ;;  %v5111_v36 = vpop.f32.mrf.mxu0  ;;  %v9188_v37 = vor.u32 %v12954_v23, %v9187_v10 }
 0x26f   : > { %5356 = vmatpush.bf16.msrb.mxu3 %v11424_v39  ;;  %5318 = vmatmul.bf16.vlgmr.msrb.gmra.mxu0 %v15849_v18  ;;  %v13018_v33 = vld [vmem:[%s20048_s1 + $0x394] sm:$0xf0]  ;;  %v9316_v38 = vor.u32 %v12986_v27, %v9315_v24  ;;  %v9043_v39 = vld [vmem:[%s20048_s1 + $0x68] sm:$0xf] }
 0x270   : > { %5362 = vmatpush.bf16.msra.mxu0 %v9108_v40  ;;  %5331 = vmatmul.bf16.vlgmr.msrb.gmra.mxu1 %v15862_v26  ;;  %v12918_v40 = vld [vmem:[%s20048_s1 + $0x74] sm:$0xf0]  ;;  %v9444_v48 = vor.u32 %v13018_v33, %v9443_v29  ;;  %v9427_v49 = vld [vmem:[%s20048_s1 + $0x368] sm:$0xf] }
 0x271   : > { %5375 = vmatpush.bf16.msra.mxu1 %v9236_v41  ;;  %5344 = vmatmul.bf16.vlgmr.msrb.gmra.mxu2 %v15860_v25  ;;  %v9171_v41 = vld [vmem:[%s20048_s1 + $0x168] sm:$0xf]  ;;  %v12950_v44 = vld [vmem:[%s20048_s1 + $0x174] sm:$0xf0]  ;;  %v9044_v51 = vor.u32 %v12918_v40, %v9043_v39 }
 0x272   : > { %5388 = vmatpush.bf16.msra.mxu2 %v9364_v42  ;;  %5357 = vmatmul.bf16.vlgmr.msrb.gmra.mxu3 %v15870_v30  ;;  %v5112_v42 = vadd.f32 %v5111_v36, %v1635_v15  ;;  %v12982_v47 = vld [vmem:[%s20048_s1 + $0x274] sm:$0xf0]  ;;  %v9155_v56 = vld [vmem:[%s20048_s1 + $0x148] sm:$0xf] }
 0x273   : > { %5401 = vmatpush.bf16.msra.mxu3 %v9492_v46  ;;  %v9299_v46 = vld [vmem:[%s20048_s1 + $0x268] sm:$0xf]  ;;  %v13014_v50 = vld [vmem:[%s20048_s1 + $0x374] sm:$0xf0] }
 0x274   : > { %5363 = vmatpush.bf16.msra.mxu0 %v9092_v52  ;;  %v5125_v6 = vadd.f32 %v5124_v43, %v5112_v42  ;;  %v9172_v52 = vor.u32 %v12950_v44, %v9171_v41  ;;  %v12914_v55 = vld [vmem:[%s20048_s1 + $0x54] sm:$0xf0]  ;;  %v5137_v57 = vpop.f32.mrf.mxu2  ;;  %v9283_v60 = vld [vmem:[%s20048_s1 + $0x248] sm:$0xf] }
 0x275   : > { %5376 = vmatpush.bf16.msra.mxu1 %v9220_v53  ;;  %v9300_v53 = vor.u32 %v12982_v47, %v9299_v46  ;;  %v12946_v59 = vld [vmem:[%s20048_s1 + $0x154] sm:$0xf0]  ;;  %v5150_v63 = vpop.f32.mrf.mxu3  ;;  %v9011_v15 = vld [vmem:[%s20048_s1 + $0x28] sm:$0xf]  ;;  %v5126_v24 = vpop.f32.mrf.mxu1 }
 0x276   : > { %5389 = vmatpush.bf16.msra.mxu2 %v9348_v54  ;;  %v9027_v54 = vld [vmem:[%s20048_s1 + $0x48] sm:$0xf]  ;;  %v12978_v61 = vld [vmem:[%s20048_s1 + $0x254] sm:$0xf0]  ;;  %v5138_v62 = vadd.f32 %v5137_v57, %v5125_v6  ;;  %v5113_v4 = vpop.f32.mrf.mxu0  ;;  %v9156_v10 = vor.u32 %v12946_v59, %v9155_v56 }
 0x277   : > { %5402 = vmatpush.bf16.msra.mxu3 %v9476_v58  ;;  %v9428_v58 = vor.u32 %v13014_v50, %v9427_v49  ;;  %v13010_v0 = vld [vmem:[%s20048_s1 + $0x354] sm:$0xf0]  ;;  %v9284_v11 = vor.u32 %v12978_v61, %v9283_v60  ;;  %v9139_v23 = vld [vmem:[%s20048_s1 + $0x128] sm:$0xf] }
 0x278   : > { %5364 = vmatpush.bf16.msra.mxu0 %v9076_v5  ;;  %v9411_v5 = vld [vmem:[%s20048_s1 + $0x348] sm:$0xf]  ;;  %v12942_v29 = vld [vmem:[%s20048_s1 + $0x134] sm:$0xf0] }
 0x279   : > { %5377 = vmatpush.bf16.msra.mxu1 %v9204_v1  ;;  %v9028_v1 = vor.u32 %v12914_v55, %v9027_v54  ;;  %v9412_v27 = vor.u32 %v13010_v0, %v9411_v5  ;;  %v9267_v33 = vld [vmem:[%s20048_s1 + $0x228] sm:$0xf]  ;;  %v12906_v40 = vld [vmem:[%s20048_s1 + $0x14] sm:$0xf0]  ;;  %v9140_v41 = vor.u32 %v12942_v29, %v9139_v23 }
 0x27a   : > { %5390 = vmatpush.bf16.msra.mxu2 %v9332_v8  ;;  %v16972_v8 = vadd.f32 %v5150_v63, %v5138_v62  ;;  %v9395_v36 = vld [vmem:[%s20048_s1 + $0x328] sm:$0xf]  ;;  %v12970_v49 = vld [vmem:[%s20048_s1 + $0x214] sm:$0xf0] }
 0x27b   : > { %5403 = vmatpush.bf16.msra.mxu3 %v9460_v22  ;;  %v12910_v22 = vld [vmem:[%s20048_s1 + $0x34] sm:$0xf0]  ;;  %v8995_v39 = vld [vmem:[%s20048_s1 + $0x8] sm:$0xf] }
 0x27c   : > { %5365 = vmatpush.bf16.msra.mxu0 %v9060_v35  ;;  %v12974_v35 = vld [vmem:[%s20048_s1 + $0x234] sm:$0xf0]  ;;  %v9123_v43 = vld [vmem:[%s20048_s1 + $0x108] sm:$0xf]  ;;  %v5139_v46 = vpop.f32.mrf.mxu2  ;;  %v8996_v55 = vor.u32 %v12906_v40, %v8995_v39 }
 0x27d   : > { %5378 = vmatpush.bf16.msra.mxu1 %v9188_v37  ;;  %v13006_v37 = vld [vmem:[%s20048_s1 + $0x334] sm:$0xf0]  ;;  %v9268_v42 = vor.u32 %v12974_v35, %v9267_v33  ;;  %v9251_v44 = vld [vmem:[%s20048_s1 + $0x208] sm:$0xf] }
 0x27e   : > { %5391 = vmatpush.bf16.msra.mxu2 %v9316_v38  ;;  %v9012_v38 = vor.u32 %v12910_v22, %v9011_v15  ;;  %v9396_v47 = vor.u32 %v13006_v37, %v9395_v36  ;;  %v9379_v50 = vld [vmem:[%s20048_s1 + $0x308] sm:$0xf]  ;;  %v13002_v6 = vld [vmem:[%s20048_s1 + $0x314] sm:$0xf0]  ;;  %v9252_v60 = vor.u32 %v12970_v49, %v9251_v44 }
 0x27f   : > { %5404 = vmatpush.bf16.msra.mxu3 %v9444_v48  ;;  %v12938_v48 = vld [vmem:[%s20048_s1 + $0x114] sm:$0xf0]  ;;  %v9747_v54 = vld [vmem:[%s20048_s1 + $0x5e8] sm:$0xf]  ;;  %v9380_v63 = vor.u32 %v13002_v6, %v9379_v50 }
 0x280   : > { %5366 = vmatpush.bf16.msra.mxu0 %v9044_v51  ;;  %v5152_v51 = vpop.f32.mrf.mxu3  ;;  %v13094_v56 = vld [vmem:[%s20048_s1 + $0x5f4] sm:$0xf0]  ;;  %v9875_v57 = vld [vmem:[%s20048_s1 + $0x6e8] sm:$0xf]  ;;  %v9124_v59 = vor.u32 %v12938_v48, %v9123_v43 }
 0x281   : > { %5379 = vmatpush.bf16.msra.mxu1 %v9172_v52  ;;  %v9619_v52 = vld [vmem:[%s20048_s1 + $0x4e8] sm:$0xf]  ;;  %v13158_v62 = vld [vmem:[%s20048_s1 + $0x7f4] sm:$0xf0]  ;;  %v9748_v0 = vor.u32 %v13094_v56, %v9747_v54 }
 0x282   : > { %5392 = vmatpush.bf16.msra.mxu2 %v9300_v53  ;;  %v13062_v53 = vld [vmem:[%s20048_s1 + $0x4f4] sm:$0xf0]  ;;  %v10003_v61 = vld [vmem:[%s20048_s1 + $0x7e8] sm:$0xf] }
 0x283   : > { %5405 = vmatpush.bf16.msra.mxu3 %v9428_v58  ;;  %v13126_v58 = vld [vmem:[%s20048_s1 + $0x6f4] sm:$0xf0]  ;;  %v9620_v5 = vor.u32 %v13062_v53, %v9619_v52  ;;  %v9603_v4 = vld [vmem:[%s20048_s1 + $0x4c8] sm:$0xf]  ;;  %v10004_v15 = vor.u32 %v13158_v62, %v10003_v61 }
 0x284   : > { %5367 = vmatpush.bf16.msra.mxu0 %v9028_v1  ;;  %v9876_v1 = vor.u32 %v13126_v58, %v9875_v57  ;;  %v13090_v22 = vld [vmem:[%s20048_s1 + $0x5d4] sm:$0xf0]  ;;  %v9859_v23 = vld [vmem:[%s20048_s1 + $0x6c8] sm:$0xf] }
 0x285   : > { %5380 = vmatpush.bf16.msra.mxu1 %v9156_v10  ;;  %v13058_v10 = vld [vmem:[%s20048_s1 + $0x4d4] sm:$0xf0]  ;;  %v9587_v37 = vld [vmem:[%s20048_s1 + $0x4a8] sm:$0xf] }
 0x286   : > { %5393 = vmatpush.bf16.msra.mxu2 %v9284_v11  ;;  %v9731_v11 = vld [vmem:[%s20048_s1 + $0x5c8] sm:$0xf]  ;;  %v13122_v24 = vld [vmem:[%s20048_s1 + $0x6d4] sm:$0xf0]  ;;  %v9604_v33 = vor.u32 %v13058_v10, %v9603_v4 }
 0x287   : > { %5406 = vmatpush.bf16.msra.mxu3 %v9412_v27  ;;  %v9987_v27 = vld [vmem:[%s20048_s1 + $0x7c8] sm:$0xf]  ;;  %v13154_v29 = vld [vmem:[%s20048_s1 + $0x7d4] sm:$0xf0]  ;;  %v9732_v35 = vor.u32 %v13090_v22, %v9731_v11  ;;  %v9860_v36 = vor.u32 %v13122_v24, %v9859_v23 }
 0x288   : > { %5368 = vmatpush.bf16.msra.mxu0 %v9012_v38  ;;  %v13054_v38 = vld [vmem:[%s20048_s1 + $0x4b4] sm:$0xf0]  ;;  %v9715_v39 = vld [vmem:[%s20048_s1 + $0x5a8] sm:$0xf]  ;;  %v9988_v40 = vor.u32 %v13154_v29, %v9987_v27 }
 0x289   : > { %5381 = vmatpush.bf16.msra.mxu1 %v9140_v41  ;;  %v13086_v41 = vld [vmem:[%s20048_s1 + $0x5b4] sm:$0xf0]  ;;  %v9971_v48 = vld [vmem:[%s20048_s1 + $0x7a8] sm:$0xf]  ;;  %v9588_v46 = vor.u32 %v13054_v38, %v9587_v37 }
 0x28a   : > { %5394 = vmatpush.bf16.msra.mxu2 %v9268_v42  ;;  %v9843_v42 = vld [vmem:[%s20048_s1 + $0x6a8] sm:$0xf]  ;;  %v13118_v43 = vld [vmem:[%s20048_s1 + $0x6b4] sm:$0xf0] }
 0x28b   : > { %5407 = vmatpush.bf16.msra.mxu3 %v9396_v47  ;;  %v13150_v44 = vld [vmem:[%s20048_s1 + $0x7b4] sm:$0xf0]  ;;  %v9716_v47 = vor.u32 %v13086_v41, %v9715_v39  ;;  %v9844_v49 = vor.u32 %v13118_v43, %v9843_v42  ;;  %v9571_v50 = vld [vmem:[%s20048_s1 + $0x488] sm:$0xf] }
 0x28c   : > { %5369 = vmatpush.bf16.msra.mxu0 %v8996_v55  ;;  %v13050_v6 = vld [vmem:[%s20048_s1 + $0x494] sm:$0xf0]  ;;  %v9699_v51 = vld [vmem:[%s20048_s1 + $0x588] sm:$0xf]  ;;  %v9972_v52 = vor.u32 %v13150_v44, %v9971_v48 }
 0x28d   : > { %5382 = vmatpush.bf16.msra.mxu1 %v9124_v59  ;;  %v13082_v53 = vld [vmem:[%s20048_s1 + $0x594] sm:$0xf0]  ;;  %v9827_v54 = vld [vmem:[%s20048_s1 + $0x688] sm:$0xf]  ;;  %v9572_v58 = vor.u32 %v13050_v6, %v9571_v50  ;;  %v5163_v59 = vpop.f32.mrf.mxu0 }
 0x28e   : > { %5395 = vmatpush.bf16.msra.mxu2 %v9252_v60  ;;  %v13114_v55 = vld [vmem:[%s20048_s1 + $0x694] sm:$0xf0]  ;;  %v9955_v56 = vld [vmem:[%s20048_s1 + $0x788] sm:$0xf]  ;;  %v9700_v60 = vor.u32 %v13082_v53, %v9699_v51 }
 0x28f   : > { %5408 = vmatpush.bf16.msra.mxu3 %v9380_v63  ;;  %5370 = vmatmul.bf16.vlgmr.msra.gmra.mxu0 %v15029_v3  ;;  %v13146_v57 = vld [vmem:[%s20048_s1 + $0x794] sm:$0xf0]  ;;  %v9828_v61 = vor.u32 %v13114_v55, %v9827_v54  ;;  %v9555_v62 = vld [vmem:[%s20048_s1 + $0x468] sm:$0xf] }
 0x290   : > { %5414 = vmatpush.bf16.msrb.mxu0 %v9620_v5  ;;  %5383 = vmatmul.bf16.vlgmr.msra.gmra.mxu1 %v15066_v19  ;;  %v13046_v63 = vld [vmem:[%s20048_s1 + $0x474] sm:$0xf0]  ;;  %v9683_v5 = vld [vmem:[%s20048_s1 + $0x568] sm:$0xf]  ;;  %v9956_v4 = vor.u32 %v13146_v57, %v9955_v56 }
 0x291   : > { %5427 = vmatpush.bf16.msrb.mxu1 %v9748_v0  ;;  %5396 = vmatmul.bf16.vlgmr.msra.gmra.mxu2 %v15027_v2  ;;  %v5164_v0 = vadd.f32 %v5163_v59, %v16972_v8  ;;  %v13078_v10 = vld [vmem:[%s20048_s1 + $0x574] sm:$0xf0]  ;;  %v9811_v11 = vld [vmem:[%s20048_s1 + $0x668] sm:$0xf]  ;;  %v9556_v24 = vor.u32 %v13046_v63, %v9555_v62 }
 0x292   : > { %5440 = vmatpush.bf16.msrb.mxu2 %v9876_v1  ;;  %5409 = vmatmul.bf16.vlgmr.msra.gmra.mxu3 %v15043_v9  ;;  %v5176_v1 = vpop.f32.mrf.mxu1  ;;  %v9939_v22 = vld [vmem:[%s20048_s1 + $0x768] sm:$0xf]  ;;  %v13142_v8 = vld [vmem:[%s20048_s1 + $0x774] sm:$0xf0]  ;;  %v9684_v27 = vor.u32 %v13078_v10, %v9683_v5 }
 0x293   : > { %5453 = vmatpush.bf16.msrb.mxu3 %v10004_v15  ;;  %v13110_v15 = vld [vmem:[%s20048_s1 + $0x674] sm:$0xf0]  ;;  %v5177_v23 = vadd.f32 %v5176_v1, %v5164_v0  ;;  %v9940_v38 = vor.u32 %v13142_v8, %v9939_v22  ;;  %v9923_v48 = vld [vmem:[%s20048_s1 + $0x748] sm:$0xf] }
 0x294   : > { %5415 = vmatpush.bf16.msrb.mxu0 %v9604_v33  ;;  %v9812_v29 = vor.u32 %v13110_v15, %v9811_v11  ;;  %v9539_v33 = vld [vmem:[%s20048_s1 + $0x448] sm:$0xf]  ;;  %v5189_v37 = vpop.f32.mrf.mxu2  ;;  %v13074_v39 = vld [vmem:[%s20048_s1 + $0x554] sm:$0xf0] }
 0x295   : > { %5428 = vmatpush.bf16.msrb.mxu1 %v9732_v35  ;;  %v13042_v35 = vld [vmem:[%s20048_s1 + $0x454] sm:$0xf0]  ;;  %v5190_v42 = vadd.f32 %v5189_v37, %v5177_v23  ;;  %v5202_v43 = vpop.f32.mrf.mxu3  ;;  %v9523_v51 = vld [vmem:[%s20048_s1 + $0x428] sm:$0xf] }
 0x296   : > { %5441 = vmatpush.bf16.msrb.mxu2 %v9860_v36  ;;  %v9667_v36 = vld [vmem:[%s20048_s1 + $0x548] sm:$0xf]  ;;  %v13106_v41 = vld [vmem:[%s20048_s1 + $0x654] sm:$0xf0] }
 0x297   : > { %5454 = vmatpush.bf16.msrb.mxu3 %v9988_v40  ;;  %v9795_v40 = vld [vmem:[%s20048_s1 + $0x648] sm:$0xf]  ;;  %v13138_v44 = vld [vmem:[%s20048_s1 + $0x754] sm:$0xf0]  ;;  %v9668_v50 = vor.u32 %v13074_v39, %v9667_v36 }
 0x298   : > { %5416 = vmatpush.bf16.msrb.mxu0 %v9588_v46  ;;  %v9540_v46 = vor.u32 %v13042_v35, %v9539_v33  ;;  %v9796_v6 = vor.u32 %v13106_v41, %v9795_v40  ;;  %v9651_v53 = vld [vmem:[%s20048_s1 + $0x528] sm:$0xf]  ;;  %v9924_v55 = vor.u32 %v13138_v44, %v9923_v48  ;;  %v13070_v56 = vld [vmem:[%s20048_s1 + $0x534] sm:$0xf0] }
 0x299   : > { %5429 = vmatpush.bf16.msrb.mxu1 %v9716_v47  ;;  %v17171_v47 = vadd.f32 %v5202_v43, %v5190_v42  ;;  %v9779_v57 = vld [vmem:[%s20048_s1 + $0x628] sm:$0xf]  ;;  %v13034_v63 = vld [vmem:[%s20048_s1 + $0x414] sm:$0xf0]  ;;  %v9652_v5 = vor.u32 %v13070_v56, %v9651_v53 }
 0x29a   : > { %5442 = vmatpush.bf16.msrb.mxu2 %v9844_v49  ;;  %v5165_v49 = vpop.f32.mrf.mxu0  ;;  %v5178_v54 = vpop.f32.mrf.mxu1  ;;  %v9907_v59 = vld [vmem:[%s20048_s1 + $0x728] sm:$0xf]  ;;  %v13098_v22 = vld [vmem:[%s20048_s1 + $0x614] sm:$0xf0] }
 0x29b   : > { %5455 = vmatpush.bf16.msrb.mxu3 %v9972_v52  ;;  %v13038_v52 = vld [vmem:[%s20048_s1 + $0x434] sm:$0xf0]  ;;  %v9507_v62 = vld [vmem:[%s20048_s1 + $0x408] sm:$0xf] }
 0x29c   : > { %5417 = vmatpush.bf16.msrb.mxu0 %v9572_v58  ;;  %v13102_v58 = vld [vmem:[%s20048_s1 + $0x634] sm:$0xf0]  ;;  %v9635_v1 = vld [vmem:[%s20048_s1 + $0x508] sm:$0xf]  ;;  %v5191_v11 = vpop.f32.mrf.mxu2  ;;  %v9508_v35 = vor.u32 %v13034_v63, %v9507_v62 }
 0x29d   : > { %5430 = vmatpush.bf16.msrb.mxu1 %v9700_v60  ;;  %v13134_v60 = vld [vmem:[%s20048_s1 + $0x734] sm:$0xf0]  ;;  %v9780_v0 = vor.u32 %v13102_v58, %v9779_v57  ;;  %v9763_v10 = vld [vmem:[%s20048_s1 + $0x608] sm:$0xf] }
 0x29e   : > { %5443 = vmatpush.bf16.msrb.mxu2 %v9828_v61  ;;  %v9524_v61 = vor.u32 %v13038_v52, %v9523_v51  ;;  %v9908_v15 = vor.u32 %v13134_v60, %v9907_v59  ;;  %v9891_v8 = vld [vmem:[%s20048_s1 + $0x708] sm:$0xf]  ;;  %v13130_v23 = vld [vmem:[%s20048_s1 + $0x714] sm:$0xf0]  ;;  %v9764_v40 = vor.u32 %v13098_v22, %v9763_v10 }
 0x29f   : > { %5456 = vmatpush.bf16.msrb.mxu3 %v9956_v4  ;;  %v13066_v4 = vld [vmem:[%s20048_s1 + $0x514] sm:$0xf0]  ;;  %v10259_v33 = vld [vmem:[%s20048_s1 + $0x9e8] sm:$0xf]  ;;  %v9892_v43 = vor.u32 %v13130_v23, %v9891_v8 }
 0x2a0   : > { %5418 = vmatpush.bf16.msrb.mxu0 %v9556_v24  ;;  %v5204_v24 = vpop.f32.mrf.mxu3  ;;  %v13222_v36 = vld [vmem:[%s20048_s1 + $0x9f4] sm:$0xf0]  ;;  %v10387_v37 = vld [vmem:[%s20048_s1 + $0xae8] sm:$0xf]  ;;  %v9636_v39 = vor.u32 %v13066_v4, %v9635_v1 }
 0x2a1   : > { %5431 = vmatpush.bf16.msrb.mxu1 %v9684_v27  ;;  %v10131_v27 = vld [vmem:[%s20048_s1 + $0x8e8] sm:$0xf]  ;;  %v13286_v42 = vld [vmem:[%s20048_s1 + $0xbf4] sm:$0xf0]  ;;  %v10260_v44 = vor.u32 %v13222_v36, %v10259_v33 }
 0x2a2   : > { %5444 = vmatpush.bf16.msrb.mxu2 %v9812_v29  ;;  %v13190_v29 = vld [vmem:[%s20048_s1 + $0x8f4] sm:$0xf0]  ;;  %v10515_v41 = vld [vmem:[%s20048_s1 + $0xbe8] sm:$0xf] }
 0x2a3   : > { %5457 = vmatpush.bf16.msrb.mxu3 %v9940_v38  ;;  %v13254_v38 = vld [vmem:[%s20048_s1 + $0xaf4] sm:$0xf0]  ;;  %v10132_v48 = vor.u32 %v13190_v29, %v10131_v27  ;;  %v10115_v49 = vld [vmem:[%s20048_s1 + $0x8c8] sm:$0xf]  ;;  %v10516_v51 = vor.u32 %v13286_v42, %v10515_v41 }
 0x2a4   : > { %5419 = vmatpush.bf16.msrb.mxu0 %v9540_v46  ;;  %v10388_v46 = vor.u32 %v13254_v38, %v10387_v37  ;;  %v13218_v52 = vld [vmem:[%s20048_s1 + $0x9d4] sm:$0xf0]  ;;  %v10371_v53 = vld [vmem:[%s20048_s1 + $0xac8] sm:$0xf] }
 0x2a5   : > { %5432 = vmatpush.bf16.msrb.mxu1 %v9668_v50  ;;  %v13186_v50 = vld [vmem:[%s20048_s1 + $0x8d4] sm:$0xf0]  ;;  %v10099_v60 = vld [vmem:[%s20048_s1 + $0x8a8] sm:$0xf] }
 0x2a6   : > { %5445 = vmatpush.bf16.msrb.mxu2 %v9796_v6  ;;  %v10243_v6 = vld [vmem:[%s20048_s1 + $0x9c8] sm:$0xf]  ;;  %v13250_v54 = vld [vmem:[%s20048_s1 + $0xad4] sm:$0xf0]  ;;  %v10116_v57 = vor.u32 %v13186_v50, %v10115_v49 }
 0x2a7   : > { %5458 = vmatpush.bf16.msrb.mxu3 %v9924_v55  ;;  %v10499_v55 = vld [vmem:[%s20048_s1 + $0xbc8] sm:$0xf]  ;;  %v13282_v56 = vld [vmem:[%s20048_s1 + $0xbd4] sm:$0xf0]  ;;  %v10244_v58 = vor.u32 %v13218_v52, %v10243_v6  ;;  %v10372_v59 = vor.u32 %v13250_v54, %v10371_v53 }
 0x2a8   : > { %5420 = vmatpush.bf16.msrb.mxu0 %v9524_v61  ;;  %v13182_v61 = vld [vmem:[%s20048_s1 + $0x8b4] sm:$0xf0]  ;;  %v10227_v62 = vld [vmem:[%s20048_s1 + $0x9a8] sm:$0xf]  ;;  %v10500_v63 = vor.u32 %v13282_v56, %v10499_v55 }
 0x2a9   : > { %5433 = vmatpush.bf16.msrb.mxu1 %v9652_v5  ;;  %v13214_v5 = vld [vmem:[%s20048_s1 + $0x9b4] sm:$0xf0]  ;;  %v10483_v4 = vld [vmem:[%s20048_s1 + $0xba8] sm:$0xf]  ;;  %v10100_v11 = vor.u32 %v13182_v61, %v10099_v60 }
 0x2aa   : > { %5446 = vmatpush.bf16.msrb.mxu2 %v9780_v0  ;;  %v10355_v0 = vld [vmem:[%s20048_s1 + $0xaa8] sm:$0xf]  ;;  %v13246_v1 = vld [vmem:[%s20048_s1 + $0xab4] sm:$0xf0] }
 0x2ab   : > { %5459 = vmatpush.bf16.msrb.mxu3 %v9908_v15  ;;  %v13278_v10 = vld [vmem:[%s20048_s1 + $0xbb4] sm:$0xf0]  ;;  %v10228_v15 = vor.u32 %v13214_v5, %v10227_v62  ;;  %v10356_v22 = vor.u32 %v13246_v1, %v10355_v0  ;;  %v10083_v8 = vld [vmem:[%s20048_s1 + $0x888] sm:$0xf] }
 0x2ac   : > { %5421 = vmatpush.bf16.msrb.mxu0 %v9508_v35  ;;  %v13178_v23 = vld [vmem:[%s20048_s1 + $0x894] sm:$0xf0]  ;;  %v10211_v24 = vld [vmem:[%s20048_s1 + $0x988] sm:$0xf]  ;;  %v10484_v27 = vor.u32 %v13278_v10, %v10483_v4  ;;  %v5215_v36 = vpop.f32.mrf.mxu0 }
 0x2ad   : > { %5434 = vmatpush.bf16.msrb.mxu1 %v9636_v39  ;;  %v13210_v29 = vld [vmem:[%s20048_s1 + $0x994] sm:$0xf0]  ;;  %v10339_v33 = vld [vmem:[%s20048_s1 + $0xa88] sm:$0xf]  ;;  %v5216_v39 = vadd.f32 %v5215_v36, %v17171_v47  ;;  %v5228_v41 = vpop.f32.mrf.mxu1 }
 0x2ae   : > { %5447 = vmatpush.bf16.msrb.mxu2 %v9764_v40  ;;  %v13242_v35 = vld [vmem:[%s20048_s1 + $0xa94] sm:$0xf0]  ;;  %v10467_v37 = vld [vmem:[%s20048_s1 + $0xb88] sm:$0xf]  ;;  %v10084_v40 = vor.u32 %v13178_v23, %v10083_v8  ;;  %v10212_v42 = vor.u32 %v13210_v29, %v10211_v24 }
 0x2af   : > { %5460 = vmatpush.bf16.msrb.mxu3 %v9892_v43  ;;  %5422 = vmatmul.bf16.vlgmr.msrb.gmra.mxu0 %v15218_v31  ;;  %v13274_v38 = vld [vmem:[%s20048_s1 + $0xb94] sm:$0xf0]  ;;  %v10340_v43 = vor.u32 %v13242_v35, %v10339_v33  ;;  %v5229_v49 = vadd.f32 %v5228_v41, %v5216_v39  ;;  %v10323_v6 = vld [vmem:[%s20048_s1 + $0xa68] sm:$0xf] }
 0x2b0   : > { %5466 = vmatpush.bf16.msra.mxu0 %v10132_v48  ;;  %5435 = vmatmul.bf16.vlgmr.msrb.gmra.mxu1 %v15222_v34  ;;  %v10067_v48 = vld [vmem:[%s20048_s1 + $0x868] sm:$0xf]  ;;  %v10468_v47 = vor.u32 %v13274_v38, %v10467_v37  ;;  %v13206_v50 = vld [vmem:[%s20048_s1 + $0x974] sm:$0xf0] }
 0x2b1   : > { %5479 = vmatpush.bf16.msra.mxu1 %v10260_v44  ;;  %5448 = vmatmul.bf16.vlgmr.msrb.gmra.mxu2 %v15210_v28  ;;  %v13174_v44 = vld [vmem:[%s20048_s1 + $0x874] sm:$0xf0]  ;;  %v10451_v52 = vld [vmem:[%s20048_s1 + $0xb68] sm:$0xf] }
 0x2b2   : > { %5492 = vmatpush.bf16.msra.mxu2 %v10388_v46  ;;  %5461 = vmatmul.bf16.vlgmr.msrb.gmra.mxu3 %v15220_v32  ;;  %v10195_v46 = vld [vmem:[%s20048_s1 + $0x968] sm:$0xf]  ;;  %v13270_v53 = vld [vmem:[%s20048_s1 + $0xb74] sm:$0xf0]  ;;  %v10068_v54 = vor.u32 %v13174_v44, %v10067_v48 }
 0x2b3   : > { %5505 = vmatpush.bf16.msra.mxu3 %v10516_v51  ;;  %v13238_v51 = vld [vmem:[%s20048_s1 + $0xa74] sm:$0xf0]  ;;  %v10196_v55 = vor.u32 %v13206_v50, %v10195_v46  ;;  %v10452_v60 = vor.u32 %v13270_v53, %v10451_v52  ;;  %v10435_v4 = vld [vmem:[%s20048_s1 + $0xb48] sm:$0xf] }
 0x2b4   : > { %5467 = vmatpush.bf16.msra.mxu0 %v10116_v57  ;;  %v10324_v56 = vor.u32 %v13238_v51, %v10323_v6  ;;  %v10051_v57 = vld [vmem:[%s20048_s1 + $0x848] sm:$0xf]  ;;  %v5241_v61 = vpop.f32.mrf.mxu2  ;;  %v13202_v62 = vld [vmem:[%s20048_s1 + $0x954] sm:$0xf0] }
 0x2b5   : > { %5480 = vmatpush.bf16.msra.mxu1 %v10244_v58  ;;  %v13170_v58 = vld [vmem:[%s20048_s1 + $0x854] sm:$0xf0]  ;;  %v5242_v0 = vadd.f32 %v5241_v61, %v5229_v49  ;;  %v5254_v1 = vpop.f32.mrf.mxu3  ;;  %v10163_v33 = vld [vmem:[%s20048_s1 + $0x928] sm:$0xf] }
 0x2b6   : > { %5493 = vmatpush.bf16.msra.mxu2 %v10372_v59  ;;  %v10179_v59 = vld [vmem:[%s20048_s1 + $0x948] sm:$0xf]  ;;  %v13234_v5 = vld [vmem:[%s20048_s1 + $0xa54] sm:$0xf0] }
 0x2b7   : > { %5506 = vmatpush.bf16.msra.mxu3 %v10500_v63  ;;  %v10307_v63 = vld [vmem:[%s20048_s1 + $0xa48] sm:$0xf]  ;;  %v13266_v10 = vld [vmem:[%s20048_s1 + $0xb54] sm:$0xf0]  ;;  %v17370_v8 = vadd.f32 %v5254_v1, %v5242_v0  ;;  %v10180_v23 = vor.u32 %v13202_v62, %v10179_v59 }
 0x2b8   : > { %5468 = vmatpush.bf16.msra.mxu0 %v10100_v11  ;;  %v5217_v11 = vpop.f32.mrf.mxu0  ;;  %v10308_v24 = vor.u32 %v13234_v5, %v10307_v63  ;;  %v13166_v29 = vld [vmem:[%s20048_s1 + $0x834] sm:$0xf0]  ;;  %v10436_v35 = vor.u32 %v13266_v10, %v10435_v4  ;;  %v10291_v37 = vld [vmem:[%s20048_s1 + $0xa28] sm:$0xf] }
 0x2b9   : > { %5481 = vmatpush.bf16.msra.mxu1 %v10228_v15  ;;  %v10052_v15 = vor.u32 %v13170_v58, %v10051_v57  ;;  %v13198_v36 = vld [vmem:[%s20048_s1 + $0x934] sm:$0xf0]  ;;  %v10419_v39 = vld [vmem:[%s20048_s1 + $0xb28] sm:$0xf] }
 0x2ba   : > { %5494 = vmatpush.bf16.msra.mxu2 %v10356_v22  ;;  %v5230_v22 = vpop.f32.mrf.mxu1  ;;  %v13230_v38 = vld [vmem:[%s20048_s1 + $0xa34] sm:$0xf0]  ;;  %v10164_v48 = vor.u32 %v13198_v36, %v10163_v33  ;;  %v10147_v46 = vld [vmem:[%s20048_s1 + $0x908] sm:$0xf] }
 0x2bb   : > { %5507 = vmatpush.bf16.msra.mxu3 %v10484_v27  ;;  %v10035_v27 = vld [vmem:[%s20048_s1 + $0x828] sm:$0xf]  ;;  %v10292_v44 = vor.u32 %v13230_v38, %v10291_v37  ;;  %v13226_v6 = vld [vmem:[%s20048_s1 + $0xa14] sm:$0xf0] }
 0x2bc   : > { %5469 = vmatpush.bf16.msra.mxu0 %v10084_v40  ;;  %v13262_v40 = vld [vmem:[%s20048_s1 + $0xb34] sm:$0xf0]  ;;  %v10036_v41 = vor.u32 %v13166_v29, %v10035_v27  ;;  %v10275_v49 = vld [vmem:[%s20048_s1 + $0xa08] sm:$0xf]  ;;  %v5243_v53 = vpop.f32.mrf.mxu2 }
 0x2bd   : > { %5482 = vmatpush.bf16.msra.mxu1 %v10212_v42  ;;  %v10019_v42 = vld [vmem:[%s20048_s1 + $0x808] sm:$0xf]  ;;  %v10420_v50 = vor.u32 %v13262_v40, %v10419_v39  ;;  %v13258_v52 = vld [vmem:[%s20048_s1 + $0xb14] sm:$0xf0]  ;;  %v5256_v57 = vpop.f32.mrf.mxu3  ;;  %v10276_v63 = vor.u32 %v13226_v6, %v10275_v49 }
 0x2be   : > { %5495 = vmatpush.bf16.msra.mxu2 %v10340_v43  ;;  %v13162_v43 = vld [vmem:[%s20048_s1 + $0x814] sm:$0xf0]  ;;  %v10403_v51 = vld [vmem:[%s20048_s1 + $0xb08] sm:$0xf] }
 0x2bf   : > { %5508 = vmatpush.bf16.msra.mxu3 %v10468_v47  ;;  %v13194_v47 = vld [vmem:[%s20048_s1 + $0x914] sm:$0xf0]  ;;  %v10020_v58 = vor.u32 %v13162_v43, %v10019_v42  ;;  %v11027_v5 = vld [vmem:[%s20048_s1 + $0xfe8] sm:$0xf]  ;;  %v10404_v1 = vor.u32 %v13258_v52, %v10403_v51 }
 0x2c0   : > { %5470 = vmatpush.bf16.msra.mxu0 %v10068_v54  ;;  %v10643_v54 = vld [vmem:[%s20048_s1 + $0xce8] sm:$0xf]  ;;  %v13350_v59 = vld [vmem:[%s20048_s1 + $0xdf4] sm:$0xf0]  ;;  %v10148_v62 = vor.u32 %v13194_v47, %v10147_v46 }
 0x2c1   : > { %5483 = vmatpush.bf16.msra.mxu1 %v10196_v55  ;;  %v13318_v55 = vld [vmem:[%s20048_s1 + $0xcf4] sm:$0xf0]  ;;  %v10883_v29 = vld [vmem:[%s20048_s1 + $0xec8] sm:$0xf] }
 0x2c2   : > { %5496 = vmatpush.bf16.msra.mxu2 %v10324_v56  ;;  %v10771_v56 = vld [vmem:[%s20048_s1 + $0xde8] sm:$0xf]  ;;  %v13382_v61 = vld [vmem:[%s20048_s1 + $0xef4] sm:$0xf0]  ;;  %v10644_v4 = vor.u32 %v13318_v55, %v10643_v54 }
 0x2c3   : > { %5509 = vmatpush.bf16.msra.mxu3 %v10452_v60  ;;  %v10899_v60 = vld [vmem:[%s20048_s1 + $0xee8] sm:$0xf]  ;;  %v13414_v0 = vld [vmem:[%s20048_s1 + $0xff4] sm:$0xf0]  ;;  %v10772_v10 = vor.u32 %v13350_v59, %v10771_v56 }
 0x2c4   : > { %5471 = vmatpush.bf16.msra.mxu0 %v10052_v15  ;;  %v10900_v11 = vor.u32 %v13382_v61, %v10899_v60  ;;  %v10627_v15 = vld [vmem:[%s20048_s1 + $0xcc8] sm:$0xf]  ;;  %v13314_v22 = vld [vmem:[%s20048_s1 + $0xcd4] sm:$0xf0] }
 0x2c5   : > { %5484 = vmatpush.bf16.msra.mxu1 %v10180_v23  ;;  %v10755_v23 = vld [vmem:[%s20048_s1 + $0xdc8] sm:$0xf]  ;;  %v13346_v27 = vld [vmem:[%s20048_s1 + $0xdd4] sm:$0xf0]  ;;  %v10628_v37 = vor.u32 %v13314_v22, %v10627_v15 }
 0x2c6   : > { %5497 = vmatpush.bf16.msra.mxu2 %v10308_v24  ;;  %v11028_v24 = vor.u32 %v13414_v0, %v11027_v5  ;;  %v13378_v33 = vld [vmem:[%s20048_s1 + $0xed4] sm:$0xf0]  ;;  %v10756_v38 = vor.u32 %v13346_v27, %v10755_v23  ;;  %v10611_v40 = vld [vmem:[%s20048_s1 + $0xca8] sm:$0xf] }
 0x2c7   : > { %5510 = vmatpush.bf16.msra.mxu3 %v10436_v35  ;;  %v11011_v35 = vld [vmem:[%s20048_s1 + $0xfc8] sm:$0xf]  ;;  %v13410_v36 = vld [vmem:[%s20048_s1 + $0xfd4] sm:$0xf0]  ;;  %v10884_v39 = vor.u32 %v13378_v33, %v10883_v29 }
 0x2c8   : > { %5472 = vmatpush.bf16.msra.mxu0 %v10036_v41  ;;  %v13310_v41 = vld [vmem:[%s20048_s1 + $0xcb4] sm:$0xf0]  ;;  %v10739_v42 = vld [vmem:[%s20048_s1 + $0xda8] sm:$0xf]  ;;  %v11012_v43 = vor.u32 %v13410_v36, %v11011_v35 }
 0x2c9   : > { %5485 = vmatpush.bf16.msra.mxu1 %v10164_v48  ;;  %v13342_v48 = vld [vmem:[%s20048_s1 + $0xdb4] sm:$0xf0]  ;;  %v10995_v47 = vld [vmem:[%s20048_s1 + $0xfa8] sm:$0xf] }
 0x2ca   : > { %5498 = vmatpush.bf16.msra.mxu2 %v10292_v44  ;;  %v10867_v44 = vld [vmem:[%s20048_s1 + $0xea8] sm:$0xf]  ;;  %v13374_v46 = vld [vmem:[%s20048_s1 + $0xeb4] sm:$0xf0]  ;;  %v10740_v6 = vor.u32 %v13342_v48, %v10739_v42 }
 0x2cb   : > { %5511 = vmatpush.bf16.msra.mxu3 %v10420_v50  ;;  %v13406_v49 = vld [vmem:[%s20048_s1 + $0xfb4] sm:$0xf0]  ;;  %v10612_v50 = vor.u32 %v13310_v41, %v10611_v40  ;;  %v10868_v51 = vor.u32 %v13374_v46, %v10867_v44  ;;  %v10595_v52 = vld [vmem:[%s20048_s1 + $0xc88] sm:$0xf] }
 0x2cc   : > { %5473 = vmatpush.bf16.msra.mxu0 %v10020_v58  ;;  %v13306_v53 = vld [vmem:[%s20048_s1 + $0xc94] sm:$0xf0]  ;;  %v10723_v54 = vld [vmem:[%s20048_s1 + $0xd88] sm:$0xf]  ;;  %v10996_v55 = vor.u32 %v13406_v49, %v10995_v47  ;;  %v5267_v59 = vpop.f32.mrf.mxu0 }
 0x2cd   : > { %5486 = vmatpush.bf16.msra.mxu1 %v10148_v62  ;;  %v13338_v56 = vld [vmem:[%s20048_s1 + $0xd94] sm:$0xf0]  ;;  %v10851_v57 = vld [vmem:[%s20048_s1 + $0xe88] sm:$0xf]  ;;  %v5268_v62 = vadd.f32 %v5267_v59, %v17370_v8  ;;  %v5280_v5 = vpop.f32.mrf.mxu1 }
 0x2ce   : > { %5499 = vmatpush.bf16.msra.mxu2 %v10276_v63  ;;  %v13370_v58 = vld [vmem:[%s20048_s1 + $0xe94] sm:$0xf0]  ;;  %v10979_v60 = vld [vmem:[%s20048_s1 + $0xf88] sm:$0xf]  ;;  %v10596_v63 = vor.u32 %v13306_v53, %v10595_v52  ;;  %v10724_v0 = vor.u32 %v13338_v56, %v10723_v54 }
 0x2cf   : > { %5512 = vmatpush.bf16.msra.mxu3 %v10404_v1  ;;  %5474 = vmatmul.bf16.vlgmr.msra.gmra.mxu0 %v15417_v12  ;;  %v13402_v61 = vld [vmem:[%s20048_s1 + $0xf94] sm:$0xf0]  ;;  %v10852_v1 = vor.u32 %v13370_v58, %v10851_v57  ;;  %v5281_v15 = vadd.f32 %v5280_v5, %v5268_v62  ;;  %v10835_v23 = vld [vmem:[%s20048_s1 + $0xe68] sm:$0xf] }
 0x2d0   : > { %5518 = vmatpush.bf16.msrb.mxu0 %v10644_v4  ;;  %5487 = vmatmul.bf16.vlgmr.msra.gmra.mxu1 %v15430_v17  ;;  %v10579_v4 = vld [vmem:[%s20048_s1 + $0xc68] sm:$0xf]  ;;  %v10980_v8 = vor.u32 %v13402_v61, %v10979_v60  ;;  %v13334_v22 = vld [vmem:[%s20048_s1 + $0xd74] sm:$0xf0] }
 0x2d1   : > { %5531 = vmatpush.bf16.msrb.mxu1 %v10772_v10  ;;  %5500 = vmatmul.bf16.vlgmr.msra.gmra.mxu2 %v15428_v16  ;;  %v13302_v10 = vld [vmem:[%s20048_s1 + $0xc74] sm:$0xf0]  ;;  %v10963_v27 = vld [vmem:[%s20048_s1 + $0xf68] sm:$0xf] }
 0x2d2   : > { %5544 = vmatpush.bf16.msrb.mxu2 %v10900_v11  ;;  %5513 = vmatmul.bf16.vlgmr.msra.gmra.mxu3 %v15438_v21  ;;  %v10707_v11 = vld [vmem:[%s20048_s1 + $0xd68] sm:$0xf]  ;;  %v13398_v29 = vld [vmem:[%s20048_s1 + $0xf74] sm:$0xf0]  ;;  %v10580_v33 = vor.u32 %v13302_v10, %v10579_v4 }
 0x2d3   : > { %5557 = vmatpush.bf16.msrb.mxu3 %v11028_v24  ;;  %v13366_v24 = vld [vmem:[%s20048_s1 + $0xe74] sm:$0xf0]  ;;  %v10708_v35 = vor.u32 %v13334_v22, %v10707_v11  ;;  %v10964_v40 = vor.u32 %v13398_v29, %v10963_v27  ;;  %v10947_v47 = vld [vmem:[%s20048_s1 + $0xf48] sm:$0xf] }
 0x2d4   : > { %5519 = vmatpush.bf16.msrb.mxu0 %v10628_v37  ;;  %v10836_v36 = vor.u32 %v13366_v24, %v10835_v23  ;;  %v10563_v37 = vld [vmem:[%s20048_s1 + $0xc48] sm:$0xf]  ;;  %v5293_v41 = vpop.f32.mrf.mxu2  ;;  %v13330_v42 = vld [vmem:[%s20048_s1 + $0xd54] sm:$0xf0] }
 0x2d5   : > { %5532 = vmatpush.bf16.msrb.mxu1 %v10756_v38  ;;  %v13298_v38 = vld [vmem:[%s20048_s1 + $0xc54] sm:$0xf0]  ;;  %v5294_v44 = vadd.f32 %v5293_v41, %v5281_v15  ;;  %v5306_v46 = vpop.f32.mrf.mxu3  ;;  %v10675_v57 = vld [vmem:[%s20048_s1 + $0xd28] sm:$0xf] }
 0x2d6   : > { %5545 = vmatpush.bf16.msrb.mxu2 %v10884_v39  ;;  %v10691_v39 = vld [vmem:[%s20048_s1 + $0xd48] sm:$0xf]  ;;  %v13362_v48 = vld [vmem:[%s20048_s1 + $0xe54] sm:$0xf0] }
 0x2d7   : > { %5558 = vmatpush.bf16.msrb.mxu3 %v11012_v43  ;;  %v10819_v43 = vld [vmem:[%s20048_s1 + $0xe48] sm:$0xf]  ;;  %v13394_v49 = vld [vmem:[%s20048_s1 + $0xf54] sm:$0xf0]  ;;  %v17569_v52 = vadd.f32 %v5306_v46, %v5294_v44  ;;  %v10692_v53 = vor.u32 %v13330_v42, %v10691_v39 }
 0x2d8   : > { %5520 = vmatpush.bf16.msrb.mxu0 %v10612_v50  ;;  %v5269_v50 = vpop.f32.mrf.mxu0  ;;  %v10820_v54 = vor.u32 %v13362_v48, %v10819_v43  ;;  %v13294_v56 = vld [vmem:[%s20048_s1 + $0xc34] sm:$0xf0]  ;;  %v10948_v58 = vor.u32 %v13394_v49, %v10947_v47  ;;  %v10803_v60 = vld [vmem:[%s20048_s1 + $0xe28] sm:$0xf] }
 0x2d9   : > { %5533 = vmatpush.bf16.msrb.mxu1 %v10740_v6  ;;  %v10564_v6 = vor.u32 %v13298_v38, %v10563_v37  ;;  %v13326_v59 = vld [vmem:[%s20048_s1 + $0xd34] sm:$0xf0]  ;;  %v10931_v62 = vld [vmem:[%s20048_s1 + $0xf28] sm:$0xf] }
 0x2da   : > { %5546 = vmatpush.bf16.msrb.mxu2 %v10868_v51  ;;  %v5282_v51 = vpop.f32.mrf.mxu1  ;;  %v13358_v61 = vld [vmem:[%s20048_s1 + $0xe34] sm:$0xf0]  ;;  %v10676_v4 = vor.u32 %v13326_v59, %v10675_v57  ;;  %v10659_v11 = vld [vmem:[%s20048_s1 + $0xd08] sm:$0xf] }
 0x2db   : > { %5559 = vmatpush.bf16.msrb.mxu3 %v10996_v55  ;;  %v10547_v55 = vld [vmem:[%s20048_s1 + $0xc28] sm:$0xf]  ;;  %v10804_v10 = vor.u32 %v13358_v61, %v10803_v60  ;;  %v13354_v23 = vld [vmem:[%s20048_s1 + $0xe14] sm:$0xf0] }
 0x2dc   : > { %5521 = vmatpush.bf16.msrb.mxu0 %v10596_v63  ;;  %v13390_v63 = vld [vmem:[%s20048_s1 + $0xf34] sm:$0xf0]  ;;  %v10548_v5 = vor.u32 %v13294_v56, %v10547_v55  ;;  %v10787_v15 = vld [vmem:[%s20048_s1 + $0xe08] sm:$0xf]  ;;  %v5295_v29 = vpop.f32.mrf.mxu2 }
 0x2dd   : > { %5534 = vmatpush.bf16.msrb.mxu1 %v10724_v0  ;;  %v10531_v0 = vld [vmem:[%s20048_s1 + $0xc08] sm:$0xf]  ;;  %v10932_v22 = vor.u32 %v13390_v63, %v10931_v62  ;;  %v13386_v27 = vld [vmem:[%s20048_s1 + $0xf14] sm:$0xf0]  ;;  %v5308_v37 = vpop.f32.mrf.mxu3  ;;  %v10788_v43 = vor.u32 %v13354_v23, %v10787_v15 }
 0x2de   : > { %5547 = vmatpush.bf16.msrb.mxu2 %v10852_v1  ;;  %v13290_v1 = vld [vmem:[%s20048_s1 + $0xc14] sm:$0xf0]  ;;  %v10915_v24 = vld [vmem:[%s20048_s1 + $0xf08] sm:$0xf] }
 0x2df   : > { %5560 = vmatpush.bf16.msrb.mxu3 %v10980_v8  ;;  %v13322_v8 = vld [vmem:[%s20048_s1 + $0xd14] sm:$0xf0]  ;;  %v10532_v38 = vor.u32 %v13290_v1, %v10531_v0  ;;  %v11539_v48 = vld [vmem:[%s20048_s1 + $0x13e8] sm:$0xf]  ;;  %v10916_v46 = vor.u32 %v13386_v27, %v10915_v24 }
 0x2e0   : > { %5522 = vmatpush.bf16.msrb.mxu0 %v10580_v33  ;;  %v11155_v33 = vld [vmem:[%s20048_s1 + $0x10e8] sm:$0xf]  ;;  %v13478_v39 = vld [vmem:[%s20048_s1 + $0x11f4] sm:$0xf0]  ;;  %v10660_v42 = vor.u32 %v13322_v8, %v10659_v11 }
 0x2e1   : > { %5535 = vmatpush.bf16.msrb.mxu1 %v10708_v35  ;;  %v13446_v35 = vld [vmem:[%s20048_s1 + $0x10f4] sm:$0xf0]  ;;  %v11395_v56 = vld [vmem:[%s20048_s1 + $0x12c8] sm:$0xf] }
 0x2e2   : > { %5548 = vmatpush.bf16.msrb.mxu2 %v10836_v36  ;;  %v11283_v36 = vld [vmem:[%s20048_s1 + $0x11e8] sm:$0xf]  ;;  %v13510_v41 = vld [vmem:[%s20048_s1 + $0x12f4] sm:$0xf0]  ;;  %v11156_v47 = vor.u32 %v13446_v35, %v11155_v33 }
 0x2e3   : > { %5561 = vmatpush.bf16.msrb.mxu3 %v10964_v40  ;;  %v11411_v40 = vld [vmem:[%s20048_s1 + $0x12e8] sm:$0xf]  ;;  %v13542_v44 = vld [vmem:[%s20048_s1 + $0x13f4] sm:$0xf0]  ;;  %v11284_v49 = vor.u32 %v13478_v39, %v11283_v36 }
 0x2e4   : > { %5523 = vmatpush.bf16.msrb.mxu0 %v10564_v6  ;;  %v11412_v50 = vor.u32 %v13510_v41, %v11411_v40  ;;  %v11139_v6 = vld [vmem:[%s20048_s1 + $0x10c8] sm:$0xf]  ;;  %v13442_v51 = vld [vmem:[%s20048_s1 + $0x10d4] sm:$0xf0] }
 0x2e5   : > { %5536 = vmatpush.bf16.msrb.mxu1 %v10692_v53  ;;  %v11267_v53 = vld [vmem:[%s20048_s1 + $0x11c8] sm:$0xf]  ;;  %v13474_v55 = vld [vmem:[%s20048_s1 + $0x11d4] sm:$0xf0]  ;;  %v11140_v60 = vor.u32 %v13442_v51, %v11139_v6 }
 0x2e6   : > { %5549 = vmatpush.bf16.msrb.mxu2 %v10820_v54  ;;  %v11540_v54 = vor.u32 %v13542_v44, %v11539_v48  ;;  %v13506_v57 = vld [vmem:[%s20048_s1 + $0x12d4] sm:$0xf0]  ;;  %v11268_v61 = vor.u32 %v13474_v55, %v11267_v53  ;;  %v11123_v63 = vld [vmem:[%s20048_s1 + $0x10a8] sm:$0xf] }
 0x2e7   : > { %5562 = vmatpush.bf16.msrb.mxu3 %v10948_v58  ;;  %v11523_v58 = vld [vmem:[%s20048_s1 + $0x13c8] sm:$0xf]  ;;  %v13538_v59 = vld [vmem:[%s20048_s1 + $0x13d4] sm:$0xf0]  ;;  %v11396_v62 = vor.u32 %v13506_v57, %v11395_v56 }
 0x2e8   : > { %5524 = vmatpush.bf16.msrb.mxu0 %v10548_v5  ;;  %v13438_v5 = vld [vmem:[%s20048_s1 + $0x10b4] sm:$0xf0]  ;;  %v11251_v0 = vld [vmem:[%s20048_s1 + $0x11a8] sm:$0xf]  ;;  %v11524_v1 = vor.u32 %v13538_v59, %v11523_v58 }
 0x2e9   : > { %5537 = vmatpush.bf16.msrb.mxu1 %v10676_v4  ;;  %v13470_v4 = vld [vmem:[%s20048_s1 + $0x11b4] sm:$0xf0]  ;;  %v11507_v8 = vld [vmem:[%s20048_s1 + $0x13a8] sm:$0xf] }
 0x2ea   : > { %5550 = vmatpush.bf16.msrb.mxu2 %v10804_v10  ;;  %v11379_v10 = vld [vmem:[%s20048_s1 + $0x12a8] sm:$0xf]  ;;  %v13502_v11 = vld [vmem:[%s20048_s1 + $0x12b4] sm:$0xf0]  ;;  %v11252_v23 = vor.u32 %v13470_v4, %v11251_v0 }
 0x2eb   : > { %5563 = vmatpush.bf16.msrb.mxu3 %v10932_v22  ;;  %v13534_v15 = vld [vmem:[%s20048_s1 + $0x13b4] sm:$0xf0]  ;;  %v11124_v22 = vor.u32 %v13438_v5, %v11123_v63  ;;  %v11380_v24 = vor.u32 %v13502_v11, %v11379_v10  ;;  %v11107_v27 = vld [vmem:[%s20048_s1 + $0x1088] sm:$0xf] }
 0x2ec   : > { %5525 = vmatpush.bf16.msrb.mxu0 %v10532_v38  ;;  %v13434_v29 = vld [vmem:[%s20048_s1 + $0x1094] sm:$0xf0]  ;;  %v11235_v33 = vld [vmem:[%s20048_s1 + $0x1188] sm:$0xf]  ;;  %v11508_v35 = vor.u32 %v13534_v15, %v11507_v8  ;;  %v5319_v39 = vpop.f32.mrf.mxu0 }
 0x2ed   : > { %5538 = vmatpush.bf16.msrb.mxu1 %v10660_v42  ;;  %v13466_v36 = vld [vmem:[%s20048_s1 + $0x1194] sm:$0xf0]  ;;  %v11363_v37 = vld [vmem:[%s20048_s1 + $0x1288] sm:$0xf]  ;;  %v5320_v42 = vadd.f32 %v5319_v39, %v17569_v52  ;;  %v5332_v48 = vpop.f32.mrf.mxu1 }
 0x2ee   : > { %5551 = vmatpush.bf16.msrb.mxu2 %v10788_v43  ;;  %v13498_v38 = vld [vmem:[%s20048_s1 + $0x1294] sm:$0xf0]  ;;  %v11491_v40 = vld [vmem:[%s20048_s1 + $0x1388] sm:$0xf]  ;;  %v11108_v43 = vor.u32 %v13434_v29, %v11107_v27  ;;  %v11236_v44 = vor.u32 %v13466_v36, %v11235_v33 }
 0x2ef   : > { %5564 = vmatpush.bf16.msrb.mxu3 %v10916_v46  ;;  %5526 = vmatmul.bf16.vlgmr.msrb.gmra.mxu0 %v15633_v7  ;;  %v13530_v41 = vld [vmem:[%s20048_s1 + $0x1394] sm:$0xf0]  ;;  %v11364_v46 = vor.u32 %v13498_v38, %v11363_v37  ;;  %v5333_v6 = vadd.f32 %v5332_v48, %v5320_v42  ;;  %v11347_v53 = vld [vmem:[%s20048_s1 + $0x1268] sm:$0xf] }
 0x2f0   : > { %5570 = vmatpush.bf16.msra.mxu0 %v11156_v47  ;;  %5539 = vmatmul.bf16.vlgmr.msrb.gmra.mxu1 %v15646_v14  ;;  %v11091_v47 = vld [vmem:[%s20048_s1 + $0x1068] sm:$0xf]  ;;  %v11492_v52 = vor.u32 %v13530_v41, %v11491_v40  ;;  %v13462_v51 = vld [vmem:[%s20048_s1 + $0x1174] sm:$0xf0] }
 0x2f1   : > { %5583 = vmatpush.bf16.msra.mxu1 %v11284_v49  ;;  %5552 = vmatmul.bf16.vlgmr.msrb.gmra.mxu2 %v15644_v13  ;;  %v13430_v49 = vld [vmem:[%s20048_s1 + $0x1074] sm:$0xf0]  ;;  %v11475_v55 = vld [vmem:[%s20048_s1 + $0x1368] sm:$0xf] }
 0x2f2   : > { %5596 = vmatpush.bf16.msra.mxu2 %v11412_v50  ;;  %5565 = vmatmul.bf16.vlgmr.msrb.gmra.mxu3 %v15654_v20  ;;  %v11219_v50 = vld [vmem:[%s20048_s1 + $0x1168] sm:$0xf]  ;;  %v13526_v56 = vld [vmem:[%s20048_s1 + $0x1374] sm:$0xf0]  ;;  %v11092_v57 = vor.u32 %v13430_v49, %v11091_v47 }
 0x2f3   : > { %5609 = vmatpush.bf16.msra.mxu3 %v11540_v54  ;;  %v13494_v54 = vld [vmem:[%s20048_s1 + $0x1274] sm:$0xf0]  ;;  %v11220_v58 = vor.u32 %v13462_v51, %v11219_v50  ;;  %v11476_v63 = vor.u32 %v13526_v56, %v11475_v55  ;;  %v11459_v8 = vld [vmem:[%s20048_s1 + $0x1348] sm:$0xf] }
 0x2f4   : > { %5571 = vmatpush.bf16.msra.mxu0 %v11140_v60  ;;  %v11348_v59 = vor.u32 %v13494_v54, %v11347_v53  ;;  %v11075_v60 = vld [vmem:[%s20048_s1 + $0x1048] sm:$0xf]  ;;  %v5345_v5 = vpop.f32.mrf.mxu2  ;;  %v13458_v0 = vld [vmem:[%s20048_s1 + $0x1154] sm:$0xf0] }
 0x2f5   : > { %5584 = vmatpush.bf16.msra.mxu1 %v11268_v61  ;;  %v13426_v61 = vld [vmem:[%s20048_s1 + $0x1054] sm:$0xf0]  ;;  %v5346_v10 = vadd.f32 %v5345_v5, %v5333_v6  ;;  %v5358_v11 = vpop.f32.mrf.mxu3  ;;  %v11187_v37 = vld [vmem:[%s20048_s1 + $0x1128] sm:$0xf]  ;;  %v9365_v5 = vld [vmem:[%s20048_s1 + $0x2f8] sm:$0xf0] }
 0x2f6   : > { %5597 = vmatpush.bf16.msra.mxu2 %v11396_v62  ;;  %v11203_v62 = vld [vmem:[%s20048_s1 + $0x1148] sm:$0xf]  ;;  %v13490_v4 = vld [vmem:[%s20048_s1 + $0x1254] sm:$0xf0] }
 0x2f7   : > { %5610 = vmatpush.bf16.msra.mxu3 %v11524_v1  ;;  %v11331_v1 = vld [vmem:[%s20048_s1 + $0x1248] sm:$0xf]  ;;  %v13522_v15 = vld [vmem:[%s20048_s1 + $0x1354] sm:$0xf0]  ;;  %v17768_v27 = vadd.f32 %v5358_v11, %v5346_v10  ;;  %v11204_v29 = vor.u32 %v13458_v0, %v11203_v62  ;;  %v9237_v62 = vld [vmem:[%s20048_s1 + $0x1f8] sm:$0xf0] }
 0x2f8   : > { %5572 = vmatpush.bf16.msra.mxu0 %v11124_v22  ;;  %v5321_v22 = vpop.f32.mrf.mxu0  ;;  %v11332_v33 = vor.u32 %v13490_v4, %v11331_v1  ;;  %v13422_v36 = vld [vmem:[%s20048_s1 + $0x1034] sm:$0xf0]  ;;  %v11460_v38 = vor.u32 %v13522_v15, %v11459_v8  ;;  %v11315_v40 = vld [vmem:[%s20048_s1 + $0x1228] sm:$0xf]  ;;  %v13028_v4 = vld [vmem:[%s20048_s1 + $0x3ec] sm:$0xf] }
 0x2f9   : > { %5585 = vmatpush.bf16.msra.mxu1 %v11252_v23  ;;  %v11076_v23 = vor.u32 %v13426_v61, %v11075_v60  ;;  %v13454_v39 = vld [vmem:[%s20048_s1 + $0x1134] sm:$0xf0]  ;;  %v11443_v42 = vld [vmem:[%s20048_s1 + $0x1328] sm:$0xf]  ;;  %v9493_v10 = vld [vmem:[%s20048_s1 + $0x3f8] sm:$0xf0] }
 0x2fa   : > { %5598 = vmatpush.bf16.msra.mxu2 %v11380_v24  ;;  %v5334_v24 = vpop.f32.mrf.mxu1  ;;  %v13486_v41 = vld [vmem:[%s20048_s1 + $0x1234] sm:$0xf0]  ;;  %v11188_v47 = vor.u32 %v13454_v39, %v11187_v37  ;;  %v11171_v50 = vld [vmem:[%s20048_s1 + $0x1108] sm:$0xf]  ;;  %v9349_v37 = vld [vmem:[%s20048_s1 + $0x2d8] sm:$0xf0] }
 0x2fb   : > { %5611 = vmatpush.bf16.msra.mxu3 %v11508_v35  ;;  %v11059_v35 = vld [vmem:[%s20048_s1 + $0x1028] sm:$0xf]  ;;  %v11316_v49 = vor.u32 %v13486_v41, %v11315_v40  ;;  %v13482_v53 = vld [vmem:[%s20048_s1 + $0x1214] sm:$0xf0]  ;;  %v9093_v24 = vld [vmem:[%s20048_s1 + $0xd8] sm:$0xf0] }
 0x2fc   : > { %5573 = vmatpush.bf16.msra.mxu0 %v11108_v43  ;;  %v13518_v43 = vld [vmem:[%s20048_s1 + $0x1334] sm:$0xf0]  ;;  %v11060_v48 = vor.u32 %v13422_v36, %v11059_v35  ;;  %v11299_v6 = vld [vmem:[%s20048_s1 + $0x1208] sm:$0xf]  ;;  %v5347_v56 = vpop.f32.mrf.mxu2  ;;  %v9221_v35 = vld [vmem:[%s20048_s1 + $0x1d8] sm:$0xf0] }
 0x2fd   : > { %5586 = vmatpush.bf16.msra.mxu1 %v11236_v44  ;;  %v11043_v44 = vld [vmem:[%s20048_s1 + $0x1008] sm:$0xf]  ;;  %v11444_v51 = vor.u32 %v13518_v43, %v11443_v42  ;;  %v13514_v55 = vld [vmem:[%s20048_s1 + $0x1314] sm:$0xf0]  ;;  %v5360_v60 = vpop.f32.mrf.mxu3  ;;  %v11300_v1 = vor.u32 %v13482_v53, %v11299_v6  ;;  %v12992_v36 = vld [vmem:[%s20048_s1 + $0x2cc] sm:$0xf] }
 0x2fe   : > { %5599 = vmatpush.bf16.msra.mxu2 %v11364_v46  ;;  %v13418_v46 = vld [vmem:[%s20048_s1 + $0x1014] sm:$0xf0]  ;;  %v11427_v54 = vld [vmem:[%s20048_s1 + $0x1308] sm:$0xf]  ;;  %v9477_v39 = vld [vmem:[%s20048_s1 + $0x3d8] sm:$0xf0]  ;;  %v9352_v42 = vor.u32 %v12992_v36, %v9349_v37 }
 0x2ff   : > { %5612 = vmatpush.bf16.msra.mxu3 %v11492_v52  ;;  %v13450_v52 = vld [vmem:[%s20048_s1 + $0x1114] sm:$0xf0]  ;;  %v11044_v61 = vor.u32 %v13418_v46, %v11043_v44  ;;  %v11428_v11 = vor.u32 %v13514_v55, %v11427_v54  ;;  %v12924_v43 = vld [vmem:[%s20048_s1 + $0xac] sm:$0xf]  ;;  %v9461_v6 = vld [vmem:[%s20048_s1 + $0x3b8] sm:$0xf0] }
 0x300   : > { %5574 = vmatpush.bf16.msra.mxu0 %v11092_v57  ;;  %v12932_v57 = vld [vmem:[%s20048_s1 + $0xec] sm:$0xf]  ;;  %v11172_v0 = vor.u32 %v13450_v52, %v11171_v50  ;;  %v9333_v50 = vld [vmem:[%s20048_s1 + $0x2b8] sm:$0xf0] }
 0x301   : > { %5587 = vmatpush.bf16.msra.mxu1 %v11220_v58  ;;  %v9109_v58 = vld [vmem:[%s20048_s1 + $0xf8] sm:$0xf0]  ;;  %v12956_v44 = vld [vmem:[%s20048_s1 + $0x1ac] sm:$0xf] }
 0x302   : > { %5600 = vmatpush.bf16.msra.mxu2 %v11348_v59  ;;  %v12964_v59 = vld [vmem:[%s20048_s1 + $0x1ec] sm:$0xf]  ;;  %v9112_v8 = vor.u32 %v12932_v57, %v9109_v58  ;;  %v9061_v56 = vld [vmem:[%s20048_s1 + $0x98] sm:$0xf0]  ;;  %v13935_v58 = vld [vmem:[%s20049_s2] sm:$0xf] }
 0x303   : > { %5613 = vmatpush.bf16.msra.mxu3 %v11476_v63  ;;  %v12996_v63 = vld [vmem:[%s20048_s1 + $0x2ec] sm:$0xf]  ;;  %v9240_v15 = vor.u32 %v12964_v59, %v9237_v62  ;;  %v1636_v59 = vperm.slane %v13935_v58, 2  ;;  %v9301_v36 = vld [vmem:[%s20048_s1 + $0x278] sm:$0xf0] }
 0x304   : > { %5575 = vmatpush.bf16.msra.mxu0 %v11076_v23  ;;  %v9368_v22 = vor.u32 %v12996_v63, %v9365_v5  ;;  %v12928_v23 = vld [vmem:[%s20048_s1 + $0xcc] sm:$0xf]  ;;  %v9317_v63 = vld [vmem:[%s20048_s1 + $0x298] sm:$0xf0] }
 0x305   : > { %5588 = vmatpush.bf16.msra.mxu1 %v11204_v29  ;;  %v12960_v29 = vld [vmem:[%s20048_s1 + $0x1cc] sm:$0xf]  ;;  %v9096_v40 = vor.u32 %v12928_v23, %v9093_v24 }
 0x306   : > { %5601 = vmatpush.bf16.msra.mxu2 %v11332_v33  ;;  %v9496_v33 = vor.u32 %v13028_v4, %v9493_v10  ;;  %v9224_v41 = vor.u32 %v12960_v29, %v9221_v35  ;;  %v13020_v52 = vld [vmem:[%s20048_s1 + $0x3ac] sm:$0xf] }
 0x307   : > { %5614 = vmatpush.bf16.msra.mxu3 %v11460_v38  ;;  %v13024_v38 = vld [vmem:[%s20048_s1 + $0x3cc] sm:$0xf]  ;;  %v9464_v60 = vor.u32 %v13020_v52, %v9461_v6  ;;  %v9285_v52 = vld [vmem:[%s20048_s1 + $0x258] sm:$0xf0] }
 0x308   : > { %5576 = vmatpush.bf16.msra.mxu0 %v11060_v48  ;;  %v9077_v48 = vld [vmem:[%s20048_s1 + $0xb8] sm:$0xf0]  ;;  %v9480_v46 = vor.u32 %v13024_v38, %v9477_v39  ;;  %v12920_v53 = vld [vmem:[%s20048_s1 + $0x8c] sm:$0xf] }
 0x309   : > { %5589 = vmatpush.bf16.msra.mxu1 %v11188_v47  ;;  %v9205_v47 = vld [vmem:[%s20048_s1 + $0x1b8] sm:$0xf0]  ;;  %v12952_v57 = vld [vmem:[%s20048_s1 + $0x18c] sm:$0xf] }
 0x30a   : > { %5602 = vmatpush.bf16.msra.mxu2 %v11316_v49  ;;  %v12988_v49 = vld [vmem:[%s20048_s1 + $0x2ac] sm:$0xf]  ;;  %v9208_v54 = vor.u32 %v12956_v44, %v9205_v47  ;;  %v9429_v38 = vld [vmem:[%s20048_s1 + $0x378] sm:$0xf0] }
 0x30b   : > { %5615 = vmatpush.bf16.msra.mxu3 %v11444_v51  ;;  %v9080_v51 = vor.u32 %v12924_v43, %v9077_v48  ;;  %v9336_v55 = vor.u32 %v12988_v49, %v9333_v50  ;;  %v12984_v62 = vld [vmem:[%s20048_s1 + $0x28c] sm:$0xf]  ;;  %v9029_v48 = vld [vmem:[%s20048_s1 + $0x58] sm:$0xf0] }
 0x30c   : > { %5577 = vmatpush.bf16.msra.mxu0 %v11044_v61  ;;  %v9189_v61 = vld [vmem:[%s20048_s1 + $0x198] sm:$0xf0]  ;;  %v13016_v5 = vld [vmem:[%s20048_s1 + $0x38c] sm:$0xf]  ;;  %v5371_v4 = vpop.f32.mrf.mxu0 }
 0x30d   : > { %5590 = vmatpush.bf16.msra.mxu1 %v11172_v0  ;;  %v9445_v0 = vld [vmem:[%s20048_s1 + $0x398] sm:$0xf0]  ;;  %v9192_v10 = vor.u32 %v12952_v57, %v9189_v61  ;;  %v5372_v23 = vadd.f32 %v5371_v4, %v1636_v59  ;;  %v5384_v24 = vpop.f32.mrf.mxu1  ;;  %v12980_v35 = vld [vmem:[%s20048_s1 + $0x26c] sm:$0xf] }
 0x30e   : > { %5603 = vmatpush.bf16.msra.mxu2 %v11300_v1  ;;  %v9064_v1 = vor.u32 %v12920_v53, %v9061_v56  ;;  %v9448_v29 = vor.u32 %v13016_v5, %v9445_v0  ;;  %v13012_v37 = vld [vmem:[%s20048_s1 + $0x36c] sm:$0xf]  ;;  %v9157_v49 = vld [vmem:[%s20048_s1 + $0x158] sm:$0xf0] }
 0x30f   : > { %5616 = vmatpush.bf16.msra.mxu3 %v11428_v11  ;;  %5578 = vmatmul.bf16.vlgmr.msra.gmra.mxu0 %v15849_v18  ;;  %v9320_v11 = vor.u32 %v12984_v62, %v9317_v63  ;;  %v5385_v39 = vadd.f32 %v5384_v24, %v5372_v23  ;;  %v12912_v43 = vld [vmem:[%s20048_s1 + $0x4c] sm:$0xf]  ;;  %v9432_v47 = vor.u32 %v13012_v37, %v9429_v38  ;;  %v9013_v61 = vld [vmem:[%s20048_s1 + $0x38] sm:$0xf0] }
 0x310   : > { %5622 = vmatpush.bf16.msrb.mxu0 %v9112_v8  ;;  %5591 = vmatmul.bf16.vlgmr.msra.gmra.mxu1 %v15862_v26  ;;  %v12916_v8 = vld [vmem:[%s20048_s1 + $0x6c] sm:$0xf]  ;;  %v9141_v0 = vld [vmem:[%s20048_s1 + $0x138] sm:$0xf0] }
 0x311   : > { %5635 = vmatpush.bf16.msrb.mxu1 %v9240_v15  ;;  %5604 = vmatmul.bf16.vlgmr.msra.gmra.mxu2 %v15860_v25  ;;  %v9045_v15 = vld [vmem:[%s20048_s1 + $0x78] sm:$0xf0]  ;;  %v12944_v44 = vld [vmem:[%s20048_s1 + $0x14c] sm:$0xf] }
 0x312   : > { %5648 = vmatpush.bf16.msrb.mxu2 %v9368_v22  ;;  %5617 = vmatmul.bf16.vlgmr.msra.gmra.mxu3 %v15870_v30  ;;  %v12948_v22 = vld [vmem:[%s20048_s1 + $0x16c] sm:$0xf]  ;;  %v9160_v58 = vor.u32 %v12944_v44, %v9157_v49  ;;  %v9269_v4 = vld [vmem:[%s20048_s1 + $0x238] sm:$0xf0] }
 0x313   : > { %5661 = vmatpush.bf16.msrb.mxu3 %v9496_v33  ;;  %v9173_v33 = vld [vmem:[%s20048_s1 + $0x178] sm:$0xf0]  ;;  %v12976_v50 = vld [vmem:[%s20048_s1 + $0x24c] sm:$0xf] }
 0x314   : > { %5623 = vmatpush.bf16.msrb.mxu0 %v9096_v40  ;;  %v9048_v40 = vor.u32 %v12916_v8, %v9045_v15  ;;  %v13008_v53 = vld [vmem:[%s20048_s1 + $0x34c] sm:$0xf]  ;;  %v5373_v57 = vpop.f32.mrf.mxu0  ;;  %v9288_v59 = vor.u32 %v12976_v50, %v9285_v52  ;;  %v9253_v38 = vld [vmem:[%s20048_s1 + $0x218] sm:$0xf0] }
 0x315   : > { %5636 = vmatpush.bf16.msrb.mxu1 %v9224_v41  ;;  %v9176_v41 = vor.u32 %v12948_v22, %v9173_v33  ;;  %v12940_v62 = vld [vmem:[%s20048_s1 + $0x12c] sm:$0xf]  ;;  %v5386_v63 = vpop.f32.mrf.mxu1  ;;  %v8997_v22 = vld [vmem:[%s20048_s1 + $0x18] sm:$0xf0] }
 0x316   : > { %5649 = vmatpush.bf16.msrb.mxu2 %v9352_v42  ;;  %v9304_v42 = vor.u32 %v12980_v35, %v9301_v36  ;;  %v12904_v15 = vld [vmem:[%s20048_s1 + $0xc] sm:$0xf]  ;;  %v9144_v23 = vor.u32 %v12940_v62, %v9141_v0  ;;  %v9125_v33 = vld [vmem:[%s20048_s1 + $0x118] sm:$0xf0] }
 0x317   : > { %5662 = vmatpush.bf16.msrb.mxu3 %v9480_v46  ;;  %v5397_v46 = vpop.f32.mrf.mxu2  ;;  %v12968_v35 = vld [vmem:[%s20048_s1 + $0x20c] sm:$0xf]  ;;  %v9000_v44 = vor.u32 %v12904_v15, %v8997_v22  ;;  %v9877_v49 = vld [vmem:[%s20048_s1 + $0x6f8] sm:$0xf0] }
 0x318   : > { %5624 = vmatpush.bf16.msrb.mxu0 %v9080_v51  ;;  %v5398_v6 = vadd.f32 %v5397_v46, %v5385_v39  ;;  %v5410_v51 = vpop.f32.mrf.mxu3  ;;  %v13000_v39 = vld [vmem:[%s20048_s1 + $0x30c] sm:$0xf]  ;;  %v9749_v46 = vld [vmem:[%s20048_s1 + $0x5f8] sm:$0xf0]  ;;  %v9256_v52 = vor.u32 %v12968_v35, %v9253_v38 }
 0x319   : > { %5637 = vmatpush.bf16.msrb.mxu1 %v9208_v54  ;;  %v9413_v54 = vld [vmem:[%s20048_s1 + $0x358] sm:$0xf0]  ;;  %v13120_v63 = vld [vmem:[%s20048_s1 + $0x6cc] sm:$0xf] }
 0x31a   : > { %5650 = vmatpush.bf16.msrb.mxu2 %v9336_v55  ;;  %v9032_v55 = vor.u32 %v12912_v43, %v9029_v48  ;;  %v17969_v56 = vadd.f32 %v5410_v51, %v5398_v6  ;;  %v9416_v5 = vor.u32 %v13008_v53, %v9413_v54  ;;  %v9621_v43 = vld [vmem:[%s20048_s1 + $0x4f8] sm:$0xf0]  ;;  %v13092_v48 = vld [vmem:[%s20048_s1 + $0x5ec] sm:$0xf] }
 0x31b   : > { %5663 = vmatpush.bf16.msrb.mxu3 %v9464_v60  ;;  %v12908_v60 = vld [vmem:[%s20048_s1 + $0x2c] sm:$0xf]  ;;  %v10005_v51 = vld [vmem:[%s20048_s1 + $0x7f8] sm:$0xf0] }
 0x31c   : > { %5625 = vmatpush.bf16.msrb.mxu0 %v9064_v1  ;;  %v12972_v1 = vld [vmem:[%s20048_s1 + $0x22c] sm:$0xf]  ;;  %v9016_v8 = vor.u32 %v12908_v60, %v9013_v61  ;;  %v9733_v62 = vld [vmem:[%s20048_s1 + $0x5d8] sm:$0xf0] }
 0x31d   : > { %5638 = vmatpush.bf16.msrb.mxu1 %v9192_v10  ;;  %v13004_v10 = vld [vmem:[%s20048_s1 + $0x32c] sm:$0xf]  ;;  %v9272_v24 = vor.u32 %v12972_v1, %v9269_v4  ;;  %v9989_v1 = vld [vmem:[%s20048_s1 + $0x7d8] sm:$0xf0] }
 0x31e   : > { %5651 = vmatpush.bf16.msrb.mxu2 %v9320_v11  ;;  %v9397_v11 = vld [vmem:[%s20048_s1 + $0x338] sm:$0xf0]  ;;  %v13156_v6 = vld [vmem:[%s20048_s1 + $0x7ec] sm:$0xf] }
 0x31f   : > { %5664 = vmatpush.bf16.msrb.mxu3 %v9448_v29  ;;  %v12936_v29 = vld [vmem:[%s20048_s1 + $0x10c] sm:$0xf]  ;;  %v5399_v36 = vpop.f32.mrf.mxu2  ;;  %v9400_v37 = vor.u32 %v13004_v10, %v9397_v11  ;;  %v10008_v61 = vor.u32 %v13156_v6, %v10005_v51  ;;  %v9589_v15 = vld [vmem:[%s20048_s1 + $0x4b8] sm:$0xf0] }
 0x320   : > { %5626 = vmatpush.bf16.msrb.mxu0 %v9048_v40  ;;  %v9381_v40 = vld [vmem:[%s20048_s1 + $0x318] sm:$0xf0]  ;;  %v9128_v50 = vor.u32 %v12936_v29, %v9125_v33  ;;  %v13088_v60 = vld [vmem:[%s20048_s1 + $0x5cc] sm:$0xf] }
 0x321   : > { %5639 = vmatpush.bf16.msrb.mxu1 %v9176_v41  ;;  %v5412_v41 = vpop.f32.mrf.mxu3  ;;  %v9384_v53 = vor.u32 %v13000_v39, %v9381_v40  ;;  %v13152_v0 = vld [vmem:[%s20048_s1 + $0x7cc] sm:$0xf]  ;;  %v9736_v10 = vor.u32 %v13088_v60, %v9733_v62  ;;  %v9845_v33 = vld [vmem:[%s20048_s1 + $0x6b8] sm:$0xf0] }
 0x322   : > { %5652 = vmatpush.bf16.msrb.mxu2 %v9304_v42  ;;  %v13060_v42 = vld [vmem:[%s20048_s1 + $0x4ec] sm:$0xf]  ;;  %v9973_v36 = vld [vmem:[%s20048_s1 + $0x7b8] sm:$0xf0] }
 0x323   : > { %5665 = vmatpush.bf16.msrb.mxu3 %v9432_v47  ;;  %v13124_v47 = vld [vmem:[%s20048_s1 + $0x6ec] sm:$0xf]  ;;  %v9624_v54 = vor.u32 %v13060_v42, %v9621_v43  ;;  %v9573_v40 = vld [vmem:[%s20048_s1 + $0x498] sm:$0xf0] }
 0x324   : > { %5627 = vmatpush.bf16.msrb.mxu0 %v9032_v55  ;;  %v9752_v55 = vor.u32 %v13092_v48, %v9749_v46  ;;  %v9880_v57 = vor.u32 %v13124_v47, %v9877_v49  ;;  %v13084_v22 = vld [vmem:[%s20048_s1 + $0x5ac] sm:$0xf]  ;;  %v9829_v42 = vld [vmem:[%s20048_s1 + $0x698] sm:$0xf0] }
 0x325   : > { %5640 = vmatpush.bf16.msrb.mxu1 %v9160_v58  ;;  %v13056_v58 = vld [vmem:[%s20048_s1 + $0x4cc] sm:$0xf]  ;;  %v9957_v48 = vld [vmem:[%s20048_s1 + $0x798] sm:$0xf0] }
 0x326   : > { %5653 = vmatpush.bf16.msrb.mxu2 %v9288_v59  ;;  %v9605_v59 = vld [vmem:[%s20048_s1 + $0x4d8] sm:$0xf0]  ;;  %v13116_v29 = vld [vmem:[%s20048_s1 + $0x6ac] sm:$0xf] }
 0x327   : > { %5666 = vmatpush.bf16.msrb.mxu3 %v9416_v5  ;;  %v9861_v5 = vld [vmem:[%s20048_s1 + $0x6d8] sm:$0xf0]  ;;  %v9608_v4 = vor.u32 %v13056_v58, %v9605_v59  ;;  %v13148_v35 = vld [vmem:[%s20048_s1 + $0x7ac] sm:$0xf] }
 0x328   : > { %5628 = vmatpush.bf16.msrb.mxu0 %v9016_v8  ;;  %v9864_v11 = vor.u32 %v13120_v63, %v9861_v5  ;;  %v13052_v8 = vld [vmem:[%s20048_s1 + $0x4ac] sm:$0xf]  ;;  %v9813_v58 = vld [vmem:[%s20048_s1 + $0x678] sm:$0xf0] }
 0x329   : > { %5641 = vmatpush.bf16.msrb.mxu1 %v9144_v23  ;;  %v9992_v23 = vor.u32 %v13152_v0, %v9989_v1  ;;  %v13048_v39 = vld [vmem:[%s20048_s1 + $0x48c] sm:$0xf]  ;;  %v9541_v0 = vld [vmem:[%s20048_s1 + $0x458] sm:$0xf0] }
 0x32a   : > { %5654 = vmatpush.bf16.msrb.mxu2 %v9272_v24  ;;  %v9717_v24 = vld [vmem:[%s20048_s1 + $0x5b8] sm:$0xf0]  ;;  %v13112_v41 = vld [vmem:[%s20048_s1 + $0x68c] sm:$0xf] }
 0x32b   : > { %5667 = vmatpush.bf16.msrb.mxu3 %v9400_v37  ;;  %v9592_v37 = vor.u32 %v13052_v8, %v9589_v15  ;;  %v9720_v38 = vor.u32 %v13084_v22, %v9717_v24  ;;  %v13144_v43 = vld [vmem:[%s20048_s1 + $0x78c] sm:$0xf]  ;;  %v9832_v49 = vor.u32 %v13112_v41, %v9829_v42  ;;  %v9797_v15 = vld [vmem:[%s20048_s1 + $0x658] sm:$0xf0] }
 0x32c   : > { %5629 = vmatpush.bf16.msrb.mxu0 %v9000_v44  ;;  %v9576_v44 = vor.u32 %v13048_v39, %v9573_v40  ;;  %v5423_v46 = vpop.f32.mrf.mxu0  ;;  %v13076_v6 = vld [vmem:[%s20048_s1 + $0x56c] sm:$0xf]  ;;  %v9525_v39 = vld [vmem:[%s20048_s1 + $0x438] sm:$0xf0] }
 0x32d   : > { %5642 = vmatpush.bf16.msrb.mxu1 %v9128_v50  ;;  %v13044_v50 = vld [vmem:[%s20048_s1 + $0x46c] sm:$0xf]  ;;  %v5424_v51 = vadd.f32 %v5423_v46, %v17969_v56  ;;  %v9941_v56 = vld [vmem:[%s20048_s1 + $0x778] sm:$0xf0] }
 0x32e   : > { %5655 = vmatpush.bf16.msrb.mxu2 %v9256_v52  ;;  %v9557_v52 = vld [vmem:[%s20048_s1 + $0x478] sm:$0xf0]  ;;  %v13140_v59 = vld [vmem:[%s20048_s1 + $0x76c] sm:$0xf] }
 0x32f   : > { %5668 = vmatpush.bf16.msrb.mxu3 %v9384_v53  ;;  %5630 = vmatmul.bf16.vlgmr.msrb.gmra.mxu0 %v15029_v3  ;;  %v13080_v3 = vld [vmem:[%s20048_s1 + $0x58c] sm:$0xf]  ;;  %v5436_v53 = vpop.f32.mrf.mxu1  ;;  %v9781_v42 = vld [vmem:[%s20048_s1 + $0x638] sm:$0xf0] }
 0x330   : > { %5674 = vmatpush.bf16.msra.mxu0 %v9624_v54  ;;  %5643 = vmatmul.bf16.vlgmr.msrb.gmra.mxu1 %v15066_v19  ;;  %v9701_v19 = vld [vmem:[%s20048_s1 + $0x598] sm:$0xf0]  ;;  %v9960_v54 = vor.u32 %v13144_v43, %v9957_v48  ;;  %v5437_v60 = vadd.f32 %v5436_v53, %v5424_v51  ;;  %v13040_v5 = vld [vmem:[%s20048_s1 + $0x44c] sm:$0xf] }
 0x331   : > { %5687 = vmatpush.bf16.msra.mxu1 %v9752_v55  ;;  %5656 = vmatmul.bf16.vlgmr.msrb.gmra.mxu2 %v15027_v2  ;;  %v9848_v2 = vor.u32 %v13116_v29, %v9845_v33  ;;  %v9704_v47 = vor.u32 %v13080_v3, %v9701_v19  ;;  %v9685_v55 = vld [vmem:[%s20048_s1 + $0x578] sm:$0xf0]  ;;  %v13072_v1 = vld [vmem:[%s20048_s1 + $0x54c] sm:$0xf]  ;;  %v9544_v33 = vor.u32 %v13040_v5, %v9541_v0 }
 0x332   : > { %5700 = vmatpush.bf16.msra.mxu2 %v9880_v57  ;;  %5669 = vmatmul.bf16.vlgmr.msrb.gmra.mxu3 %v15043_v9  ;;  %v9976_v9 = vor.u32 %v13148_v35, %v9973_v36  ;;  %v13108_v57 = vld [vmem:[%s20048_s1 + $0x66c] sm:$0xf]  ;;  %v9688_v62 = vor.u32 %v13076_v6, %v9685_v55  ;;  %v9925_v29 = vld [vmem:[%s20048_s1 + $0x758] sm:$0xf0] }
 0x333   : > { %5713 = vmatpush.bf16.msra.mxu3 %v10008_v61  ;;  %v9560_v61 = vor.u32 %v13044_v50, %v9557_v52  ;;  %v9816_v63 = vor.u32 %v13108_v57, %v9813_v58  ;;  %v13104_v8 = vld [vmem:[%s20048_s1 + $0x64c] sm:$0xf]  ;;  %v9653_v19 = vld [vmem:[%s20048_s1 + $0x538] sm:$0xf0] }
 0x334   : > { %5675 = vmatpush.bf16.msra.mxu0 %v9608_v4  ;;  %v5449_v4 = vpop.f32.mrf.mxu2  ;;  %v13136_v24 = vld [vmem:[%s20048_s1 + $0x74c] sm:$0xf]  ;;  %v5425_v36 = vpop.f32.mrf.mxu0  ;;  %v9909_v48 = vld [vmem:[%s20048_s1 + $0x738] sm:$0xf0] }
 0x335   : > { %5688 = vmatpush.bf16.msra.mxu1 %v9736_v10  ;;  %v9944_v10 = vor.u32 %v13140_v59, %v9941_v56  ;;  %v5450_v22 = vadd.f32 %v5449_v4, %v5437_v60  ;;  %v13068_v40 = vld [vmem:[%s20048_s1 + $0x52c] sm:$0xf]  ;;  %v9637_v6 = vld [vmem:[%s20048_s1 + $0x518] sm:$0xf0] }
 0x336   : > { %5701 = vmatpush.bf16.msra.mxu2 %v9864_v11  ;;  %v9669_v11 = vld [vmem:[%s20048_s1 + $0x558] sm:$0xf0]  ;;  %v13100_v41 = vld [vmem:[%s20048_s1 + $0x62c] sm:$0xf] }
 0x337   : > { %5714 = vmatpush.bf16.msra.mxu3 %v9992_v23  ;;  %v5462_v23 = vpop.f32.mrf.mxu3  ;;  %v5438_v3 = vpop.f32.mrf.mxu1  ;;  %v13132_v43 = vld [vmem:[%s20048_s1 + $0x72c] sm:$0xf]  ;;  %v9784_v50 = vor.u32 %v13100_v41, %v9781_v42  ;;  %v9765_v55 = vld [vmem:[%s20048_s1 + $0x618] sm:$0xf0] }
 0x338   : > { %5676 = vmatpush.bf16.msra.mxu0 %v9592_v37  ;;  %v18168_v35 = vadd.f32 %v5462_v23, %v5450_v22  ;;  %v9672_v37 = vor.u32 %v13072_v1, %v9669_v11  ;;  %v13032_v46 = vld [vmem:[%s20048_s1 + $0x40c] sm:$0xf]  ;;  %v9893_v58 = vld [vmem:[%s20048_s1 + $0x718] sm:$0xf0] }
 0x339   : > { %5689 = vmatpush.bf16.msra.mxu1 %v9720_v38  ;;  %v9800_v38 = vor.u32 %v13104_v8, %v9797_v15  ;;  %v13064_v52 = vld [vmem:[%s20048_s1 + $0x50c] sm:$0xf]  ;;  %v10133_v60 = vld [vmem:[%s20048_s1 + $0x8f8] sm:$0xf0] }
 0x33a   : > { %5702 = vmatpush.bf16.msra.mxu2 %v9848_v2  ;;  %v13036_v2 = vld [vmem:[%s20048_s1 + $0x42c] sm:$0xf]  ;;  %v10389_v0 = vld [vmem:[%s20048_s1 + $0xaf8] sm:$0xf0]  ;;  %v9640_v1 = vor.u32 %v13064_v52, %v9637_v6 }
 0x33b   : > { %5715 = vmatpush.bf16.msra.mxu3 %v9976_v9  ;;  %v9928_v9 = vor.u32 %v13136_v24, %v9925_v29  ;;  %v13096_v51 = vld [vmem:[%s20048_s1 + $0x60c] sm:$0xf]  ;;  %v10517_v11 = vld [vmem:[%s20048_s1 + $0xbf8] sm:$0xf0] }
 0x33c   : > { %5677 = vmatpush.bf16.msra.mxu0 %v9576_v44  ;;  %v9528_v44 = vor.u32 %v13036_v2, %v9525_v39  ;;  %v5451_v53 = vpop.f32.mrf.mxu2  ;;  %v13128_v57 = vld [vmem:[%s20048_s1 + $0x70c] sm:$0xf]  ;;  %v9768_v4 = vor.u32 %v13096_v51, %v9765_v55  ;;  %v10117_v29 = vld [vmem:[%s20048_s1 + $0x8d8] sm:$0xf0] }
 0x33d   : > { %5690 = vmatpush.bf16.msra.mxu1 %v9704_v47  ;;  %v9509_v47 = vld [vmem:[%s20048_s1 + $0x418] sm:$0xf0]  ;;  %v13188_v56 = vld [vmem:[%s20048_s1 + $0x8ec] sm:$0xf]  ;;  %v9896_v8 = vor.u32 %v13128_v57, %v9893_v58 }
 0x33e   : > { %5703 = vmatpush.bf16.msra.mxu2 %v9832_v49  ;;  %v9656_v49 = vor.u32 %v13068_v40, %v9653_v19  ;;  %v13252_v5 = vld [vmem:[%s20048_s1 + $0xaec] sm:$0xf]  ;;  %v10136_v15 = vor.u32 %v13188_v56, %v10133_v60  ;;  %v10373_v2 = vld [vmem:[%s20048_s1 + $0xad8] sm:$0xf0] }
 0x33f   : > { %5716 = vmatpush.bf16.msra.mxu3 %v9960_v54  ;;  %v9912_v54 = vor.u32 %v13132_v43, %v9909_v48  ;;  %v5464_v59 = vpop.f32.mrf.mxu3  ;;  %v10392_v23 = vor.u32 %v13252_v5, %v10389_v0  ;;  %v13184_v24 = vld [vmem:[%s20048_s1 + $0x8cc] sm:$0xf]  ;;  %v10501_v40 = vld [vmem:[%s20048_s1 + $0xbd8] sm:$0xf0] }
 0x340   : > { %5678 = vmatpush.bf16.msra.mxu0 %v9560_v61  ;;  %v13220_v61 = vld [vmem:[%s20048_s1 + $0x9ec] sm:$0xf]  ;;  %v10120_v3 = vor.u32 %v13184_v24, %v10117_v29  ;;  %v10101_v42 = vld [vmem:[%s20048_s1 + $0x8b8] sm:$0xf0] }
 0x341   : > { %5691 = vmatpush.bf16.msra.mxu1 %v9688_v62  ;;  %v9512_v62 = vor.u32 %v13032_v46, %v9509_v47  ;;  %v13280_v39 = vld [vmem:[%s20048_s1 + $0xbcc] sm:$0xf]  ;;  %v10357_v47 = vld [vmem:[%s20048_s1 + $0xab8] sm:$0xf0] }
 0x342   : > { %5704 = vmatpush.bf16.msra.mxu2 %v9816_v63  ;;  %v10261_v63 = vld [vmem:[%s20048_s1 + $0x9f8] sm:$0xf0]  ;;  %v13180_v41 = vld [vmem:[%s20048_s1 + $0x8ac] sm:$0xf]  ;;  %v10504_v48 = vor.u32 %v13280_v39, %v10501_v40 }
 0x343   : > { %5717 = vmatpush.bf16.msra.mxu3 %v9944_v10  ;;  %v13284_v10 = vld [vmem:[%s20048_s1 + $0xbec] sm:$0xf]  ;;  %v10264_v22 = vor.u32 %v13220_v61, %v10261_v63  ;;  %v10085_v53 = vld [vmem:[%s20048_s1 + $0x898] sm:$0xf0] }
 0x344   : > { %5679 = vmatpush.bf16.msra.mxu0 %v9544_v33  ;;  %v13216_v33 = vld [vmem:[%s20048_s1 + $0x9cc] sm:$0xf]  ;;  %v10520_v36 = vor.u32 %v13284_v10, %v10517_v11  ;;  %v10341_v55 = vld [vmem:[%s20048_s1 + $0xa98] sm:$0xf0] }
 0x345   : > { %5692 = vmatpush.bf16.msra.mxu1 %v9672_v37  ;;  %v10245_v37 = vld [vmem:[%s20048_s1 + $0x9d8] sm:$0xf0]  ;;  %v13212_v43 = vld [vmem:[%s20048_s1 + $0x9ac] sm:$0xf] }
 0x346   : > { %5705 = vmatpush.bf16.msra.mxu2 %v9800_v38  ;;  %v13248_v38 = vld [vmem:[%s20048_s1 + $0xacc] sm:$0xf]  ;;  %v10469_v59 = vld [vmem:[%s20048_s1 + $0xb98] sm:$0xf0] }
 0x347   : > { %5718 = vmatpush.bf16.msra.mxu3 %v9928_v9  ;;  %v10248_v9 = vor.u32 %v13216_v33, %v10245_v37  ;;  %v10376_v19 = vor.u32 %v13248_v38, %v10373_v2  ;;  %v13244_v46 = vld [vmem:[%s20048_s1 + $0xaac] sm:$0xf]  ;;  %v10069_v0 = vld [vmem:[%s20048_s1 + $0x878] sm:$0xf0] }
 0x348   : > { %5680 = vmatpush.bf16.msra.mxu0 %v9528_v44  ;;  %v10229_v44 = vld [vmem:[%s20048_s1 + $0x9b8] sm:$0xf0]  ;;  %v10360_v6 = vor.u32 %v13244_v46, %v10357_v47  ;;  %v13176_v51 = vld [vmem:[%s20048_s1 + $0x88c] sm:$0xf] }
 0x349   : > { %5693 = vmatpush.bf16.msra.mxu1 %v9656_v49  ;;  %v13276_v49 = vld [vmem:[%s20048_s1 + $0xbac] sm:$0xf]  ;;  %v10232_v52 = vor.u32 %v13212_v43, %v10229_v44  ;;  %v10088_v60 = vor.u32 %v13176_v51, %v10085_v53  ;;  %v10197_v10 = vld [vmem:[%s20048_s1 + $0x978] sm:$0xf0] }
 0x34a   : > { %5706 = vmatpush.bf16.msra.mxu2 %v9784_v50  ;;  %v10104_v50 = vor.u32 %v13180_v41, %v10101_v42  ;;  %v13272_v58 = vld [vmem:[%s20048_s1 + $0xb8c] sm:$0xf]  ;;  %v10181_v39 = vld [vmem:[%s20048_s1 + $0x958] sm:$0xf0] }
 0x34b   : > { %5719 = vmatpush.bf16.msra.mxu3 %v9912_v54  ;;  %v13240_v54 = vld [vmem:[%s20048_s1 + $0xa8c] sm:$0xf]  ;;  %v10437_v42 = vld [vmem:[%s20048_s1 + $0xb58] sm:$0xf0] }
 0x34c   : > { %5681 = vmatpush.bf16.msra.mxu0 %v9512_v62  ;;  %v5475_v57 = vpop.f32.mrf.mxu0  ;;  %v10344_v63 = vor.u32 %v13240_v54, %v10341_v55  ;;  %v13172_v5 = vld [vmem:[%s20048_s1 + $0x86c] sm:$0xf]  ;;  %v10165_v51 = vld [vmem:[%s20048_s1 + $0x938] sm:$0xf0] }
 0x34d   : > { %5694 = vmatpush.bf16.msra.mxu1 %v9640_v1  ;;  %v5476_v56 = vadd.f32 %v5475_v57, %v18168_v35  ;;  %v5488_v61 = vpop.f32.mrf.mxu1  ;;  %v13204_v1 = vld [vmem:[%s20048_s1 + $0x96c] sm:$0xf]  ;;  %v10472_v35 = vor.u32 %v13272_v58, %v10469_v59  ;;  %v10021_v57 = vld [vmem:[%s20048_s1 + $0x818] sm:$0xf0] }
 0x34e   : > { %5707 = vmatpush.bf16.msra.mxu2 %v9768_v4  ;;  %v13236_v11 = vld [vmem:[%s20048_s1 + $0xa6c] sm:$0xf]  ;;  %v10200_v24 = vor.u32 %v13204_v1, %v10197_v10 }
 0x34f   : > { %5720 = vmatpush.bf16.msra.mxu3 %v9896_v8  ;;  %5682 = vmatmul.bf16.vlgmr.msra.gmra.mxu0 %v15218_v31  ;;  %v13208_v31 = vld [vmem:[%s20048_s1 + $0x98c] sm:$0xf]  ;;  %v5489_v4 = vadd.f32 %v5488_v61, %v5476_v56  ;;  %v10325_v8 = vld [vmem:[%s20048_s1 + $0xa78] sm:$0xf0] }
 0x350   : > { %5726 = vmatpush.bf16.msrb.mxu0 %v10136_v15  ;;  %5695 = vmatmul.bf16.vlgmr.msra.gmra.mxu1 %v15222_v34  ;;  %v10213_v34 = vld [vmem:[%s20048_s1 + $0x998] sm:$0xf0]  ;;  %v13268_v15 = vld [vmem:[%s20048_s1 + $0xb6c] sm:$0xf]  ;;  %v10328_v29 = vor.u32 %v13236_v11, %v10325_v8 }
 0x351   : > { %5739 = vmatpush.bf16.msrb.mxu1 %v10264_v22  ;;  %5708 = vmatmul.bf16.vlgmr.msra.gmra.mxu2 %v15210_v28  ;;  %v10485_v28 = vld [vmem:[%s20048_s1 + $0xbb8] sm:$0xf0]  ;;  %v10216_v62 = vor.u32 %v13208_v31, %v10213_v34  ;;  %v13168_v33 = vld [vmem:[%s20048_s1 + $0x84c] sm:$0xf] }
 0x352   : > { %5752 = vmatpush.bf16.msrb.mxu2 %v10392_v23  ;;  %5721 = vmatmul.bf16.vlgmr.msra.gmra.mxu3 %v15220_v32  ;;  %v10488_v32 = vor.u32 %v13276_v49, %v10485_v28  ;;  %v10453_v22 = vld [vmem:[%s20048_s1 + $0xb78] sm:$0xf0]  ;;  %v10072_v23 = vor.u32 %v13172_v5, %v10069_v0  ;;  %v13200_v37 = vld [vmem:[%s20048_s1 + $0x94c] sm:$0xf] }
 0x353   : > { %5765 = vmatpush.bf16.msrb.mxu3 %v10520_v36  ;;  %v10053_v36 = vld [vmem:[%s20048_s1 + $0x858] sm:$0xf0]  ;;  %v10456_v38 = vor.u32 %v13268_v15, %v10453_v22  ;;  %v13232_v40 = vld [vmem:[%s20048_s1 + $0xa4c] sm:$0xf]  ;;  %v10184_v47 = vor.u32 %v13200_v37, %v10181_v39 }
 0x354   : > { %5727 = vmatpush.bf16.msrb.mxu0 %v10120_v3  ;;  %v5501_v2 = vpop.f32.mrf.mxu2  ;;  %v10309_v3 = vld [vmem:[%s20048_s1 + $0xa58] sm:$0xf0]  ;;  %v13264_v41 = vld [vmem:[%s20048_s1 + $0xb4c] sm:$0xf]  ;;  %v5477_v43 = vpop.f32.mrf.mxu0 }
 0x355   : > { %5740 = vmatpush.bf16.msrb.mxu1 %v10248_v9  ;;  %v5502_v9 = vadd.f32 %v5501_v2, %v5489_v4  ;;  %v5490_v44 = vpop.f32.mrf.mxu1  ;;  %v10312_v49 = vor.u32 %v13232_v40, %v10309_v3  ;;  %v13164_v28 = vld [vmem:[%s20048_s1 + $0x82c] sm:$0xf]  ;;  %v10293_v31 = vld [vmem:[%s20048_s1 + $0xa38] sm:$0xf0] }
 0x356   : > { %5753 = vmatpush.bf16.msrb.mxu2 %v10376_v19  ;;  %v5514_v19 = vpop.f32.mrf.mxu3  ;;  %v13228_v53 = vld [vmem:[%s20048_s1 + $0xa2c] sm:$0xf]  ;;  %v10421_v34 = vld [vmem:[%s20048_s1 + $0xb38] sm:$0xf0] }
 0x357   : > { %5766 = vmatpush.bf16.msrb.mxu3 %v10504_v48  ;;  %v10056_v48 = vor.u32 %v13168_v33, %v10053_v36  ;;  %v18367_v46 = vadd.f32 %v5514_v19, %v5502_v9  ;;  %v13160_v55 = vld [vmem:[%s20048_s1 + $0x80c] sm:$0xf]  ;;  %v10296_v59 = vor.u32 %v13228_v53, %v10293_v31  ;;  %v10405_v0 = vld [vmem:[%s20048_s1 + $0xb18] sm:$0xf0] }
 0x358   : > { %5728 = vmatpush.bf16.msrb.mxu0 %v10104_v50  ;;  %v10037_v50 = vld [vmem:[%s20048_s1 + $0x838] sm:$0xf0]  ;;  %v13192_v56 = vld [vmem:[%s20048_s1 + $0x90c] sm:$0xf]  ;;  %v10024_v8 = vor.u32 %v13160_v55, %v10021_v57 }
 0x359   : > { %5741 = vmatpush.bf16.msrb.mxu1 %v10232_v52  ;;  %v13196_v52 = vld [vmem:[%s20048_s1 + $0x92c] sm:$0xf]  ;;  %v10040_v54 = vor.u32 %v13164_v28, %v10037_v50  ;;  %v10645_v4 = vld [vmem:[%s20048_s1 + $0xcf8] sm:$0xf0] }
 0x35a   : > { %5754 = vmatpush.bf16.msrb.mxu2 %v10360_v6  ;;  %v10440_v6 = vor.u32 %v13264_v41, %v10437_v42  ;;  %v10168_v58 = vor.u32 %v13196_v52, %v10165_v51  ;;  %v13224_v61 = vld [vmem:[%s20048_s1 + $0xa0c] sm:$0xf]  ;;  %v10773_v15 = vld [vmem:[%s20048_s1 + $0xdf8] sm:$0xf0] }
 0x35b   : > { %5767 = vmatpush.bf16.msrb.mxu3 %v10488_v32  ;;  %v13260_v32 = vld [vmem:[%s20048_s1 + $0xb2c] sm:$0xf]  ;;  %v11029_v36 = vld [vmem:[%s20048_s1 + $0xff8] sm:$0xf0] }
 0x35c   : > { %5729 = vmatpush.bf16.msrb.mxu0 %v10088_v60  ;;  %v10149_v60 = vld [vmem:[%s20048_s1 + $0x918] sm:$0xf0]  ;;  %v13256_v5 = vld [vmem:[%s20048_s1 + $0xb0c] sm:$0xf]  ;;  %v5503_v1 = vpop.f32.mrf.mxu2 }
 0x35d   : > { %5742 = vmatpush.bf16.msrb.mxu1 %v10216_v62  ;;  %v10424_v62 = vor.u32 %v13260_v32, %v10421_v34  ;;  %v13348_v10 = vld [vmem:[%s20048_s1 + $0xdec] sm:$0xf]  ;;  %v10408_v37 = vor.u32 %v13256_v5, %v10405_v0  ;;  %v10629_v3 = vld [vmem:[%s20048_s1 + $0xcd8] sm:$0xf0] }
 0x35e   : > { %5755 = vmatpush.bf16.msrb.mxu2 %v10344_v63  ;;  %v10277_v63 = vld [vmem:[%s20048_s1 + $0xa18] sm:$0xf0]  ;;  %v5516_v11 = vpop.f32.mrf.mxu3  ;;  %v13380_v22 = vld [vmem:[%s20048_s1 + $0xeec] sm:$0xf]  ;;  %v10776_v2 = vor.u32 %v13348_v10, %v10773_v15 }
 0x35f   : > { %5768 = vmatpush.bf16.msrb.mxu3 %v10472_v35  ;;  %v13316_v35 = vld [vmem:[%s20048_s1 + $0xcec] sm:$0xf]  ;;  %v10757_v41 = vld [vmem:[%s20048_s1 + $0xdd8] sm:$0xf0] }
 0x360   : > { %5730 = vmatpush.bf16.msrb.mxu0 %v10072_v23  ;;  %v10901_v23 = vld [vmem:[%s20048_s1 + $0xef8] sm:$0xf0]  ;;  %v13412_v33 = vld [vmem:[%s20048_s1 + $0xfec] sm:$0xf] }
 0x361   : > { %5743 = vmatpush.bf16.msrb.mxu1 %v10200_v24  ;;  %v10152_v24 = vor.u32 %v13192_v56, %v10149_v60  ;;  %v10904_v39 = vor.u32 %v13380_v22, %v10901_v23  ;;  %v13312_v40 = vld [vmem:[%s20048_s1 + $0xccc] sm:$0xf]  ;;  %v11032_v19 = vor.u32 %v13412_v33, %v11029_v36  ;;  %v10885_v43 = vld [vmem:[%s20048_s1 + $0xed8] sm:$0xf0] }
 0x362   : > { %5756 = vmatpush.bf16.msrb.mxu2 %v10328_v29  ;;  %v10280_v29 = vor.u32 %v13224_v61, %v10277_v63  ;;  %v13344_v9 = vld [vmem:[%s20048_s1 + $0xdcc] sm:$0xf]  ;;  %v11013_v44 = vld [vmem:[%s20048_s1 + $0xfd8] sm:$0xf0] }
 0x363   : > { %5769 = vmatpush.bf16.msrb.mxu3 %v10456_v38  ;;  %v10648_v38 = vor.u32 %v13316_v35, %v10645_v4  ;;  %v13376_v42 = vld [vmem:[%s20048_s1 + $0xecc] sm:$0xf]  ;;  %v10613_v52 = vld [vmem:[%s20048_s1 + $0xcb8] sm:$0xf0] }
 0x364   : > { %5731 = vmatpush.bf16.msrb.mxu0 %v10056_v48  ;;  %v13408_v48 = vld [vmem:[%s20048_s1 + $0xfcc] sm:$0xf]  ;;  %v10888_v28 = vor.u32 %v13376_v42, %v10885_v43  ;;  %v10741_v53 = vld [vmem:[%s20048_s1 + $0xdb8] sm:$0xf0] }
 0x365   : > { %5744 = vmatpush.bf16.msrb.mxu1 %v10184_v47  ;;  %v10632_v47 = vor.u32 %v13312_v40, %v10629_v3  ;;  %v13308_v50 = vld [vmem:[%s20048_s1 + $0xcac] sm:$0xf]  ;;  %v11016_v51 = vor.u32 %v13408_v48, %v11013_v44  ;;  %v10869_v32 = vld [vmem:[%s20048_s1 + $0xeb8] sm:$0xf0] }
 0x366   : > { %5757 = vmatpush.bf16.msrb.mxu2 %v10312_v49  ;;  %v10760_v49 = vor.u32 %v13344_v9, %v10757_v41  ;;  %v13372_v31 = vld [vmem:[%s20048_s1 + $0xeac] sm:$0xf]  ;;  %v10997_v34 = vld [vmem:[%s20048_s1 + $0xfb8] sm:$0xf0] }
 0x367   : > { %5770 = vmatpush.bf16.msrb.mxu3 %v10440_v6  ;;  %v13340_v6 = vld [vmem:[%s20048_s1 + $0xdac] sm:$0xf]  ;;  %v10872_v57 = vor.u32 %v13372_v31, %v10869_v32  ;;  %v10853_v60 = vld [vmem:[%s20048_s1 + $0xe98] sm:$0xf0] }
 0x368   : > { %5732 = vmatpush.bf16.msrb.mxu0 %v10040_v54  ;;  %v10616_v54 = vor.u32 %v13308_v50, %v10613_v52  ;;  %v10744_v55 = vor.u32 %v13340_v6, %v10741_v53  ;;  %v13368_v56 = vld [vmem:[%s20048_s1 + $0xe8c] sm:$0xf]  ;;  %v10981_v63 = vld [vmem:[%s20048_s1 + $0xf98] sm:$0xf0] }
 0x369   : > { %5745 = vmatpush.bf16.msrb.mxu1 %v10168_v58  ;;  %v13336_v58 = vld [vmem:[%s20048_s1 + $0xd8c] sm:$0xf]  ;;  %v10856_v4 = vor.u32 %v13368_v56, %v10853_v60  ;;  %v10581_v11 = vld [vmem:[%s20048_s1 + $0xc78] sm:$0xf0] }
 0x36a   : > { %5758 = vmatpush.bf16.msrb.mxu2 %v10296_v59  ;;  %v10725_v59 = vld [vmem:[%s20048_s1 + $0xd98] sm:$0xf0]  ;;  %v13300_v10 = vld [vmem:[%s20048_s1 + $0xc6c] sm:$0xf] }
 0x36b   : > { %5771 = vmatpush.bf16.msrb.mxu3 %v10424_v62  ;;  %v13400_v62 = vld [vmem:[%s20048_s1 + $0xf8c] sm:$0xf]  ;;  %v10728_v35 = vor.u32 %v13336_v58, %v10725_v59  ;;  %v10709_v22 = vld [vmem:[%s20048_s1 + $0xd78] sm:$0xf0]  ;;  %v10584_v36 = vor.u32 %v13300_v10, %v10581_v11 }
 0x36c   : > { %5733 = vmatpush.bf16.msrb.mxu0 %v10024_v8  ;;  %v5527_v61 = vpop.f32.mrf.mxu0  ;;  %v13332_v8 = vld [vmem:[%s20048_s1 + $0xd6c] sm:$0xf]  ;;  %v10965_v33 = vld [vmem:[%s20048_s1 + $0xf78] sm:$0xf0] }
 0x36d   : > { %5746 = vmatpush.bf16.msrb.mxu1 %v10152_v24  ;;  %v5528_v5 = vadd.f32 %v5527_v61, %v18367_v46  ;;  %v5540_v1 = vpop.f32.mrf.mxu1  ;;  %v10984_v46 = vor.u32 %v13400_v62, %v10981_v63  ;;  %v13364_v23 = vld [vmem:[%s20048_s1 + $0xe6c] sm:$0xf]  ;;  %v10837_v24 = vld [vmem:[%s20048_s1 + $0xe78] sm:$0xf0] }
 0x36e   : > { %5759 = vmatpush.bf16.msrb.mxu2 %v10280_v29  ;;  %v13396_v29 = vld [vmem:[%s20048_s1 + $0xf6c] sm:$0xf]  ;;  %v10821_v42 = vld [vmem:[%s20048_s1 + $0xe58] sm:$0xf0] }
 0x36f   : > { %5772 = vmatpush.bf16.msrb.mxu3 %v10408_v37  ;;  %5734 = vmatmul.bf16.vlgmr.msrb.gmra.mxu0 %v15417_v12  ;;  %v13404_v12 = vld [vmem:[%s20048_s1 + $0xfac] sm:$0xf]  ;;  %v18527_v15 = vadd.f32 %v5540_v1, %v5528_v5  ;;  %v10712_v37 = vor.u32 %v13332_v8, %v10709_v22  ;;  %v10968_v3 = vor.u32 %v13396_v29, %v10965_v33  ;;  %v10949_v44 = vld [vmem:[%s20048_s1 + $0xf58] sm:$0xf0] }
 0x370   : > { %5778 = vmatpush.bf16.msra.mxu0 %v10648_v38  ;;  %5747 = vmatmul.bf16.vlgmr.msrb.gmra.mxu1 %v15430_v17  ;;  %v10597_v17 = vld [vmem:[%s20048_s1 + $0xc98] sm:$0xf0]  ;;  %v10840_v38 = vor.u32 %v13364_v23, %v10837_v24  ;;  %v13328_v40 = vld [vmem:[%s20048_s1 + $0xd4c] sm:$0xf] }
 0x371   : > { %5791 = vmatpush.bf16.msra.mxu1 %v10776_v2  ;;  %5760 = vmatmul.bf16.vlgmr.msrb.gmra.mxu2 %v15428_v16  ;;  %v13304_v16 = vld [vmem:[%s20048_s1 + $0xc8c] sm:$0xf]  ;;  %v10677_v32 = vld [vmem:[%s20048_s1 + $0xd38] sm:$0xf0] }
 0x372   : > { %5804 = vmatpush.bf16.msra.mxu2 %v10904_v39  ;;  %5773 = vmatmul.bf16.vlgmr.msrb.gmra.mxu3 %v15438_v21  ;;  %v11000_v21 = vor.u32 %v13404_v12, %v10997_v34  ;;  %v10600_v0 = vor.u32 %v13304_v16, %v10597_v17  ;;  %v13296_v2 = vld [vmem:[%s20048_s1 + $0xc4c] sm:$0xf]  ;;  %v10565_v39 = vld [vmem:[%s20048_s1 + $0xc58] sm:$0xf0] }
 0x373   : > { %5817 = vmatpush.bf16.msra.mxu3 %v11032_v19  ;;  %v10693_v19 = vld [vmem:[%s20048_s1 + $0xd58] sm:$0xf0]  ;;  %v13360_v41 = vld [vmem:[%s20048_s1 + $0xe4c] sm:$0xf] }
 0x374   : > { %5779 = vmatpush.bf16.msra.mxu0 %v10632_v47  ;;  %v18553_v9 = vpop.f32.mrf.mxu2  ;;  %v13392_v48 = vld [vmem:[%s20048_s1 + $0xf4c] sm:$0xf]  ;;  %v5529_v47 = vpop.f32.mrf.mxu0  ;;  %v10696_v50 = vor.u32 %v13328_v40, %v10693_v19  ;;  %v10824_v52 = vor.u32 %v13360_v41, %v10821_v42  ;;  %v10805_v34 = vld [vmem:[%s20048_s1 + $0xe38] sm:$0xf0] }
 0x375   : > { %5792 = vmatpush.bf16.msra.mxu1 %v10760_v49  ;;  %v18564_v43 = vpop.f32.mrf.mxu3  ;;  %v10568_v49 = vor.u32 %v13296_v2, %v10565_v39  ;;  %v13292_v6 = vld [vmem:[%s20048_s1 + $0xc2c] sm:$0xf]  ;;  %v10952_v31 = vor.u32 %v13392_v48, %v10949_v44  ;;  %v10533_v17 = vld [vmem:[%s20048_s1 + $0xc18] sm:$0xf0] }
 0x376   : > { %5805 = vmatpush.bf16.msra.mxu2 %v10888_v28  ;;  %v5542_v28 = vpop.f32.mrf.mxu1  ;;  %v13324_v53 = vld [vmem:[%s20048_s1 + $0xd2c] sm:$0xf]  ;;  %v10661_v56 = vld [vmem:[%s20048_s1 + $0xd18] sm:$0xf0] }
 0x377   : > { %5818 = vmatpush.bf16.msra.mxu3 %v11016_v51  ;;  %v10549_v51 = vld [vmem:[%s20048_s1 + $0xc38] sm:$0xf0]  ;;  %v13356_v12 = vld [vmem:[%s20048_s1 + $0xe2c] sm:$0xf]  ;;  %v10680_v58 = vor.u32 %v13324_v53, %v10677_v32 }
 0x378   : > { %5780 = vmatpush.bf16.msra.mxu0 %v10616_v54  ;;  %v13388_v54 = vld [vmem:[%s20048_s1 + $0xf2c] sm:$0xf]  ;;  %v10789_v62 = vld [vmem:[%s20048_s1 + $0xe18] sm:$0xf0] }
 0x379   : > { %5793 = vmatpush.bf16.msra.mxu1 %v10744_v55  ;;  %v10933_v55 = vld [vmem:[%s20048_s1 + $0xf38] sm:$0xf0]  ;;  %v13288_v16 = vld [vmem:[%s20048_s1 + $0xc0c] sm:$0xf] }
 0x37a   : > { %5806 = vmatpush.bf16.msra.mxu2 %v10872_v57  ;;  %v10552_v57 = vor.u32 %v13292_v6, %v10549_v51  ;;  %v13320_v59 = vld [vmem:[%s20048_s1 + $0xd0c] sm:$0xf]  ;;  %v10936_v61 = vor.u32 %v13388_v54, %v10933_v55  ;;  %v10917_v5 = vld [vmem:[%s20048_s1 + $0xf18] sm:$0xf0]  ;;  %v10536_v11 = vor.u32 %v13288_v16, %v10533_v17 }
 0x37b   : > { %5819 = vmatpush.bf16.msra.mxu3 %v11000_v21  ;;  %v10808_v21 = vor.u32 %v13356_v12, %v10805_v34  ;;  %v13352_v60 = vld [vmem:[%s20048_s1 + $0xe0c] sm:$0xf]  ;;  %v11285_v8 = vld [vmem:[%s20048_s1 + $0x11f8] sm:$0xf0]  ;;  %v10664_v23 = vor.u32 %v13320_v59, %v10661_v56 }
 0x37c   : > { %5781 = vmatpush.bf16.msra.mxu0 %v10600_v0  ;;  %v13384_v63 = vld [vmem:[%s20048_s1 + $0xf0c] sm:$0xf]  ;;  %v5555_v0 = vpop.f32.mrf.mxu2  ;;  %v11413_v22 = vld [vmem:[%s20048_s1 + $0x12f8] sm:$0xf0]  ;;  %v10792_v24 = vor.u32 %v13352_v60, %v10789_v62 }
 0x37d   : > { %5794 = vmatpush.bf16.msra.mxu1 %v10728_v35  ;;  %v13444_v1 = vld [vmem:[%s20048_s1 + $0x10ec] sm:$0xf]  ;;  %v11157_v35 = vld [vmem:[%s20048_s1 + $0x10f8] sm:$0xf0]  ;;  %v5568_v10 = vpop.f32.mrf.mxu3 }
 0x37e   : > { %5807 = vmatpush.bf16.msra.mxu2 %v10856_v4  ;;  %v13476_v4 = vld [vmem:[%s20048_s1 + $0x11ec] sm:$0xf]  ;;  %v11541_v33 = vld [vmem:[%s20048_s1 + $0x13f8] sm:$0xf0] }
 0x37f   : > { %5820 = vmatpush.bf16.msra.mxu3 %v10984_v46  ;;  %v13508_v46 = vld [vmem:[%s20048_s1 + $0x12ec] sm:$0xf]  ;;  %v11141_v40 = vld [vmem:[%s20048_s1 + $0x10d8] sm:$0xf0] }
 0x380   : > { %5782 = vmatpush.bf16.msra.mxu0 %v10584_v36  ;;  %v13540_v29 = vld [vmem:[%s20048_s1 + $0x13ec] sm:$0xf]  ;;  %v10920_v36 = vor.u32 %v13384_v63, %v10917_v5  ;;  %v11416_v2 = vor.u32 %v13508_v46, %v11413_v22  ;;  %v11269_v41 = vld [vmem:[%s20048_s1 + $0x11d8] sm:$0xf0] }
 0x381   : > { %5795 = vmatpush.bf16.msra.mxu1 %v10712_v37  ;;  %v11160_v37 = vor.u32 %v13444_v1, %v11157_v35  ;;  %v13440_v39 = vld [vmem:[%s20048_s1 + $0x10cc] sm:$0xf]  ;;  %v11544_v19 = vor.u32 %v13540_v29, %v11541_v33  ;;  %v11397_v48 = vld [vmem:[%s20048_s1 + $0x12d8] sm:$0xf0] }
 0x382   : > { %5808 = vmatpush.bf16.msra.mxu2 %v10840_v38  ;;  %v11288_v38 = vor.u32 %v13476_v4, %v11285_v8  ;;  %v13504_v42 = vld [vmem:[%s20048_s1 + $0x12cc] sm:$0xf]  ;;  %v11525_v47 = vld [vmem:[%s20048_s1 + $0x13d8] sm:$0xf0] }
 0x383   : > { %5821 = vmatpush.bf16.msra.mxu3 %v10968_v3  ;;  %v13472_v3 = vld [vmem:[%s20048_s1 + $0x11cc] sm:$0xf]  ;;  %v11125_v6 = vld [vmem:[%s20048_s1 + $0x10b8] sm:$0xf0] }
 0x384   : > { %5783 = vmatpush.bf16.msra.mxu0 %v10568_v49  ;;  %v13536_v44 = vld [vmem:[%s20048_s1 + $0x13cc] sm:$0xf]  ;;  %v11144_v49 = vor.u32 %v13440_v39, %v11141_v40  ;;  %v11272_v28 = vor.u32 %v13472_v3, %v11269_v41  ;;  %v11381_v12 = vld [vmem:[%s20048_s1 + $0x12b8] sm:$0xf0] }
 0x385   : > { %5796 = vmatpush.bf16.msra.mxu1 %v10696_v50  ;;  %v11400_v50 = vor.u32 %v13504_v42, %v11397_v48  ;;  %v13468_v51 = vld [vmem:[%s20048_s1 + $0x11ac] sm:$0xf]  ;;  %v11528_v53 = vor.u32 %v13536_v44, %v11525_v47  ;;  %v11509_v34 = vld [vmem:[%s20048_s1 + $0x13b8] sm:$0xf0] }
 0x386   : > { %5809 = vmatpush.bf16.msra.mxu2 %v10824_v52  ;;  %v13436_v52 = vld [vmem:[%s20048_s1 + $0x10ac] sm:$0xf]  ;;  %v11237_v17 = vld [vmem:[%s20048_s1 + $0x1198] sm:$0xf0] }
 0x387   : > { %5822 = vmatpush.bf16.msra.mxu3 %v10952_v31  ;;  %v11253_v31 = vld [vmem:[%s20048_s1 + $0x11b8] sm:$0xf0]  ;;  %v13500_v32 = vld [vmem:[%s20048_s1 + $0x12ac] sm:$0xf]  ;;  %v11128_v54 = vor.u32 %v13436_v52, %v11125_v6 }
 0x388   : > { %5784 = vmatpush.bf16.msra.mxu0 %v10552_v57  ;;  %v11256_v55 = vor.u32 %v13468_v51, %v11253_v31  ;;  %v11384_v57 = vor.u32 %v13500_v32, %v11381_v12  ;;  %v13464_v16 = vld [vmem:[%s20048_s1 + $0x118c] sm:$0xf]  ;;  %v11493_v60 = vld [vmem:[%s20048_s1 + $0x1398] sm:$0xf0] }
 0x389   : > { %5797 = vmatpush.bf16.msra.mxu1 %v10680_v58  ;;  %v13496_v58 = vld [vmem:[%s20048_s1 + $0x128c] sm:$0xf]  ;;  %v11240_v63 = vor.u32 %v13464_v16, %v11237_v17  ;;  %v11093_v1 = vld [vmem:[%s20048_s1 + $0x1078] sm:$0xf0] }
 0x38a   : > { %5810 = vmatpush.bf16.msra.mxu2 %v10808_v21  ;;  %v11365_v21 = vld [vmem:[%s20048_s1 + $0x1298] sm:$0xf0]  ;;  %v13528_v56 = vld [vmem:[%s20048_s1 + $0x138c] sm:$0xf] }
 0x38b   : > { %5823 = vmatpush.bf16.msra.mxu3 %v10936_v61  ;;  %v11368_v5 = vor.u32 %v13496_v58, %v11365_v21  ;;  %v13428_v0 = vld [vmem:[%s20048_s1 + $0x106c] sm:$0xf]  ;;  %v11496_v4 = vor.u32 %v13528_v56, %v11493_v60  ;;  %v11221_v10 = vld [vmem:[%s20048_s1 + $0x1178] sm:$0xf0] }
 0x38c   : > { %5785 = vmatpush.bf16.msra.mxu0 %v10536_v11  ;;  %v18714_v59 = vpop.f32.mrf.mxu0  ;;  %v13460_v35 = vld [vmem:[%s20048_s1 + $0x116c] sm:$0xf]  ;;  %v11349_v8 = vld [vmem:[%s20048_s1 + $0x1278] sm:$0xf0] }
 0x38d   : > { %5798 = vmatpush.bf16.msra.mxu1 %v10664_v23  ;;  %v18722_v62 = vpop.f32.mrf.mxu1  ;;  %v13492_v11 = vld [vmem:[%s20048_s1 + $0x126c] sm:$0xf]  ;;  %v11477_v22 = vld [vmem:[%s20048_s1 + $0x1378] sm:$0xf0]  ;;  %v11096_v23 = vor.u32 %v13428_v0, %v11093_v1 }
 0x38e   : > { %5811 = vmatpush.bf16.msra.mxu2 %v10792_v24  ;;  %v13524_v46 = vld [vmem:[%s20048_s1 + $0x136c] sm:$0xf]  ;;  %v11224_v24 = vor.u32 %v13460_v35, %v11221_v10  ;;  %v11352_v29 = vor.u32 %v13492_v11, %v11349_v8  ;;  %v11205_v39 = vld [vmem:[%s20048_s1 + $0x1158] sm:$0xf0]  ;;  %v13574_v35 = vld [vmem:[%s20050_s3 + $0xf4] sm:$0xf0] }
 0x38f   : > { %5824 = vmatpush.bf16.msra.mxu3 %v10920_v36  ;;  %5786 = vmatmul.bf16.vlgmr.msra.gmra.mxu0 %v15633_v7  ;;  %v13532_v7 = vld [vmem:[%s20048_s1 + $0x13ac] sm:$0xf]  ;;  %v11077_v36 = vld [vmem:[%s20048_s1 + $0x1058] sm:$0xf0]  ;;  %v13590_v10 = vld [vmem:[%s20050_s3 + $0x174] sm:$0xf0] }
 0x390   : > { %5830 = vmatpush.bf16.msrb.mxu0 %v11160_v37  ;;  %5799 = vmatmul.bf16.vlgmr.msra.gmra.mxu1 %v15646_v14  ;;  %v11109_v14 = vld [vmem:[%s20048_s1 + $0x1098] sm:$0xf0]  ;;  %v13424_v33 = vld [vmem:[%s20048_s1 + $0x104c] sm:$0xf] }
 0x391   : > { %5843 = vmatpush.bf16.msrb.mxu1 %v11288_v38  ;;  %5812 = vmatmul.bf16.vlgmr.msra.gmra.mxu2 %v15644_v13  ;;  %v13432_v13 = vld [vmem:[%s20048_s1 + $0x108c] sm:$0xf]  ;;  %v11480_v38 = vor.u32 %v13524_v46, %v11477_v22  ;;  %v11333_v3 = vld [vmem:[%s20048_s1 + $0x1258] sm:$0xf0]  ;;  %v11080_v44 = vor.u32 %v13424_v33, %v11077_v36  ;;  %v13556_v33 = vld [vmem:[%s20050_s3 + $0x64] sm:$0xf0] }
 0x392   : > { %5856 = vmatpush.bf16.msrb.mxu2 %v11416_v2  ;;  %5825 = vmatmul.bf16.vlgmr.msra.gmra.mxu3 %v15654_v20  ;;  %v11512_v20 = vor.u32 %v13532_v7, %v11509_v34  ;;  %v11112_v61 = vor.u32 %v13432_v13, %v11109_v14  ;;  %v13456_v37 = vld [vmem:[%s20048_s1 + $0x114c] sm:$0xf]  ;;  %v11461_v42 = vld [vmem:[%s20048_s1 + $0x1358] sm:$0xf0]  ;;  %v11659_v36 = vld [vmem:[%s20050_s3 + $0xe0] sm:$0xf] }
 0x393   : > { %5869 = vmatpush.bf16.msrb.mxu3 %v11544_v19  ;;  %v13488_v40 = vld [vmem:[%s20048_s1 + $0x124c] sm:$0xf]  ;;  %v11061_v52 = vld [vmem:[%s20048_s1 + $0x1038] sm:$0xf0] }
 0x394   : > { %5831 = vmatpush.bf16.msrb.mxu0 %v11144_v49  ;;  %v18757_v2 = vpop.f32.mrf.mxu2  ;;  %v13520_v41 = vld [vmem:[%s20048_s1 + $0x134c] sm:$0xf]  ;;  %v5581_v48 = vpop.f32.mrf.mxu0  ;;  %v11208_v49 = vor.u32 %v13456_v37, %v11205_v39  ;;  %v11317_v32 = vld [vmem:[%s20048_s1 + $0x1238] sm:$0xf0]  ;;  %v13572_v37 = vld [vmem:[%s20050_s3 + $0xe4] sm:$0xf0] }
 0x395   : > { %5844 = vmatpush.bf16.msrb.mxu1 %v11272_v28  ;;  %v18768_v19 = vpop.f32.mrf.mxu3  ;;  %v5594_v47 = vpop.f32.mrf.mxu1  ;;  %v11336_v28 = vor.u32 %v13488_v40, %v11333_v3  ;;  %v13452_v6 = vld [vmem:[%s20048_s1 + $0x112c] sm:$0xf]  ;;  %v11464_v51 = vor.u32 %v13520_v41, %v11461_v42  ;;  %v11445_v7 = vld [vmem:[%s20048_s1 + $0x1338] sm:$0xf0]  ;;  %v13588_v39 = vld [vmem:[%s20050_s3 + $0x164] sm:$0xf0]  ;;  %v11660_v3 = vor.u32 %v13572_v37, %v11659_v36 }
 0x396   : > { %5857 = vmatpush.bf16.msrb.mxu2 %v11400_v50  ;;  %v13420_v50 = vld [vmem:[%s20048_s1 + $0x102c] sm:$0xf]  ;;  %v11173_v16 = vld [vmem:[%s20048_s1 + $0x1118] sm:$0xf0]  ;;  %v11587_v42 = vld [vmem:[%s20050_s3 + $0x50] sm:$0xf] }
 0x397   : > { %5870 = vmatpush.bf16.msrb.mxu3 %v11528_v53  ;;  %v11189_v53 = vld [vmem:[%s20048_s1 + $0x1138] sm:$0xf0]  ;;  %v13484_v31 = vld [vmem:[%s20048_s1 + $0x122c] sm:$0xf]  ;;  %v11064_v34 = vor.u32 %v13420_v50, %v11061_v52  ;;  %v13554_v48 = vld [vmem:[%s20050_s3 + $0x54] sm:$0xf0] }
 0x398   : > { %5832 = vmatpush.bf16.msrb.mxu0 %v11128_v54  ;;  %v13516_v12 = vld [vmem:[%s20048_s1 + $0x132c] sm:$0xf]  ;;  %v11320_v13 = vor.u32 %v13484_v31, %v11317_v32  ;;  %v11301_v58 = vld [vmem:[%s20048_s1 + $0x1218] sm:$0xf0]  ;;  %v13570_v47 = vld [vmem:[%s20050_s3 + $0xd4] sm:$0xf0] }
 0x399   : > { %5845 = vmatpush.bf16.msrb.mxu1 %v11256_v55  ;;  %v13416_v54 = vld [vmem:[%s20048_s1 + $0x100c] sm:$0xf]  ;;  %v11045_v55 = vld [vmem:[%s20048_s1 + $0x1018] sm:$0xf0]  ;;  %v11448_v17 = vor.u32 %v13516_v12, %v11445_v7  ;;  %v13568_v31 = vld [vmem:[%s20050_s3 + $0xc4] sm:$0xf0] }
 0x39a   : > { %5858 = vmatpush.bf16.msrb.mxu2 %v11384_v57  ;;  %v11192_v57 = vor.u32 %v13452_v6, %v11189_v53  ;;  %v13448_v14 = vld [vmem:[%s20048_s1 + $0x110c] sm:$0xf]  ;;  %v11429_v56 = vld [vmem:[%s20048_s1 + $0x1318] sm:$0xf0]  ;;  %v11048_v1 = vor.u32 %v13416_v54, %v11045_v55  ;;  %v13552_v6 = vld [vmem:[%s20050_s3 + $0x44] sm:$0xf0]  ;;  %v5554_v53 = vadd.f32 %v18553_v9, %v18527_v15 }
 0x39b   : > { %5871 = vmatpush.bf16.msrb.mxu3 %v11512_v20  ;;  %v13480_v20 = vld [vmem:[%s20048_s1 + $0x120c] sm:$0xf]  ;;  %v11176_v11 = vor.u32 %v13448_v14, %v11173_v16  ;;  %v11707_v32 = vld [vmem:[%s20050_s3 + $0x140] sm:$0xf]  ;;  %v13584_v12 = vld [vmem:[%s20050_s3 + $0x144] sm:$0xf0] }
 0x39c   : > { %5833 = vmatpush.bf16.msrb.mxu0 %v11112_v61  ;;  %v13512_v21 = vld [vmem:[%s20048_s1 + $0x130c] sm:$0xf]  ;;  %v5607_v60 = vpop.f32.mrf.mxu2  ;;  %v11603_v61 = vld [vmem:[%s20050_s3 + $0x70] sm:$0xf]  ;;  %v11304_v8 = vor.u32 %v13480_v20, %v11301_v58  ;;  %v11708_v55 = vor.u32 %v13584_v12, %v11707_v32  ;;  %v13550_v9 = vld [vmem:[%s20050_s3 + $0x34] sm:$0xf0]  ;;  %v5567_v16 = vadd.f32 %v18564_v43, %v5554_v53 }
 0x39d   : > { %5846 = vmatpush.bf16.msrb.mxu1 %v11240_v63  ;;  %v13558_v63 = vld [vmem:[%s20050_s3 + $0x74] sm:$0xf0]  ;;  %v5620_v0 = vpop.f32.mrf.mxu3  ;;  %v11432_v46 = vor.u32 %v13512_v21, %v11429_v56  ;;  %v11571_v15 = vld [vmem:[%s20050_s3 + $0x30] sm:$0xf]  ;;  %v5882_v53 = vmax.f32 %v16771_v45, 0.0 }
 0x39e   : > { %5859 = vmatpush.bf16.msrb.mxu2 %v11368_v5  ;;  %v11667_v5 = vld [vmem:[%s20050_s3 + $0xf0] sm:$0xf]  ;;  %v11604_v22 = vor.u32 %v13558_v63, %v11603_v61  ;;  %v13566_v20 = vld [vmem:[%s20050_s3 + $0xb4] sm:$0xf0]  ;;  %v5580_v56 = vadd.f32 %v18714_v59, %v5567_v16  ;;  %v11572_v60 = vor.u32 %v13550_v9, %v11571_v15  ;;  %v11563_v63 = vld [vmem:[%s20050_s3 + $0x20] sm:$0xf] }
 0x39f   : > { %5872 = vmatpush.bf16.msrb.mxu3 %v11496_v4  ;;  %v11731_v4 = vld [vmem:[%s20050_s3 + $0x170] sm:$0xf]  ;;  %v13582_v58 = vld [vmem:[%s20050_s3 + $0x134] sm:$0xf0]  ;;  %v11627_v0 = vld [vmem:[%s20050_s3 + $0xa0] sm:$0xf]  ;;  %v19010_v9 = vpack.c.bf16 %v5882_v53, %v5882_v53 }
 0x3a0   : > { %5834 = vmatpush.bf16.msrb.mxu0 %v11096_v23  ;;  %v11668_v23 = vor.u32 %v13574_v35, %v11667_v5  ;;  %v13548_v5 = vld [vmem:[%s20050_s3 + $0x24] sm:$0xf0]  ;;  %v11691_v35 = vld [vmem:[%s20050_s3 + $0x120] sm:$0xf]  ;;  %v13546_v36 = vld [vmem:[%s20050_s3 + $0x14] sm:$0xf0] }
 0x3a1   : > { %5847 = vmatpush.bf16.msrb.mxu1 %v11224_v24  ;;  %v11732_v24 = vor.u32 %v13590_v10, %v11731_v4  ;;  %v13564_v59 = vld [vmem:[%s20050_s3 + $0xa4] sm:$0xf0]  ;;  %v11661_v15 = vld [vmem:[%s20050_s3 + $0xe8] sm:$0xf0]  ;;  %v13587_v45 = vld [vmem:[%s20050_s3 + $0x164] sm:$0xf] }
 0x3a2   : > { %5860 = vmatpush.bf16.msrb.mxu2 %v11352_v29  ;;  %v11595_v29 = vld [vmem:[%s20050_s3 + $0x60] sm:$0xf]  ;;  %v13580_v4 = vld [vmem:[%s20050_s3 + $0x124] sm:$0xf0] }
 0x3a3   : > { %5873 = vmatpush.bf16.msrb.mxu3 %v11480_v38  ;;  %v11723_v38 = vld [vmem:[%s20050_s3 + $0x160] sm:$0xf]  ;;  %v11596_v40 = vor.u32 %v13556_v33, %v11595_v29  ;;  %v11692_v29 = vor.u32 %v13580_v4, %v11691_v35  ;;  %v11555_v33 = vld [vmem:[%s20050_s3 + $0x10] sm:$0xf]  ;;  %v11637_v4 = vld [vmem:[%s20050_s3 + $0xb8] sm:$0xf0] }
 0x3a4   : > { %5835 = vmatpush.bf16.msrb.mxu0 %v11080_v44  ;;  %v11724_v41 = vor.u32 %v13588_v39, %v11723_v38  ;;  %v11651_v44 = vld [vmem:[%s20050_s3 + $0xd0] sm:$0xf]  ;;  %v13562_v39 = vld [vmem:[%s20050_s3 + $0x94] sm:$0xf0] }
 0x3a5   : > { %5848 = vmatpush.bf16.msrb.mxu1 %v11208_v49  ;;  %v11715_v49 = vld [vmem:[%s20050_s3 + $0x150] sm:$0xf]  ;;  %v11652_v50 = vor.u32 %v13570_v47, %v11651_v44  ;;  %v13544_v44 = vld [vmem:[%s20050_s3 + $0x4] sm:$0xf0]  ;;  %v11611_v47 = vld [vmem:[%s20050_s3 + $0x80] sm:$0xf] }
 0x3a6   : > { %5861 = vmatpush.bf16.msrb.mxu2 %v11336_v28  ;;  %v13586_v28 = vld [vmem:[%s20050_s3 + $0x154] sm:$0xf0] }
 0x3a7   : > { %5874 = vmatpush.bf16.msrb.mxu3 %v11464_v51  ;;  %v11716_v52 = vor.u32 %v13586_v28, %v11715_v49  ;;  %v13560_v49 = vld [vmem:[%s20050_s3 + $0x84] sm:$0xf0] }
 0x3a8   : > { %5836 = vmatpush.bf16.msrb.mxu0 %v11064_v34  ;;  %v11612_v32 = vor.u32 %v13560_v49, %v11611_v47  ;;  %v11685_v47 = vld [vmem:[%s20050_s3 + $0x118] sm:$0xf0] }
 0x3a9   : > { %5849 = vmatpush.bf16.msrb.mxu1 %v11192_v57  ;;  %v11635_v57 = vld [vmem:[%s20050_s3 + $0xb0] sm:$0xf] }
 0x3aa   : > { %5862 = vmatpush.bf16.msrb.mxu2 %v11320_v13  ;;  %v11636_v43 = vor.u32 %v13566_v20, %v11635_v57  ;;  %v13569_v20 = vld [vmem:[%s20050_s3 + $0xd4] sm:$0xf] }
 0x3ab   : > { %5875 = vmatpush.bf16.msrb.mxu3 %v11448_v17  ;;  %v11699_v17 = vld [vmem:[%s20050_s3 + $0x130] sm:$0xf] }
 0x3ac   : > { %5837 = vmatpush.bf16.msrb.mxu0 %v11048_v1  ;;  %v5631_v34 = vpop.f32.mrf.mxu0  ;;  %v11700_v61 = vor.u32 %v13582_v58, %v11699_v17  ;;  %v11653_v17 = vld [vmem:[%s20050_s3 + $0xd8] sm:$0xf0]  ;;  %v13585_v58 = vld [vmem:[%s20050_s3 + $0x154] sm:$0xf] }
 0x3ad   : > { %5850 = vmatpush.bf16.msrb.mxu1 %v11176_v11  ;;  %v5644_v14 = vpop.f32.mrf.mxu1 }
 0x3ae   : > { %5863 = vmatpush.bf16.msrb.mxu2 %v11304_v8  ;;  %v5593_v8 = vadd.f32 %v18722_v62, %v5580_v56  ;;  %v11619_v62 = vld [vmem:[%s20050_s3 + $0x90] sm:$0xf]  ;;  %v11656_v56 = vor.u32 %v13569_v20, %v11653_v17  ;;  %v13555_v20 = vld [vmem:[%s20050_s3 + $0x64] sm:$0xf]  ;;  %v11597_v17 = vld [vmem:[%s20050_s3 + $0x68] sm:$0xf0] }
 0x3af   : > { %5876 = vmatpush.bf16.msrb.mxu3 %v11432_v46  ;;  %5838 = vmatmul.bf16.vlgmr.msrb.gmra.mxu0 %v15849_v18  ;;  %v11588_v18 = vor.u32 %v13554_v48, %v11587_v42  ;;  %v11564_v46 = vor.u32 %v13548_v5, %v11563_v63  ;;  %v11547_v42 = vld [vmem:[%s20050_s3] sm:$0xf]  ;;  %v13583_v63 = vld [vmem:[%s20050_s3 + $0x144] sm:$0xf]  ;;  %v11709_v5 = vld [vmem:[%s20050_s3 + $0x148] sm:$0xf0] }
 0x3b0   : > { %6200 = vmatpush.bf16.msra.mxu0 %v11604_v22  ;;  %5851 = vmatmul.bf16.vlgmr.msrb.gmra.mxu1 %v15862_v26  ;;  %v11579_v26 = vld [vmem:[%s20050_s3 + $0x40] sm:$0xf]  ;;  %v5606_v38 = vadd.f32 %v18757_v2, %v5593_v8  ;;  %v11620_v2 = vor.u32 %v13562_v39, %v11619_v62  ;;  %v13579_v62 = vld [vmem:[%s20050_s3 + $0x124] sm:$0xf] }
 0x3b1   : > { %6213 = vmatpush.bf16.msra.mxu1 %v11668_v23  ;;  %5864 = vmatmul.bf16.vlgmr.msrb.gmra.mxu2 %v15860_v25  ;;  %v11643_v25 = vld [vmem:[%s20050_s3 + $0xc0] sm:$0xf]  ;;  %v11580_v7 = vor.u32 %v13552_v6, %v11579_v26 }
 0x3b2   : > { %6226 = vmatpush.bf16.msra.mxu2 %v11732_v24  ;;  %5877 = vmatmul.bf16.vlgmr.msrb.gmra.mxu3 %v15870_v30  ;;  %v13936_v30 = vld [vmem:[%s20049_s2] sm:$0xf]  ;;  %v11644_v54 = vor.u32 %v13568_v31, %v11643_v25  ;;  %v11628_v24 = vor.u32 %v13564_v59, %v11627_v0  ;;  %v11669_v25 = vld [vmem:[%s20050_s3 + $0xf8] sm:$0xf0]  ;;  %v5883_v31 = vmax.f32 %v17768_v27, 0.0 }
 0x3b3   : > { %v1637_v51 = vperm.slane %v13936_v30, 3  ;;  %v11675_v26 = vld [vmem:[%s20050_s3 + $0x100] sm:$0xf]  ;;  %v11733_v30 = vld [vmem:[%s20050_s3 + $0x178] sm:$0xf0] }
 0x3b4   : > { %6201 = vmatpush.bf16.msra.mxu0 %v11596_v40  ;;  %v5657_v1 = vpop.f32.mrf.mxu2  ;;  %v5633_v23 = vpop.f32.mrf.mxu0  ;;  %v11683_v40 = vld [vmem:[%s20050_s3 + $0x110] sm:$0xf]  ;;  %v11725_v27 = vld [vmem:[%s20050_s3 + $0x168] sm:$0xf0]  ;;  %v19012_v57 = vpack.c.bf16 %v5883_v31, %v5883_v31  ;;  %v13565_v59 = vld [vmem:[%s20050_s3 + $0xb4] sm:$0xf] }
 0x3b5   : > { %6214 = vmatpush.bf16.msra.mxu1 %v11660_v3  ;;  %v5632_v13 = vadd.f32 %v5631_v34, %v1637_v51  ;;  %v5670_v11 = vpop.f32.mrf.mxu3  ;;  %v5646_v37 = vpop.f32.mrf.mxu1  ;;  %v13578_v3 = vld [vmem:[%s20050_s3 + $0x114] sm:$0xf0]  ;;  %v11548_v51 = vor.u32 %v13544_v44, %v11547_v42  ;;  %v11728_v16 = vor.u32 %v13587_v45, %v11725_v27  ;;  %v13577_v44 = vld [vmem:[%s20050_s3 + $0x114] sm:$0xf] }
 0x3b6   : > { %6227 = vmatpush.bf16.msra.mxu2 %v11724_v41  ;;  %v11556_v41 = vor.u32 %v13546_v36, %v11555_v33  ;;  %v11684_v48 = vor.u32 %v13578_v3, %v11683_v40  ;;  %v13563_v33 = vld [vmem:[%s20050_s3 + $0xa4] sm:$0xf]  ;;  %v11629_v36 = vld [vmem:[%s20050_s3 + $0xa8] sm:$0xf0] }
 0x3b7   : > { %v5645_v21 = vadd.f32 %v5644_v14, %v5632_v13  ;;  %v11632_v40 = vor.u32 %v13563_v33, %v11629_v36  ;;  %v13547_v36 = vld [vmem:[%s20050_s3 + $0x24] sm:$0xf] }
 0x3b8   : > { %6202 = vmatpush.bf16.msra.mxu0 %v11588_v18  ;;  %v5619_v18 = vadd.f32 %v18768_v19, %v5606_v38  ;;  %v13589_v19 = vld [vmem:[%s20050_s3 + $0x174] sm:$0xf] }
 0x3b9   : > { %6215 = vmatpush.bf16.msra.mxu1 %v11652_v50  ;;  %v5658_v10 = vadd.f32 %v5657_v1, %v5645_v21  ;;  %v13576_v50 = vld [vmem:[%s20050_s3 + $0x104] sm:$0xf0]  ;;  %v11717_v21 = vld [vmem:[%s20050_s3 + $0x158] sm:$0xf0]  ;;  %v11712_v1 = vor.u32 %v13583_v63, %v11709_v5 }
 0x3ba   : > { %6228 = vmatpush.bf16.msra.mxu2 %v11716_v52  ;;  %v13573_v52 = vld [vmem:[%s20050_s3 + $0xf4] sm:$0xf]  ;;  %v11676_v12 = vor.u32 %v13576_v50, %v11675_v26  ;;  %v13559_v26 = vld [vmem:[%s20050_s3 + $0x84] sm:$0xf]  ;;  %v11613_v50 = vld [vmem:[%s20050_s3 + $0x88] sm:$0xf0] }
 0x3bb   : > { %v18944_v22 = vadd.f32 %v5670_v11, %v5658_v10  ;;  %v11672_v34 = vor.u32 %v13573_v52, %v11669_v25  ;;  %v13581_v10 = vld [vmem:[%s20050_s3 + $0x134] sm:$0xf]  ;;  %v11701_v11 = vld [vmem:[%s20050_s3 + $0x138] sm:$0xf0]  ;;  %v13575_v52 = vld [vmem:[%s20050_s3 + $0x104] sm:$0xf] }
 0x3bc   : > { %6203 = vmatpush.bf16.msra.mxu0 %v11580_v7  ;;  %v5659_v28 = vpop.f32.mrf.mxu2  ;;  %v5884_v7 = vmax.f32 %v5619_v18, 0.0  ;;  %v11688_v18 = vor.u32 %v13577_v44, %v11685_v47 }
 0x3bd   : > { %6216 = vmatpush.bf16.msra.mxu1 %v11644_v54  ;;  %v5672_v6 = vpop.f32.mrf.mxu3  ;;  %v11736_v54 = vor.u32 %v13589_v19, %v11733_v30  ;;  %v11616_v30 = vor.u32 %v13559_v26, %v11613_v50 }
 0x3be   : > { %6229 = vmatpush.bf16.msra.mxu2 %v11708_v55  ;;  %v13571_v55 = vld [vmem:[%s20050_s3 + $0xe4] sm:$0xf]  ;;  %v19014_v13 = vpack.c.bf16 %v5884_v7, %v5884_v7  ;;  %v11677_v6 = vld [vmem:[%s20050_s3 + $0x108] sm:$0xf0] }
 0x3bf   : > { %v11664_v14 = vor.u32 %v13571_v55, %v11661_v15  ;;  %v13592_v55 = vld [vmem:[%s20050_s3 + $0x184] sm:$0xf0] }
 0x3c0   : > { %6204 = vmatpush.bf16.msra.mxu0 %v11572_v60  ;;  %v11720_v60 = vor.u32 %v13585_v58, %v11717_v21  ;;  %v11600_v21 = vor.u32 %v13555_v20, %v11597_v17 }
 0x3c1   : > { %6217 = vmatpush.bf16.msra.mxu1 %v11636_v43  ;;  %v13567_v43 = vld [vmem:[%s20050_s3 + $0xc4] sm:$0xf] }
 0x3c2   : > { %6230 = vmatpush.bf16.msra.mxu2 %v11700_v61  ;;  %v11645_v61 = vld [vmem:[%s20050_s3 + $0xc8] sm:$0xf0] }
 0x3c3   : > { %v11648_v0 = vor.u32 %v13567_v43, %v11645_v61 }
 0x3c4   : > { %6205 = vmatpush.bf16.msra.mxu0 %v11564_v46 }
 0x3c5   : > { %6218 = vmatpush.bf16.msra.mxu1 %v11628_v24  ;;  %v11640_v24 = vor.u32 %v13565_v59, %v11637_v4  ;;  %v11581_v59 = vld [vmem:[%s20050_s3 + $0x48] sm:$0xf0] }
 0x3c6   : > { %6231 = vmatpush.bf16.msra.mxu2 %v11692_v29  ;;  %v11704_v29 = vor.u32 %v13581_v10, %v11701_v11  ;;  %v11741_v11 = vld [vmem:[%s20050_s3 + $0x188] sm:$0xf0] }
 0x3c8   : > { %6206 = vmatpush.bf16.msra.mxu0 %v11556_v41  ;;  %v13561_v41 = vld [vmem:[%s20050_s3 + $0x94] sm:$0xf] }
 0x3c9   : > { %6219 = vmatpush.bf16.msra.mxu1 %v11620_v2 }
 0x3ca   : > { %6232 = vmatpush.bf16.msra.mxu2 %v11684_v48  ;;  %v11621_v48 = vld [vmem:[%s20050_s3 + $0x98] sm:$0xf0] }
 0x3cb   : > { %v11624_v28 = vor.u32 %v13561_v41, %v11621_v48  ;;  %v11549_v48 = vld [vmem:[%s20050_s3 + $0x8] sm:$0xf0] }
 0x3cc   : > { %6207 = vmatpush.bf16.msra.mxu0 %v11548_v51  ;;  %v5683_v35 = vpop.f32.mrf.mxu0  ;;  %v11680_v51 = vor.u32 %v13575_v52, %v11677_v6 }
 0x3cd   : > { %6220 = vmatpush.bf16.msra.mxu1 %v11612_v32  ;;  %v5684_v8 = vadd.f32 %v5683_v35, %v18944_v22  ;;  %v5696_v46 = vpop.f32.mrf.mxu1  ;;  %v11693_v22 = vld [vmem:[%s20050_s3 + $0x128] sm:$0xf0]  ;;  %v13591_v35 = vld [vmem:[%s20050_s3 + $0x184] sm:$0xf] }
 0x3ce   : > { %6233 = vmatpush.bf16.msra.mxu2 %v11676_v12  ;;  %v11696_v3 = vor.u32 %v13579_v62, %v11693_v22  ;;  %v11565_v62 = vld [vmem:[%s20050_s3 + $0x28] sm:$0xf0] }
 0x3cf   : > { %6208 = vmatmul.bf16.vlgmr.msra.gmra.mxu0 %v19010_v9  ;;  %v5697_v23 = vadd.f32 %v5696_v46, %v5684_v8  ;;  %v11744_v8 = vor.u32 %v13591_v35, %v11741_v11  ;;  %v13622_v35 = vld [vmem:[%s20052_s5 + $0xec] sm:$0xf] }
 0x3d0   : > { %6265 = vmatpush.bf16.msrb.mxu0 %v11672_v34  ;;  %6221 = vmatmul.bf16.vlgmr.msra.gmra.mxu1 %v19012_v57 }
 0x3d1   : > { %6278 = vmatpush.bf16.msrb.mxu1 %v11736_v54  ;;  %6234 = vmatmul.bf16.vlgmr.msra.gmra.mxu2 %v19014_v13  ;;  %v11739_v54 = vld [vmem:[%s20050_s3 + $0x180] sm:$0xf] }
 0x3d2   : > { %v11740_v45 = vor.u32 %v13592_v55, %v11739_v54  ;;  %6298 = vmatpush.bf16.msrb.mxu2 %v11744_v8  ;;  %v13619_v8 = vld [vmem:[%s20052_s5 + $0xcc] sm:$0xf0] }
 0x3d4   : > { %6266 = vmatpush.bf16.msrb.mxu0 %v11664_v14  ;;  %v5709_v37 = vpop.f32.mrf.mxu2  ;;  %v5685_v2 = vpop.f32.mrf.mxu0  ;;  %6246 = vmatpush.bf16.msra.mxu3 %v11740_v45 }
 0x3d5   : > { %6279 = vmatpush.bf16.msrb.mxu1 %v11728_v16  ;;  %v5710_v38 = vadd.f32 %v5709_v37, %v5697_v23  ;;  %v5722_v39 = vpop.f32.mrf.mxu3  ;;  %v5698_v49 = vpop.f32.mrf.mxu1  ;;  %v13549_v23 = vld [vmem:[%s20050_s3 + $0x34] sm:$0xf]  ;;  %v11568_v37 = vor.u32 %v13547_v36, %v11565_v62  ;;  %v13543_v2 = vld [vmem:[%s20050_s3 + $0x4] sm:$0xf]  ;;  %v13620_v36 = vld [vmem:[%s20052_s5 + $0xd4] sm:$0xf0] }
 0x3d6   : > { %v11552_v44 = vor.u32 %v13543_v2, %v11549_v48  ;;  %v13618_v62 = vld [vmem:[%s20052_s5 + $0xcc] sm:$0xf]  ;;  %v11837_v2 = vld [vmem:[%s20052_s5 + $0xa8] sm:$0xf]  ;;  %v13616_v48 = vld [vmem:[%s20052_s5 + $0xb4] sm:$0xf0] }
 0x3d7   : > { %v5723_v42 = vadd.f32 %v5722_v39, %v5710_v38  ;;  %v13545_v39 = vld [vmem:[%s20050_s3 + $0x14] sm:$0xf] }
 0x3d8   : > { %6267 = vmatpush.bf16.msrb.mxu0 %v11656_v56  ;;  %v13553_v56 = vld [vmem:[%s20050_s3 + $0x54] sm:$0xf] }
 0x3d9   : > { %6280 = vmatpush.bf16.msrb.mxu1 %v11720_v60  ;;  %v11589_v60 = vld [vmem:[%s20050_s3 + $0x58] sm:$0xf0] }
 0x3da   : > { %v11592_v43 = vor.u32 %v13553_v56, %v11589_v60  ;;  %v11861_v60 = vld [vmem:[%s20052_s5 + $0xe0] sm:$0xf] }
 0x3dc   : > { %6268 = vmatpush.bf16.msrb.mxu0 %v11648_v0  ;;  %v5711_v25 = vpop.f32.mrf.mxu2 }
 0x3dd   : > { %6281 = vmatpush.bf16.msrb.mxu1 %v11712_v1  ;;  %v5724_v19 = vpop.f32.mrf.mxu3  ;;  %v13551_v1 = vld [vmem:[%s20050_s3 + $0x44] sm:$0xf] }
 0x3de   : > { %v11584_v10 = vor.u32 %v13551_v1, %v11581_v59 }
 0x3e0   : > { %6269 = vmatpush.bf16.msrb.mxu0 %v11640_v24  ;;  %v11573_v24 = vld [vmem:[%s20050_s3 + $0x38] sm:$0xf0] }
 0x3e1   : > { %6282 = vmatpush.bf16.msrb.mxu1 %v11704_v29  ;;  %v11576_v29 = vor.u32 %v13549_v23, %v11573_v24  ;;  %v11847_v23 = vld [vmem:[%s20052_s5 + $0xd0] sm:$0xf0] }
 0x3e4   : > { %6270 = vmatpush.bf16.msrb.mxu0 %v11632_v40  ;;  %v11557_v40 = vld [vmem:[%s20050_s3 + $0x18] sm:$0xf0] }
 0x3e5   : > { %6283 = vmatpush.bf16.msrb.mxu1 %v11696_v3  ;;  %v11560_v41 = vor.u32 %v13545_v39, %v11557_v40  ;;  %v11829_v39 = vld [vmem:[%s20052_s5 + $0xa0] sm:$0xf]  ;;  %v13615_v40 = vld [vmem:[%s20052_s5 + $0xac] sm:$0xf0] }
 0x3e8   : > { %6271 = vmatpush.bf16.msrb.mxu0 %v11624_v28 }
 0x3e9   : > { %6284 = vmatpush.bf16.msrb.mxu1 %v11688_v18 }
 0x3ec   : > { %6272 = vmatpush.bf16.msrb.mxu0 %v11616_v30  ;;  %v5735_v53 = vpop.f32.mrf.mxu0 }
 0x3ed   : > { %6285 = vmatpush.bf16.msrb.mxu1 %v11680_v51  ;;  %v5748_v31 = vpop.f32.mrf.mxu1  ;;  %v5736_v63 = vadd.f32 %v5735_v53, %v5723_v42 }
 0x3ef   : > { %6273 = vmatmul.bf16.vlgmr.msrb.gmra.mxu0 %v19012_v57  ;;  %v13557_v57 = vld [vmem:[%s20050_s3 + $0x74] sm:$0xf]  ;;  %v5749_v46 = vadd.f32 %v5748_v31, %v5736_v63 }
 0x3f0   : > { %6286 = vmatmul.bf16.vlgmr.msrb.gmra.mxu1 %v19014_v13  ;;  %v11605_v13 = vld [vmem:[%s20050_s3 + $0x78] sm:$0xf0]  ;;  %v11863_v63 = vld [vmem:[%s20052_s5 + $0xf0] sm:$0xf0] }
 0x3f1   : > { %v11608_v14 = vor.u32 %v13557_v57, %v11605_v13 }
 0x3f3   : > { %6252 = vmatpush.bf16.msrb.mxu3 %v11608_v14 }
 0x3f4   : > { %v5761_v32 = vpop.f32.mrf.mxu2  ;;  %v5737_v7 = vpop.f32.mrf.mxu0 }
 0x3f5   : > { %v5774_v12 = vpop.f32.mrf.mxu3  ;;  %v5750_v34 = vpop.f32.mrf.mxu1  ;;  %v5762_v33 = vadd.f32 %v5761_v32, %v5749_v46  ;;  %v13617_v46 = vld [vmem:[%s20052_s5 + $0xc4] sm:$0xf] }
 0x3f6   : > { %v19157_v34 = vld [vmem:[%s20051_s4] sm:$0x3] }
 0x3f7   : > { %6253 = vmatpush.bf16.msrb.mxu3 %v11600_v21  ;;  %v5775_v3 = vadd.f32 %v5774_v12, %v5762_v33  ;;  %v5942_v54 = vperm.slane %v19157_v34, 0  ;;  %v11853_v33 = vld [vmem:[%s20052_s5 + $0xc8] sm:$0xf] }
 0x3fb   : > { %6254 = vmatpush.bf16.msrb.mxu3 %v11592_v43  ;;  %v13621_v43 = vld [vmem:[%s20052_s5 + $0xe4] sm:$0xf] }
 0x3fc   : > { %v5763_v15 = vpop.f32.mrf.mxu2  ;;  %v11866_v1 = vor.u32 %v13621_v43, %v11863_v63  ;;  %v13601_v43 = vld [vmem:[%s20052_s5 + $0x44] sm:$0xf]  ;;  %v11783_v63 = vld [vmem:[%s20052_s5 + $0x50] sm:$0xf0] }
 0x3fd   : > { %v5776_v27 = vpop.f32.mrf.mxu3 }
 0x3ff   : > { %6255 = vmatpush.bf16.msrb.mxu3 %v11584_v10  ;;  %v11845_v10 = vld [vmem:[%s20052_s5 + $0xc0] sm:$0xf] }
 0x400   : > { %v11846_v24 = vor.u32 %v13619_v8, %v11845_v10  ;;  %v11765_v10 = vld [vmem:[%s20052_s5 + $0x20] sm:$0xf]  ;;  %v13599_v8 = vld [vmem:[%s20052_s5 + $0x2c] sm:$0xf0] }
 0x403   : > { %6256 = vmatpush.bf16.msrb.mxu3 %v11576_v29  ;;  %v11850_v29 = vor.u32 %v13617_v46, %v11847_v23  ;;  %v13597_v46 = vld [vmem:[%s20052_s5 + $0x24] sm:$0xf]  ;;  %v11767_v23 = vld [vmem:[%s20052_s5 + $0x30] sm:$0xf0] }
 0x407   : > { %6257 = vmatpush.bf16.msrb.mxu3 %v11568_v37  ;;  %v11855_v37 = vld [vmem:[%s20052_s5 + $0xd8] sm:$0xf0] }
 0x40b   : > { %6258 = vmatpush.bf16.msrb.mxu3 %v11560_v41  ;;  %v11830_v41 = vor.u32 %v13615_v40, %v11829_v39  ;;  %v11775_v40 = vld [vmem:[%s20052_s5 + $0x38] sm:$0xf0] }
 0x40c   : > { %v5787_v16 = vpop.f32.mrf.mxu0 }
 0x40d   : > { %v5800_v58 = vpop.f32.mrf.mxu1  ;;  %v5788_v42 = vadd.f32 %v5787_v16, %v5775_v3  ;;  %v13613_v3 = vld [vmem:[%s20052_s5 + $0xa4] sm:$0xf] }
 0x40f   : > { %v5801_v47 = vadd.f32 %v5800_v58, %v5788_v42  ;;  %6259 = vmatpush.bf16.msrb.mxu3 %v11552_v44  ;;  %v11831_v42 = vld [vmem:[%s20052_s5 + $0xb0] sm:$0xf0] }
 0x410   : > { %v11834_v44 = vor.u32 %v13613_v3, %v11831_v42  ;;  %v11749_v3 = vld [vmem:[%s20052_s5] sm:$0xf] }
 0x414   : > { %v5813_v61 = vpop.f32.mrf.mxu2  ;;  %v5789_v0 = vpop.f32.mrf.mxu0 }
 0x415   : > { %v5826_v5 = vpop.f32.mrf.mxu3  ;;  %v5802_v4 = vpop.f32.mrf.mxu1  ;;  %v5814_v49 = vadd.f32 %v5813_v61, %v5801_v47  ;;  %v13624_v0 = vld [vmem:[%s20052_s5 + $0xf4] sm:$0xf0]  ;;  %v11838_v47 = vor.u32 %v13616_v48, %v11837_v2  ;;  %v13593_v2 = vld [vmem:[%s20052_s5 + $0x4] sm:$0xf]  ;;  %v11757_v48 = vld [vmem:[%s20052_s5 + $0x8] sm:$0xf] }
 0x416   : > { %v11871_v4 = vld [vmem:[%s20052_s5 + $0xf8] sm:$0xf0] }
 0x417   : > { %v5827_v28 = vadd.f32 %v5826_v5, %v5814_v49  ;;  %v11869_v5 = vld [vmem:[%s20052_s5 + $0xe8] sm:$0xf]  ;;  %v11874_v11 = vor.u32 %v13622_v35, %v11871_v4  ;;  %v13614_v49 = vld [vmem:[%s20052_s5 + $0xac] sm:$0xf]  ;;  %v11791_v4 = vld [vmem:[%s20052_s5 + $0x58] sm:$0xf0] }
 0x418   : > { %v11870_v59 = vor.u32 %v13624_v0, %v11869_v5  ;;  %v11789_v5 = vld [vmem:[%s20052_s5 + $0x48] sm:$0xf]  ;;  %v13604_v0 = vld [vmem:[%s20052_s5 + $0x54] sm:$0xf0]  ;;  %v13602_v35 = vld [vmem:[%s20052_s5 + $0x4c] sm:$0xf] }
 0x419   : > { %6552 = vmatpush.bf16.msra.mxu1 %v11874_v11  ;;  %v11794_v11 = vor.u32 %v13602_v35, %v11791_v4 }
 0x41a   : > { %6539 = vmatpush.bf16.msra.mxu0 %v11870_v59  ;;  %v11790_v59 = vor.u32 %v13604_v0, %v11789_v5 }
 0x41c   : > { %v5815_v22 = vpop.f32.mrf.mxu2 }
 0x41d   : > { %v5828_v38 = vpop.f32.mrf.mxu3  ;;  %v11854_v22 = vor.u32 %v13620_v36, %v11853_v33  ;;  %v11766_v33 = vor.u32 %v13599_v8, %v11765_v10  ;;  %v11770_v36 = vor.u32 %v13597_v46, %v11767_v23 }
 0x41e   : > { %v11858_v38 = vor.u32 %v13618_v62, %v11855_v37  ;;  %v11773_v62 = vld [vmem:[%s20052_s5 + $0x28] sm:$0xf]  ;;  %v13598_v37 = vld [vmem:[%s20052_s5 + $0x2c] sm:$0xf] }
 0x41f   : > { %6540 = vmatpush.bf16.msra.mxu0 %v11854_v22  ;;  %v13600_v22 = vld [vmem:[%s20052_s5 + $0x34] sm:$0xf0]  ;;  %v11778_v42 = vor.u32 %v13598_v37, %v11775_v40 }
 0x420   : > { %6553 = vmatpush.bf16.msra.mxu1 %v11858_v38  ;;  %v11774_v39 = vor.u32 %v13600_v22, %v11773_v62 }
 0x423   : > { %6541 = vmatpush.bf16.msra.mxu0 %v11838_v47  ;;  %v13596_v47 = vld [vmem:[%s20052_s5 + $0x14] sm:$0xf0] }
 0x42c   : > { %v5839_v18 = vpop.f32.mrf.mxu0 }
 0x42d   : > { %v5852_v26 = vpop.f32.mrf.mxu1  ;;  %v5840_v50 = vadd.f32 %v5839_v18, %v5827_v28  ;;  %v11839_v28 = vld [vmem:[%s20052_s5 + $0xb8] sm:$0xf0] }
 0x42e   : > { %v11842_v18 = vor.u32 %v13614_v49, %v11839_v28  ;;  %v13594_v49 = vld [vmem:[%s20052_s5 + $0xc] sm:$0xf] }
 0x42f   : > { %v5853_v52 = vadd.f32 %v5852_v26, %v5840_v50  ;;  %v11813_v26 = vld [vmem:[%s20052_s5 + $0x80] sm:$0xf]  ;;  %v13611_v50 = vld [vmem:[%s20052_s5 + $0x8c] sm:$0xf0] }
 0x430   : > { %6554 = vmatpush.bf16.msra.mxu1 %v11842_v18  ;;  %v11758_v18 = vor.u32 %v13596_v47, %v11757_v48 }
 0x434   : > { %v5865_v6 = vpop.f32.mrf.mxu2  ;;  %v5841_v30 = vpop.f32.mrf.mxu0 }
 0x435   : > { %v5878_v25 = vpop.f32.mrf.mxu3  ;;  %v5866_v19 = vadd.f32 %v5865_v6, %v5853_v52  ;;  %v5854_v51 = vpop.f32.mrf.mxu1  ;;  %v13609_v52 = vld [vmem:[%s20052_s5 + $0x84] sm:$0xf]  ;;  %v11814_v6 = vor.u32 %v13611_v50, %v11813_v26  ;;  %v13612_v30 = vld [vmem:[%s20052_s5 + $0x94] sm:$0xf0]  ;;  %v11759_v26 = vld [vmem:[%s20052_s5 + $0x18] sm:$0xf0] }
 0x436   : > { %v11762_v50 = vor.u32 %v13594_v49, %v11759_v26 }
 0x437   : > { %v5879_v53 = vadd.f32 %v5878_v25, %v5866_v19  ;;  %v11815_v25 = vld [vmem:[%s20052_s5 + $0x90] sm:$0xf0]  ;;  %v11821_v19 = vld [vmem:[%s20052_s5 + $0x88] sm:$0xf] }
 0x438   : > { %v11818_v51 = vor.u32 %v13609_v52, %v11815_v25  ;;  %v5943_v25 = vperm.slane %v19157_v34, 1 }
 0x439   : > { %v5885_v31 = vmax.f32 %v5879_v53, 0.0  ;;  %v11822_v53 = vor.u32 %v13612_v30, %v11821_v19 }
 0x43b   : > { %v5889_v32 = vpack.c.bf16 %v5885_v31, %v5885_v31  ;;  %v13610_v31 = vld [vmem:[%s20052_s5 + $0x8c] sm:$0xf]  ;;  %6542 = vmatpush.bf16.msra.mxu0 %v11822_v53 }
 0x43c   : > { %v5867_v12 = vpop.f32.mrf.mxu2 }
 0x43d   : > { %v5880_v7 = vpop.f32.mrf.mxu3  ;;  %11745 = vmatmul.msk.bf16.vlgmr.msra.gmra.mxu3 %vm6196_vm0, %v5889_v32  ;;  %11746 = vmatmul.msk.bf16.vlgmr.msrb.gmra.mxu2 %vm6196_vm0, %v5889_v32  ;;  %v11823_v32 = vld [vmem:[%s20052_s5 + $0x98] sm:$0xf0] }
 0x43e   : > { %6526 = vmatpush.bf16.msra.mxu3 %v11866_v1  ;;  %v11826_v12 = vor.u32 %v13610_v31, %v11823_v32  ;;  %v11797_v7 = vld [vmem:[%s20052_s5 + $0x60] sm:$0xf]  ;;  %v11786_v1 = vor.u32 %v13601_v43, %v11783_v63 }
 0x440   : > { %6555 = vmatpush.bf16.msra.mxu1 %v11826_v12 }
 0x442   : > { %6527 = vmatpush.bf16.msra.mxu3 %v11850_v29 }
 0x446   : > { %6528 = vmatpush.bf16.msra.mxu3 %v11834_v44 }
 0x44a   : > { %6529 = vmatpush.bf16.msra.mxu3 %v11818_v51 }
 0x44c   : > { %v6209_v55 = vpop.f32.mrf.mxu0 }
 0x44d   : > { %v6210_v15 = vadd.f32 %v6209_v55, %v5942_v54  ;;  %v6222_v45 = vpop.f32.mrf.mxu1  ;;  %6260 = vmatmul.bf16.vlgmr.msrb.gmra.mxu3 %v19010_v9  ;;  %v13623_v9 = vld [vmem:[%s20052_s5 + $0xec] sm:$0xf0]  ;;  %v13605_v55 = vld [vmem:[%s20052_s5 + $0x64] sm:$0xf] }
 0x44e   : > { %v11862_v61 = vor.u32 %v13623_v9, %v11861_v60  ;;  %v13607_v54 = vld [vmem:[%s20052_s5 + $0x6c] sm:$0xf0]  ;;  %v11781_v60 = vld [vmem:[%s20052_s5 + $0x40] sm:$0xf] }
 0x44f   : > { %v6223_v27 = vadd.f32 %v6222_v45, %v6210_v15  ;;  %v11798_v15 = vor.u32 %v13607_v54, %v11797_v7  ;;  %v11799_v45 = vld [vmem:[%s20052_s5 + $0x70] sm:$0xf0]  ;;  %v13603_v9 = vld [vmem:[%s20052_s5 + $0x4c] sm:$0xf0]  ;;  %v6304_v54 = vld [vmem:[%s20056_s9] sm:$0xff] }
 0x450   : > { %6513 = vmatpush.bf16.msra.mxu2 %v11862_v61  ;;  %v11782_v61 = vor.u32 %v13603_v9, %v11781_v60 }
 0x454   : > { %v6235_v57 = vpop.f32.mrf.mxu2  ;;  %v6211_v14 = vpop.f32.mrf.mxu0  ;;  %6514 = vmatpush.bf16.msra.mxu2 %v11846_v24 }
 0x455   : > { %v19161_v13 = vadd.f32 %v6235_v57, %v6223_v27  ;;  %v6224_v16 = vpop.f32.mrf.mxu1  ;;  %v11805_v27 = vld [vmem:[%s20052_s5 + $0x68] sm:$0xf]  ;;  %v13608_v57 = vld [vmem:[%s20052_s5 + $0x74] sm:$0xf0]  ;;  %v11802_v14 = vor.u32 %v13605_v55, %v11799_v45 }
 0x456   : > { %v11806_v16 = vor.u32 %v13608_v57, %v11805_v27 }
 0x457   : > { %6530 = vmatpush.bf16.msra.mxu3 %v11802_v14 }
 0x458   : > { %6515 = vmatpush.bf16.msra.mxu2 %v11830_v41  ;;  %6543 = vmatpush.bf16.msra.mxu0 %v11806_v16  ;;  %v13595_v41 = vld [vmem:[%s20052_s5 + $0xc] sm:$0xf0] }
 0x459   : > { %v11750_v44 = vor.u32 %v13595_v41, %v11749_v3 }
 0x45b   : > { %6531 = vmatpush.bf16.msra.mxu3 %v11786_v1 }
 0x45c   : > { %v6237_v20 = vpop.f32.mrf.mxu2  ;;  %6516 = vmatpush.bf16.msra.mxu2 %v11814_v6  ;;  %6544 = vmatpush.bf16.msra.mxu0 %v11790_v59 }
 0x45d   : > { %v13606_v20 = vld [vmem:[%s20052_s5 + $0x6c] sm:$0xf] }
 0x45f   : > { %6532 = vmatpush.bf16.msra.mxu3 %v11770_v36 }
 0x460   : > { %6517 = vmatpush.bf16.msra.mxu2 %v11798_v15  ;;  %6545 = vmatpush.bf16.msra.mxu0 %v11774_v39 }
 0x464   : > { %6518 = vmatpush.bf16.msra.mxu2 %v11782_v61  ;;  %6546 = vmatpush.bf16.msra.mxu0 %v11758_v18 }
 0x468   : > { %6519 = vmatpush.bf16.msra.mxu2 %v11766_v33 }
 0x46c   : > { %v19163_v17 = vpop.f32.mrf.mxu0  ;;  %6520 = vmatpush.bf16.msra.mxu2 %v11750_v44 }
 0x46d   : > { %v19165_v58 = vpop.f32.mrf.mxu1 }
 0x474   : > { %v6276_v21 = vpop.f32.mrf.mxu0 }
 0x475   : > { %v6289_v56 = vpop.f32.mrf.mxu1  ;;  %v11807_v21 = vld [vmem:[%s20052_s5 + $0x78] sm:$0xf0] }
 0x476   : > { %v11810_v56 = vor.u32 %v13606_v20, %v11807_v21 }
 0x478   : > { %6556 = vmatpush.bf16.msra.mxu1 %v11810_v56 }
 0x47c   : > { %6557 = vmatpush.bf16.msra.mxu1 %v11794_v11 }
 0x480   : > { %6558 = vmatpush.bf16.msra.mxu1 %v11778_v42 }
 0x484   : > { %6559 = vmatpush.bf16.msra.mxu1 %v11762_v50 }
 0x4c0   : > { %v6248_v24 = vpop.f32.mrf.mxu3  ;;  %v6300_v29 = vpop.f32.mrf.mxu2 }
 0x4c1   : > { %v6249_v38 = vadd.f32 %v6248_v24, %v19161_v13  ;;  %v11751_v13 = vld [vmem:[%s20052_s5 + $0x10] sm:$0xf0] }
 0x4c2   : > { %v11754_v28 = vor.u32 %v13593_v2, %v11751_v13 }
 0x4c3   : > { %6576 = vst [vmem:[#allocation6] sm:$0xff] %v6249_v38 }
 0x4c4   : > { %6533 = vmatpush.bf16.msra.mxu3 %v11754_v28 }
 0x4c8   : > { %v6250_v52 = vpop.f32.mrf.mxu3  ;;  %v6302_v6 = vpop.f32.mrf.mxu2 }
 0x4d0   : > { %v6261_v19 = vpop.f32.mrf.mxu3 }
 0x4d1   : > { %v6262_v30 = vadd.f32 %v6261_v19, %v5943_v25 }
 0x4d3   : > { %v6275_v51 = vadd.f32 %v19163_v17, %v6262_v30  ;;  %v6343_v17 = vld [vmem:[%s20053_s6] sm:$0xf] }
 0x4d4   : > { %v6348_v27 = vperm.slane %v6343_v17, 3  ;;  %v6345_v21 = vperm.slane %v6343_v17, 0  ;;  %v6346_v56 = vperm.slane %v6343_v17, 1 }
 0x4d5   : > { %v6288_v53 = vadd.f32 %v19165_v58, %v6275_v51  ;;  %v6347_v58 = vperm.slane %v6343_v17, 2 }
 0x4d7   : > { %v6301_v31 = vadd.f32 %v6300_v29, %v6288_v53 }
 0x4d8   : > { %v6263_v32 = vpop.f32.mrf.mxu3 }
 0x4d9   : > { %v6305_v12 = vmul.f32 0.5, %v6301_v31  ;;  %6577 = vst [vmem:[#allocation8] sm:$0xff] %v6301_v31 }
 0x4db   : > { %v6306_v7 = vmul.f32 1.442695, %v6305_v12 }
 0x4dd   : > { %13932 = vpow2.f32 %v6306_v7 }
 0x4e3   : > { %v13933_v55 = vpop.eup %13932 }
 0x4e4   : > { %v6308_v15 = vmul.f32 %v13933_v55, %v6304_v54 }
 0x4e6   : > { %v6309_v45 = vadd.f32 %v6308_v15, %v6249_v38 }
 0x4e8   : > { %v6310_v34 = vpack.c.bf16 %v6309_v45, %v6309_v45 }
 0x4ea   : > { %6521 = vmatmul.bf16.vlgmr.msra.gmra.mxu2 %v6310_v34  ;;  %6534 = vmatmul.bf16.vlgmr.msra.gmra.mxu3 %v6310_v34 }
 0x4eb   : > { %6547 = vmatmul.bf16.vlgmr.msra.gmra.mxu0 %v6310_v34  ;;  %6560 = vmatmul.bf16.vlgmr.msra.gmra.mxu1 %v6310_v34 }
 0x568   : > { %v6548_v57 = vpop.f32.mrf.mxu0  ;;  %v6561_v14 = vpop.f32.mrf.mxu1 }
 0x569   : > { %v6549_v16 = vadd.f32 %v6548_v57, %v6347_v58  ;;  %v6562_v20 = vadd.f32 %v6561_v14, %v6348_v27 }
 0x56b   : > { %v6567_v60 = vmax.f32 %v6549_v16, 0.0  ;;  %v6568_v9 = vmax.f32 %v6562_v20, 0.0 }
 0x56d   : > { %v6570_v43 = vpack.c.bf16 %v6568_v9, %v6567_v60  ;;  %v6522_v61 = vpop.f32.mrf.mxu2  ;;  %v6535_v63 = vpop.f32.mrf.mxu3 }
 0x56e   : > { %v6523_v5 = vadd.f32 %v6522_v61, %v6345_v21  ;;  %v6536_v0 = vadd.f32 %v6535_v63, %v6346_v56 }
 0x56f   : > { %6575 = vst.msk [vmem:[#allocation2 + $0x8] sm:$0xff] %vm6574_vm3, %v6570_v43 }
 0x570   : > { %v6565_v1 = vmax.f32 %v6523_v5, 0.0  ;;  %v6566_v59 = vmax.f32 %v6536_v0, 0.0  ;;  %v6550_v35 = vpop.f32.mrf.mxu0  ;;  %v6563_v4 = vpop.f32.mrf.mxu1 }
 0x572   : > { %v6569_v10 = vpack.c.bf16 %v6566_v59, %v6565_v1 }
 0x574   : > { %6571 = vst [vmem:[#allocation2] sm:$0xff] %v6569_v10 }
 0x575   : > { %v6524_v11 = vpop.f32.mrf.mxu2  ;;  %v6537_v8 = vpop.f32.mrf.mxu3 }
 0x576 PF: > { %v12157_v46 = vld [vmem:[%s14743_s20 + $0x230] sm:$0xf]  ;;  %v13700_v23 = vld [vmem:[%s14743_s20 + $0x254] sm:$0xf0]  ;;  %v12837_v36 = vld [vmem:[%s14743_s20 + $0x780] sm:$0xf] }
 0x577   : > { %v12797_v24 = vld [vmem:[%s14743_s20 + $0x730] sm:$0xf]  ;;  %v12158_v29 = vor.u32 %v13700_v23, %v12157_v46  ;;  %v13860_v33 = vld [vmem:[%s14743_s20 + $0x754] sm:$0xf0]  ;;  %v13870_v62 = vld [vmem:[%s14743_s20 + $0x7a4] sm:$0xf0] }
 0x578   : > { %v12798_v22 = vor.u32 %v13860_v33, %v12797_v24  ;;  %v12838_v37 = vor.u32 %v13870_v62, %v12837_v36  ;;  %v13695_v38 = vld [vmem:[%s14743_s20 + $0x234] sm:$0xf]  ;;  %v12159_v39 = vld [vmem:[%s14743_s20 + $0x258] sm:$0xf0]  ;;  %v12477_v40 = vld [vmem:[%s14743_s20 + $0x4b0] sm:$0xf] }
 0x579   : > { %8121 = vmatpush.bf16.msra.mxu0 %v12158_v29  ;;  %v12162_v3 = vor.u32 %v13695_v38, %v12159_v39  ;;  %v13780_v41 = vld [vmem:[%s14743_s20 + $0x4d4] sm:$0xf0]  ;;  %v12117_v42 = vld [vmem:[%s14743_s20 + $0x1e0] sm:$0xf]  ;;  %v13690_v2 = vld [vmem:[%s14743_s20 + $0x204] sm:$0xf0] }
 0x57a   : > { %8147 = vmatpush.bf16.msra.mxu2 %v12798_v22  ;;  %8167 = vmatpush.bf16.msra.mxu3 %v12838_v37  ;;  %v12478_v13 = vor.u32 %v13780_v41, %v12477_v40  ;;  %v12118_v48 = vor.u32 %v13690_v2, %v12117_v42  ;;  %v12757_v44 = vld [vmem:[%s14743_s20 + $0x6e0] sm:$0xf]  ;;  %v13850_v47 = vld [vmem:[%s14743_s20 + $0x704] sm:$0xf0]  ;;  %v13685_v49 = vld [vmem:[%s14743_s20 + $0x1e4] sm:$0xf] }
 0x57b   : > { %v12758_v28 = vor.u32 %v13850_v47, %v12757_v44  ;;  %v12119_v18 = vld [vmem:[%s14743_s20 + $0x208] sm:$0xf0]  ;;  %v12437_v26 = vld [vmem:[%s14743_s20 + $0x460] sm:$0xf]  ;;  %v13770_v50 = vld [vmem:[%s14743_s20 + $0x484] sm:$0xf0] }
 0x57c   : > { %8134 = vmatpush.bf16.msra.mxu1 %v12478_v13  ;;  %v12122_v52 = vor.u32 %v13685_v49, %v12119_v18  ;;  %v12438_v6 = vor.u32 %v13770_v50, %v12437_v26  ;;  %v12077_v25 = vld [vmem:[%s14743_s20 + $0x190] sm:$0xf]  ;;  %v13680_v19 = vld [vmem:[%s14743_s20 + $0x1b4] sm:$0xf0]  ;;  %v13675_v31 = vld [vmem:[%s14743_s20 + $0x194] sm:$0xf] }
 0x57d   : > { %v12717_v30 = vld [vmem:[%s14743_s20 + $0x690] sm:$0xf]  ;;  %8122 = vmatpush.bf16.msra.mxu0 %v12118_v48  ;;  %v12078_v51 = vor.u32 %v13680_v19, %v12077_v25  ;;  %v13840_v53 = vld [vmem:[%s14743_s20 + $0x6b4] sm:$0xf0]  ;;  %v12079_v32 = vld [vmem:[%s14743_s20 + $0x1b8] sm:$0xf0] }
 0x57e   : > { %8173 = vmatpush.bf16.msrb.mxu3 %v12162_v3  ;;  %8148 = vmatpush.bf16.msra.mxu2 %v12758_v28  ;;  %v12718_v12 = vor.u32 %v13840_v53, %v12717_v30  ;;  %v12397_v7 = vld [vmem:[%s14743_s20 + $0x410] sm:$0xf]  ;;  %v13760_v54 = vld [vmem:[%s14743_s20 + $0x434] sm:$0xf0]  ;;  %v12037_v55 = vld [vmem:[%s14743_s20 + $0x140] sm:$0xf]  ;;  %v12082_v15 = vor.u32 %v13675_v31, %v12079_v32 }
 0x57f   : > { %v13670_v45 = vld [vmem:[%s14743_s20 + $0x164] sm:$0xf0]  ;;  %v12677_v34 = vld [vmem:[%s14743_s20 + $0x640] sm:$0xf]  ;;  %v12398_v58 = vor.u32 %v13760_v54, %v12397_v7  ;;  %v13665_v27 = vld [vmem:[%s14743_s20 + $0x144] sm:$0xf] }
 0x580   : > { %v13830_v17 = vld [vmem:[%s14743_s20 + $0x664] sm:$0xf0]  ;;  %8135 = vmatpush.bf16.msra.mxu1 %v12438_v6  ;;  %v12039_v57 = vld [vmem:[%s14743_s20 + $0x168] sm:$0xf0]  ;;  %v12038_v14 = vor.u32 %v13670_v45, %v12037_v55  ;;  %v12357_v16 = vld [vmem:[%s14743_s20 + $0x3c0] sm:$0xf] }
 0x581   : > { %8123 = vmatpush.bf16.msra.mxu0 %v12078_v51  ;;  %v13750_v20 = vld [vmem:[%s14743_s20 + $0x3e4] sm:$0xf0]  ;;  %v12678_v21 = vor.u32 %v13830_v17, %v12677_v34  ;;  %v11997_v56 = vld [vmem:[%s14743_s20 + $0xf0] sm:$0xf]  ;;  %v13660_v60 = vld [vmem:[%s14743_s20 + $0x114] sm:$0xf0]  ;;  %v12042_v9 = vor.u32 %v13665_v27, %v12039_v57 }
 0x582   : > { %8174 = vmatpush.bf16.msrb.mxu3 %v12122_v52  ;;  %8149 = vmatpush.bf16.msra.mxu2 %v12718_v12  ;;  %v12637_v43 = vld [vmem:[%s14743_s20 + $0x5f0] sm:$0xf]  ;;  %v13820_v61 = vld [vmem:[%s14743_s20 + $0x614] sm:$0xf0]  ;;  %v12358_v63 = vor.u32 %v13750_v20, %v12357_v16  ;;  %v13655_v5 = vld [vmem:[%s14743_s20 + $0xf4] sm:$0xf]  ;;  %v11998_v1 = vor.u32 %v13660_v60, %v11997_v56 }
 0x583   : > { %v11999_v0 = vld [vmem:[%s14743_s20 + $0x118] sm:$0xf0]  ;;  %v12317_v59 = vld [vmem:[%s14743_s20 + $0x370] sm:$0xf]  ;;  %v13740_v35 = vld [vmem:[%s14743_s20 + $0x394] sm:$0xf0]  ;;  %v12638_v4 = vor.u32 %v13820_v61, %v12637_v43 }
 0x584   : > { %8136 = vmatpush.bf16.msra.mxu1 %v12398_v58  ;;  %v11957_v10 = vld [vmem:[%s14743_s20 + $0xa0] sm:$0xf]  ;;  %v13650_v11 = vld [vmem:[%s14743_s20 + $0xc4] sm:$0xf0]  ;;  %v12002_v46 = vor.u32 %v13655_v5, %v11999_v0  ;;  %v12318_v33 = vor.u32 %v13740_v35, %v12317_v59  ;;  %v13645_v36 = vld [vmem:[%s14743_s20 + $0xa4] sm:$0xf] }
 0x585   : > { %8124 = vmatpush.bf16.msra.mxu0 %v12038_v14  ;;  %v19413_v8 = vld [vmem:[#allocation2 + $0x8] sm:$0xff]  ;;  %v12597_v23 = vld [vmem:[%s14743_s20 + $0x5a0] sm:$0xf]  ;;  %v11958_v22 = vor.u32 %v13650_v11, %v11957_v10  ;;  %vm8117_vm4 = vcmask 130048   ;;  %v11917_v3 = vld [vmem:[%s14743_s20 + $0x50] sm:$0xf] }
 0x586   : > { %8175 = vmatpush.bf16.msrb.mxu3 %v12082_v15  ;;  %8150 = vmatpush.bf16.msra.mxu2 %v12678_v21  ;;  %v13810_v24 = vld [vmem:[%s14743_s20 + $0x5c4] sm:$0xf0]  ;;  %v6859_v29 = vunpack.c.h.b16 %v19413_v8  ;;  %v11959_v62 = vld [vmem:[%s14743_s20 + $0xc8] sm:$0xf0]  ;;  %v12277_v37 = vld [vmem:[%s14743_s20 + $0x320] sm:$0xf]  ;;  %v6858_v34 = vunpack.c.l.b16 %v19413_v8 }
 0x587   : > { %v13730_v38 = vld [vmem:[%s14743_s20 + $0x344] sm:$0xf0]  ;;  %v12598_v40 = vor.u32 %v13810_v24, %v12597_v23  ;;  %v13640_v41 = vld [vmem:[%s14743_s20 + $0x74] sm:$0xf0]  ;;  %v11962_v42 = vor.u32 %v13645_v36, %v11959_v62  ;;  %v12557_v2 = vld [vmem:[%s14743_s20 + $0x550] sm:$0xf] }
 0x588   : > { %8137 = vmatpush.bf16.msra.mxu1 %v12358_v63  ;;  %v19422_v39 = vpack.c.b16 %v6859_v29, %v6859_v29  ;;  %v13800_v13 = vld [vmem:[%s14743_s20 + $0x574] sm:$0xf0]  ;;  %v12278_v48 = vor.u32 %v13730_v38, %v12277_v37  ;;  %v13635_v44 = vld [vmem:[%s14743_s20 + $0x54] sm:$0xf]  ;;  %v11919_v47 = vld [vmem:[%s14743_s20 + $0x78] sm:$0xf0]  ;;  %v11918_v28 = vor.u32 %v13640_v41, %v11917_v3 }
 0x589   : > { %8125 = vmatpush.bf16.msra.mxu0 %v11998_v1  ;;  %v12237_v49 = vld [vmem:[%s14743_s20 + $0x2d0] sm:$0xf]  ;;  %v13720_v18 = vld [vmem:[%s14743_s20 + $0x2f4] sm:$0xf0]  ;;  %v11877_v26 = vld [vmem:[%s14743_s20] sm:$0xf]  ;;  %v12558_v52 = vor.u32 %v13800_v13, %v12557_v2  ;;  %v11922_v19 = vor.u32 %v13635_v44, %v11919_v47  ;;  %v19455_v1 = vpack.c.b16 %v6858_v34, %v6858_v34 }
 0x58a   : > { %8176 = vmatpush.bf16.msrb.mxu3 %v12042_v9  ;;  %8151 = vmatpush.bf16.msra.mxu2 %v12638_v4  ;;  %v13630_v50 = vld [vmem:[%s14743_s20 + $0x24] sm:$0xf0]  ;;  %v12517_v6 = vld [vmem:[%s14743_s20 + $0x500] sm:$0xf]  ;;  %v13775_v30 = vld [vmem:[%s14743_s20 + $0x4b4] sm:$0xf]  ;;  %v12238_v31 = vor.u32 %v13720_v18, %v12237_v49 }
 0x58b   : > { %12875 = vmatmul.msk.bf16.vlgmr.msra.gmra.mxu3 %vm8117_vm4, %v19422_v39  ;;  %v13790_v25 = vld [vmem:[%s14743_s20 + $0x524] sm:$0xf0]  ;;  %v12479_v51 = vld [vmem:[%s14743_s20 + $0x4d8] sm:$0xf0]  ;;  %v6578_v53 = vld [vmem:[#allocation2] sm:$0xff]  ;;  %v11878_v54 = vor.u32 %v13630_v50, %v11877_v26  ;;  %s8869_s27 = sshll.u32 %s20058_s11, 4  ;;  %s8870_s27 = int_to_ptr.hbm [resolvable:$true] %s8869_s27 }
 0x58c   : > { %8138 = vmatpush.bf16.msra.mxu1 %v12318_v33  ;;  %v13625_v32 = vld [vmem:[%s14743_s20 + $0x4] sm:$0xf]  ;;  %v11879_v12 = vld [vmem:[%s14743_s20 + $0x28] sm:$0xf0]  ;;  %v12197_v7 = vld [vmem:[%s14743_s20 + $0x280] sm:$0xf]  ;;  %v12518_v17 = vor.u32 %v13790_v25, %v12517_v6  ;;  %v12482_v58 = vor.u32 %v13775_v30, %v12479_v51  ;;  %v6856_v14 = vunpack.c.l.b16 %v6578_v53  ;;  %v6857_v56 = vunpack.c.h.b16 %v6578_v53 }
 0x58d   : > { %8126 = vmatpush.bf16.msra.mxu0 %v11958_v22  ;;  %v13710_v55 = vld [vmem:[%s14743_s20 + $0x2a4] sm:$0xf0]  ;;  %v12165_v15 = vld [vmem:[%s14743_s20 + $0x238] sm:$0xf]  ;;  %v13701_v45 = vld [vmem:[%s14743_s20 + $0x25c] sm:$0xf0]  ;;  %v11882_v20 = vor.u32 %v13625_v32, %v11879_v12 }
 0x58e   : > { %8177 = vmatpush.bf16.msrb.mxu3 %v12002_v46  ;;  %8152 = vmatpush.bf16.msra.mxu2 %v12598_v40  ;;  %v13855_v27 = vld [vmem:[%s14743_s20 + $0x734] sm:$0xf]  ;;  %v12799_v57 = vld [vmem:[%s14743_s20 + $0x758] sm:$0xf0]  ;;  %v13865_v16 = vld [vmem:[%s14743_s20 + $0x784] sm:$0xf]  ;;  %v12198_v9 = vor.u32 %v13710_v55, %v12197_v7  ;;  %v12166_v43 = vor.u32 %v13701_v45, %v12165_v15  ;;  %v19459_v10 = vpack.c.b16 %v6856_v14, %v6856_v14 }
 0x58f   : > { %v13765_v21 = vld [vmem:[%s14743_s20 + $0x464] sm:$0xf]  ;;  %v12839_v60 = vld [vmem:[%s14743_s20 + $0x7a8] sm:$0xf0]  ;;  %v12485_v5 = vld [vmem:[%s14743_s20 + $0x4b8] sm:$0xf]  ;;  %v12802_v59 = vor.u32 %v13855_v27, %v12799_v57  ;;  %v19463_v24 = vpack.c.b16 %v6857_v56, %v6857_v56 }
 0x590   : > { %8139 = vmatpush.bf16.msra.mxu1 %v12278_v48  ;;  %v12439_v61 = vld [vmem:[%s14743_s20 + $0x488] sm:$0xf0]  ;;  %v12842_v63 = vor.u32 %v13865_v16, %v12839_v60  ;;  %v13781_v0 = vld [vmem:[%s14743_s20 + $0x4dc] sm:$0xf0]  ;;  %v12125_v35 = vld [vmem:[%s14743_s20 + $0x1e8] sm:$0xf] }
 0x591   : > { %8127 = vmatpush.bf16.msra.mxu0 %v11918_v28  ;;  %v13691_v4 = vld [vmem:[%s14743_s20 + $0x20c] sm:$0xf0]  ;;  %v13845_v11 = vld [vmem:[%s14743_s20 + $0x6e4] sm:$0xf]  ;;  %v12759_v8 = vld [vmem:[%s14743_s20 + $0x708] sm:$0xf0]  ;;  %v12486_v46 = vor.u32 %v13781_v0, %v12485_v5  ;;  %v12442_v23 = vor.u32 %v13765_v21, %v12439_v61 }
 0x592   : > { %8178 = vmatpush.bf16.msrb.mxu3 %v11962_v42  ;;  %8153 = vmatpush.bf16.msra.mxu2 %v12558_v52  ;;  %v12445_v29 = vld [vmem:[%s14743_s20 + $0x468] sm:$0xf]  ;;  %v13771_v33 = vld [vmem:[%s14743_s20 + $0x48c] sm:$0xf0]  ;;  %v12126_v36 = vor.u32 %v13691_v4, %v12125_v35  ;;  %v13755_v62 = vld [vmem:[%s14743_s20 + $0x414] sm:$0xf]  ;;  %v12762_v37 = vor.u32 %v13845_v11, %v12759_v8 }
 0x593   : > { %v12399_v22 = vld [vmem:[%s14743_s20 + $0x438] sm:$0xf0]  ;;  %v12085_v38 = vld [vmem:[%s14743_s20 + $0x198] sm:$0xf]  ;;  %v13681_v40 = vld [vmem:[%s14743_s20 + $0x1bc] sm:$0xf0]  ;;  %v12446_v42 = vor.u32 %v13771_v33, %v12445_v29 }
 0x594   : > { %8140 = vmatpush.bf16.msra.mxu1 %v12238_v31  ;;  %v13835_v3 = vld [vmem:[%s14743_s20 + $0x694] sm:$0xf]  ;;  %v12719_v41 = vld [vmem:[%s14743_s20 + $0x6b8] sm:$0xf0]  ;;  %v12402_v2 = vor.u32 %v13755_v62, %v12399_v22  ;;  %v12405_v13 = vld [vmem:[%s14743_s20 + $0x418] sm:$0xf]  ;;  %v12086_v44 = vor.u32 %v13681_v40, %v12085_v38 }
 0x595   : > { %8128 = vmatpush.bf16.msra.mxu0 %v11878_v54  ;;  %v13761_v48 = vld [vmem:[%s14743_s20 + $0x43c] sm:$0xf0]  ;;  %v13745_v47 = vld [vmem:[%s14743_s20 + $0x3c4] sm:$0xf]  ;;  %v12359_v49 = vld [vmem:[%s14743_s20 + $0x3e8] sm:$0xf0]  ;;  %v12722_v28 = vor.u32 %v13835_v3, %v12719_v41 }
 0x596   : > { %8179 = vmatpush.bf16.msrb.mxu3 %v11922_v19  ;;  %8154 = vmatpush.bf16.msra.mxu2 %v12518_v17  ;;  %v12045_v18 = vld [vmem:[%s14743_s20 + $0x148] sm:$0xf]  ;;  %v13671_v26 = vld [vmem:[%s14743_s20 + $0x16c] sm:$0xf0]  ;;  %v13825_v50 = vld [vmem:[%s14743_s20 + $0x644] sm:$0xf]  ;;  %v12406_v6 = vor.u32 %v13761_v48, %v12405_v13  ;;  %v12362_v25 = vor.u32 %v13745_v47, %v12359_v49 }
 0x597   : > { %v12679_v52 = vld [vmem:[%s14743_s20 + $0x668] sm:$0xf0]  ;;  %v12365_v19 = vld [vmem:[%s14743_s20 + $0x3c8] sm:$0xf]  ;;  %v13751_v30 = vld [vmem:[%s14743_s20 + $0x3ec] sm:$0xf0]  ;;  %v12046_v51 = vor.u32 %v13671_v26, %v12045_v18 }
 0x598   : > { %8141 = vmatpush.bf16.msra.mxu1 %v12198_v9  ;;  %8129 = vmatmul.bf16.vlgmr.msra.gmra.mxu0 %v19459_v10  ;;  %v13735_v53 = vld [vmem:[%s14743_s20 + $0x374] sm:$0xf]  ;;  %v12319_v31 = vld [vmem:[%s14743_s20 + $0x398] sm:$0xf0]  ;;  %v12682_v32 = vor.u32 %v13825_v50, %v12679_v52  ;;  %v12005_v12 = vld [vmem:[%s14743_s20 + $0xf8] sm:$0xf]  ;;  %v12366_v15 = vor.u32 %v13751_v30, %v12365_v19 }
 0x599   : > { %8186 = vmatpush.bf16.msrb.mxu0 %v12482_v58  ;;  %8155 = vmatmul.bf16.vlgmr.msra.gmra.mxu2 %v19455_v1  ;;  %v13661_v7 = vld [vmem:[%s14743_s20 + $0x11c] sm:$0xf0]  ;;  %v13815_v54 = vld [vmem:[%s14743_s20 + $0x5f4] sm:$0xf]  ;;  %v12639_v55 = vld [vmem:[%s14743_s20 + $0x618] sm:$0xf0]  ;;  %v12322_v45 = vor.u32 %v13735_v53, %v12319_v31 }
 0x59a   : > { %8180 = vmatpush.bf16.msrb.mxu3 %v11882_v20  ;;  %8219 = vmatpush.bf16.msrb.mxu2 %v12842_v63  ;;  %v12325_v34 = vld [vmem:[%s14743_s20 + $0x378] sm:$0xf]  ;;  %v13741_v17 = vld [vmem:[%s14743_s20 + $0x39c] sm:$0xf0]  ;;  %v12006_v58 = vor.u32 %v13661_v7, %v12005_v12  ;;  %v13725_v27 = vld [vmem:[%s14743_s20 + $0x324] sm:$0xf]  ;;  %v12642_v14 = vor.u32 %v13815_v54, %v12639_v55 }
 0x59b   : > { %8142 = vmatmul.bf16.vlgmr.msra.gmra.mxu1 %v19463_v24  ;;  %v12279_v57 = vld [vmem:[%s14743_s20 + $0x348] sm:$0xf0]  ;;  %v11965_v16 = vld [vmem:[%s14743_s20 + $0xa8] sm:$0xf]  ;;  %v13651_v20 = vld [vmem:[%s14743_s20 + $0xcc] sm:$0xf0]  ;;  %v12326_v60 = vor.u32 %v13741_v17, %v12325_v34 }
 0x59c   : > { %8199 = vmatpush.bf16.msrb.mxu1 %v12802_v59  ;;  %v13805_v21 = vld [vmem:[%s14743_s20 + $0x5a4] sm:$0xf]  ;;  %v12599_v56 = vld [vmem:[%s14743_s20 + $0x5c8] sm:$0xf0]  ;;  %v12282_v9 = vor.u32 %v13725_v27, %v12279_v57  ;;  %v13731_v61 = vld [vmem:[%s14743_s20 + $0x34c] sm:$0xf0]  ;;  %v11966_v63 = vor.u32 %v13651_v20, %v11965_v16 }
 0x59d   : > { %8187 = vmatpush.bf16.msrb.mxu0 %v12442_v23  ;;  %8181 = vmatmul.bf16.vlgmr.msrb.gmra.mxu3 %v19459_v10  ;;  %v13715_v5 = vld [vmem:[%s14743_s20 + $0x2d4] sm:$0xf]  ;;  %v12239_v0 = vld [vmem:[%s14743_s20 + $0x2f8] sm:$0xf0]  ;;  %v12602_v59 = vor.u32 %v13805_v21, %v12599_v56  ;;  %v11925_v35 = vld [vmem:[%s14743_s20 + $0x58] sm:$0xf] }
 0x59e   : > { %8225 = vmatpush.bf16.msra.mxu3 %v12166_v43  ;;  %8238 = vmatpush.bf16.msra.mxu2 %v12486_v46  ;;  %v12285_v43 = vld [vmem:[%s14743_s20 + $0x328] sm:$0xf]  ;;  %v13641_v4 = vld [vmem:[%s14743_s20 + $0x7c] sm:$0xf0]  ;;  %v13795_v11 = vld [vmem:[%s14743_s20 + $0x554] sm:$0xf]  ;;  %v12242_v23 = vor.u32 %v13715_v5, %v12239_v0 }
 0x59f   : > { %v12559_v8 = vld [vmem:[%s14743_s20 + $0x578] sm:$0xf0]  ;;  %v12286_v46 = vor.u32 %v13731_v61, %v12285_v43  ;;  %v13705_v29 = vld [vmem:[%s14743_s20 + $0x284] sm:$0xf]  ;;  %v12245_v33 = vld [vmem:[%s14743_s20 + $0x2d8] sm:$0xf]  ;;  %v11926_v62 = vor.u32 %v13641_v4, %v11925_v35 }
 0x5a0   : > { %8200 = vmatpush.bf16.msrb.mxu1 %v12762_v37  ;;  %v12199_v22 = vld [vmem:[%s14743_s20 + $0x2a8] sm:$0xf0]  ;;  %v11885_v37 = vld [vmem:[%s14743_s20 + $0x8] sm:$0xf]  ;;  %v13631_v38 = vld [vmem:[%s14743_s20 + $0x2c] sm:$0xf0]  ;;  %v12562_v40 = vor.u32 %v13795_v11, %v12559_v8 }
 0x5a1   : > { %8188 = vmatpush.bf16.msrb.mxu0 %v12402_v2  ;;  %v12805_v3 = vld [vmem:[%s14743_s20 + $0x738] sm:$0xf]  ;;  %v13861_v41 = vld [vmem:[%s14743_s20 + $0x75c] sm:$0xf0]  ;;  %v12519_v2 = vld [vmem:[%s14743_s20 + $0x528] sm:$0xf0]  ;;  %v12202_v47 = vor.u32 %v13705_v29, %v12199_v22  ;;  %v11886_v18 = vor.u32 %v13631_v38, %v11885_v37 }
 0x5a2   : > { %8226 = vmatpush.bf16.msra.mxu3 %v12126_v36  ;;  %8239 = vmatpush.bf16.msra.mxu2 %v12446_v42  ;;  %v13721_v36 = vld [vmem:[%s14743_s20 + $0x2fc] sm:$0xf0]  ;;  %v13785_v42 = vld [vmem:[%s14743_s20 + $0x504] sm:$0xf]  ;;  %v13696_v13 = vld [vmem:[%s14743_s20 + $0x23c] sm:$0xf]  ;;  %v12806_v26 = vor.u32 %v13861_v41, %v12805_v3 }
 0x5a3   : > { %v12167_v48 = vld [vmem:[%s14743_s20 + $0x260] sm:$0xf0]  ;;  %v12845_v49 = vld [vmem:[%s14743_s20 + $0x788] sm:$0xf]  ;;  %v13711_v52 = vld [vmem:[%s14743_s20 + $0x2ac] sm:$0xf0] }
 0x5a4   : > { %8201 = vmatpush.bf16.msrb.mxu1 %v12722_v28  ;;  %v13871_v28 = vld [vmem:[%s14743_s20 + $0x7ac] sm:$0xf0]  ;;  %v12205_v50 = vld [vmem:[%s14743_s20 + $0x288] sm:$0xf]  ;;  %v12127_v53 = vld [vmem:[%s14743_s20 + $0x210] sm:$0xf0] }
 0x5a5   : > { %8189 = vmatpush.bf16.msrb.mxu0 %v12362_v25  ;;  %v12170_v25 = vor.u32 %v13696_v13, %v12167_v48  ;;  %v12765_v19 = vld [vmem:[%s14743_s20 + $0x6e8] sm:$0xf]  ;;  %v13851_v30 = vld [vmem:[%s14743_s20 + $0x70c] sm:$0xf0]  ;;  %v12846_v31 = vor.u32 %v13871_v28, %v12845_v49  ;;  %v12487_v12 = vld [vmem:[%s14743_s20 + $0x4e0] sm:$0xf0]  ;;  %v12206_v7 = vor.u32 %v13711_v52, %v12205_v50 }
 0x5a6   : > { %8227 = vmatpush.bf16.msra.mxu3 %v12086_v44  ;;  %8240 = vmatpush.bf16.msra.mxu2 %v12406_v6  ;;  %v12246_v44 = vor.u32 %v13721_v36, %v12245_v33  ;;  %v12522_v6 = vor.u32 %v13785_v42, %v12519_v2  ;;  %v13856_v54 = vld [vmem:[%s14743_s20 + $0x73c] sm:$0xf]  ;;  %v12807_v55 = vld [vmem:[%s14743_s20 + $0x760] sm:$0xf0]  ;;  %v12725_v34 = vld [vmem:[%s14743_s20 + $0x698] sm:$0xf] }
 0x5a7   : > { %v13841_v17 = vld [vmem:[%s14743_s20 + $0x6bc] sm:$0xf0]  ;;  %v12087_v57 = vld [vmem:[%s14743_s20 + $0x1c0] sm:$0xf0]  ;;  %v13766_v16 = vld [vmem:[%s14743_s20 + $0x46c] sm:$0xf] }
 0x5a8   : > { %8202 = vmatpush.bf16.msrb.mxu1 %v12682_v32  ;;  %v13776_v32 = vld [vmem:[%s14743_s20 + $0x4bc] sm:$0xf]  ;;  %v12447_v20 = vld [vmem:[%s14743_s20 + $0x490] sm:$0xf0]  ;;  %v13846_v21 = vld [vmem:[%s14743_s20 + $0x6ec] sm:$0xf] }
 0x5a9   : > { %8190 = vmatpush.bf16.msrb.mxu0 %v12322_v45  ;;  %12876 = vmatmul.msk.bf16.vlgmr.msrb.gmra.mxu2 %vm8117_vm4, %v19422_v39  ;;  %v12490_v27 = vor.u32 %v13776_v32, %v12487_v12  ;;  %v12767_v56 = vld [vmem:[%s14743_s20 + $0x710] sm:$0xf0]  ;;  %v12685_v43 = vld [vmem:[%s14743_s20 + $0x648] sm:$0xf]  ;;  %v13831_v61 = vld [vmem:[%s14743_s20 + $0x66c] sm:$0xf0]  ;;  %v12450_v5 = vor.u32 %v13766_v16, %v12447_v20 }
 0x5aa   : > { %8228 = vmatpush.bf16.msra.mxu3 %v12046_v51  ;;  %8241 = vmatpush.bf16.msra.mxu2 %v12366_v15  ;;  %v13686_v51 = vld [vmem:[%s14743_s20 + $0x1ec] sm:$0xf]  ;;  %v12766_v15 = vor.u32 %v13851_v30, %v12765_v19  ;;  %v12047_v0 = vld [vmem:[%s14743_s20 + $0x170] sm:$0xf0]  ;;  %v13756_v35 = vld [vmem:[%s14743_s20 + $0x41c] sm:$0xf] }
 0x5ab   : > { %v12130_v45 = vor.u32 %v13686_v51, %v12127_v53  ;;  %v12407_v4 = vld [vmem:[%s14743_s20 + $0x440] sm:$0xf0]  ;;  %v13836_v11 = vld [vmem:[%s14743_s20 + $0x69c] sm:$0xf]  ;;  %v12645_v29 = vld [vmem:[%s14743_s20 + $0x5f8] sm:$0xf] }
 0x5ac   : > { %8203 = vmatpush.bf16.msrb.mxu1 %v12642_v14  ;;  %v12810_v14 = vor.u32 %v13856_v54, %v12807_v55  ;;  %v12727_v8 = vld [vmem:[%s14743_s20 + $0x6c0] sm:$0xf0]  ;;  %v13821_v33 = vld [vmem:[%s14743_s20 + $0x61c] sm:$0xf0]  ;;  %v13656_v36 = vld [vmem:[%s14743_s20 + $0xfc] sm:$0xf] }
 0x5ad   : > { %8191 = vmatpush.bf16.msrb.mxu0 %v12282_v9  ;;  %v12007_v22 = vld [vmem:[%s14743_s20 + $0x120] sm:$0xf0]  ;;  %v12730_v37 = vor.u32 %v13836_v11, %v12727_v8  ;;  %v13746_v38 = vld [vmem:[%s14743_s20 + $0x3cc] sm:$0xf]  ;;  %v12687_v41 = vld [vmem:[%s14743_s20 + $0x670] sm:$0xf0]  ;;  %v12646_v42 = vor.u32 %v13821_v33, %v12645_v29 }
 0x5ae   : > { %8229 = vmatpush.bf16.msra.mxu3 %v12006_v58  ;;  %8242 = vmatpush.bf16.msra.mxu2 %v12326_v60  ;;  %v13676_v58 = vld [vmem:[%s14743_s20 + $0x19c] sm:$0xf]  ;;  %v12726_v60 = vor.u32 %v13841_v17, %v12725_v34  ;;  %v13826_v3 = vld [vmem:[%s14743_s20 + $0x64c] sm:$0xf]  ;;  %v12010_v2 = vor.u32 %v13656_v36, %v12007_v22  ;;  %v12605_v13 = vld [vmem:[%s14743_s20 + $0x5a8] sm:$0xf] }
 0x5af   : > { %v12090_v9 = vor.u32 %v13676_v58, %v12087_v57  ;;  %v13811_v48 = vld [vmem:[%s14743_s20 + $0x5cc] sm:$0xf0]  ;;  %v11967_v49 = vld [vmem:[%s14743_s20 + $0xd0] sm:$0xf0]  ;;  %v12690_v28 = vor.u32 %v13826_v3, %v12687_v41  ;;  %v13816_v50 = vld [vmem:[%s14743_s20 + $0x5fc] sm:$0xf] }
 0x5b0   : > { %8204 = vmatpush.bf16.msrb.mxu1 %v12602_v59  ;;  %v12770_v59 = vor.u32 %v13846_v21, %v12767_v56  ;;  %v12647_v52 = vld [vmem:[%s14743_s20 + $0x620] sm:$0xf0]  ;;  %v12565_v19 = vld [vmem:[%s14743_s20 + $0x558] sm:$0xf]  ;;  %v13801_v30 = vld [vmem:[%s14743_s20 + $0x57c] sm:$0xf0] }
 0x5b1   : > { %8192 = vmatpush.bf16.msrb.mxu0 %v12242_v23  ;;  %v13636_v51 = vld [vmem:[%s14743_s20 + $0x5c] sm:$0xf]  ;;  %v12650_v32 = vor.u32 %v13816_v50, %v12647_v52  ;;  %v13726_v12 = vld [vmem:[%s14743_s20 + $0x32c] sm:$0xf]  ;;  %v12607_v55 = vld [vmem:[%s14743_s20 + $0x5d0] sm:$0xf0] }
 0x5b2   : > { %8230 = vmatpush.bf16.msra.mxu3 %v11966_v63  ;;  %8243 = vmatpush.bf16.msra.mxu2 %v12286_v46  ;;  %v13666_v63 = vld [vmem:[%s14743_s20 + $0x14c] sm:$0xf]  ;;  %v12686_v46 = vor.u32 %v13831_v61, %v12685_v43  ;;  %v13791_v17 = vld [vmem:[%s14743_s20 + $0x52c] sm:$0xf0]  ;;  %v12847_v20 = vld [vmem:[%s14743_s20 + $0x7b0] sm:$0xf0] }
 0x5b3   : > { %v12050_v23 = vor.u32 %v13666_v63, %v12047_v0  ;;  %v13806_v54 = vld [vmem:[%s14743_s20 + $0x5ac] sm:$0xf]  ;;  %v13702_v56 = vld [vmem:[%s14743_s20 + $0x264] sm:$0xf0]  ;;  %v13796_v61 = vld [vmem:[%s14743_s20 + $0x55c] sm:$0xf] }
 0x5b4   : > { %8205 = vmatpush.bf16.msrb.mxu1 %v12562_v40  ;;  %v12367_v40 = vld [vmem:[%s14743_s20 + $0x3f0] sm:$0xf0]  ;;  %v13626_v58 = vld [vmem:[%s14743_s20 + $0xc] sm:$0xf]  ;;  %v12610_v21 = vor.u32 %v13806_v54, %v12607_v55  ;;  %v12567_v63 = vld [vmem:[%s14743_s20 + $0x580] sm:$0xf0] }
 0x5b5   : > { %8193 = vmatpush.bf16.msrb.mxu0 %v12202_v47  ;;  %v12370_v47 = vor.u32 %v13746_v38, %v12367_v40  ;;  %v13866_v16 = vld [vmem:[%s14743_s20 + $0x78c] sm:$0xf]  ;;  %v12133_v11 = vld [vmem:[%s14743_s20 + $0x1f0] sm:$0xf]  ;;  %v13692_v8 = vld [vmem:[%s14743_s20 + $0x214] sm:$0xf0] }
 0x5b6   : > { %8231 = vmatpush.bf16.msra.mxu3 %v11926_v62  ;;  %8244 = vmatpush.bf16.msra.mxu2 %v12246_v44  ;;  %v12410_v62 = vor.u32 %v13756_v35, %v12407_v4  ;;  %v13646_v44 = vld [vmem:[%s14743_s20 + $0xac] sm:$0xf]  ;;  %v12850_v0 = vor.u32 %v13866_v16, %v12847_v20  ;;  %v13782_v35 = vld [vmem:[%s14743_s20 + $0x4e4] sm:$0xf0]  ;;  %v12453_v29 = vld [vmem:[%s14743_s20 + $0x470] sm:$0xf] }
 0x5b7   : > { %v13706_v33 = vld [vmem:[%s14743_s20 + $0x28c] sm:$0xf]  ;;  %v12207_v36 = vld [vmem:[%s14743_s20 + $0x2b0] sm:$0xf0]  ;;  %v12813_v38 = vld [vmem:[%s14743_s20 + $0x740] sm:$0xf] }
 0x5b8   : > { %8206 = vmatpush.bf16.msrb.mxu1 %v12522_v6  ;;  %8194 = vmatmul.bf16.vlgmr.msrb.gmra.mxu0 %v19463_v24  ;;  %v12606_v6 = vor.u32 %v13811_v48, %v12605_v13  ;;  %v13862_v40 = vld [vmem:[%s14743_s20 + $0x764] sm:$0xf0]  ;;  %v13772_v3 = vld [vmem:[%s14743_s20 + $0x494] sm:$0xf0]  ;;  %v12853_v41 = vld [vmem:[%s14743_s20 + $0x790] sm:$0xf]  ;;  %v12210_v13 = vor.u32 %v13706_v33, %v12207_v36 }
 0x5b9   : > { %8251 = vmatpush.bf16.msra.mxu0 %v12806_v26  ;;  %v12327_v26 = vld [vmem:[%s14743_s20 + $0x3a0] sm:$0xf0]  ;;  %v12093_v48 = vld [vmem:[%s14743_s20 + $0x1a0] sm:$0xf]  ;;  %v13852_v50 = vld [vmem:[%s14743_s20 + $0x714] sm:$0xf0] }
 0x5ba   : > { %8232 = vmatpush.bf16.msra.mxu3 %v11886_v18  ;;  %8245 = vmatpush.bf16.msra.mxu2 %v12206_v7  ;;  %v13736_v18 = vld [vmem:[%s14743_s20 + $0x37c] sm:$0xf]  ;;  %v12287_v7 = vld [vmem:[%s14743_s20 + $0x350] sm:$0xf0]  ;;  %v13697_v52 = vld [vmem:[%s14743_s20 + $0x244] sm:$0xf] }
 0x5bb   : > { %8207 = vmatmul.bf16.vlgmr.msrb.gmra.mxu1 %v19455_v1  ;;  %v12330_v53 = vor.u32 %v13736_v18, %v12327_v26  ;;  %v12290_v57 = vor.u32 %v13726_v12, %v12287_v7  ;;  %v12454_v18 = vor.u32 %v13772_v3, %v12453_v29  ;;  %v12733_v12 = vld [vmem:[%s14743_s20 + $0x6a0] sm:$0xf]  ;;  %v13842_v54 = vld [vmem:[%s14743_s20 + $0x6c4] sm:$0xf0]  ;;  %v13687_v55 = vld [vmem:[%s14743_s20 + $0x1f4] sm:$0xf] }
 0x5bc   : > { %8271 = vmatpush.bf16.msra.mxu1 %v12846_v31  ;;  %v11927_v31 = vld [vmem:[%s14743_s20 + $0x80] sm:$0xf0]  ;;  %v12333_v20 = vld [vmem:[%s14743_s20 + $0x380] sm:$0xf]  ;;  %v12055_v29 = vld [vmem:[%s14743_s20 + $0x178] sm:$0xf0] }
 0x5bd   : > { %8233 = vmatmul.bf16.vlgmr.msra.gmra.mxu3 %v19459_v10  ;;  %8252 = vmatpush.bf16.msra.mxu0 %v12766_v15  ;;  %v12566_v15 = vor.u32 %v13801_v30, %v12565_v19  ;;  %v11930_v34 = vor.u32 %v13636_v51, %v11927_v31  ;;  %v13762_v19 = vld [vmem:[%s14743_s20 + $0x444] sm:$0xf0]  ;;  %v12053_v51 = vld [vmem:[%s14743_s20 + $0x150] sm:$0xf]  ;;  %v11933_v36 = vld [vmem:[%s14743_s20 + $0x60] sm:$0xf] }
 0x5be   : > { %8277 = vmatpush.bf16.msrb.mxu3 %v12170_v25  ;;  %8303 = vmatpush.bf16.msrb.mxu2 %v12810_v14  ;;  %v11970_v25 = vor.u32 %v13646_v44, %v11967_v49  ;;  %v12173_v14 = vld [vmem:[%s14743_s20 + $0x240] sm:$0xf]  ;;  %v13682_v44 = vld [vmem:[%s14743_s20 + $0x1c4] sm:$0xf0]  ;;  %v12814_v49 = vor.u32 %v13862_v40, %v12813_v38  ;;  %v12613_v3 = vld [vmem:[%s14743_s20 + $0x5b0] sm:$0xf] }
 0x5bf   : > { %8246 = vmatmul.bf16.vlgmr.msra.gmra.mxu2 %v19463_v24  ;;  %v12174_v4 = vor.u32 %v13702_v56, %v12173_v14  ;;  %v12094_v30 = vor.u32 %v13682_v44, %v12093_v48  ;;  %v13832_v56 = vld [vmem:[%s14743_s20 + $0x674] sm:$0xf0]  ;;  %v12253_v38 = vld [vmem:[%s14743_s20 + $0x2e0] sm:$0xf]  ;;  %v11893_v44 = vld [vmem:[%s14743_s20 + $0x10] sm:$0xf] }
 0x5c0   : > { %8290 = vmatpush.bf16.msrb.mxu1 %v12490_v27  ;;  %v11887_v27 = vld [vmem:[%s14743_s20 + $0x30] sm:$0xf0]  ;;  %s8881_s8 = sshll.u32 %s20059_s12, 4  ;;  %s14103_s15 = smov [#allocation8]   ;;  %s8882_s8 = int_to_ptr.hbm [resolvable:$true] %s8881_s8 }
 0x5c1   : > { %8253 = vmatpush.bf16.msra.mxu0 %v12726_v60  ;;  %v13716_v60 = vld [vmem:[%s14743_s20 + $0x2dc] sm:$0xf]  ;;  %s8879_s16 = sshll.u32 %s14103_s15, 4  ;;  %s8842_s23 = scalar_lea.sflag [#allocation5], %s14733_s28  ;;  %s8880_s16 = int_to_ptr.vmem [resolvable:$true] %s8879_s16 }
 0x5c2   : > { %8278 = vmatpush.bf16.msrb.mxu3 %v12130_v45  ;;  %8304 = vmatpush.bf16.msrb.mxu2 %v12770_v59  ;;  %v12525_v45 = vld [vmem:[%s14743_s20 + $0x508] sm:$0xf]  ;;  %v12493_v59 = vld [vmem:[%s14743_s20 + $0x4c0] sm:$0xf] }
 0x5c3   : > { %v12526_v43 = vor.u32 %v13791_v17, %v12525_v45  ;;  %v12494_v22 = vor.u32 %v13782_v35, %v12493_v59  ;;  %v12373_v45 = vld [vmem:[%s14743_s20 + $0x3d0] sm:$0xf] }
 0x5c4   : > { %8291 = vmatpush.bf16.msrb.mxu1 %v12450_v5  ;;  %v11890_v5 = vor.u32 %v13626_v58, %v11887_v27  ;;  %v12013_v58 = vld [vmem:[%s14743_s20 + $0x100] sm:$0xf]  ;;  %v13662_v27 = vld [vmem:[%s14743_s20 + $0x124] sm:$0xf0]  ;;  %v12293_v35 = vld [vmem:[%s14743_s20 + $0x330] sm:$0xf] }
 0x5c5   : > { %8254 = vmatpush.bf16.msra.mxu0 %v12686_v46 }
 0x5c6   : > { %8279 = vmatpush.bf16.msrb.mxu3 %v12090_v9  ;;  %8305 = vmatpush.bf16.msrb.mxu2 %v12730_v37  ;;  %v12247_v9 = vld [vmem:[%s14743_s20 + $0x300] sm:$0xf0]  ;;  %v12527_v37 = vld [vmem:[%s14743_s20 + $0x530] sm:$0xf0] }
 0x5c7   : > { %v12250_v46 = vor.u32 %v13716_v60, %v12247_v9  ;;  %v13742_v60 = vld [vmem:[%s14743_s20 + $0x3a4] sm:$0xf0]  ;;  %v13677_v9 = vld [vmem:[%s14743_s20 + $0x1a4] sm:$0xf] }
 0x5c8   : > { %8292 = vmatpush.bf16.msrb.mxu1 %v12410_v62  ;;  %v13786_v62 = vld [vmem:[%s14743_s20 + $0x50c] sm:$0xf]  ;;  %v12334_v59 = vor.u32 %v13742_v60, %v12333_v20  ;;  %v13867_v20 = vld [vmem:[%s14743_s20 + $0x794] sm:$0xf]  ;;  %v13757_v60 = vld [vmem:[%s14743_s20 + $0x424] sm:$0xf] }
 0x5c9   : > { %8255 = vmatpush.bf16.msra.mxu0 %v12646_v42  ;;  %v13872_v42 = vld [vmem:[%s14743_s20 + $0x7b4] sm:$0xf0] }
 0x5ca   : > { %8280 = vmatpush.bf16.msrb.mxu3 %v12050_v23  ;;  %8306 = vmatpush.bf16.msrb.mxu2 %v12690_v28  ;;  %v12570_v23 = vor.u32 %v13796_v61, %v12567_v63  ;;  %v12773_v28 = vld [vmem:[%s14743_s20 + $0x6f0] sm:$0xf]  ;;  %v12854_v26 = vor.u32 %v13872_v42, %v12853_v41  ;;  %v12014_v61 = vor.u32 %v13662_v27, %v12013_v58  ;;  %v13812_v41 = vld [vmem:[%s14743_s20 + $0x5d4] sm:$0xf0]  ;;  %v13722_v42 = vld [vmem:[%s14743_s20 + $0x304] sm:$0xf0] }
 0x5cb   : > { %12877 = vmatmul.msk.bf16.vlgmr.msra.gmra.mxu1 %vm8117_vm4, %v19422_v39  ;;  %v12774_v31 = vor.u32 %v13852_v50, %v12773_v28  ;;  %v11973_v63 = vld [vmem:[%s14743_s20 + $0xb0] sm:$0xf]  ;;  %v12495_v28 = vld [vmem:[%s14743_s20 + $0x4e8] sm:$0xf0]  ;;  %v13847_v27 = vld [vmem:[%s14743_s20 + $0x6f4] sm:$0xf] }
 0x5cc   : > { %8293 = vmatpush.bf16.msrb.mxu1 %v12370_v47  ;;  %v12530_v47 = vor.u32 %v13786_v62, %v12527_v37  ;;  %v13642_v62 = vld [vmem:[%s14743_s20 + $0x84] sm:$0xf0]  ;;  %v12213_v50 = vld [vmem:[%s14743_s20 + $0x290] sm:$0xf] }
 0x5cd   : > { %8256 = vmatpush.bf16.msra.mxu0 %v12606_v6  ;;  %v12175_v6 = vld [vmem:[%s14743_s20 + $0x268] sm:$0xf0]  ;;  %v11934_v48 = vor.u32 %v13642_v62, %v11933_v36  ;;  %v12375_v62 = vld [vmem:[%s14743_s20 + $0x3f8] sm:$0xf0] }
 0x5ce   : > { %8281 = vmatpush.bf16.msrb.mxu3 %v12010_v2  ;;  %8307 = vmatpush.bf16.msrb.mxu2 %v12650_v32  ;;  %v12134_v2 = vor.u32 %v13692_v8, %v12133_v11  ;;  %v12178_v32 = vor.u32 %v13697_v52, %v12175_v6  ;;  %v12653_v11 = vld [vmem:[%s14743_s20 + $0x600] sm:$0xf]  ;;  %v13822_v8 = vld [vmem:[%s14743_s20 + $0x624] sm:$0xf0] }
 0x5cf   : > { %v12573_v6 = vld [vmem:[%s14743_s20 + $0x560] sm:$0xf] }
 0x5d0   : > { %8294 = vmatpush.bf16.msrb.mxu1 %v12330_v53  ;;  %v13672_v53 = vld [vmem:[%s14743_s20 + $0x174] sm:$0xf0] }
 0x5d1   : > { %8257 = vmatpush.bf16.msra.mxu0 %v12566_v15  ;;  %v12135_v15 = vld [vmem:[%s14743_s20 + $0x218] sm:$0xf0]  ;;  %v12054_v17 = vor.u32 %v13672_v53, %v12053_v51 }
 0x5d2   : > { %8282 = vmatpush.bf16.msrb.mxu3 %v11970_v25  ;;  %8308 = vmatpush.bf16.msrb.mxu2 %v12610_v21  ;;  %v12413_v25 = vld [vmem:[%s14743_s20 + $0x420] sm:$0xf]  ;;  %v12138_v14 = vor.u32 %v13687_v55, %v12135_v15  ;;  %v12693_v21 = vld [vmem:[%s14743_s20 + $0x650] sm:$0xf]  ;;  %v11975_v51 = vld [vmem:[%s14743_s20 + $0xd8] sm:$0xf0] }
 0x5d3   : > { %v12414_v7 = vor.u32 %v13762_v19, %v12413_v25  ;;  %v13802_v25 = vld [vmem:[%s14743_s20 + $0x584] sm:$0xf0]  ;;  %v13712_v19 = vld [vmem:[%s14743_s20 + $0x2b4] sm:$0xf0]  ;;  %v12455_v15 = vld [vmem:[%s14743_s20 + $0x498] sm:$0xf0] }
 0x5d4   : > { %8295 = vmatpush.bf16.msrb.mxu1 %v12290_v57  ;;  %v12734_v57 = vor.u32 %v13842_v54, %v12733_v12  ;;  %v12574_v54 = vor.u32 %v13802_v25, %v12573_v6  ;;  %v12214_v55 = vor.u32 %v13712_v19, %v12213_v50  ;;  %v13817_v50 = vld [vmem:[%s14743_s20 + $0x604] sm:$0xf]  ;;  %v12655_v6 = vld [vmem:[%s14743_s20 + $0x628] sm:$0xf0]  ;;  %v12421_v25 = vld [vmem:[%s14743_s20 + $0x428] sm:$0xf] }
 0x5d5   : > { %8258 = vmatpush.bf16.msra.mxu0 %v12526_v43  ;;  %v12095_v43 = vld [vmem:[%s14743_s20 + $0x1c8] sm:$0xf0]  ;;  %v13763_v19 = vld [vmem:[%s14743_s20 + $0x44c] sm:$0xf0] }
 0x5d6   : > { %8283 = vmatpush.bf16.msrb.mxu3 %v11930_v34  ;;  %8309 = vmatpush.bf16.msrb.mxu2 %v12570_v23  ;;  %v13752_v34 = vld [vmem:[%s14743_s20 + $0x3f4] sm:$0xf0]  ;;  %v13667_v23 = vld [vmem:[%s14743_s20 + $0x154] sm:$0xf] }
 0x5d7   : > { %v12374_v16 = vor.u32 %v13752_v34, %v12373_v45  ;;  %v12058_v40 = vor.u32 %v13667_v23, %v12055_v29  ;;  %v12533_v34 = vld [vmem:[%s14743_s20 + $0x510] sm:$0xf] }
 0x5d8   : > { %8296 = vmatpush.bf16.msrb.mxu1 %v12250_v46  ;;  %8259 = vmatmul.bf16.vlgmr.msra.gmra.mxu0 %v19455_v1  ;;  %v13732_v46 = vld [vmem:[%s14743_s20 + $0x354] sm:$0xf0]  ;;  %v13783_v23 = vld [vmem:[%s14743_s20 + $0x4ec] sm:$0xf0] }
 0x5d9   : > { %8323 = vmatpush.bf16.msrb.mxu0 %v12850_v0  ;;  %v12694_v0 = vor.u32 %v13832_v56, %v12693_v21  ;;  %v12294_v37 = vor.u32 %v13732_v46, %v12293_v35  ;;  %v12855_v21 = vld [vmem:[%s14743_s20 + $0x7b8] sm:$0xf0]  ;;  %v12501_v46 = vld [vmem:[%s14743_s20 + $0x4c8] sm:$0xf] }
 0x5da   : > { %8284 = vmatpush.bf16.msrb.mxu3 %v11890_v5  ;;  %8310 = vmatpush.bf16.msrb.mxu2 %v12530_v47  ;;  %v13652_v5 = vld [vmem:[%s14743_s20 + $0xd4] sm:$0xf0]  ;;  %v12858_v35 = vor.u32 %v13867_v20, %v12855_v21  ;;  %v13797_v21 = vld [vmem:[%s14743_s20 + $0x564] sm:$0xf] }
 0x5db   : > { %v11974_v33 = vor.u32 %v13652_v5, %v11973_v63  ;;  %v13632_v47 = vld [vmem:[%s14743_s20 + $0x34] sm:$0xf0]  ;;  %v12181_v63 = vld [vmem:[%s14743_s20 + $0x248] sm:$0xf]  ;;  %v13703_v5 = vld [vmem:[%s14743_s20 + $0x26c] sm:$0xf0] }
 0x5dc   : > { %8297 = vmatpush.bf16.msrb.mxu1 %v12210_v13  ;;  %v12015_v13 = vld [vmem:[%s14743_s20 + $0x128] sm:$0xf0]  ;;  %v11894_v53 = vor.u32 %v13632_v47, %v11893_v44  ;;  %v12182_v36 = vor.u32 %v13703_v5, %v12181_v63  ;;  %v13737_v44 = vld [vmem:[%s14743_s20 + $0x384] sm:$0xf]  ;;  %v13707_v63 = vld [vmem:[%s14743_s20 + $0x294] sm:$0xf] }
 0x5dd   : > { %8342 = vmatpush.bf16.msra.mxu0 %v12494_v22  ;;  %8285 = vmatmul.bf16.vlgmr.msrb.gmra.mxu3 %v19459_v10  ;;  %v12654_v22 = vor.u32 %v13822_v8, %v12653_v11  ;;  %v11895_v11 = vld [vmem:[%s14743_s20 + $0x38] sm:$0xf0]  ;;  %v12735_v8 = vld [vmem:[%s14743_s20 + $0x6c8] sm:$0xf0] }
 0x5de   : > { %8329 = vmatpush.bf16.msra.mxu3 %v12174_v4  ;;  %8375 = vmatpush.bf16.msra.mxu2 %v12854_v26  ;;  %v12098_v4 = vor.u32 %v13677_v9, %v12095_v43  ;;  %v12254_v26 = vor.u32 %v13722_v42, %v12253_v38  ;;  %v12415_v43 = vld [vmem:[%s14743_s20 + $0x448] sm:$0xf0]  ;;  %v13693_v38 = vld [vmem:[%s14743_s20 + $0x21c] sm:$0xf0]  ;;  %v12695_v42 = vld [vmem:[%s14743_s20 + $0x678] sm:$0xf0] }
 0x5df   : > { %8298 = vmatmul.bf16.vlgmr.msrb.gmra.mxu1 %v19463_v24  ;;  %8311 = vmatmul.bf16.vlgmr.msrb.gmra.mxu2 %v19455_v1  ;;  %v12418_v29 = vor.u32 %v13757_v60, %v12415_v43  ;;  %v12575_v60 = vld [vmem:[%s14743_s20 + $0x588] sm:$0xf0]  ;;  %v13743_v43 = vld [vmem:[%s14743_s20 + $0x3ac] sm:$0xf0] }
 0x5e0   : > { %8355 = vmatpush.bf16.msra.mxu1 %v12814_v49  ;;  %v13777_v49 = vld [vmem:[%s14743_s20 + $0x4c4] sm:$0xf] }
 0x5e1   : > { %8343 = vmatpush.bf16.msra.mxu0 %v12454_v18  ;;  %v12614_v18 = vor.u32 %v13812_v41, %v12613_v3  ;;  %v12498_v12 = vor.u32 %v13777_v49, %v12495_v28  ;;  %v13827_v3 = vld [vmem:[%s14743_s20 + $0x654] sm:$0xf]  ;;  %v12502_v41 = vor.u32 %v13783_v23, %v12501_v46  ;;  %v12335_v49 = vld [vmem:[%s14743_s20 + $0x3a8] sm:$0xf0]  ;;  %v12101_v28 = vld [vmem:[%s14743_s20 + $0x1a8] sm:$0xf] }
 0x5e2   : > { %8330 = vmatpush.bf16.msra.mxu3 %v12134_v2  ;;  %8381 = vmatpush.bf16.msrb.mxu2 %v12178_v32  ;;  %v13657_v2 = vld [vmem:[%s14743_s20 + $0x104] sm:$0xf]  ;;  %v12815_v32 = vld [vmem:[%s14743_s20 + $0x768] sm:$0xf0]  ;;  %v13787_v46 = vld [vmem:[%s14743_s20 + $0x514] sm:$0xf] }
 0x5e3   : > { %v12018_v52 = vor.u32 %v13657_v2, %v12015_v13  ;;  %v12461_v2 = vld [vmem:[%s14743_s20 + $0x478] sm:$0xf]  ;;  %v13773_v13 = vld [vmem:[%s14743_s20 + $0x49c] sm:$0xf0] }
 0x5e4   : > { %8356 = vmatpush.bf16.msra.mxu1 %v12774_v31  ;;  %v13857_v31 = vld [vmem:[%s14743_s20 + $0x744] sm:$0xf] }
 0x5e5   : > { %8344 = vmatpush.bf16.msra.mxu0 %v12414_v7  ;;  %v13767_v7 = vld [vmem:[%s14743_s20 + $0x474] sm:$0xf]  ;;  %v12818_v58 = vor.u32 %v13857_v31, %v12815_v32  ;;  %v12295_v31 = vld [vmem:[%s14743_s20 + $0x358] sm:$0xf0]  ;;  %v12061_v32 = vld [vmem:[%s14743_s20 + $0x158] sm:$0xf] }
 0x5e6   : > { %8331 = vmatpush.bf16.msra.mxu3 %v12094_v30  ;;  %8382 = vmatpush.bf16.msrb.mxu2 %v12138_v14  ;;  %v13647_v30 = vld [vmem:[%s14743_s20 + $0xb4] sm:$0xf]  ;;  %v11935_v14 = vld [vmem:[%s14743_s20 + $0x88] sm:$0xf0]  ;;  %v12458_v56 = vor.u32 %v13767_v7, %v12455_v15  ;;  %v12658_v7 = vor.u32 %v13817_v50, %v12655_v6  ;;  %v12615_v15 = vld [vmem:[%s14743_s20 + $0x5d8] sm:$0xf0] }
 0x5e7   : > { %v11978_v45 = vor.u32 %v13647_v30, %v11975_v51  ;;  %v12338_v30 = vor.u32 %v13737_v44, %v12335_v49  ;;  %v13727_v51 = vld [vmem:[%s14743_s20 + $0x334] sm:$0xf]  ;;  %v13698_v44 = vld [vmem:[%s14743_s20 + $0x24c] sm:$0xf]  ;;  %v12741_v50 = vld [vmem:[%s14743_s20 + $0x6a8] sm:$0xf] }
 0x5e8   : > { %8357 = vmatpush.bf16.msra.mxu1 %v12734_v57  ;;  %12878 = vmatmul.msk.bf16.vlgmr.msrb.gmra.mxu0 %vm8117_vm4, %v19422_v39  ;;  %v13637_v57 = vld [vmem:[%s14743_s20 + $0x64] sm:$0xf]  ;;  %v12183_v49 = vld [vmem:[%s14743_s20 + $0x270] sm:$0xf0]  ;;  %v13843_v6 = vld [vmem:[%s14743_s20 + $0x6cc] sm:$0xf0] }
 0x5e9   : > { %8345 = vmatpush.bf16.msra.mxu0 %v12374_v16  ;;  %v12775_v16 = vld [vmem:[%s14743_s20 + $0x718] sm:$0xf0] }
 0x5ea   : > { %8332 = vmatpush.bf16.msra.mxu3 %v12054_v17  ;;  %8383 = vmatpush.bf16.msrb.mxu2 %v12098_v4  ;;  %v13792_v17 = vld [vmem:[%s14743_s20 + $0x534] sm:$0xf0]  ;;  %v13627_v4 = vld [vmem:[%s14743_s20 + $0x14] sm:$0xf] }
 0x5eb   : > { %v12534_v9 = vor.u32 %v13792_v17, %v12533_v34  ;;  %v13753_v34 = vld [vmem:[%s14743_s20 + $0x3fc] sm:$0xf0]  ;;  %v12298_v17 = vor.u32 %v13727_v51, %v12295_v31  ;;  %v13778_v31 = vld [vmem:[%s14743_s20 + $0x4cc] sm:$0xf] }
 0x5ec   : > { %8358 = vmatpush.bf16.msra.mxu1 %v12694_v0  ;;  %v12778_v0 = vor.u32 %v13847_v27, %v12775_v16  ;;  %v13663_v16 = vld [vmem:[%s14743_s20 + $0x12c] sm:$0xf0] }
 0x5ed   : > { %8346 = vmatpush.bf16.msra.mxu0 %v12334_v59  ;;  %v13837_v59 = vld [vmem:[%s14743_s20 + $0x6a4] sm:$0xf] }
 0x5ee   : > { %8333 = vmatpush.bf16.msra.mxu3 %v12014_v61  ;;  %8384 = vmatpush.bf16.msrb.mxu2 %v12058_v40  ;;  %v11938_v61 = vor.u32 %v13637_v57, %v11935_v14  ;;  %v12738_v40 = vor.u32 %v13837_v59, %v12735_v8  ;;  %v12255_v57 = vld [vmem:[%s14743_s20 + $0x308] sm:$0xf0]  ;;  %v12021_v14 = vld [vmem:[%s14743_s20 + $0x108] sm:$0xf]  ;;  %v11981_v59 = vld [vmem:[%s14743_s20 + $0xb8] sm:$0xf] }
 0x5ef   : > { %12879 = vmatmul.msk.bf16.vlgmr.msra.gmra.mxu2 %vm8117_vm4, %v19422_v39  ;;  %v12022_v5 = vor.u32 %v13663_v16, %v12021_v14  ;;  %v13863_v8 = vld [vmem:[%s14743_s20 + $0x76c] sm:$0xf0]  ;;  %v13833_v16 = vld [vmem:[%s14743_s20 + $0x67c] sm:$0xf0] }
 0x5f0   : > { %8359 = vmatpush.bf16.msra.mxu1 %v12654_v22  ;;  %v11898_v22 = vor.u32 %v13627_v4, %v11895_v11  ;;  %v12578_v4 = vor.u32 %v13797_v21, %v12575_v60  ;;  %v12821_v11 = vld [vmem:[%s14743_s20 + $0x748] sm:$0xf]  ;;  %v13768_v21 = vld [vmem:[%s14743_s20 + $0x47c] sm:$0xf]  ;;  %v13678_v60 = vld [vmem:[%s14743_s20 + $0x1ac] sm:$0xf] }
 0x5f1   : > { %8347 = vmatpush.bf16.msra.mxu0 %v12294_v37  ;;  %v12141_v37 = vld [vmem:[%s14743_s20 + $0x1f8] sm:$0xf] }
 0x5f2   : > { %8334 = vmatpush.bf16.msra.mxu3 %v11974_v33  ;;  %8385 = vmatpush.bf16.msrb.mxu2 %v12018_v52  ;;  %v13747_v33 = vld [vmem:[%s14743_s20 + $0x3d4] sm:$0xf]  ;;  %v12142_v47 = vor.u32 %v13693_v38, %v12141_v37  ;;  %v12462_v52 = vor.u32 %v13773_v13, %v12461_v2  ;;  %v12861_v37 = vld [vmem:[%s14743_s20 + $0x798] sm:$0xf]  ;;  %v13873_v38 = vld [vmem:[%s14743_s20 + $0x7bc] sm:$0xf0] }
 0x5f3   : > { %v12781_v2 = vld [vmem:[%s14743_s20 + $0x6f8] sm:$0xf]  ;;  %v13853_v13 = vld [vmem:[%s14743_s20 + $0x71c] sm:$0xf0] }
 0x5f4   : > { %8360 = vmatpush.bf16.msra.mxu1 %v12614_v18  ;;  %v13683_v18 = vld [vmem:[%s14743_s20 + $0x1cc] sm:$0xf0] }
 0x5f5   : > { %8348 = vmatpush.bf16.msra.mxu0 %v12254_v26  ;;  %v12698_v26 = vor.u32 %v13827_v3, %v12695_v42  ;;  %v11941_v3 = vld [vmem:[%s14743_s20 + $0x68] sm:$0xf] }
 0x5f6   : > { %8335 = vmatpush.bf16.msra.mxu3 %v11934_v48  ;;  %8386 = vmatpush.bf16.msrb.mxu2 %v11978_v45  ;;  %v12378_v48 = vor.u32 %v13747_v33, %v12375_v62  ;;  %v12381_v45 = vld [vmem:[%s14743_s20 + $0x3d8] sm:$0xf] }
 0x5f7   : > { %v12301_v33 = vld [vmem:[%s14743_s20 + $0x338] sm:$0xf] }
 0x5f8   : > { %8361 = vmatpush.bf16.msra.mxu1 %v12574_v54  ;;  %v13807_v54 = vld [vmem:[%s14743_s20 + $0x5b4] sm:$0xf] }
 0x5f9   : > { %8349 = vmatpush.bf16.msra.mxu0 %v12214_v55  ;;  %v12422_v55 = vor.u32 %v13763_v19, %v12421_v25  ;;  %v12618_v20 = vor.u32 %v13807_v54, %v12615_v15  ;;  %v11901_v25 = vld [vmem:[%s14743_s20 + $0x18] sm:$0xf]  ;;  %v13633_v19 = vld [vmem:[%s14743_s20 + $0x3c] sm:$0xf0] }
 0x5fa   : > { %8336 = vmatpush.bf16.msra.mxu3 %v11894_v53  ;;  %8387 = vmatpush.bf16.msrb.mxu2 %v11938_v61  ;;  %v12102_v53 = vor.u32 %v13683_v18, %v12101_v28  ;;  %v12261_v28 = vld [vmem:[%s14743_s20 + $0x2e8] sm:$0xf]  ;;  %v13723_v18 = vld [vmem:[%s14743_s20 + $0x30c] sm:$0xf0]  ;;  %v13713_v54 = vld [vmem:[%s14743_s20 + $0x2bc] sm:$0xf0]  ;;  %v11902_v15 = vor.u32 %v13633_v19, %v11901_v25 }
 0x5fb   : > { %v12262_v51 = vor.u32 %v13723_v18, %v12261_v28  ;;  %v12023_v28 = vld [vmem:[%s14743_s20 + $0x130] sm:$0xf0]  ;;  %v12581_v25 = vld [vmem:[%s14743_s20 + $0x568] sm:$0xf] }
 0x5fc   : > { %8362 = vmatpush.bf16.msra.mxu1 %v12534_v9  ;;  %8350 = vmatmul.bf16.vlgmr.msra.gmra.mxu0 %v19463_v24  ;;  %v12341_v9 = vld [vmem:[%s14743_s20 + $0x388] sm:$0xf] }
 0x5fd   : > { %8407 = vmatpush.bf16.msrb.mxu0 %v12818_v58  ;;  %8337 = vmatmul.bf16.vlgmr.msra.gmra.mxu3 %v19459_v10  ;;  %v13717_v58 = vld [vmem:[%s14743_s20 + $0x2e4] sm:$0xf]  ;;  %v12342_v23 = vor.u32 %v13743_v43, %v12341_v9  ;;  %v12103_v9 = vld [vmem:[%s14743_s20 + $0x1d0] sm:$0xf0] }
 0x5fe   : > { %8394 = vmatpush.bf16.msrb.mxu3 %v12498_v12  ;;  %8388 = vmatpush.bf16.msrb.mxu2 %v11898_v22  ;;  %v13673_v12 = vld [vmem:[%s14743_s20 + $0x17c] sm:$0xf0]  ;;  %v12258_v61 = vor.u32 %v13717_v58, %v12255_v57 }
 0x5ff   : > { %8363 = vmatmul.bf16.vlgmr.msra.gmra.mxu1 %v19455_v1  ;;  %v12062_v27 = vor.u32 %v13673_v12, %v12061_v32  ;;  %v12503_v32 = vld [vmem:[%s14743_s20 + $0x4f0] sm:$0xf0]  ;;  %v12143_v12 = vld [vmem:[%s14743_s20 + $0x220] sm:$0xf0] }
 0x600   : > { %8427 = vmatpush.bf16.msrb.mxu1 %v12858_v35  ;;  %v13653_v35 = vld [vmem:[%s14743_s20 + $0xdc] sm:$0xf0]  ;;  %v12506_v57 = vor.u32 %v13778_v31, %v12503_v32  ;;  %v13738_v31 = vld [vmem:[%s14743_s20 + $0x38c] sm:$0xf]  ;;  %v12343_v32 = vld [vmem:[%s14743_s20 + $0x3b0] sm:$0xf0] }
 0x601   : > { %8408 = vmatpush.bf16.msrb.mxu0 %v12778_v0  ;;  %8389 = vmatmul.bf16.vlgmr.msrb.gmra.mxu2 %v19459_v10  ;;  %v12215_v0 = vld [vmem:[%s14743_s20 + $0x2b8] sm:$0xf0]  ;;  %v11982_v22 = vor.u32 %v13653_v35, %v11981_v59  ;;  %v19762_v58 = vld [vmem:[%s14741_s19] sm:$0xff]  ;;  %v12661_v59 = vld [vmem:[%s14743_s20 + $0x608] sm:$0xf] }
 0x602   : > { %8395 = vmatpush.bf16.msrb.mxu3 %v12458_v56  ;;  %8446 = vmatpush.bf16.msra.mxu2 %v12502_v41  ;;  %v12382_v56 = vor.u32 %v13753_v34, %v12381_v45  ;;  %v12218_v62 = vor.u32 %v13707_v63, %v12215_v0  ;;  %v13643_v41 = vld [vmem:[%s14743_s20 + $0x8c] sm:$0xf0]  ;;  %v13858_v45 = vld [vmem:[%s14743_s20 + $0x74c] sm:$0xf]  ;;  %v12823_v34 = vld [vmem:[%s14743_s20 + $0x770] sm:$0xf0] }
 0x603   : > { %v12826_v43 = vor.u32 %v13858_v45, %v12823_v34  ;;  %v12783_v63 = vld [vmem:[%s14743_s20 + $0x720] sm:$0xf0]  ;;  %v13818_v45 = vld [vmem:[%s14743_s20 + $0x60c] sm:$0xf]  ;;  %v12663_v34 = vld [vmem:[%s14743_s20 + $0x630] sm:$0xf0] }
 0x604   : > { %8433 = vmatpush.bf16.msra.mxu1 %v12182_v36  ;;  %v13733_v36 = vld [vmem:[%s14743_s20 + $0x35c] sm:$0xf0] }
 0x605   : > { %8409 = vmatpush.bf16.msrb.mxu0 %v12738_v40  ;;  %v12822_v40 = vor.u32 %v13863_v8, %v12821_v11  ;;  %v13823_v11 = vld [vmem:[%s14743_s20 + $0x62c] sm:$0xf0]  ;;  %v13758_v8 = vld [vmem:[%s14743_s20 + $0x42c] sm:$0xf] }
 0x606   : > { %8396 = vmatpush.bf16.msrb.mxu3 %v12418_v29  ;;  %8447 = vmatpush.bf16.msra.mxu2 %v12462_v52  ;;  %v12535_v29 = vld [vmem:[%s14743_s20 + $0x538] sm:$0xf0]  ;;  %v12782_v52 = vor.u32 %v13853_v13, %v12781_v2  ;;  %v13813_v13 = vld [vmem:[%s14743_s20 + $0x5dc] sm:$0xf0] }
 0x607   : > { %v12538_v42 = vor.u32 %v13787_v46, %v12535_v29  ;;  %v12423_v46 = vld [vmem:[%s14743_s20 + $0x450] sm:$0xf0]  ;;  %v12063_v29 = vld [vmem:[%s14743_s20 + $0x180] sm:$0xf0] }
 0x608   : > { %8434 = vmatpush.bf16.msra.mxu1 %v12142_v47  ;;  %v12862_v47 = vor.u32 %v13873_v38, %v12861_v37  ;;  %v12743_v37 = vld [vmem:[%s14743_s20 + $0x6d0] sm:$0xf0] }
 0x609   : > { %8410 = vmatpush.bf16.msrb.mxu0 %v12698_v26  ;;  %v11942_v26 = vor.u32 %v13643_v41, %v11941_v3  ;;  %v12662_v3 = vor.u32 %v13823_v11, %v12661_v59  ;;  %v12621_v41 = vld [vmem:[%s14743_s20 + $0x5b8] sm:$0xf]  ;;  %v13808_v59 = vld [vmem:[%s14743_s20 + $0x5bc] sm:$0xf]  ;;  %v12189_v11 = vld [vmem:[%s14743_s20 + $0x250] sm:$0xf] }
 0x60a   : > { %8397 = vmatpush.bf16.msrb.mxu3 %v12378_v48  ;;  %8448 = vmatpush.bf16.msra.mxu2 %v12422_v55  ;;  %v12302_v48 = vor.u32 %v13733_v36, %v12301_v33 }
 0x60c   : > { %8435 = vmatpush.bf16.msra.mxu1 %v12102_v53  ;;  %v13688_v53 = vld [vmem:[%s14743_s20 + $0x1fc] sm:$0xf] }
 0x60d   : > { %8411 = vmatpush.bf16.msrb.mxu0 %v12658_v7  ;;  %v12221_v7 = vld [vmem:[%s14743_s20 + $0x298] sm:$0xf]  ;;  %v12146_v14 = vor.u32 %v13688_v53, %v12143_v12  ;;  %v13803_v53 = vld [vmem:[%s14743_s20 + $0x58c] sm:$0xf0]  ;;  %v13648_v12 = vld [vmem:[%s14743_s20 + $0xbc] sm:$0xf] }
 0x60e   : > { %8398 = vmatpush.bf16.msrb.mxu3 %v12338_v30  ;;  %8449 = vmatpush.bf16.msra.mxu2 %v12382_v56  ;;  %v12186_v30 = vor.u32 %v13698_v44, %v12183_v49  ;;  %v19756_v55 = vpop.f32.mrf.mxu3  ;;  %v12463_v56 = vld [vmem:[%s14743_s20 + $0x4a0] sm:$0xf0]  ;;  %v13658_v49 = vld [vmem:[%s14743_s20 + $0x10c] sm:$0xf] }
 0x60f   : > { %12880 = vmatmul.msk.bf16.vlgmr.msrb.gmra.mxu1 %vm8117_vm4, %v19422_v39  ;;  %v12466_v35 = vor.u32 %v13768_v21, %v12463_v56  ;;  %v12383_v44 = vld [vmem:[%s14743_s20 + $0x400] sm:$0xf0] }
 0x610   : > { %8436 = vmatpush.bf16.msra.mxu1 %v12062_v27  ;;  %v12701_v27 = vld [vmem:[%s14743_s20 + $0x658] sm:$0xf] }
 0x611   : > { %8412 = vmatpush.bf16.msrb.mxu0 %v12618_v20  ;;  %v12222_v20 = vor.u32 %v13713_v54, %v12221_v7  ;;  %v12702_v0 = vor.u32 %v13833_v16, %v12701_v27  ;;  %v11983_v7 = vld [vmem:[%s14743_s20 + $0xe0] sm:$0xf0]  ;;  %v12582_v27 = vor.u32 %v13803_v53, %v12581_v25  ;;  %v13638_v16 = vld [vmem:[%s14743_s20 + $0x6c] sm:$0xf]  ;;  %v13788_v53 = vld [vmem:[%s14743_s20 + $0x51c] sm:$0xf] }
 0x612   : > { %8399 = vmatpush.bf16.msrb.mxu3 %v12298_v17  ;;  %8450 = vmatpush.bf16.msra.mxu2 %v12342_v23  ;;  %v12742_v17 = vor.u32 %v13843_v6, %v12741_v50  ;;  %v13668_v23 = vld [vmem:[%s14743_s20 + $0x15c] sm:$0xf]  ;;  %v12703_v50 = vld [vmem:[%s14743_s20 + $0x680] sm:$0xf0]  ;;  %v12622_v6 = vor.u32 %v13813_v13, %v12621_v41  ;;  %v13798_v41 = vld [vmem:[%s14743_s20 + $0x56c] sm:$0xf] }
 0x613   : > { %v12066_v2 = vor.u32 %v13668_v23, %v12063_v29  ;;  %v12149_v13 = vld [vmem:[%s14743_s20 + $0x200] sm:$0xf] }
 0x614   : > { %8437 = vmatpush.bf16.msra.mxu1 %v12022_v5  ;;  %v6834_v5 = vperm.slane %v19762_v58, 0 }
 0x615   : > { %8413 = vmatpush.bf16.msrb.mxu0 %v12578_v4  ;;  %v12106_v4 = vor.u32 %v13678_v60, %v12103_v9  ;;  %v8130_v36 = vpop.f32.mrf.mxu0  ;;  %v11986_v60 = vor.u32 %v13648_v12, %v11983_v7  ;;  %v13728_v9 = vld [vmem:[%s14743_s20 + $0x33c] sm:$0xf]  ;;  %v12109_v7 = vld [vmem:[%s14743_s20 + $0x1b0] sm:$0xf] }
 0x616   : > { %8400 = vmatpush.bf16.msrb.mxu3 %v12258_v61  ;;  %8451 = vmatpush.bf16.msra.mxu2 %v12302_v48  ;;  %v13848_v61 = vld [vmem:[%s14743_s20 + $0x6fc] sm:$0xf]  ;;  %v8131_v38 = vadd.f32 %v8130_v36, %v6834_v5  ;;  %v13718_v36 = vld [vmem:[%s14743_s20 + $0x2ec] sm:$0xf] }
 0x617   : > { %v12786_v33 = vor.u32 %v13848_v61, %v12783_v63  ;;  %v13748_v48 = vld [vmem:[%s14743_s20 + $0x3dc] sm:$0xf]  ;;  %v11943_v61 = vld [vmem:[%s14743_s20 + $0x90] sm:$0xf0]  ;;  %v12666_v63 = vor.u32 %v13818_v45, %v12663_v34  ;;  %v13684_v45 = vld [vmem:[%s14743_s20 + $0x1d4] sm:$0xf0] }
 0x618   : > { %8438 = vmatpush.bf16.msra.mxu1 %v11982_v22  ;;  %v13838_v22 = vld [vmem:[%s14743_s20 + $0x6ac] sm:$0xf]  ;;  %v12386_v19 = vor.u32 %v13748_v48, %v12383_v44  ;;  %v13868_v5 = vld [vmem:[%s14743_s20 + $0x79c] sm:$0xf]  ;;  %v11946_v23 = vor.u32 %v13638_v16, %v11943_v61  ;;  %v13694_v48 = vld [vmem:[%s14743_s20 + $0x224] sm:$0xf0]  ;;  %v12110_v61 = vor.u32 %v13684_v45, %v12109_v7 }
 0x619   : > { %8414 = vmatpush.bf16.msrb.mxu0 %v12538_v42  ;;  %v12426_v42 = vor.u32 %v13758_v8, %v12423_v46  ;;  %v12746_v18 = vor.u32 %v13838_v22, %v12743_v37  ;;  %v13628_v22 = vld [vmem:[%s14743_s20 + $0x1c] sm:$0xf]  ;;  %v11903_v37 = vld [vmem:[%s14743_s20 + $0x40] sm:$0xf0]  ;;  %v12150_v12 = vor.u32 %v13694_v48, %v12149_v13  ;;  %v12429_v16 = vld [vmem:[%s14743_s20 + $0x430] sm:$0xf] }
 0x61a   : > { %8401 = vmatpush.bf16.msrb.mxu3 %v12218_v62  ;;  %8452 = vmatpush.bf16.msra.mxu2 %v12262_v51  ;;  %v8171_v62 = vpop.f32.mrf.mxu3  ;;  %v12026_v51 = vor.u32 %v13658_v49, %v12023_v28  ;;  %v11906_v28 = vor.u32 %v13628_v22, %v11903_v37  ;;  %v13744_v13 = vld [vmem:[%s14743_s20 + $0x3b4] sm:$0xf0]  ;;  %v13734_v7 = vld [vmem:[%s14743_s20 + $0x364] sm:$0xf0]  ;;  %v12669_v45 = vld [vmem:[%s14743_s20 + $0x610] sm:$0xf] }
 0x61b   : > { %v12263_v62 = vld [vmem:[%s14743_s20 + $0x310] sm:$0xf0] }
 0x61c   : > { %8439 = vmatpush.bf16.msra.mxu1 %v11942_v26  ;;  %8415 = vmatmul.bf16.vlgmr.msrb.gmra.mxu0 %v19455_v1  ;;  %v13828_v26 = vld [vmem:[%s14743_s20 + $0x65c] sm:$0xf]  ;;  %v12266_v44 = vor.u32 %v13718_v36, %v12263_v62  ;;  %v13689_v36 = vld [vmem:[%s14743_s20 + $0x204] sm:$0xf]  ;;  %v12151_v62 = vld [vmem:[%s14743_s20 + $0x228] sm:$0xf0] }
 0x61d   : > { %8402 = vmatmul.bf16.vlgmr.msrb.gmra.mxu3 %v19463_v24  ;;  %8479 = vmatpush.bf16.msra.mxu0 %v12862_v47  ;;  %v12706_v54 = vor.u32 %v13828_v26, %v12703_v50  ;;  %v13708_v26 = vld [vmem:[%s14743_s20 + $0x29c] sm:$0xf]  ;;  %v12223_v50 = vld [vmem:[%s14743_s20 + $0x2c0] sm:$0xf0] }
 0x61e   : > { %8459 = vmatpush.bf16.msra.mxu3 %v12822_v40  ;;  %8453 = vmatpush.bf16.msra.mxu2 %v12222_v20  ;;  %v8143_v40 = vpop.f32.mrf.mxu1  ;;  %v12346_v20 = vor.u32 %v13738_v31, %v12343_v32  ;;  %v12543_v31 = vld [vmem:[%s14743_s20 + $0x540] sm:$0xf0]  ;;  %v6835_v32 = vperm.slane %v19762_v58, 1 }
 0x61f   : > { %v8144_v47 = vadd.f32 %v8143_v40, %v8131_v38  ;;  %v12509_v40 = vld [vmem:[%s14743_s20 + $0x4d0] sm:$0xf] }
 0x620   : > { %8440 = vmatpush.bf16.msra.mxu1 %v11902_v15 }
 0x621   : > { %8485 = vmatpush.bf16.msrb.mxu0 %v12186_v30  ;;  %8454 = vmatmul.bf16.vlgmr.msra.gmra.mxu2 %v19463_v24 }
 0x622   : > { %8460 = vmatpush.bf16.msra.mxu3 %v12782_v52  ;;  %8511 = vmatpush.bf16.msrb.mxu2 %v12826_v43  ;;  %v8156_v52 = vpop.f32.mrf.mxu2  ;;  %v19803_v56 = vpop.f32.mrf.mxu3  ;;  %v12303_v43 = vld [vmem:[%s14743_s20 + $0x360] sm:$0xf0] }
 0x623   : > { %8441 = vmatmul.bf16.vlgmr.msra.gmra.mxu1 %v19459_v10  ;;  %v8157_v30 = vadd.f32 %v8156_v52, %v8144_v47  ;;  %v12306_v8 = vor.u32 %v13728_v9, %v12303_v43  ;;  %v12191_v9 = vld [vmem:[%s14743_s20 + $0x278] sm:$0xf0]  ;;  %v8183_v43 = vadd.f32 %v19803_v56, %v6835_v32  ;;  %v12749_v56 = vld [vmem:[%s14743_s20 + $0x6b0] sm:$0xf] }
 0x624   : > { %8498 = vmatpush.bf16.msrb.mxu1 %v12506_v57  ;;  %v12541_v57 = vld [vmem:[%s14743_s20 + $0x518] sm:$0xf] }
 0x625   : > { %8486 = vmatpush.bf16.msrb.mxu0 %v12146_v14  ;;  %v8170_v15 = vadd.f32 %v19756_v55, %v8157_v30  ;;  %v13793_v14 = vld [vmem:[%s14743_s20 + $0x53c] sm:$0xf0]  ;;  %v13864_v30 = vld [vmem:[%s14743_s20 + $0x774] sm:$0xf0] }
 0x626   : > { %8461 = vmatpush.bf16.msra.mxu3 %v12742_v17  ;;  %8512 = vmatpush.bf16.msrb.mxu2 %v12786_v33  ;;  %v8132_v17 = vpop.f32.mrf.mxu0  ;;  %v8145_v21 = vpop.f32.mrf.mxu1  ;;  %v13704_v33 = vld [vmem:[%s14743_s20 + $0x274] sm:$0xf0] }
 0x627   : > { %v12885_v55 = vmul.f32 -1.442695, %v8170_v15  ;;  %v12869_v17 = vld [vmem:[%s14743_s20 + $0x7a0] sm:$0xf]  ;;  %v13854_v21 = vld [vmem:[%s14743_s20 + $0x724] sm:$0xf0] }
 0x628   : > { %8499 = vmatpush.bf16.msrb.mxu1 %v12466_v35  ;;  %v12623_v35 = vld [vmem:[%s14743_s20 + $0x5e0] sm:$0xf0] }
 0x629   : > { %8487 = vmatpush.bf16.msrb.mxu0 %v12106_v4  ;;  %13937 = vpow2.f32 %v12885_v55  ;;  %v12542_v4 = vor.u32 %v13793_v14, %v12541_v57  ;;  %v12626_v38 = vor.u32 %v13808_v59, %v12623_v35  ;;  %v12546_v14 = vor.u32 %v13788_v53, %v12543_v31  ;;  %v13764_v55 = vld [vmem:[%s14743_s20 + $0x454] sm:$0xf0]  ;;  %v11989_v53 = vld [vmem:[%s14743_s20 + $0xc0] sm:$0xf]  ;;  %v13654_v31 = vld [vmem:[%s14743_s20 + $0xe4] sm:$0xf0] }
 0x62a   : > { %8462 = vmatpush.bf16.msra.mxu3 %v12702_v0  ;;  %8513 = vmatpush.bf16.msrb.mxu2 %v12746_v18  ;;  %v12863_v0 = vld [vmem:[%s14743_s20 + $0x7c0] sm:$0xf0]  ;;  %v8158_v46 = vpop.f32.mrf.mxu2  ;;  %v8184_v47 = vpop.f32.mrf.mxu3  ;;  %v12469_v18 = vld [vmem:[%s14743_s20 + $0x480] sm:$0xf] }
 0x62b   : > { %v12866_v29 = vor.u32 %v13868_v5, %v12863_v0  ;;  %v12069_v5 = vld [vmem:[%s14743_s20 + $0x160] sm:$0xf]  ;;  %v13674_v0 = vld [vmem:[%s14743_s20 + $0x184] sm:$0xf0] }
 0x62c   : > { %8500 = vmatpush.bf16.msrb.mxu1 %v12426_v42  ;;  %12881 = vmatmul.msk.bf16.vlgmr.msra.gmra.mxu0 %vm8117_vm4, %v19422_v39  ;;  %v12583_v42 = vld [vmem:[%s14743_s20 + $0x590] sm:$0xf0]  ;;  %v12070_v37 = vor.u32 %v13674_v0, %v12069_v5 }
 0x62d   : > { %8488 = vmatpush.bf16.msrb.mxu0 %v12066_v2  ;;  %v12190_v2 = vor.u32 %v13704_v33, %v12189_v11  ;;  %v12586_v25 = vor.u32 %v13798_v41, %v12583_v42  ;;  %v12389_v11 = vld [vmem:[%s14743_s20 + $0x3e0] sm:$0xf]  ;;  %v13754_v33 = vld [vmem:[%s14743_s20 + $0x404] sm:$0xf0] }
 0x62e   : > { %8463 = vmatpush.bf16.msra.mxu3 %v12662_v3  ;;  %8514 = vmatpush.bf16.msrb.mxu2 %v12706_v54  ;;  %v13784_v3 = vld [vmem:[%s14743_s20 + $0x4f4] sm:$0xf0]  ;;  %v12226_v54 = vor.u32 %v13708_v26, %v12223_v50  ;;  %v12154_v26 = vor.u32 %v13689_v36, %v12151_v62  ;;  %v13634_v36 = vld [vmem:[%s14743_s20 + $0x44] sm:$0xf0]  ;;  %v13779_v62 = vld [vmem:[%s14743_s20 + $0x4d4] sm:$0xf] }
 0x62f   : > { %v13938_v49 = vpop.eup %13937 }
 0x630   : > { %8501 = vmatpush.bf16.msrb.mxu1 %v12386_v19  ;;  %v19829_v52 = vadd.f32 1.0, %v13938_v49  ;;  %v12829_v19 = vld [vmem:[%s14743_s20 + $0x750] sm:$0xf]  ;;  %v12390_v49 = vor.u32 %v13754_v33, %v12389_v11  ;;  %v11909_v33 = vld [vmem:[%s14743_s20 + $0x20] sm:$0xf] }
 0x631   : > { %8489 = vmatpush.bf16.msrb.mxu0 %v12026_v51  ;;  %v13774_v51 = vld [vmem:[%s14743_s20 + $0x4a4] sm:$0xf0]  ;;  %v12830_v34 = vor.u32 %v13864_v30, %v12829_v19  ;;  %v12111_v19 = vld [vmem:[%s14743_s20 + $0x1d8] sm:$0xf0] }
 0x632   : > { %8464 = vmatpush.bf16.msra.mxu3 %v12622_v6  ;;  %8515 = vmatpush.bf16.msrb.mxu2 %v12666_v63  ;;  %v12510_v6 = vor.u32 %v13784_v3, %v12509_v40  ;;  %13939 = vrcp.f32 %v19829_v52  ;;  %v19840_v15 = vpop.f32.mrf.mxu2  ;;  %v12470_v57 = vor.u32 %v13774_v51, %v12469_v18  ;;  %v13664_v40 = vld [vmem:[%s14743_s20 + $0x134] sm:$0xf0]  ;;  %v13834_v18 = vld [vmem:[%s14743_s20 + $0x684] sm:$0xf0]  ;;  %vm8686_vm6 = vweird.f32 %v19829_v52 }
 0x634   : > { %8502 = vmatpush.bf16.msrb.mxu1 %v12346_v20  ;;  %v12789_v20 = vld [vmem:[%s14743_s20 + $0x700] sm:$0xf] }
 0x635   : > { %8490 = vmatpush.bf16.msrb.mxu0 %v11986_v60  ;;  %v13699_v60 = vld [vmem:[%s14743_s20 + $0x254] sm:$0xf]  ;;  %v12790_v59 = vor.u32 %v13854_v21, %v12789_v20  ;;  %v13669_v21 = vld [vmem:[%s14743_s20 + $0x164] sm:$0xf] }
 0x636   : > { %8465 = vmatpush.bf16.msra.mxu3 %v12582_v27  ;;  %8516 = vmatpush.bf16.msrb.mxu2 %v12626_v38  ;;  %v13874_v27 = vld [vmem:[%s14743_s20 + $0x7c4] sm:$0xf0]  ;;  %v12194_v46 = vor.u32 %v13699_v60, %v12191_v9  ;;  %v12029_v38 = vld [vmem:[%s14743_s20 + $0x110] sm:$0xf]  ;;  %v11990_v9 = vor.u32 %v13654_v31, %v11989_v53  ;;  %v12471_v53 = vld [vmem:[%s14743_s20 + $0x4a8] sm:$0xf0] }
 0x637   : > { %v12870_v63 = vor.u32 %v13874_v27, %v12869_v17  ;;  %v12030_v51 = vor.u32 %v13664_v40, %v12029_v38  ;;  %v12549_v31 = vld [vmem:[%s14743_s20 + $0x520] sm:$0xf] }
 0x638   : > { %8503 = vmatpush.bf16.msrb.mxu1 %v12306_v8  ;;  %v19854_v35 = vpop.eup %13939  ;;  %v13844_v8 = vld [vmem:[%s14743_s20 + $0x6d4] sm:$0xf0]  ;;  %v8208_v42 = vpop.f32.mrf.mxu1 }
 0x639   : > { %8491 = vmatpush.bf16.msrb.mxu0 %v11946_v23  ;;  %v8682_v23 = vmul.f32 %v19854_v35, %v19829_v52  ;;  %v12750_v48 = vor.u32 %v13844_v8, %v12749_v56  ;;  %vm8687_vm5 = vweird.f32 %v19854_v35  ;;  %v13724_v8 = vld [vmem:[%s14743_s20 + $0x314] sm:$0xf0] }
 0x63a   : > { %8466 = vmatpush.bf16.msra.mxu3 %v12542_v4  ;;  %8517 = vmatpush.bf16.msrb.mxu2 %v12586_v25  ;;  %v12430_v4 = vor.u32 %v13764_v55, %v12429_v16  ;;  %v8223_v3 = vpop.f32.mrf.mxu2  ;;  %v13679_v25 = vld [vmem:[%s14743_s20 + $0x1b4] sm:$0xf]  ;;  %vm19889_vm7 = vmor %vm8686_vm6, %vm8687_vm5  ;;  %v12071_v55 = vld [vmem:[%s14743_s20 + $0x188] sm:$0xf0] }
 0x63b   : > { %v8683_v41 = vsub.f32 1.0, %v8682_v23  ;;  %v12074_v11 = vor.u32 %v13669_v21, %v12071_v55  ;;  %v12031_v23 = vld [vmem:[%s14743_s20 + $0x138] sm:$0xf0]  ;;  %v13759_v21 = vld [vmem:[%s14743_s20 + $0x434] sm:$0xf] }
 0x63c   : > { %8504 = vmatpush.bf16.msrb.mxu1 %v12266_v44  ;;  %v8692_v44 = vand.u32 2147483648, %v19829_v52  ;;  %v12431_v55 = vld [vmem:[%s14743_s20 + $0x458] sm:$0xf0] }
 0x63d   : > { %8467 = vmatmul.bf16.vlgmr.msra.gmra.mxu3 %v19455_v1  ;;  %8492 = vmatpush.bf16.msrb.mxu0 %v11906_v28  ;;  %v12709_v28 = vld [vmem:[%s14743_s20 + $0x660] sm:$0xf]  ;;  %v8684_v50 = vmul.f32 %v19854_v35, %v8683_v41  ;;  %v13714_v41 = vld [vmem:[%s14743_s20 + $0x2c4] sm:$0xf0] }
 0x63e   : > { %8531 = vmatpush.bf16.msrb.mxu3 %v12866_v29  ;;  %8518 = vmatpush.bf16.msrb.mxu2 %v12546_v14  ;;  %v8195_v29 = vpop.f32.mrf.mxu0 }
 0x63f   : > { %v8196_v22 = vadd.f32 %v8195_v29, %v8183_v43  ;;  %v8685_v32 = vadd.f32 %v19854_v35, %v8684_v50  ;;  %v11949_v43 = vld [vmem:[%s14743_s20 + $0x70] sm:$0xf] }
 0x640   : > { %8505 = vmatpush.bf16.msrb.mxu1 %v12226_v54  ;;  %8493 = vmatmul.bf16.vlgmr.msrb.gmra.mxu0 %v19459_v10  ;;  %v12710_v54 = vor.u32 %v13834_v18, %v12709_v28  ;;  %v19894_v14 = vpop.f32.mrf.mxu3  ;;  %v8210_v5 = vpop.f32.mrf.mxu1  ;;  %v11910_v28 = vor.u32 %v13634_v36, %v11909_v33  ;;  %v13859_v18 = vld [vmem:[%s14743_s20 + $0x754] sm:$0xf] }
 0x641   : > { %8550 = vmatpush.bf16.msra.mxu0 %v12510_v6  ;;  %8519 = vmatmul.bf16.vlgmr.msrb.gmra.mxu2 %v19455_v1  ;;  %v8209_v47 = vadd.f32 %v8208_v42, %v8196_v22  ;;  %v8690_v6 = vand.u32 2147483647, %v19829_v52  ;;  %v13824_v52 = vld [vmem:[%s14743_s20 + $0x634] sm:$0xf0]  ;;  %v8689_v16 = vsel %vm19889_vm7, %v19854_v35, %v8685_v32  ;;  %v12629_v35 = vld [vmem:[%s14743_s20 + $0x5c0] sm:$0xf] }
 0x642   : > { %8537 = vmatpush.bf16.msra.mxu3 %v12190_v2  ;;  %8583 = vmatpush.bf16.msra.mxu2 %v12870_v63  ;;  %v12349_v2 = vld [vmem:[%s14743_s20 + $0x390] sm:$0xf]  ;;  %v12670_v63 = vor.u32 %v13824_v52, %v12669_v45  ;;  %v19909_v56 = vpop.f32.mrf.mxu2  ;;  %v12511_v22 = vld [vmem:[%s14743_s20 + $0x4f8] sm:$0xf0]  ;;  %v13794_v32 = vld [vmem:[%s14743_s20 + $0x544] sm:$0xf0] }
 0x643   : > { %8506 = vmatmul.bf16.vlgmr.msrb.gmra.mxu1 %v19463_v24  ;;  %v8222_v30 = vadd.f32 %v19840_v15, %v8209_v47  ;;  %v12350_v27 = vor.u32 %v13744_v13, %v12349_v2  ;;  %vm8691_vm8 = vcmp.eq.f32.partialorder %v8690_v6, 8.507059e+37  ;;  %v12589_v42 = vld [vmem:[%s14743_s20 + $0x570] sm:$0xf]  ;;  %v13804_v2 = vld [vmem:[%s14743_s20 + $0x594] sm:$0xf0]  ;;  %v12514_v50 = vor.u32 %v13779_v62, %v12511_v22 }
 0x644   : > { %8563 = vmatpush.bf16.msra.mxu1 %v12830_v34  ;;  %v8693_v34 = vor.u32 1.1754944e-38, %v8692_v44  ;;  %v13649_v47 = vld [vmem:[%s14743_s20 + $0xc4] sm:$0xf]  ;;  %v6836_v6 = vperm.slane %v19762_v58, 2  ;;  %v13639_v15 = vld [vmem:[%s14743_s20 + $0x74] sm:$0xf] }
 0x645   : > { %8551 = vmatpush.bf16.msra.mxu0 %v12470_v57  ;;  %v12886_v17 = vmul.f32 -1.442695, %v8222_v30  ;;  %v12114_v57 = vor.u32 %v13679_v25, %v12111_v19  ;;  %v13769_v25 = vld [vmem:[%s14743_s20 + $0x484] sm:$0xf]  ;;  %v12590_v19 = vor.u32 %v13804_v2, %v12589_v42  ;;  %v12871_v52 = vld [vmem:[%s14743_s20 + $0x7c8] sm:$0xf0] }
 0x646   : > { %8538 = vmatpush.bf16.msra.mxu3 %v12150_v12  ;;  %8589 = vmatpush.bf16.msrb.mxu2 %v12194_v46  ;;  %v12309_v12 = vld [vmem:[%s14743_s20 + $0x340] sm:$0xf]  ;;  %v8197_v20 = vpop.f32.mrf.mxu0  ;;  %v8694_v60 = vsel %vm8691_vm8, %v8693_v34, %v8689_v16  ;;  %v13659_v46 = vld [vmem:[%s14743_s20 + $0x114] sm:$0xf]  ;;  %v13849_v45 = vld [vmem:[%s14743_s20 + $0x704] sm:$0xf]  ;;  %v12474_v16 = vor.u32 %v13769_v25, %v12471_v53 }
 0x647   : > { %13941 = vpow2.f32 %v12886_v17  ;;  %8831 = vst [vmem:[%s14745_s26] sm:$0xff] %v8694_v60  ;;  %v12310_v0 = vor.u32 %v13734_v7, %v12309_v12  ;;  %v12034_v13 = vor.u32 %v13659_v46, %v12031_v23  ;;  %v11951_v34 = vld [vmem:[%s14743_s20 + $0x98] sm:$0xf0]  ;;  %v12791_v17 = vld [vmem:[%s14743_s20 + $0x728] sm:$0xf0]  ;;  %v12550_v20 = vor.u32 %v13794_v32, %v12549_v31  ;;  %v13749_v46 = vld [vmem:[%s14743_s20 + $0x3e4] sm:$0xf] }
 0x648   : > { %8564 = vmatpush.bf16.msra.mxu1 %v12790_v59  ;;  %v12269_v59 = vld [vmem:[%s14743_s20 + $0x2f0] sm:$0xf]  ;;  %v19933_v30 = vpop.f32.mrf.mxu1  ;;  %v11954_v60 = vor.u32 %v13639_v15, %v11951_v34  ;;  %v12391_v23 = vld [vmem:[%s14743_s20 + $0x408] sm:$0xf0]  ;;  %v13739_v42 = vld [vmem:[%s14743_s20 + $0x394] sm:$0xf] }
 0x649   : > { %8552 = vmatpush.bf16.msra.mxu0 %v12430_v4  ;;  %v13814_v4 = vld [vmem:[%s14743_s20 + $0x5e4] sm:$0xf0]  ;;  %v12270_v3 = vor.u32 %v13724_v8, %v12269_v59  ;;  %v12751_v59 = vld [vmem:[%s14743_s20 + $0x6d8] sm:$0xf0]  ;;  %v13729_v25 = vld [vmem:[%s14743_s20 + $0x344] sm:$0xf] }
 0x64a   : > { %8539 = vmatpush.bf16.msra.mxu3 %v12110_v61  ;;  %8590 = vmatpush.bf16.msrb.mxu2 %v12154_v26  ;;  %v13644_v61 = vld [vmem:[%s14743_s20 + $0x94] sm:$0xf0]  ;;  %v12630_v38 = vor.u32 %v13814_v4, %v12629_v35  ;;  %v12831_v26 = vld [vmem:[%s14743_s20 + $0x778] sm:$0xf0]  ;;  %v8249_v7 = vpop.f32.mrf.mxu2  ;;  %v12434_v4 = vor.u32 %v13759_v21, %v12431_v55  ;;  %v13709_v55 = vld [vmem:[%s14743_s20 + $0x2a4] sm:$0xf] }
 0x64b   : > { %v11950_v29 = vor.u32 %v13644_v61, %v11949_v43  ;;  %v12794_v43 = vor.u32 %v13849_v45, %v12791_v17  ;;  %v13629_v61 = vld [vmem:[%s14743_s20 + $0x24] sm:$0xf]  ;;  %v12351_v2 = vld [vmem:[%s14743_s20 + $0x3b8] sm:$0xf0]  ;;  %v12631_v7 = vld [vmem:[%s14743_s20 + $0x5e8] sm:$0xf0] }
 0x64c   : > { %8565 = vmatpush.bf16.msra.mxu1 %v12750_v48  ;;  %v8236_v48 = vpop.f32.mrf.mxu3  ;;  %v13719_v45 = vld [vmem:[%s14743_s20 + $0x2f4] sm:$0xf]  ;;  %v12271_v15 = vld [vmem:[%s14743_s20 + $0x318] sm:$0xf0] }
 0x64d   : > { %8553 = vmatpush.bf16.msra.mxu0 %v12390_v49  ;;  %12882 = vmatmul.msk.bf16.vlgmr.msrb.gmra.mxu3 %vm8117_vm4, %v19422_v39  ;;  %v13942_v40 = vpop.eup %13941  ;;  %v11991_v49 = vld [vmem:[%s14743_s20 + $0xe8] sm:$0xf0]  ;;  %v13799_v17 = vld [vmem:[%s14743_s20 + $0x574] sm:$0xf] }
 0x64e   : > { %8540 = vmatpush.bf16.msra.mxu3 %v12070_v37  ;;  %8591 = vmatpush.bf16.msrb.mxu2 %v12114_v57  ;;  %v12229_v37 = vld [vmem:[%s14743_s20 + $0x2a0] sm:$0xf]  ;;  %v19922_v44 = vadd.f32 1.0, %v13942_v40  ;;  %v11994_v12 = vor.u32 %v13649_v47, %v11991_v49  ;;  %v8235_v57 = vadd.f32 %v19894_v14, %v6836_v6  ;;  %v13819_v49 = vld [vmem:[%s14743_s20 + $0x614] sm:$0xf]  ;;  %v12354_v6 = vor.u32 %v13739_v42, %v12351_v2 }
 0x650   : > { %8566 = vmatpush.bf16.msra.mxu1 %v12710_v54  ;;  %13943 = vrcp.f32 %v19922_v44  ;;  %v12834_v54 = vor.u32 %v13859_v18, %v12831_v26  ;;  %v8248_v35 = vadd.f32 %v19909_v56, %v8235_v57  ;;  %v8707_v33 = vand.u32 2147483648, %v19922_v44 }
 0x651   : > { %8554 = vmatpush.bf16.msra.mxu0 %v12350_v27  ;;  %12883 = vmatmul.msk.bf16.vlgmr.msra.gmra.mxu2 %vm8117_vm4, %v19422_v39  ;;  %v13869_v27 = vld [vmem:[%s14743_s20 + $0x7a4] sm:$0xf]  ;;  %vm8701_vm9 = vweird.f32 %v19922_v44  ;;  %v8705_v62 = vand.u32 2147483647, %v19922_v44  ;;  %v6837_v18 = vperm.slane %v19762_v58, 3  ;;  %v12274_v57 = vor.u32 %v13719_v45, %v12271_v15 }
 0x652   : > { %8541 = vmatpush.bf16.msra.mxu3 %v12030_v51  ;;  %8592 = vmatpush.bf16.msrb.mxu2 %v12074_v11  ;;  %v12230_v51 = vor.u32 %v13714_v41, %v12229_v37  ;;  %v12874_v14 = vor.u32 %v13869_v27, %v12871_v52  ;;  %v8275_v11 = vpop.f32.mrf.mxu1  ;;  %v13829_v37 = vld [vmem:[%s14743_s20 + $0x664] sm:$0xf]  ;;  %v12591_v27 = vld [vmem:[%s14743_s20 + $0x598] sm:$0xf0] }
 0x653   : > { %vm8706_vm12 = vcmp.eq.f32.partialorder %v8705_v62, 8.507059e+37 }
 0x654   : > { %8567 = vmatpush.bf16.msra.mxu1 %v12670_v63  ;;  %v11911_v63 = vld [vmem:[%s14743_s20 + $0x48] sm:$0xf0] }
 0x655   : > { %8555 = vmatpush.bf16.msra.mxu0 %v12310_v0  ;;  %v13839_v0 = vld [vmem:[%s14743_s20 + $0x6b4] sm:$0xf]  ;;  %v8260_v22 = vpop.f32.mrf.mxu0 }
 0x656   : > { %8542 = vmatpush.bf16.msra.mxu3 %v11990_v9  ;;  %8593 = vmatpush.bf16.msrb.mxu2 %v12034_v13  ;;  %v13944_v9 = vpop.eup %13943  ;;  %v12754_v36 = vor.u32 %v13839_v0, %v12751_v59  ;;  %v8261_v40 = vadd.f32 %v8260_v22, %v8248_v35  ;;  %v8708_v13 = vor.u32 1.1754944e-38, %v8707_v33 }
 0x657   : > { %v8697_v5 = vmul.f32 %v13944_v9, %v19922_v44  ;;  %vm8702_vm10 = vweird.f32 %v13944_v9 }
 0x658   : > { %8568 = vmatpush.bf16.msra.mxu1 %v12630_v38  ;;  %v12711_v38 = vld [vmem:[%s14743_s20 + $0x688] sm:$0xf0]  ;;  %vm8703_vm11 = vmor %vm8701_vm9, %vm8702_vm10  ;;  %v8274_v48 = vadd.f32 %v19933_v30, %v8261_v40 }
 0x659   : > { %8556 = vmatpush.bf16.msra.mxu0 %v12270_v3  ;;  %v8698_v8 = vsub.f32 1.0, %v8697_v5  ;;  %v12394_v3 = vor.u32 %v13749_v46, %v12391_v23  ;;  %v12714_v44 = vor.u32 %v13829_v37, %v12711_v38  ;;  %v12551_v5 = vld [vmem:[%s14743_s20 + $0x548] sm:$0xf0] }
 0x65a   : > { %8543 = vmatpush.bf16.msra.mxu3 %v11950_v29  ;;  %8594 = vmatpush.bf16.msrb.mxu2 %v11994_v12  ;;  %v11914_v29 = vor.u32 %v13629_v61, %v11911_v63  ;;  %v13809_v12 = vld [vmem:[%s14743_s20 + $0x5c4] sm:$0xf] }
 0x65b   : > { %v8699_v56 = vmul.f32 %v13944_v9, %v8698_v8  ;;  %v12634_v34 = vor.u32 %v13809_v12, %v12631_v7 }
 0x65c   : > { %8569 = vmatpush.bf16.msra.mxu1 %v12590_v19  ;;  %v12311_v19 = vld [vmem:[%s14743_s20 + $0x368] sm:$0xf0]  ;;  %v8299_v30 = vpop.f32.mrf.mxu1 }
 0x65d   : > { %8557 = vmatpush.bf16.msra.mxu0 %v12230_v51  ;;  %v8700_v41 = vadd.f32 %v13944_v9, %v8699_v56  ;;  %v8262_v31 = vpop.f32.mrf.mxu0 }
 0x65e   : > { %8544 = vmatpush.bf16.msra.mxu3 %v11910_v28  ;;  %8595 = vmatpush.bf16.msrb.mxu2 %v11954_v60  ;;  %v12671_v28 = vld [vmem:[%s14743_s20 + $0x638] sm:$0xf0]  ;;  %v12231_v60 = vld [vmem:[%s14743_s20 + $0x2c8] sm:$0xf0] }
 0x65f   : > { %v8704_v47 = vsel %vm8703_vm11, %v13944_v9, %v8700_v41  ;;  %v12674_v51 = vor.u32 %v13819_v49, %v12671_v28  ;;  %v12234_v59 = vor.u32 %v13709_v55, %v12231_v60 }
 0x660   : > { %8570 = vmatpush.bf16.msra.mxu1 %v12550_v20  ;;  %8558 = vmatmul.bf16.vlgmr.msra.gmra.mxu0 %v19463_v24  ;;  %v8709_v26 = vsel %vm8706_vm12, %v8708_v13, %v8704_v47  ;;  %v8286_v53 = vpop.f32.mrf.mxu3 }
 0x661   : > { %8545 = vmatmul.bf16.vlgmr.msra.gmra.mxu3 %v19459_v10  ;;  %8615 = vmatpush.bf16.msrb.mxu0 %v12834_v54  ;;  %8832 = vst [vmem:[%s14745_s26 + $0x8] sm:$0xff] %v8709_v26  ;;  %v8287_v32 = vadd.f32 %v8286_v53, %v6837_v18 }
 0x662   : > { %8602 = vmatpush.bf16.msrb.mxu3 %v12514_v50  ;;  %8596 = vmatpush.bf16.msrb.mxu2 %v11914_v29  ;;  %v12887_v50 = vmul.f32 -1.442695, %v8274_v48 }
 0x663   : > { %8571 = vmatmul.bf16.vlgmr.msra.gmra.mxu1 %v19455_v1  ;;  %v8300_v54 = vadd.f32 %v8299_v30, %v8287_v32 }
 0x664   : > { %8635 = vmatpush.bf16.msrb.mxu1 %v12874_v14  ;;  %13945 = vpow2.f32 %v12887_v50  ;;  %v8301_v9 = vpop.f32.mrf.mxu1  ;;  %v13789_v14 = vld [vmem:[%s14743_s20 + $0x524] sm:$0xf]  ;;  %s14102_s20 = smov [#allocation6]  }
 0x665   : > { %8616 = vmatpush.bf16.msrb.mxu0 %v12794_v43  ;;  %8597 = vmatmul.bf16.vlgmr.msrb.gmra.mxu2 %v19459_v10  ;;  %v12314_v10 = vor.u32 %v13729_v25, %v12311_v19  ;;  %v12594_v43 = vor.u32 %v13799_v17, %v12591_v27  ;;  %v8325_v63 = vpop.f32.mrf.mxu0  ;;  %s8867_s22 = sshll.u32 %s14102_s20, 4  ;;  %s8855_s20 = sshll.u32 %s14745_s26, 4  ;;  %s8868_s22 = int_to_ptr.vmem [resolvable:$true] %s8867_s22  ;;  %s8856_s20 = int_to_ptr.vmem [resolvable:$true] %s8855_s20 }
 0x666   : > { %8603 = vmatpush.bf16.msrb.mxu3 %v12474_v16  ;;  %v8312_v16 = vpop.f32.mrf.mxu2  ;;  %13881 = dma.vmem_to_hbm [thread:$0]  (%p265_p3), %s8868_s22, 128, %s8870_s27, [#allocation7]  }
 0x667   : > { %v8313_v21 = vadd.f32 %v8312_v16, %v8300_v54  ;;  %13883 = dma.vmem_to_hbm [thread:$0]  (%p265_p3), %s8880_s16, 128, %s8882_s8, [#allocation7]  }
 0x668   : > { %v8288_v61 = vpop.f32.mrf.mxu3  ;;  %s14054_s8 = scalar_lea.hbm %s20057_s10, 160 }
 0x669   : > { %8617 = vmatpush.bf16.msrb.mxu0 %v12754_v36  ;;  %v8326_v0 = vadd.f32 %v8325_v63, %v8313_v21 }
 0x66a   : > { %8604 = vmatpush.bf16.msrb.mxu3 %v12434_v4  ;;  %v13946_v52 = vpop.eup %13945  ;;  %v12554_v4 = vor.u32 %v13789_v14, %v12551_v5 }
 0x66b   : > { %v8673_v20 = vadd.f32 1.0, %v13946_v52  ;;  %v12888_v35 = vmul.f32 -1.442695, %v8326_v0 }
 0x66d   : > { %8618 = vmatpush.bf16.msrb.mxu0 %v12714_v44  ;;  %13947 = vrcp.f32 %v8673_v20  ;;  %v8327_v23 = vpop.f32.mrf.mxu0  ;;  %v8722_v33 = vand.u32 2147483648, %v8673_v20  ;;  %vm8716_vm13 = vweird.f32 %v8673_v20  ;;  %v8720_v56 = vand.u32 2147483647, %v8673_v20 }
 0x66e   : > { %8605 = vmatpush.bf16.msrb.mxu3 %v12394_v3  ;;  %13949 = vpow2.f32 %v12888_v35  ;;  %v8314_v11 = vpop.f32.mrf.mxu2  ;;  %v6838_v3 = vperm.slane %v19762_v58, 4 }
 0x66f   : > { %v8723_v38 = vor.u32 1.1754944e-38, %v8722_v33  ;;  %vm8721_vm0 = vcmp.eq.f32.partialorder %v8720_v56, 8.507059e+37 }
 0x671   : > { %8619 = vmatpush.bf16.msrb.mxu0 %v12674_v51 }
 0x672   : > { %8606 = vmatpush.bf16.msrb.mxu3 %v12354_v6 }
 0x673   : > { %12884 = vmatmul.msk.bf16.vlgmr.msrb.gmra.mxu1 %vm8117_vm4, %v19422_v39  ;;  %v13948_v8 = vpop.eup %13947 }
 0x674   : > { %v8712_v46 = vmul.f32 %v13948_v8, %v8673_v20  ;;  %v13950_v39 = vpop.eup %13949  ;;  %vm8717_vm14 = vweird.f32 %v13948_v8 }
 0x675   : > { %8620 = vmatpush.bf16.msrb.mxu0 %v12634_v34  ;;  %v8674_v62 = vadd.f32 1.0, %v13950_v39  ;;  %vm8718_vm15 = vmor %vm8716_vm13, %vm8717_vm14  ;;  %v6839_v34 = vperm.slane %v19762_v58, 5  ;;  %v13977_v39 = vld [vmem:[%s14741_s19] sm:$0xff] }
 0x676   : > { %8607 = vmatpush.bf16.msrb.mxu3 %v12314_v10  ;;  %v8713_v29 = vsub.f32 1.0, %v8712_v46  ;;  %v8377_v37 = vpop.f32.mrf.mxu2 }
 0x677   : > { %13951 = vrcp.f32 %v8674_v62  ;;  %vm8731_vm1 = vweird.f32 %v8674_v62  ;;  %v8737_v47 = vand.u32 2147483648, %v8674_v62  ;;  %v8735_v28 = vand.u32 2147483647, %v8674_v62 }
 0x678   : > { %v8714_v36 = vmul.f32 %v13948_v8, %v8713_v29 }
 0x679   : > { %8621 = vmatpush.bf16.msrb.mxu0 %v12594_v43  ;;  %v8351_v41 = vpop.f32.mrf.mxu0  ;;  %v8738_v25 = vor.u32 1.1754944e-38, %v8737_v47  ;;  %vm8736_vm4 = vcmp.eq.f32.partialorder %v8735_v28, 8.507059e+37 }
 0x67a   : > { %8608 = vmatpush.bf16.msrb.mxu3 %v12274_v57  ;;  %v8715_v22 = vadd.f32 %v13948_v8, %v8714_v36  ;;  %v6840_v36 = vperm.slane %v13977_v39, 6 }
 0x67c   : > { %v8719_v40 = vsel %vm8718_vm15, %v13948_v8, %v8715_v22  ;;  %v8364_v42 = vpop.f32.mrf.mxu1 }
 0x67d   : > { %8622 = vmatpush.bf16.msrb.mxu0 %v12554_v4 }
 0x67e   : > { %8609 = vmatpush.bf16.msrb.mxu3 %v12234_v59  ;;  %v8379_v44 = vpop.f32.mrf.mxu2 }
 0x680   : > { %8623 = vmatmul.bf16.vlgmr.msrb.gmra.mxu0 %v19455_v1  ;;  %v13952_v1 = vpop.eup %13951  ;;  %v8338_v2 = vpop.f32.mrf.mxu3 }
 0x681   : > { %8610 = vmatmul.bf16.vlgmr.msrb.gmra.mxu3 %v19463_v24  ;;  %v8724_v24 = vsel %vm8721_vm0, %v8723_v38, %v8719_v40  ;;  %v8727_v13 = vmul.f32 %v13952_v1, %v8674_v62  ;;  %v8339_v48 = vadd.f32 %v8338_v2, %v6838_v3  ;;  %vm8732_vm2 = vweird.f32 %v13952_v1  ;;  %v8353_v6 = vpop.f32.mrf.mxu0 }
 0x682   : > { %8833 = vst [vmem:[%s14745_s26 + $0x10] sm:$0xff] %v8724_v24  ;;  %vm8733_vm3 = vmor %vm8731_vm1, %vm8732_vm2 }
 0x683   : > { %v8728_v49 = vsub.f32 1.0, %v8727_v13  ;;  %v8352_v18 = vadd.f32 %v8351_v41, %v8339_v48  ;;  %v6841_v13 = vperm.slane %v13977_v39, 7 }
 0x684   : > { %v8366_v51 = vpop.f32.mrf.mxu1 }
 0x685   : > { %v8729_v26 = vmul.f32 %v13952_v1, %v8728_v49  ;;  %v8365_v50 = vadd.f32 %v8364_v42, %v8352_v18 }
 0x686   : > { %v8390_v7 = vpop.f32.mrf.mxu2 }
 0x687   : > { %v8730_v19 = vadd.f32 %v13952_v1, %v8729_v26  ;;  %v8378_v30 = vadd.f32 %v8377_v37, %v8365_v50  ;;  %v8391_v57 = vadd.f32 %v8390_v7, %v6839_v34 }
 0x688   : > { %v8340_v53 = vpop.f32.mrf.mxu3 }
 0x689   : > { %v8734_v31 = vsel %vm8733_vm3, %v13952_v1, %v8730_v19  ;;  %v12889_v32 = vmul.f32 -1.442695, %v8378_v30 }
 0x68a   : > { %v8739_v12 = vsel %vm8736_vm4, %v8738_v25, %v8734_v31 }
 0x68b   : > { %8834 = vst [vmem:[%s14745_s26 + $0x18] sm:$0xff] %v8739_v12  ;;  %13953 = vpow2.f32 %v12889_v32 }
 0x68c   : > { %v8429_v10 = vpop.f32.mrf.mxu1 }
 0x68e   : > { %v8392_v15 = vpop.f32.mrf.mxu2 }
 0x691   : > { %v13954_v54 = vpop.eup %13953 }
 0x692   : > { %v8675_v45 = vadd.f32 1.0, %v13954_v54 }
 0x694   : > { %13955 = vrcp.f32 %v8675_v45  ;;  %v8431_v17 = vpop.f32.mrf.mxu1  ;;  %v8752_v20 = vand.u32 2147483648, %v8675_v45  ;;  %vm8746_vm5 = vweird.f32 %v8675_v45  ;;  %v8750_v58 = vand.u32 2147483647, %v8675_v45 }
 0x696   : > { %v8753_v61 = vor.u32 1.1754944e-38, %v8752_v20  ;;  %vm8751_vm8 = vcmp.eq.f32.partialorder %v8750_v58, 8.507059e+37 }
 0x699   : > { %v8416_v27 = vpop.f32.mrf.mxu0 }
 0x69a   : > { %v13956_v52 = vpop.eup %13955 }
 0x69b   : > { %v8742_v16 = vmul.f32 %v13956_v52, %v8675_v45  ;;  %vm8747_vm6 = vweird.f32 %v13956_v52 }
 0x69c   : > { %vm8748_vm7 = vmor %vm8746_vm5, %vm8747_vm6 }
 0x69d   : > { %v8743_v21 = vsub.f32 1.0, %v8742_v16 }
 0x69f   : > { %v8744_v9 = vmul.f32 %v13956_v52, %v8743_v21 }
 0x6a0   : > { %v8403_v55 = vpop.f32.mrf.mxu3  ;;  %v8442_v43 = vpop.f32.mrf.mxu1 }
 0x6a1   : > { %v8404_v60 = vadd.f32 %v8403_v55, %v8391_v57  ;;  %v8745_v14 = vadd.f32 %v13956_v52, %v8744_v9  ;;  %v8418_v5 = vpop.f32.mrf.mxu0  ;;  %v8443_v62 = vadd.f32 %v8442_v43, %v6840_v36  ;;  %v6831_v57 = vld [vmem:[%s14741_s19 + $0x8] sm:$0x3]  ;;  %s13875_s19 = smul.u32 80, %s14190_s25 }
 0x6a2   : > { %v6842_v9 = vperm.slane %v6831_v57, 0 }
 0x6a3   : > { %v8417_v63 = vadd.f32 %v8416_v27, %v8404_v60  ;;  %v8749_v59 = vsel %vm8748_vm7, %v13956_v52, %v8745_v14  ;;  %s8853_s7 = scalar_lea.hbm %s20057_s10, %s13875_s19 }
 0x6a4   : > { %v8754_v35 = vsel %vm8751_vm8, %v8753_v61, %v8749_v59  ;;  %v8455_v46 = vpop.f32.mrf.mxu2  ;;  %s8857_s22 = sshll.u32 %s8853_s7, 4  ;;  %s8858_s22 = int_to_ptr.hbm [resolvable:$true] %s8857_s22 }
 0x6a5   : > { %v8430_v0 = vadd.f32 %v8429_v10, %v8417_v63  ;;  %8835 = vst [vmem:[%s14745_s26 + $0x20] sm:$0xff] %v8754_v35  ;;  %v8456_v40 = vadd.f32 %v8455_v46, %v8443_v62  ;;  %s14048_s24 = sshra.s32 %s8858_s22, 4  ;;  %s14049_s24 = int_to_ptr.hbm [resolvable:$true] %s14048_s24 }
 0x6a6   : > { %s14050_s27 = scalar_lea.hbm %s14049_s24, 80  ;;  %p14055_p5 = scmp.lt.s32.totalorder %s14049_s24, %s20057_s10 }
 0x6a7   : > { %v12890_v4 = vmul.f32 -1.442695, %v8430_v0  ;;  %p14051_p1 = scmp.ne.s32.totalorder %s14049_s24, %s14050_s27  ;;  %p14056_p7 = scmp.lt.s32.totalorder %s14054_s8, %s14050_s27 }
 0x6a8   : > { %v8405_v11 = vpop.f32.mrf.mxu3  ;;  %v8444_v8 = vpop.f32.mrf.mxu1 }
 0x6a9   : > { %13957 = vpow2.f32 %v12890_v4  ;;  %v8481_v23 = vpop.f32.mrf.mxu0  ;;  %p14052_p2 = pnand %p14051_p1, %p14210_p6  ;;  %p14057_p10 = por %p14056_p7, %p14055_p5 }
 0x6ab   : > { %p14053_p4 = pneg %p14052_p2 }
 0x6ac   : > { %v8457_v56 = vpop.f32.mrf.mxu2 }
 0x6ad   : > { %p14058_p11 = pnand %p14057_p10, %p14053_p4 }
 0x6af   : > { %v13958_v29 = vpop.eup %13957 }
 0x6b0   : > { %v8676_v33 = vadd.f32 1.0, %v13958_v29 }
 0x6b1   : > { %v8483_v22 = vpop.f32.mrf.mxu0 }
 0x6b2   : > { %13959 = vrcp.f32 %v8676_v33  ;;  %v8767_v3 = vand.u32 2147483648, %v8676_v33  ;;  %v8765_v42 = vand.u32 2147483647, %v8676_v33  ;;  %vm8761_vm10 = vweird.f32 %v8676_v33 }
 0x6b4   : > { %v8768_v47 = vor.u32 1.1754944e-38, %v8767_v3  ;;  %vm8766_vm12 = vcmp.eq.f32.partialorder %v8765_v42, 8.507059e+37 }
 0x6b8   : > { %v13960_v37 = vpop.eup %13959 }
 0x6b9   : > { %v8757_v38 = vmul.f32 %v13960_v37, %v8676_v33  ;;  %vm8762_vm9 = vweird.f32 %v13960_v37 }
 0x6ba   : > { %vm8763_vm11 = vmor %vm8761_vm10, %vm8762_vm9 }
 0x6bb   : > { %v8758_v24 = vsub.f32 1.0, %v8757_v38 }
 0x6bd   : > { %v8759_v41 = vmul.f32 %v13960_v37, %v8758_v24  ;;  %v8494_v44 = vpop.f32.mrf.mxu0 }
 0x6be   : > { %v8495_v6 = vadd.f32 %v8494_v44, %v6841_v13 }
 0x6bf   : > { %v8760_v48 = vadd.f32 %v13960_v37, %v8759_v41 }
 0x6c0   : > { %v8468_v1 = vpop.f32.mrf.mxu3  ;;  %v8507_v28 = vpop.f32.mrf.mxu1 }
 0x6c1   : > { %v8469_v2 = vadd.f32 %v8468_v1, %v8456_v40  ;;  %v8764_v18 = vsel %vm8763_vm11, %v13960_v37, %v8760_v48  ;;  %v8508_v19 = vadd.f32 %v8507_v28, %v8495_v6  ;;  %v6843_v48 = vperm.slane %v6831_v57, 1 }
 0x6c2   : > { %v8769_v26 = vsel %vm8766_vm12, %v8768_v47, %v8764_v18 }
 0x6c3   : > { %v8482_v49 = vadd.f32 %v8481_v23, %v8469_v2  ;;  %8836 = vst [vmem:[%s14745_s26 + $0x28] sm:$0xff] %v8769_v26 }
 0x6c4   : > { %v8520_v30 = vpop.f32.mrf.mxu2 }
 0x6c5   : > { %v12891_v50 = vmul.f32 -1.442695, %v8482_v49  ;;  %v8496_v51 = vpop.f32.mrf.mxu0  ;;  %v8521_v32 = vadd.f32 %v8520_v30, %v8508_v19 }
 0x6c7   : > { %13961 = vpow2.f32 %v12891_v50 }
 0x6c8   : > { %v8470_v25 = vpop.f32.mrf.mxu3  ;;  %v8509_v53 = vpop.f32.mrf.mxu1 }
 0x6cc   : > { %v8522_v54 = vpop.f32.mrf.mxu2 }
 0x6cd   : > { %v13962_v31 = vpop.eup %13961 }
 0x6ce   : > { %v8677_v12 = vadd.f32 1.0, %v13962_v31 }
 0x6d0   : > { %13963 = vrcp.f32 %v8677_v12  ;;  %v8533_v7 = vpop.f32.mrf.mxu3  ;;  %v8782_v52 = vand.u32 2147483648, %v8677_v12  ;;  %v8780_v58 = vand.u32 2147483647, %v8677_v12  ;;  %vm8776_vm14 = vweird.f32 %v8677_v12 }
 0x6d1   : > { %v8534_v10 = vadd.f32 %v8533_v7, %v8521_v32 }
 0x6d2   : > { %v8783_v61 = vor.u32 1.1754944e-38, %v8782_v52  ;;  %vm8781_vm0 = vcmp.eq.f32.partialorder %v8780_v58, 8.507059e+37 }
 0x6d3   : > { %v12892_v45 = vmul.f32 -1.442695, %v8534_v10 }
 0x6d4   : > { %v8585_v16 = vpop.f32.mrf.mxu2 }
 0x6d5   : > { %13965 = vpow2.f32 %v12892_v45 }
 0x6d6   : > { %v13964_v15 = vpop.eup %13963 }
 0x6d7   : > { %v8772_v34 = vmul.f32 %v13964_v15, %v8677_v12  ;;  %vm8777_vm13 = vweird.f32 %v13964_v15 }
 0x6d8   : > { %v8535_v17 = vpop.f32.mrf.mxu3  ;;  %vm8778_vm15 = vmor %vm8776_vm14, %vm8777_vm13 }
 0x6d9   : > { %v8773_v27 = vsub.f32 1.0, %v8772_v34 }
 0x6db   : > { %v13966_v20 = vpop.eup %13965  ;;  %v8774_v21 = vmul.f32 %v13964_v15, %v8773_v27 }
 0x6dc   : > { %v8678_v55 = vadd.f32 1.0, %v13966_v20  ;;  %v8587_v35 = vpop.f32.mrf.mxu2 }
 0x6dd   : > { %v8775_v60 = vadd.f32 %v13964_v15, %v8774_v21  ;;  %v8559_v43 = vpop.f32.mrf.mxu0 }
 0x6de   : > { %13967 = vrcp.f32 %v8678_v55  ;;  %vm8791_vm1 = vweird.f32 %v8678_v55  ;;  %v8797_v29 = vand.u32 2147483648, %v8678_v55  ;;  %v8795_v39 = vand.u32 2147483647, %v8678_v55 }
 0x6df   : > { %v8779_v63 = vsel %vm8778_vm15, %v13964_v15, %v8775_v60 }
 0x6e0   : > { %v8572_v14 = vpop.f32.mrf.mxu1  ;;  %v8784_v5 = vsel %vm8781_vm0, %v8783_v61, %v8779_v63  ;;  %v8798_v38 = vor.u32 1.1754944e-38, %v8797_v29  ;;  %vm8796_vm4 = vcmp.eq.f32.partialorder %v8795_v39, 8.507059e+37 }
 0x6e1   : > { %8837 = vst [vmem:[%s14745_s26 + $0x30] sm:$0xff] %v8784_v5 }
 0x6e4   : > { %v8546_v0 = vpop.f32.mrf.mxu3  ;;  %v13968_v11 = vpop.eup %13967 }
 0x6e5   : > { %v8547_v59 = vadd.f32 %v8546_v0, %v6842_v9  ;;  %v8787_v8 = vmul.f32 %v13968_v11, %v8678_v55  ;;  %v8561_v23 = vpop.f32.mrf.mxu0  ;;  %vm8792_vm2 = vweird.f32 %v13968_v11 }
 0x6e6   : > { %vm8793_vm3 = vmor %vm8791_vm1, %vm8792_vm2 }
 0x6e7   : > { %v8560_v4 = vadd.f32 %v8559_v43, %v8547_v59  ;;  %v8788_v33 = vsub.f32 1.0, %v8787_v8 }
 0x6e8   : > { %v8574_v56 = vpop.f32.mrf.mxu1  ;;  %v8598_v40 = vpop.f32.mrf.mxu2 }
 0x6e9   : > { %v8573_v46 = vadd.f32 %v8572_v14, %v8560_v4  ;;  %v8789_v22 = vmul.f32 %v13968_v11, %v8788_v33  ;;  %v8599_v28 = vadd.f32 %v8598_v40, %v6843_v48 }
 0x6eb   : > { %v8586_v36 = vadd.f32 %v8585_v16, %v8573_v46  ;;  %v8790_v24 = vadd.f32 %v13968_v11, %v8789_v22 }
 0x6ec   : > { %v8548_v62 = vpop.f32.mrf.mxu3 }
 0x6ed   : > { %v12893_v37 = vmul.f32 -1.442695, %v8586_v36  ;;  %v8794_v3 = vsel %vm8793_vm3, %v13968_v11, %v8790_v24 }
 0x6ee   : > { %v8799_v41 = vsel %vm8796_vm4, %v8798_v38, %v8794_v3 }
 0x6ef   : > { %13969 = vpow2.f32 %v12893_v37  ;;  %8838 = vst [vmem:[%s14745_s26 + $0x38] sm:$0xff] %v8799_v41 }
 0x6f0   : > { %v8637_v42 = vpop.f32.mrf.mxu1  ;;  %v8600_v13 = vpop.f32.mrf.mxu2 }
 0x6f5   : > { %v13970_v1 = vpop.eup %13969 }
 0x6f6   : > { %v8679_v2 = vadd.f32 1.0, %v13970_v1 }
 0x6f8   : > { %13971 = vrcp.f32 %v8679_v2  ;;  %v8639_v44 = vpop.f32.mrf.mxu1  ;;  %v8812_v6 = vand.u32 2147483648, %v8679_v2  ;;  %v8810_v30 = vand.u32 2147483647, %v8679_v2  ;;  %vm8806_vm6 = vweird.f32 %v8679_v2 }
 0x6fa   : > { %v8813_v32 = vor.u32 1.1754944e-38, %v8812_v6  ;;  %vm8811_vm8 = vcmp.eq.f32.partialorder %v8810_v30, 8.507059e+37 }
 0x6fd   : > { %v8624_v47 = vpop.f32.mrf.mxu0 }
 0x6fe   : > { %v13972_v49 = vpop.eup %13971 }
 0x6ff   : > { %v8802_v18 = vmul.f32 %v13972_v49, %v8679_v2  ;;  %vm8807_vm5 = vweird.f32 %v13972_v49 }
 0x700   : > { %vm8808_vm7 = vmor %vm8806_vm6, %vm8807_vm5 }
 0x701   : > { %v8803_v26 = vsub.f32 1.0, %v8802_v18 }
 0x703   : > { %v8804_v19 = vmul.f32 %v13972_v49, %v8803_v26 }
 0x704   : > { %v8611_v50 = vpop.f32.mrf.mxu3 }
 0x705   : > { %v8612_v25 = vadd.f32 %v8611_v50, %v8599_v28  ;;  %v8805_v53 = vadd.f32 %v13972_v49, %v8804_v19  ;;  %v8626_v31 = vpop.f32.mrf.mxu0 }
 0x707   : > { %v8625_v51 = vadd.f32 %v8624_v47, %v8612_v25  ;;  %v8809_v7 = vsel %vm8808_vm7, %v13972_v49, %v8805_v53 }
 0x708   : > { %v8814_v10 = vsel %vm8811_vm8, %v8813_v32, %v8809_v7 }
 0x709   : > { %v8638_v12 = vadd.f32 %v8637_v42, %v8625_v51  ;;  %8839 = vst [vmem:[%s14745_s26 + $0x40] sm:$0xff] %v8814_v10 }
 0x70b   : > { %v12894_v54 = vmul.f32 -1.442695, %v8638_v12 }
 0x70c   : > { %v8613_v45 = vpop.f32.mrf.mxu3 }
 0x70d   : > { %13973 = vpow2.f32 %v12894_v54 }
 0x713   : > { %v13974_v15 = vpop.eup %13973 }
 0x714   : > { %v8680_v34 = vadd.f32 1.0, %v13974_v15 }
 0x716   : > { %13975 = vrcp.f32 %v8680_v34  ;;  %v8827_v57 = vand.u32 2147483648, %v8680_v34  ;;  %v8825_v20 = vand.u32 2147483647, %v8680_v34  ;;  %vm8821_vm10 = vweird.f32 %v8680_v34 }
 0x718   : > { %v8828_v58 = vor.u32 1.1754944e-38, %v8827_v57  ;;  %vm8826_vm12 = vcmp.eq.f32.partialorder %v8825_v20, 8.507059e+37 }
 0x71c   : > { %v13976_v17 = vpop.eup %13975 }
 0x71d   : > { %v8817_v27 = vmul.f32 %v13976_v17, %v8680_v34  ;;  %vm8822_vm9 = vweird.f32 %v13976_v17 }
 0x71e   : > { %vm8823_vm11 = vmor %vm8821_vm10, %vm8822_vm9 }
 0x71f   : > { %v8818_v52 = vsub.f32 1.0, %v8817_v27 }
 0x721   : > { %v8819_v16 = vmul.f32 %v13976_v17, %v8818_v52 }
 0x723   : > { %v8820_v21 = vadd.f32 %v13976_v17, %v8819_v16 }
 0x725   : > { %v8824_v55 = vsel %vm8823_vm11, %v13976_v17, %v8820_v21 }
 0x726   : > { %v8829_v60 = vsel %vm8826_vm12, %v8828_v58, %v8824_v55 }
 0x727   : > { %8840 = vst [vmem:[%s14745_s26 + $0x48] sm:$0xff] %v8829_v60 }
 0x728   : > { %14061 = shalt.err (!%p14058_p11)
}
 0x729   : > { %13879 = dma.vmem_to_hbm [thread:$0]  (%p14210_p6), %s8856_s20, 1280, %s8858_s22, %s8842_s23  }
 0x72a   : > { %14079 = dma.done.wait (%p265_p3), [#allocation7], 256  }
 0x72b   : > { %14081 = vsyncadd (%p265_p3), [#allocation7], 4294967040 }
 0x72c PF: > { %s8903_s26 = sand.u32 1, %s14088_s21   ;;  %p13890_p12 = pnand %p8981_p9, %p14214_p8 }
 0x72d   : > { %s8904_s19 = scalar_lea.sflag [#allocation5], %s8903_s26 }
 0x72e   : > { %p13891_p13 = pneg %p13890_p12 }
 0x730   : > { %14083 = dma.done.wait (%p13891_p13), %s8904_s19, 1280  }
 0x731   : > { %14085 = vsyncadd (%p13891_p13), %s8904_s19, 4294966016  ;;  %s20079_s24 = sld [smem:[#allocation14_spill]] }
 0x732   : > { %s20080_s21 = sld [smem:[#allocation11_spill]] }
 0x733   : > { %s20081_s22 = sld [smem:[#allocation12_spill]] }
 0x734   : > { %s20082_s23 = sld [smem:[#allocation15_spill]] }
 0x737   : > { %p24_p6 = scmp.ge.s32.totalorder %s20079_s24, 4  }
 0x739   :  { %26 = sbr.rel (!%p24_p6) target bundleno = 7 (0x7), region = 146 }
 0x73e   :  { %8910 = vsyncpa [#allocation5], 1 }
 0x73f   :  { %8912 = vsyncpa [#allocation5 + $0x1], 1 }
 0x740   :  { %8913 = vsyncpa [#allocation7], 1 }

</bundles_post_ra>
